<compile_context>
chip_gen: v6e
topology: v6e:2x2x1
jax: 0.10.0
libtpu: 0.0.40
codegen_flags: <defaults>
</compile_context>

<pallas_src>
import jax
import jax.numpy as jnp
from jax.experimental import pallas as pl
from jax.experimental.pallas import tpu as pltpu

BN_EPS = 1e-5  # PyTorch BatchNorm2d default

# (Cin, Cout, K) for the 8 conv layers, in forward order.
_CONV_CFG = [
    (1, 32, 5), (32, 32, 3),        # conv_init      (+ maxpool)
    (32, 64, 3), (64, 64, 3),       # conv_1         (+ maxpool)
    (64, 128, 3), (128, 128, 3),    # conv_2         (+ maxpool)
    (128, 128, 3), (128, 16, 3),    # conv_nonlinear (last has no ReLU)
]
_N_LAYERS = len(_CONV_CFG)


def _round8(n):
    return ((n + 7) // 8) * 8


# Weight-slab layout: layer l occupies rows [_W_OFFS[l], _W_OFFS[l] + 9*Cin)
# (layer 0: 25 rows padded to 32); row = tap*Cin + ci, lanes [0, Cout) real,
# rest zero.  All block offsets are multiples of 8 (sublane aligned).
_W_BLOCK_ROWS = [_round8(k * k * cin) for (cin, _, k) in _CONV_CFG]
_W_OFFS = [sum(_W_BLOCK_ROWS[:i]) for i in range(_N_LAYERS)]
_W_TOTAL_ROWS = sum(_W_BLOCK_ROWS)

# gamma/beta slab: rows 2l / 2l+1 = gamma / beta of layer l; then fc weight
# and bias rows; padded to a multiple of 8 rows, 128 lanes, f32.
_FC_W_ROW = 2 * _N_LAYERS
_FC_B_ROW = 2 * _N_LAYERS + 1
_GB_ROWS = _round8(_FC_B_ROW + 1)

_ZPAD = 16  # zero-extension rows used by the in-kernel shifts (sublane aligned)


# --------------------------------------------------------------------------
# In-kernel building blocks (traced inline inside the single fused kernel).
# --------------------------------------------------------------------------
def _bn_relu(acc, gb_ref, layer, relu):
    """Training-mode BN over the N*H*W rows of acc (P, C) + optional ReLU.

    Single pass: E[x], E[x^2] in f32; scale/shift folded so the normalize+
    affine is one multiply + one add per element.
    """
    cout = acc.shape[-1]
    gamma = gb_ref[2 * layer:2 * layer + 1, 0:cout]          # (1, C)
    beta = gb_ref[2 * layer + 1:2 * layer + 2, 0:cout]        # (1, C)
    inv_n = 1.0 / acc.shape[0]
    mean = jnp.sum(acc, axis=0, keepdims=True) * inv_n
    ex2 = jnp.sum(acc * acc, axis=0, keepdims=True) * inv_n
    var = jnp.maximum(ex2 - mean * mean, 0.0)                 # guard cancellation
    scale = gamma * jax.lax.rsqrt(var + BN_EPS)
    shift = beta - mean * scale
    y = acc * scale + shift
    return jnp.maximum(y, 0.0) if relu else y


def _conv3x3(y, hw, w_ref, w_off, cin, cout):
    """'same' 3x3 conv on a flat (H*W, Cin) activation -> (H*W, Cout) f32.

    9 per-tap MXU dots.  Horizontal (+/-1) shifts: one small slice of a
    zero-extended copy + a row mask (built once per layer).  Vertical shifts:
    sublane-aligned slices of a zero-extended copy (offsets multiples of W).
    """
    H, W = hw
    P = H * W
    x = y.astype(jnp.bfloat16)

    # Horizontal variants (dx = -1, 0, +1), masked at the image row borders.
    w_idx = jax.lax.broadcasted_iota(jnp.int32, (P, 1), 0) % W
    zh = jnp.zeros((_ZPAD, cin), jnp.bfloat16)
    xh = jnp.concatenate([zh, x, zh], axis=0)                 # aligned concat
    var = {0: x}
    sp = xh[_ZPAD + 1:_ZPAD + 1 + P, :]                       # row p -> x[p+1]
    var[1] = jnp.where(w_idx < (W - 1), sp, jnp.zeros_like(sp))
    sm = xh[_ZPAD - 1:_ZPAD - 1 + P, :]                       # row p -> x[p-1]
    var[-1] = jnp.where(w_idx >= 1, sm, jnp.zeros_like(sm))

    # Vertical zero-extension; tap slices below land at offsets pad + dy*W.
    pad = max(_ZPAD, W)
    zv = jnp.zeros((pad, cin), jnp.bfloat16)
    ext = {dx: jnp.concatenate([zv, var[dx], zv], axis=0) for dx in (-1, 0, 1)}

    acc = None
    for dy in (-1, 0, 1):
        for dx in (-1, 0, 1):
            t = (dy + 1) * 3 + (dx + 1)
            tap = ext[dx][pad + dy * W:pad + dy * W + P, :]   # (P, Cin) bf16
            wt = w_ref[w_off + t * cin:w_off + (t + 1) * cin, 0:cout]
            d = jnp.dot(tap, wt, preferred_element_type=jnp.float32)
            acc = d if acc is None else acc + d
    return acc                                                # (P, Cout) f32


def _maxpool2x2(y, hw):
    """2x2 / stride-2 max pool on a flat (H*W, C) activation -> (H*W//4, C)."""
    H, W = hw
    C = y.shape[-1]
    a = y.reshape(H * (W // 2), 2, C)                  # pair columns (w even/odd)
    yw = jnp.maximum(a[:, 0, :], a[:, 1, :])
    b = yw.reshape(H // 2, 2, W // 2, C)               # pair rows (h even/odd)
    yh = jnp.maximum(b[:, 0, :, :], b[:, 1, :, :])
    return yh.reshape((H // 2) * (W // 2), C)


def _make_kernel(H, W):
    assert H % 8 == 0 and W % 8 == 0, "need 3 rounds of 2x2 pooling + alignment"
    H2, W2 = H // 2, W // 2
    H4, W4 = H // 4, W // 4
    H8, W8 = H // 8, W // 8

    def kernel(p0_ref, w_ref, gb_ref, o_ref):
        # ---- conv_init --------------------------------------------------
        # Layer 1: single aligned (H*W, 32) x (32, 32) bf16 dot (K padded).
        acc = jnp.dot(p0_ref[...], w_ref[_W_OFFS[0]:_W_OFFS[0] + 32, 0:32],
                      preferred_element_type=jnp.float32)
        y = _bn_relu(acc, gb_ref, 0, relu=True)                     # (H*W, 32)
        y = _bn_relu(_conv3x3(y, (H, W), w_ref, _W_OFFS[1], 32, 32),
                     gb_ref, 1, relu=True)
        y = _maxpool2x2(y, (H, W))                                  # (H2*W2, 32)
        # ---- conv_1 -----------------------------------------------------
        y = _bn_relu(_conv3x3(y, (H2, W2), w_ref, _W_OFFS[2], 32, 64),
                     gb_ref, 2, relu=True)
        y = _bn_relu(_conv3x3(y, (H2, W2), w_ref, _W_OFFS[3], 64, 64),
                     gb_ref, 3, relu=True)
        y = _maxpool2x2(y, (H2, W2))                                # (H4*W4, 64)
        # ---- conv_2 -----------------------------------------------------
        y = _bn_relu(_conv3x3(y, (H4, W4), w_ref, _W_OFFS[4], 64, 128),
                     gb_ref, 4, relu=True)
        y = _bn_relu(_conv3x3(y, (H4, W4), w_ref, _W_OFFS[5], 128, 128),
                     gb_ref, 5, relu=True)
        y = _maxpool2x2(y, (H4, W4))                                # (H8*W8, 128)
        # ---- conv_nonlinear ----------------------------------------------
        y = _bn_relu(_conv3x3(y, (H8, W8), w_ref, _W_OFFS[6], 128, 128),
                     gb_ref, 6, relu=True)
        y = _bn_relu(_conv3x3(y, (H8, W8), w_ref, _W_OFFS[7], 128, 16),
                     gb_ref, 7, relu=False)                         # (H8*W8, 16)
        # ---- adaptive_avg_pool2d((1,1)) + view(1,-1) + Linear(16,1) -------
        pooled = jnp.mean(y, axis=0, keepdims=True)                 # (1, 16)
        fcw = gb_ref[_FC_W_ROW:_FC_W_ROW + 1, 0:16]
        fcb = gb_ref[_FC_B_ROW:_FC_B_ROW + 1, 0:1]
        o_ref[...] = jnp.sum(pooled * fcw, axis=1, keepdims=True) + fcb

    return kernel


# --------------------------------------------------------------------------
# Parameters (canonical, f32) and packing into the two kernel slabs.
# Canonical conv weight: (K*K*Cin, Cout), row = (ky*K + kx)*Cin + ci.
# --------------------------------------------------------------------------
def init_params(key):
    conv_params = []
    for cin, cout, k in _CONV_CFG:
        key, kw, kg, kb = jax.random.split(key, 4)
        fan_in = float(cin * k * k)
        w = jax.random.normal(kw, (k * k * cin, cout), jnp.float32) / (fan_in ** 0.5)
        gamma = 1.0 + 0.1 * jax.random.normal(kg, (cout,), jnp.float32)
        beta = 0.1 * jax.random.normal(kb, (cout,), jnp.float32)
        conv_params.append((w, gamma, beta))
    key, kfw, kfb = jax.random.split(key, 3)
    fc_w = jax.random.normal(kfw, (16,), jnp.float32) / 4.0
    fc_b = 0.01 * jax.random.normal(kfb, (1,), jnp.float32)
    return conv_params, (fc_w, fc_b)


def pack_params(conv_params, fc):
    """Pack all weights into one bf16 slab and one f32 gamma/beta/fc slab."""
    blocks = []
    for (w, _, _), (cin, cout, k), rows in zip(conv_params, _CONV_CFG, _W_BLOCK_ROWS):
        blk = jnp.pad(w, ((0, rows - k * k * cin), (0, 128 - cout)))
        blocks.append(blk)
    w_slab = jnp.concatenate(blocks, axis=0).astype(jnp.bfloat16)   # (rows, 128)

    gb = jnp.zeros((_GB_ROWS, 128), jnp.float32)
    for i, ((_, gamma, beta), (_, cout, _)) in enumerate(zip(conv_params, _CONV_CFG)):
        gb = gb.at[2 * i, :cout].set(gamma)
        gb = gb.at[2 * i + 1, :cout].set(beta)
    fc_w, fc_b = fc
    gb = gb.at[_FC_W_ROW, :16].set(fc_w)
    gb = gb.at[_FC_B_ROW, 0].set(fc_b[0])
    return w_slab, gb


# --------------------------------------------------------------------------
# Forward pass: one pallas_call for the whole network, 3 packed operands.
# --------------------------------------------------------------------------
def _build_patches5x5(img_2d, H, W):
    """(H, W) f32 -> (H*W, 32) bf16 'same' 5x5 im2col, K padded 25 -> 32."""
    imgp = jnp.pad(img_2d, ((2, 2), (2, 2)))
    cols = [imgp[dy:dy + H, dx:dx + W].reshape(H * W, 1)
            for dy in range(5) for dx in range(5)]
    cols.append(jnp.zeros((H * W, 7), jnp.float32))
    return jnp.concatenate(cols, axis=1).astype(jnp.bfloat16)


@jax.jit
def discriminator_forward(x_nchw, w_slab, gb_slab):
    N, Cin, H, W = x_nchw.shape
    assert N == 1 and Cin == 1, "x.view(1,-1) + Linear(16,1) force a single 1-ch image"
    patches0 = _build_patches5x5(x_nchw[0, 0].astype(jnp.float32), H, W)
    vmem = pltpu.MemorySpace.VMEM
    return pl.pallas_call(
        _make_kernel(H, W),
        out_shape=jax.ShapeDtypeStruct((1, 1), jnp.float32),
        in_specs=[pl.BlockSpec(memory_space=vmem)] * 3,
        out_specs=pl.BlockSpec(memory_space=vmem),
    )(patches0, w_slab, gb_slab)


# --------------------------------------------------------------------------
# Pure-JAX/XLA reference with matching numerics (bf16 matmul inputs, f32
# accumulation, train-mode BatchNorm) for a correctness check.
# --------------------------------------------------------------------------
@jax.jit
def reference_forward(x_nchw, conv_params, fc):
    def conv(x, w_flat, k):
        cin, cout = x.shape[-1], w_flat.shape[-1]
        w4 = w_flat.reshape(k, k, cin, cout).astype(jnp.bfloat16)
        return jax.lax.conv_general_dilated(
            x.astype(jnp.bfloat16), w4,
            window_strides=(1, 1), padding=[(k // 2, k // 2)] * 2,
            dimension_numbers=("NHWC", "HWIO", "NHWC"),
            preferred_element_type=jnp.float32)

    def bn(x, gamma, beta, relu):
        mean = jnp.mean(x, axis=(0, 1, 2), keepdims=True)
        var = jnp.mean((x - mean) ** 2, axis=(0, 1, 2), keepdims=True)
        y = (x - mean) * jax.lax.rsqrt(var + BN_EPS) * gamma + beta
        return jnp.maximum(y, 0.0) if relu else y

    def pool(x):
        n, h, w, c = x.shape
        return jnp.max(x.reshape(n, h // 2, 2, w // 2, 2, c), axis=(2, 4))

    x = jnp.transpose(x_nchw, (0, 2, 3, 1)).astype(jnp.float32)
    for i, ((w, gamma, beta), (_, _, k)) in enumerate(zip(conv_params, _CONV_CFG)):
        x = bn(conv(x, w, k), gamma, beta, relu=(i != 7))
        if i in (1, 3, 5):
            x = pool(x)
    pooled = jnp.mean(x, axis=(1, 2))                  # (1, 16)
    fc_w, fc_b = fc
    return jnp.sum(pooled * fc_w[None, :], axis=1, keepdims=True) + fc_b[None, :]


if __name__ == "__main__":
    key = jax.random.PRNGKey(0)
    kx, kp = jax.random.split(key)
    # Batch 1, single channel, 16x16 (batch=1 is required by view(1,-1) + Linear(16,1)).
    x = jax.random.normal(kx, (1, 1, 16, 16), jnp.float32)
    conv_params, fc = init_params(kp)
    w_slab, gb_slab = pack_params(conv_params, fc)

    out = jax.block_until_ready(discriminator_forward(x, w_slab, gb_slab))
    assert out.shape == (1, 1), out.shape
    assert bool(jnp.all(jnp.isfinite(out))), out

    ref = jax.block_until_ready(reference_forward(x, conv_params, fc))
    assert bool(jnp.allclose(out, ref, rtol=2e-2, atol=2e-2)), (out, ref)

    print("KERNEL_OK")
</pallas_src>

<mosaic_0001>
module attributes {stable_mosaic.version = 11 : i64} {
  func.func @kernel(%arg0: memref<256x32xbf16, #tpu.memory_space<vmem>>, %arg1: memref<5216x128xbf16, #tpu.memory_space<vmem>>, %arg2: memref<24x128xf32, #tpu.memory_space<vmem>>, %arg3: memref<1x1xf32, #tpu.memory_space<vmem>>) attributes {dimension_semantics = [], scalar_prefetch = 0 : i64, scratch_operands = 0 : i64, tpu.core_type = #tpu.core_type<tc>} {
    %c0 = arith.constant 0 : index
    %c0_0 = arith.constant 0 : index
    %0 = vector.load %arg0[%c0, %c0_0] : memref<256x32xbf16, #tpu.memory_space<vmem>>, vector<256x32xbf16>
    %c0_1 = arith.constant 0 : index
    %c0_2 = arith.constant 0 : index
    %1 = vector.load %arg1[%c0_1, %c0_2] : memref<5216x128xbf16, #tpu.memory_space<vmem>>, vector<32x32xbf16>
    %cst = arith.constant dense<0.000000e+00> : vector<256x32xf32>
    %2 = tpu.matmul %0, %1, %cst {dimension_numbers = #tpu.dot_dimension_numbers<[1], [0], [0], [1], [0, 0, 1, 1], [], []>} : vector<256x32xbf16>, vector<32x32xbf16>, vector<256x32xf32> -> vector<256x32xf32>
    %c0_3 = arith.constant 0 : index
    %c0_4 = arith.constant 0 : index
    %3 = vector.load %arg2[%c0_3, %c0_4] : memref<24x128xf32, #tpu.memory_space<vmem>>, vector<1x32xf32>
    %c1 = arith.constant 1 : index
    %c0_5 = arith.constant 0 : index
    %4 = vector.load %arg2[%c1, %c0_5] : memref<24x128xf32, #tpu.memory_space<vmem>>, vector<1x32xf32>
    %cst_6 = arith.constant dense<0.000000e+00> : vector<32xf32>
    %5 = vector.multi_reduction <add>, %2, %cst_6 [0] : vector<256x32xf32> to vector<32xf32>
    %6 = vector.shape_cast %5 : vector<32xf32> to vector<1x32xf32>
    %cst_7 = arith.constant 3.906250e-03 : f32
    %7 = vector.broadcast %cst_7 : f32 to vector<1x32xf32>
    %8 = arith.mulf %6, %7 : vector<1x32xf32>
    %9 = arith.mulf %2, %2 : vector<256x32xf32>
    %cst_8 = arith.constant dense<0.000000e+00> : vector<32xf32>
    %10 = vector.multi_reduction <add>, %9, %cst_8 [0] : vector<256x32xf32> to vector<32xf32>
    %11 = vector.shape_cast %10 : vector<32xf32> to vector<1x32xf32>
    %cst_9 = arith.constant 3.906250e-03 : f32
    %12 = vector.broadcast %cst_9 : f32 to vector<1x32xf32>
    %13 = arith.mulf %11, %12 : vector<1x32xf32>
    %14 = arith.mulf %8, %8 : vector<1x32xf32>
    %15 = arith.subf %13, %14 : vector<1x32xf32>
    %cst_10 = arith.constant 0.000000e+00 : f32
    %16 = vector.broadcast %cst_10 : f32 to vector<1x32xf32>
    %17 = arith.maximumf %15, %16 : vector<1x32xf32>
    %cst_11 = arith.constant 9.99999974E-6 : f32
    %18 = vector.broadcast %cst_11 : f32 to vector<1x32xf32>
    %19 = arith.addf %17, %18 : vector<1x32xf32>
    %20 = math.rsqrt %19 : vector<1x32xf32>
    %21 = arith.mulf %3, %20 : vector<1x32xf32>
    %22 = arith.mulf %8, %21 : vector<1x32xf32>
    %23 = arith.subf %4, %22 : vector<1x32xf32>
    %24 = vector.broadcast %21 : vector<1x32xf32> to vector<256x32xf32>
    %25 = arith.mulf %2, %24 : vector<256x32xf32>
    %26 = vector.broadcast %23 : vector<1x32xf32> to vector<256x32xf32>
    %27 = arith.addf %25, %26 : vector<256x32xf32>
    %cst_12 = arith.constant 0.000000e+00 : f32
    %28 = vector.broadcast %cst_12 : f32 to vector<256x32xf32>
    %29 = arith.maximumf %27, %28 : vector<256x32xf32>
    %30 = arith.truncf %29 : vector<256x32xf32> to vector<256x32xbf16>
    %31 = tpu.iota {dimensions = array<i32: 0>} : vector<256x1xi32>
    %c16_i32 = arith.constant 16 : i32
    %c0_i32 = arith.constant 0 : i32
    %32 = arith.cmpi eq, %c16_i32, %c0_i32 : i32
    %c1_i32 = arith.constant 1 : i32
    %33 = arith.select %32, %c1_i32, %c16_i32 : i32
    %34 = vector.broadcast %33 : i32 to vector<256x1xi32>
    %35 = arith.remsi %31, %34 : vector<256x1xi32>
    %c0_i32_13 = arith.constant 0 : i32
    %36 = vector.broadcast %c0_i32_13 : i32 to vector<256x1xi32>
    %37 = arith.cmpi ne, %35, %36 : vector<256x1xi32>
    %c0_i32_14 = arith.constant 0 : i32
    %38 = vector.broadcast %c0_i32_14 : i32 to vector<256x1xi32>
    %39 = arith.cmpi slt, %35, %38 : vector<256x1xi32>
    %c0_i32_15 = arith.constant 0 : i32
    %40 = arith.cmpi slt, %33, %c0_i32_15 : i32
    %41 = vector.broadcast %40 : i1 to vector<256x1xi1>
    %42 = vector.broadcast %41 : vector<256x1xi1> to vector<256x1xi1>
    %43 = arith.xori %39, %42 : vector<256x1xi1>
    %44 = arith.andi %43, %37 : vector<256x1xi1>
    %45 = vector.broadcast %33 : i32 to vector<256x1xi32>
    %46 = arith.addi %35, %45 : vector<256x1xi32>
    %47 = arith.select %44, %46, %35 : vector<256x1xi1>, vector<256x1xi32>
    %cst_16 = arith.constant 0.000000e+00 : bf16
    %48 = vector.broadcast %cst_16 : bf16 to vector<16x32xbf16>
    %49 = tpu.concatenate %48, %30, %48 in 0 : vector<16x32xbf16>, vector<256x32xbf16>, vector<16x32xbf16> -> vector<288x32xbf16>
    %50 = vector.extract_strided_slice %49 {offsets = [17, 0], sizes = [256, 32], strides = [1, 1]} : vector<288x32xbf16> to vector<256x32xbf16>
    %c15_i32 = arith.constant 15 : i32
    %51 = vector.broadcast %c15_i32 : i32 to vector<256x1xi32>
    %52 = arith.cmpi slt, %47, %51 : vector<256x1xi32>
    %cst_17 = arith.constant 0.000000e+00 : bf16
    %53 = vector.broadcast %cst_17 : bf16 to vector<256x32xbf16>
    %54 = vector.shape_cast %52 : vector<256x1xi1> to vector<256x1xi1>
    %55 = vector.broadcast %54 : vector<256x1xi1> to vector<256x32xi1>
    %56 = arith.select %55, %50, %53 : vector<256x32xi1>, vector<256x32xbf16>
    %57 = vector.extract_strided_slice %49 {offsets = [15, 0], sizes = [256, 32], strides = [1, 1]} : vector<288x32xbf16> to vector<256x32xbf16>
    %c1_i32_18 = arith.constant 1 : i32
    %58 = vector.broadcast %c1_i32_18 : i32 to vector<256x1xi32>
    %59 = arith.cmpi sge, %47, %58 : vector<256x1xi32>
    %cst_19 = arith.constant 0.000000e+00 : bf16
    %60 = vector.broadcast %cst_19 : bf16 to vector<256x32xbf16>
    %61 = vector.shape_cast %59 : vector<256x1xi1> to vector<256x1xi1>
    %62 = vector.broadcast %61 : vector<256x1xi1> to vector<256x32xi1>
    %63 = arith.select %62, %57, %60 : vector<256x32xi1>, vector<256x32xbf16>
    %cst_20 = arith.constant 0.000000e+00 : bf16
    %64 = vector.broadcast %cst_20 : bf16 to vector<16x32xbf16>
    %65 = tpu.concatenate %64, %63, %64 in 0 : vector<16x32xbf16>, vector<256x32xbf16>, vector<16x32xbf16> -> vector<288x32xbf16>
    %66 = tpu.concatenate %64, %30, %64 in 0 : vector<16x32xbf16>, vector<256x32xbf16>, vector<16x32xbf16> -> vector<288x32xbf16>
    %67 = tpu.concatenate %64, %56, %64 in 0 : vector<16x32xbf16>, vector<256x32xbf16>, vector<16x32xbf16> -> vector<288x32xbf16>
    %68 = vector.extract_strided_slice %65 {offsets = [0, 0], sizes = [256, 32], strides = [1, 1]} : vector<288x32xbf16> to vector<256x32xbf16>
    %c32 = arith.constant 32 : index
    %c0_21 = arith.constant 0 : index
    %69 = vector.load %arg1[%c32, %c0_21] : memref<5216x128xbf16, #tpu.memory_space<vmem>>, vector<32x32xbf16>
    %cst_22 = arith.constant dense<0.000000e+00> : vector<256x32xf32>
    %70 = tpu.matmul %68, %69, %cst_22 {dimension_numbers = #tpu.dot_dimension_numbers<[1], [0], [0], [1], [0, 0, 1, 1], [], []>} : vector<256x32xbf16>, vector<32x32xbf16>, vector<256x32xf32> -> vector<256x32xf32>
    %71 = vector.extract_strided_slice %66 {offsets = [0, 0], sizes = [256, 32], strides = [1, 1]} : vector<288x32xbf16> to vector<256x32xbf16>
    %c64 = arith.constant 64 : index
    %c0_23 = arith.constant 0 : index
    %72 = vector.load %arg1[%c64, %c0_23] : memref<5216x128xbf16, #tpu.memory_space<vmem>>, vector<32x32xbf16>
    %cst_24 = arith.constant dense<0.000000e+00> : vector<256x32xf32>
    %73 = tpu.matmul %71, %72, %cst_24 {dimension_numbers = #tpu.dot_dimension_numbers<[1], [0], [0], [1], [0, 0, 1, 1], [], []>} : vector<256x32xbf16>, vector<32x32xbf16>, vector<256x32xf32> -> vector<256x32xf32>
    %74 = arith.addf %70, %73 : vector<256x32xf32>
    %75 = vector.extract_strided_slice %67 {offsets = [0, 0], sizes = [256, 32], strides = [1, 1]} : vector<288x32xbf16> to vector<256x32xbf16>
    %c96 = arith.constant 96 : index
    %c0_25 = arith.constant 0 : index
    %76 = vector.load %arg1[%c96, %c0_25] : memref<5216x128xbf16, #tpu.memory_space<vmem>>, vector<32x32xbf16>
    %cst_26 = arith.constant dense<0.000000e+00> : vector<256x32xf32>
    %77 = tpu.matmul %75, %76, %cst_26 {dimension_numbers = #tpu.dot_dimension_numbers<[1], [0], [0], [1], [0, 0, 1, 1], [], []>} : vector<256x32xbf16>, vector<32x32xbf16>, vector<256x32xf32> -> vector<256x32xf32>
    %78 = arith.addf %74, %77 : vector<256x32xf32>
    %79 = vector.extract_strided_slice %65 {offsets = [16, 0], sizes = [256, 32], strides = [1, 1]} : vector<288x32xbf16> to vector<256x32xbf16>
    %c128 = arith.constant 128 : index
    %c0_27 = arith.constant 0 : index
    %80 = vector.load %arg1[%c128, %c0_27] : memref<5216x128xbf16, #tpu.memory_space<vmem>>, vector<32x32xbf16>
    %cst_28 = arith.constant dense<0.000000e+00> : vector<256x32xf32>
    %81 = tpu.matmul %79, %80, %cst_28 {dimension_numbers = #tpu.dot_dimension_numbers<[1], [0], [0], [1], [0, 0, 1, 1], [], []>} : vector<256x32xbf16>, vector<32x32xbf16>, vector<256x32xf32> -> vector<256x32xf32>
    %82 = arith.addf %78, %81 : vector<256x32xf32>
    %83 = vector.extract_strided_slice %66 {offsets = [16, 0], sizes = [256, 32], strides = [1, 1]} : vector<288x32xbf16> to vector<256x32xbf16>
    %c160 = arith.constant 160 : index
    %c0_29 = arith.constant 0 : index
    %84 = vector.load %arg1[%c160, %c0_29] : memref<5216x128xbf16, #tpu.memory_space<vmem>>, vector<32x32xbf16>
    %cst_30 = arith.constant dense<0.000000e+00> : vector<256x32xf32>
    %85 = tpu.matmul %83, %84, %cst_30 {dimension_numbers = #tpu.dot_dimension_numbers<[1], [0], [0], [1], [0, 0, 1, 1], [], []>} : vector<256x32xbf16>, vector<32x32xbf16>, vector<256x32xf32> -> vector<256x32xf32>
    %86 = arith.addf %82, %85 : vector<256x32xf32>
    %87 = vector.extract_strided_slice %67 {offsets = [16, 0], sizes = [256, 32], strides = [1, 1]} : vector<288x32xbf16> to vector<256x32xbf16>
    %c192 = arith.constant 192 : index
    %c0_31 = arith.constant 0 : index
    %88 = vector.load %arg1[%c192, %c0_31] : memref<5216x128xbf16, #tpu.memory_space<vmem>>, vector<32x32xbf16>
    %cst_32 = arith.constant dense<0.000000e+00> : vector<256x32xf32>
    %89 = tpu.matmul %87, %88, %cst_32 {dimension_numbers = #tpu.dot_dimension_numbers<[1], [0], [0], [1], [0, 0, 1, 1], [], []>} : vector<256x32xbf16>, vector<32x32xbf16>, vector<256x32xf32> -> vector<256x32xf32>
    %90 = arith.addf %86, %89 : vector<256x32xf32>
    %91 = vector.extract_strided_slice %65 {offsets = [32, 0], sizes = [256, 32], strides = [1, 1]} : vector<288x32xbf16> to vector<256x32xbf16>
    %c224 = arith.constant 224 : index
    %c0_33 = arith.constant 0 : index
    %92 = vector.load %arg1[%c224, %c0_33] : memref<5216x128xbf16, #tpu.memory_space<vmem>>, vector<32x32xbf16>
    %cst_34 = arith.constant dense<0.000000e+00> : vector<256x32xf32>
    %93 = tpu.matmul %91, %92, %cst_34 {dimension_numbers = #tpu.dot_dimension_numbers<[1], [0], [0], [1], [0, 0, 1, 1], [], []>} : vector<256x32xbf16>, vector<32x32xbf16>, vector<256x32xf32> -> vector<256x32xf32>
    %94 = arith.addf %90, %93 : vector<256x32xf32>
    %95 = vector.extract_strided_slice %66 {offsets = [32, 0], sizes = [256, 32], strides = [1, 1]} : vector<288x32xbf16> to vector<256x32xbf16>
    %c256 = arith.constant 256 : index
    %c0_35 = arith.constant 0 : index
    %96 = vector.load %arg1[%c256, %c0_35] : memref<5216x128xbf16, #tpu.memory_space<vmem>>, vector<32x32xbf16>
    %cst_36 = arith.constant dense<0.000000e+00> : vector<256x32xf32>
    %97 = tpu.matmul %95, %96, %cst_36 {dimension_numbers = #tpu.dot_dimension_numbers<[1], [0], [0], [1], [0, 0, 1, 1], [], []>} : vector<256x32xbf16>, vector<32x32xbf16>, vector<256x32xf32> -> vector<256x32xf32>
    %98 = arith.addf %94, %97 : vector<256x32xf32>
    %99 = vector.extract_strided_slice %67 {offsets = [32, 0], sizes = [256, 32], strides = [1, 1]} : vector<288x32xbf16> to vector<256x32xbf16>
    %c288 = arith.constant 288 : index
    %c0_37 = arith.constant 0 : index
    %100 = vector.load %arg1[%c288, %c0_37] : memref<5216x128xbf16, #tpu.memory_space<vmem>>, vector<32x32xbf16>
    %cst_38 = arith.constant dense<0.000000e+00> : vector<256x32xf32>
    %101 = tpu.matmul %99, %100, %cst_38 {dimension_numbers = #tpu.dot_dimension_numbers<[1], [0], [0], [1], [0, 0, 1, 1], [], []>} : vector<256x32xbf16>, vector<32x32xbf16>, vector<256x32xf32> -> vector<256x32xf32>
    %102 = arith.addf %98, %101 : vector<256x32xf32>
    %c2 = arith.constant 2 : index
    %c0_39 = arith.constant 0 : index
    %103 = vector.load %arg2[%c2, %c0_39] : memref<24x128xf32, #tpu.memory_space<vmem>>, vector<1x32xf32>
    %c3 = arith.constant 3 : index
    %c0_40 = arith.constant 0 : index
    %104 = vector.load %arg2[%c3, %c0_40] : memref<24x128xf32, #tpu.memory_space<vmem>>, vector<1x32xf32>
    %cst_41 = arith.constant dense<0.000000e+00> : vector<32xf32>
    %105 = vector.multi_reduction <add>, %102, %cst_41 [0] : vector<256x32xf32> to vector<32xf32>
    %106 = vector.shape_cast %105 : vector<32xf32> to vector<1x32xf32>
    %cst_42 = arith.constant 3.906250e-03 : f32
    %107 = vector.broadcast %cst_42 : f32 to vector<1x32xf32>
    %108 = arith.mulf %106, %107 : vector<1x32xf32>
    %109 = arith.mulf %102, %102 : vector<256x32xf32>
    %cst_43 = arith.constant dense<0.000000e+00> : vector<32xf32>
    %110 = vector.multi_reduction <add>, %109, %cst_43 [0] : vector<256x32xf32> to vector<32xf32>
    %111 = vector.shape_cast %110 : vector<32xf32> to vector<1x32xf32>
    %cst_44 = arith.constant 3.906250e-03 : f32
    %112 = vector.broadcast %cst_44 : f32 to vector<1x32xf32>
    %113 = arith.mulf %111, %112 : vector<1x32xf32>
    %114 = arith.mulf %108, %108 : vector<1x32xf32>
    %115 = arith.subf %113, %114 : vector<1x32xf32>
    %cst_45 = arith.constant 0.000000e+00 : f32
    %116 = vector.broadcast %cst_45 : f32 to vector<1x32xf32>
    %117 = arith.maximumf %115, %116 : vector<1x32xf32>
    %cst_46 = arith.constant 9.99999974E-6 : f32
    %118 = vector.broadcast %cst_46 : f32 to vector<1x32xf32>
    %119 = arith.addf %117, %118 : vector<1x32xf32>
    %120 = math.rsqrt %119 : vector<1x32xf32>
    %121 = arith.mulf %103, %120 : vector<1x32xf32>
    %122 = arith.mulf %108, %121 : vector<1x32xf32>
    %123 = arith.subf %104, %122 : vector<1x32xf32>
    %124 = vector.broadcast %121 : vector<1x32xf32> to vector<256x32xf32>
    %125 = arith.mulf %102, %124 : vector<256x32xf32>
    %126 = vector.broadcast %123 : vector<1x32xf32> to vector<256x32xf32>
    %127 = arith.addf %125, %126 : vector<256x32xf32>
    %cst_47 = arith.constant 0.000000e+00 : f32
    %128 = vector.broadcast %cst_47 : f32 to vector<256x32xf32>
    %129 = arith.maximumf %127, %128 : vector<256x32xf32>
    %130 = vector.shape_cast %129 : vector<256x32xf32> to vector<128x2x32xf32>
    %131 = vector.extract_strided_slice %130 {offsets = [0, 0, 0], sizes = [128, 1, 32], strides = [1, 1, 1]} : vector<128x2x32xf32> to vector<128x1x32xf32>
    %132 = vector.shape_cast %131 : vector<128x1x32xf32> to vector<128x32xf32>
    %133 = vector.extract_strided_slice %130 {offsets = [0, 1, 0], sizes = [128, 1, 32], strides = [1, 1, 1]} : vector<128x2x32xf32> to vector<128x1x32xf32>
    %134 = vector.shape_cast %133 : vector<128x1x32xf32> to vector<128x32xf32>
    %135 = arith.maximumf %132, %134 : vector<128x32xf32>
    %136 = vector.shape_cast %135 : vector<128x32xf32> to vector<8x2x8x32xf32>
    %137 = vector.extract_strided_slice %136 {offsets = [0, 0, 0, 0], sizes = [8, 1, 8, 32], strides = [1, 1, 1, 1]} : vector<8x2x8x32xf32> to vector<8x1x8x32xf32>
    %138 = vector.shape_cast %137 : vector<8x1x8x32xf32> to vector<8x8x32xf32>
    %139 = vector.extract_strided_slice %136 {offsets = [0, 1, 0, 0], sizes = [8, 1, 8, 32], strides = [1, 1, 1, 1]} : vector<8x2x8x32xf32> to vector<8x1x8x32xf32>
    %140 = vector.shape_cast %139 : vector<8x1x8x32xf32> to vector<8x8x32xf32>
    %141 = arith.maximumf %138, %140 : vector<8x8x32xf32>
    %142 = vector.shape_cast %141 : vector<8x8x32xf32> to vector<64x32xf32>
    %143 = arith.truncf %142 : vector<64x32xf32> to vector<64x32xbf16>
    %144 = tpu.iota {dimensions = array<i32: 0>} : vector<64x1xi32>
    %c8_i32 = arith.constant 8 : i32
    %c0_i32_48 = arith.constant 0 : i32
    %145 = arith.cmpi eq, %c8_i32, %c0_i32_48 : i32
    %c1_i32_49 = arith.constant 1 : i32
    %146 = arith.select %145, %c1_i32_49, %c8_i32 : i32
    %147 = vector.broadcast %146 : i32 to vector<64x1xi32>
    %148 = arith.remsi %144, %147 : vector<64x1xi32>
    %c0_i32_50 = arith.constant 0 : i32
    %149 = vector.broadcast %c0_i32_50 : i32 to vector<64x1xi32>
    %150 = arith.cmpi ne, %148, %149 : vector<64x1xi32>
    %c0_i32_51 = arith.constant 0 : i32
    %151 = vector.broadcast %c0_i32_51 : i32 to vector<64x1xi32>
    %152 = arith.cmpi slt, %148, %151 : vector<64x1xi32>
    %c0_i32_52 = arith.constant 0 : i32
    %153 = arith.cmpi slt, %146, %c0_i32_52 : i32
    %154 = vector.broadcast %153 : i1 to vector<64x1xi1>
    %155 = vector.broadcast %154 : vector<64x1xi1> to vector<64x1xi1>
    %156 = arith.xori %152, %155 : vector<64x1xi1>
    %157 = arith.andi %156, %150 : vector<64x1xi1>
    %158 = vector.broadcast %146 : i32 to vector<64x1xi32>
    %159 = arith.addi %148, %158 : vector<64x1xi32>
    %160 = arith.select %157, %159, %148 : vector<64x1xi1>, vector<64x1xi32>
    %cst_53 = arith.constant 0.000000e+00 : bf16
    %161 = vector.broadcast %cst_53 : bf16 to vector<16x32xbf16>
    %162 = tpu.concatenate %161, %143, %161 in 0 : vector<16x32xbf16>, vector<64x32xbf16>, vector<16x32xbf16> -> vector<96x32xbf16>
    %163 = vector.extract_strided_slice %162 {offsets = [17, 0], sizes = [64, 32], strides = [1, 1]} : vector<96x32xbf16> to vector<64x32xbf16>
    %c7_i32 = arith.constant 7 : i32
    %164 = vector.broadcast %c7_i32 : i32 to vector<64x1xi32>
    %165 = arith.cmpi slt, %160, %164 : vector<64x1xi32>
    %cst_54 = arith.constant 0.000000e+00 : bf16
    %166 = vector.broadcast %cst_54 : bf16 to vector<64x32xbf16>
    %167 = vector.shape_cast %165 : vector<64x1xi1> to vector<64x1xi1>
    %168 = vector.broadcast %167 : vector<64x1xi1> to vector<64x32xi1>
    %169 = arith.select %168, %163, %166 : vector<64x32xi1>, vector<64x32xbf16>
    %170 = vector.extract_strided_slice %162 {offsets = [15, 0], sizes = [64, 32], strides = [1, 1]} : vector<96x32xbf16> to vector<64x32xbf16>
    %c1_i32_55 = arith.constant 1 : i32
    %171 = vector.broadcast %c1_i32_55 : i32 to vector<64x1xi32>
    %172 = arith.cmpi sge, %160, %171 : vector<64x1xi32>
    %cst_56 = arith.constant 0.000000e+00 : bf16
    %173 = vector.broadcast %cst_56 : bf16 to vector<64x32xbf16>
    %174 = vector.shape_cast %172 : vector<64x1xi1> to vector<64x1xi1>
    %175 = vector.broadcast %174 : vector<64x1xi1> to vector<64x32xi1>
    %176 = arith.select %175, %170, %173 : vector<64x32xi1>, vector<64x32xbf16>
    %cst_57 = arith.constant 0.000000e+00 : bf16
    %177 = vector.broadcast %cst_57 : bf16 to vector<16x32xbf16>
    %178 = tpu.concatenate %177, %176, %177 in 0 : vector<16x32xbf16>, vector<64x32xbf16>, vector<16x32xbf16> -> vector<96x32xbf16>
    %179 = tpu.concatenate %177, %143, %177 in 0 : vector<16x32xbf16>, vector<64x32xbf16>, vector<16x32xbf16> -> vector<96x32xbf16>
    %180 = tpu.concatenate %177, %169, %177 in 0 : vector<16x32xbf16>, vector<64x32xbf16>, vector<16x32xbf16> -> vector<96x32xbf16>
    %181 = vector.extract_strided_slice %178 {offsets = [8, 0], sizes = [64, 32], strides = [1, 1]} : vector<96x32xbf16> to vector<64x32xbf16>
    %c320 = arith.constant 320 : index
    %c0_58 = arith.constant 0 : index
    %182 = vector.load %arg1[%c320, %c0_58] : memref<5216x128xbf16, #tpu.memory_space<vmem>>, vector<32x64xbf16>
    %cst_59 = arith.constant dense<0.000000e+00> : vector<64x64xf32>
    %183 = tpu.matmul %181, %182, %cst_59 {dimension_numbers = #tpu.dot_dimension_numbers<[1], [0], [0], [1], [0, 0, 1, 1], [], []>} : vector<64x32xbf16>, vector<32x64xbf16>, vector<64x64xf32> -> vector<64x64xf32>
    %184 = vector.extract_strided_slice %179 {offsets = [8, 0], sizes = [64, 32], strides = [1, 1]} : vector<96x32xbf16> to vector<64x32xbf16>
    %c352 = arith.constant 352 : index
    %c0_60 = arith.constant 0 : index
    %185 = vector.load %arg1[%c352, %c0_60] : memref<5216x128xbf16, #tpu.memory_space<vmem>>, vector<32x64xbf16>
    %cst_61 = arith.constant dense<0.000000e+00> : vector<64x64xf32>
    %186 = tpu.matmul %184, %185, %cst_61 {dimension_numbers = #tpu.dot_dimension_numbers<[1], [0], [0], [1], [0, 0, 1, 1], [], []>} : vector<64x32xbf16>, vector<32x64xbf16>, vector<64x64xf32> -> vector<64x64xf32>
    %187 = arith.addf %183, %186 : vector<64x64xf32>
    %188 = vector.extract_strided_slice %180 {offsets = [8, 0], sizes = [64, 32], strides = [1, 1]} : vector<96x32xbf16> to vector<64x32xbf16>
    %c384 = arith.constant 384 : index
    %c0_62 = arith.constant 0 : index
    %189 = vector.load %arg1[%c384, %c0_62] : memref<5216x128xbf16, #tpu.memory_space<vmem>>, vector<32x64xbf16>
    %cst_63 = arith.constant dense<0.000000e+00> : vector<64x64xf32>
    %190 = tpu.matmul %188, %189, %cst_63 {dimension_numbers = #tpu.dot_dimension_numbers<[1], [0], [0], [1], [0, 0, 1, 1], [], []>} : vector<64x32xbf16>, vector<32x64xbf16>, vector<64x64xf32> -> vector<64x64xf32>
    %191 = arith.addf %187, %190 : vector<64x64xf32>
    %192 = vector.extract_strided_slice %178 {offsets = [16, 0], sizes = [64, 32], strides = [1, 1]} : vector<96x32xbf16> to vector<64x32xbf16>
    %c416 = arith.constant 416 : index
    %c0_64 = arith.constant 0 : index
    %193 = vector.load %arg1[%c416, %c0_64] : memref<5216x128xbf16, #tpu.memory_space<vmem>>, vector<32x64xbf16>
    %cst_65 = arith.constant dense<0.000000e+00> : vector<64x64xf32>
    %194 = tpu.matmul %192, %193, %cst_65 {dimension_numbers = #tpu.dot_dimension_numbers<[1], [0], [0], [1], [0, 0, 1, 1], [], []>} : vector<64x32xbf16>, vector<32x64xbf16>, vector<64x64xf32> -> vector<64x64xf32>
    %195 = arith.addf %191, %194 : vector<64x64xf32>
    %196 = vector.extract_strided_slice %179 {offsets = [16, 0], sizes = [64, 32], strides = [1, 1]} : vector<96x32xbf16> to vector<64x32xbf16>
    %c448 = arith.constant 448 : index
    %c0_66 = arith.constant 0 : index
    %197 = vector.load %arg1[%c448, %c0_66] : memref<5216x128xbf16, #tpu.memory_space<vmem>>, vector<32x64xbf16>
    %cst_67 = arith.constant dense<0.000000e+00> : vector<64x64xf32>
    %198 = tpu.matmul %196, %197, %cst_67 {dimension_numbers = #tpu.dot_dimension_numbers<[1], [0], [0], [1], [0, 0, 1, 1], [], []>} : vector<64x32xbf16>, vector<32x64xbf16>, vector<64x64xf32> -> vector<64x64xf32>
    %199 = arith.addf %195, %198 : vector<64x64xf32>
    %200 = vector.extract_strided_slice %180 {offsets = [16, 0], sizes = [64, 32], strides = [1, 1]} : vector<96x32xbf16> to vector<64x32xbf16>
    %c480 = arith.constant 480 : index
    %c0_68 = arith.constant 0 : index
    %201 = vector.load %arg1[%c480, %c0_68] : memref<5216x128xbf16, #tpu.memory_space<vmem>>, vector<32x64xbf16>
    %cst_69 = arith.constant dense<0.000000e+00> : vector<64x64xf32>
    %202 = tpu.matmul %200, %201, %cst_69 {dimension_numbers = #tpu.dot_dimension_numbers<[1], [0], [0], [1], [0, 0, 1, 1], [], []>} : vector<64x32xbf16>, vector<32x64xbf16>, vector<64x64xf32> -> vector<64x64xf32>
    %203 = arith.addf %199, %202 : vector<64x64xf32>
    %204 = vector.extract_strided_slice %178 {offsets = [24, 0], sizes = [64, 32], strides = [1, 1]} : vector<96x32xbf16> to vector<64x32xbf16>
    %c512 = arith.constant 512 : index
    %c0_70 = arith.constant 0 : index
    %205 = vector.load %arg1[%c512, %c0_70] : memref<5216x128xbf16, #tpu.memory_space<vmem>>, vector<32x64xbf16>
    %cst_71 = arith.constant dense<0.000000e+00> : vector<64x64xf32>
    %206 = tpu.matmul %204, %205, %cst_71 {dimension_numbers = #tpu.dot_dimension_numbers<[1], [0], [0], [1], [0, 0, 1, 1], [], []>} : vector<64x32xbf16>, vector<32x64xbf16>, vector<64x64xf32> -> vector<64x64xf32>
    %207 = arith.addf %203, %206 : vector<64x64xf32>
    %208 = vector.extract_strided_slice %179 {offsets = [24, 0], sizes = [64, 32], strides = [1, 1]} : vector<96x32xbf16> to vector<64x32xbf16>
    %c544 = arith.constant 544 : index
    %c0_72 = arith.constant 0 : index
    %209 = vector.load %arg1[%c544, %c0_72] : memref<5216x128xbf16, #tpu.memory_space<vmem>>, vector<32x64xbf16>
    %cst_73 = arith.constant dense<0.000000e+00> : vector<64x64xf32>
    %210 = tpu.matmul %208, %209, %cst_73 {dimension_numbers = #tpu.dot_dimension_numbers<[1], [0], [0], [1], [0, 0, 1, 1], [], []>} : vector<64x32xbf16>, vector<32x64xbf16>, vector<64x64xf32> -> vector<64x64xf32>
    %211 = arith.addf %207, %210 : vector<64x64xf32>
    %212 = vector.extract_strided_slice %180 {offsets = [24, 0], sizes = [64, 32], strides = [1, 1]} : vector<96x32xbf16> to vector<64x32xbf16>
    %c576 = arith.constant 576 : index
    %c0_74 = arith.constant 0 : index
    %213 = vector.load %arg1[%c576, %c0_74] : memref<5216x128xbf16, #tpu.memory_space<vmem>>, vector<32x64xbf16>
    %cst_75 = arith.constant dense<0.000000e+00> : vector<64x64xf32>
    %214 = tpu.matmul %212, %213, %cst_75 {dimension_numbers = #tpu.dot_dimension_numbers<[1], [0], [0], [1], [0, 0, 1, 1], [], []>} : vector<64x32xbf16>, vector<32x64xbf16>, vector<64x64xf32> -> vector<64x64xf32>
    %215 = arith.addf %211, %214 : vector<64x64xf32>
    %c4 = arith.constant 4 : index
    %c0_76 = arith.constant 0 : index
    %216 = vector.load %arg2[%c4, %c0_76] : memref<24x128xf32, #tpu.memory_space<vmem>>, vector<1x64xf32>
    %c5 = arith.constant 5 : index
    %c0_77 = arith.constant 0 : index
    %217 = vector.load %arg2[%c5, %c0_77] : memref<24x128xf32, #tpu.memory_space<vmem>>, vector<1x64xf32>
    %cst_78 = arith.constant dense<0.000000e+00> : vector<64xf32>
    %218 = vector.multi_reduction <add>, %215, %cst_78 [0] : vector<64x64xf32> to vector<64xf32>
    %219 = vector.shape_cast %218 : vector<64xf32> to vector<1x64xf32>
    %cst_79 = arith.constant 1.562500e-02 : f32
    %220 = vector.broadcast %cst_79 : f32 to vector<1x64xf32>
    %221 = arith.mulf %219, %220 : vector<1x64xf32>
    %222 = arith.mulf %215, %215 : vector<64x64xf32>
    %cst_80 = arith.constant dense<0.000000e+00> : vector<64xf32>
    %223 = vector.multi_reduction <add>, %222, %cst_80 [0] : vector<64x64xf32> to vector<64xf32>
    %224 = vector.shape_cast %223 : vector<64xf32> to vector<1x64xf32>
    %cst_81 = arith.constant 1.562500e-02 : f32
    %225 = vector.broadcast %cst_81 : f32 to vector<1x64xf32>
    %226 = arith.mulf %224, %225 : vector<1x64xf32>
    %227 = arith.mulf %221, %221 : vector<1x64xf32>
    %228 = arith.subf %226, %227 : vector<1x64xf32>
    %cst_82 = arith.constant 0.000000e+00 : f32
    %229 = vector.broadcast %cst_82 : f32 to vector<1x64xf32>
    %230 = arith.maximumf %228, %229 : vector<1x64xf32>
    %cst_83 = arith.constant 9.99999974E-6 : f32
    %231 = vector.broadcast %cst_83 : f32 to vector<1x64xf32>
    %232 = arith.addf %230, %231 : vector<1x64xf32>
    %233 = math.rsqrt %232 : vector<1x64xf32>
    %234 = arith.mulf %216, %233 : vector<1x64xf32>
    %235 = arith.mulf %221, %234 : vector<1x64xf32>
    %236 = arith.subf %217, %235 : vector<1x64xf32>
    %237 = vector.broadcast %234 : vector<1x64xf32> to vector<64x64xf32>
    %238 = arith.mulf %215, %237 : vector<64x64xf32>
    %239 = vector.broadcast %236 : vector<1x64xf32> to vector<64x64xf32>
    %240 = arith.addf %238, %239 : vector<64x64xf32>
    %cst_84 = arith.constant 0.000000e+00 : f32
    %241 = vector.broadcast %cst_84 : f32 to vector<64x64xf32>
    %242 = arith.maximumf %240, %241 : vector<64x64xf32>
    %243 = arith.truncf %242 : vector<64x64xf32> to vector<64x64xbf16>
    %244 = tpu.iota {dimensions = array<i32: 0>} : vector<64x1xi32>
    %c8_i32_85 = arith.constant 8 : i32
    %c0_i32_86 = arith.constant 0 : i32
    %245 = arith.cmpi eq, %c8_i32_85, %c0_i32_86 : i32
    %c1_i32_87 = arith.constant 1 : i32
    %246 = arith.select %245, %c1_i32_87, %c8_i32_85 : i32
    %247 = vector.broadcast %246 : i32 to vector<64x1xi32>
    %248 = arith.remsi %244, %247 : vector<64x1xi32>
    %c0_i32_88 = arith.constant 0 : i32
    %249 = vector.broadcast %c0_i32_88 : i32 to vector<64x1xi32>
    %250 = arith.cmpi ne, %248, %249 : vector<64x1xi32>
    %c0_i32_89 = arith.constant 0 : i32
    %251 = vector.broadcast %c0_i32_89 : i32 to vector<64x1xi32>
    %252 = arith.cmpi slt, %248, %251 : vector<64x1xi32>
    %c0_i32_90 = arith.constant 0 : i32
    %253 = arith.cmpi slt, %246, %c0_i32_90 : i32
    %254 = vector.broadcast %253 : i1 to vector<64x1xi1>
    %255 = vector.broadcast %254 : vector<64x1xi1> to vector<64x1xi1>
    %256 = arith.xori %252, %255 : vector<64x1xi1>
    %257 = arith.andi %256, %250 : vector<64x1xi1>
    %258 = vector.broadcast %246 : i32 to vector<64x1xi32>
    %259 = arith.addi %248, %258 : vector<64x1xi32>
    %260 = arith.select %257, %259, %248 : vector<64x1xi1>, vector<64x1xi32>
    %cst_91 = arith.constant 0.000000e+00 : bf16
    %261 = vector.broadcast %cst_91 : bf16 to vector<16x64xbf16>
    %262 = tpu.concatenate %261, %243, %261 in 0 : vector<16x64xbf16>, vector<64x64xbf16>, vector<16x64xbf16> -> vector<96x64xbf16>
    %263 = vector.extract_strided_slice %262 {offsets = [17, 0], sizes = [64, 64], strides = [1, 1]} : vector<96x64xbf16> to vector<64x64xbf16>
    %c7_i32_92 = arith.constant 7 : i32
    %264 = vector.broadcast %c7_i32_92 : i32 to vector<64x1xi32>
    %265 = arith.cmpi slt, %260, %264 : vector<64x1xi32>
    %cst_93 = arith.constant 0.000000e+00 : bf16
    %266 = vector.broadcast %cst_93 : bf16 to vector<64x64xbf16>
    %267 = vector.shape_cast %265 : vector<64x1xi1> to vector<64x1xi1>
    %268 = vector.broadcast %267 : vector<64x1xi1> to vector<64x64xi1>
    %269 = arith.select %268, %263, %266 : vector<64x64xi1>, vector<64x64xbf16>
    %270 = vector.extract_strided_slice %262 {offsets = [15, 0], sizes = [64, 64], strides = [1, 1]} : vector<96x64xbf16> to vector<64x64xbf16>
    %c1_i32_94 = arith.constant 1 : i32
    %271 = vector.broadcast %c1_i32_94 : i32 to vector<64x1xi32>
    %272 = arith.cmpi sge, %260, %271 : vector<64x1xi32>
    %cst_95 = arith.constant 0.000000e+00 : bf16
    %273 = vector.broadcast %cst_95 : bf16 to vector<64x64xbf16>
    %274 = vector.shape_cast %272 : vector<64x1xi1> to vector<64x1xi1>
    %275 = vector.broadcast %274 : vector<64x1xi1> to vector<64x64xi1>
    %276 = arith.select %275, %270, %273 : vector<64x64xi1>, vector<64x64xbf16>
    %cst_96 = arith.constant 0.000000e+00 : bf16
    %277 = vector.broadcast %cst_96 : bf16 to vector<16x64xbf16>
    %278 = tpu.concatenate %277, %276, %277 in 0 : vector<16x64xbf16>, vector<64x64xbf16>, vector<16x64xbf16> -> vector<96x64xbf16>
    %279 = tpu.concatenate %277, %243, %277 in 0 : vector<16x64xbf16>, vector<64x64xbf16>, vector<16x64xbf16> -> vector<96x64xbf16>
    %280 = tpu.concatenate %277, %269, %277 in 0 : vector<16x64xbf16>, vector<64x64xbf16>, vector<16x64xbf16> -> vector<96x64xbf16>
    %281 = vector.extract_strided_slice %278 {offsets = [8, 0], sizes = [64, 64], strides = [1, 1]} : vector<96x64xbf16> to vector<64x64xbf16>
    %c608 = arith.constant 608 : index
    %c0_97 = arith.constant 0 : index
    %282 = vector.load %arg1[%c608, %c0_97] : memref<5216x128xbf16, #tpu.memory_space<vmem>>, vector<64x64xbf16>
    %cst_98 = arith.constant dense<0.000000e+00> : vector<64x64xf32>
    %283 = tpu.matmul %281, %282, %cst_98 {dimension_numbers = #tpu.dot_dimension_numbers<[1], [0], [0], [1], [0, 0, 1, 1], [], []>} : vector<64x64xbf16>, vector<64x64xbf16>, vector<64x64xf32> -> vector<64x64xf32>
    %284 = vector.extract_strided_slice %279 {offsets = [8, 0], sizes = [64, 64], strides = [1, 1]} : vector<96x64xbf16> to vector<64x64xbf16>
    %c672 = arith.constant 672 : index
    %c0_99 = arith.constant 0 : index
    %285 = vector.load %arg1[%c672, %c0_99] : memref<5216x128xbf16, #tpu.memory_space<vmem>>, vector<64x64xbf16>
    %cst_100 = arith.constant dense<0.000000e+00> : vector<64x64xf32>
    %286 = tpu.matmul %284, %285, %cst_100 {dimension_numbers = #tpu.dot_dimension_numbers<[1], [0], [0], [1], [0, 0, 1, 1], [], []>} : vector<64x64xbf16>, vector<64x64xbf16>, vector<64x64xf32> -> vector<64x64xf32>
    %287 = arith.addf %283, %286 : vector<64x64xf32>
    %288 = vector.extract_strided_slice %280 {offsets = [8, 0], sizes = [64, 64], strides = [1, 1]} : vector<96x64xbf16> to vector<64x64xbf16>
    %c736 = arith.constant 736 : index
    %c0_101 = arith.constant 0 : index
    %289 = vector.load %arg1[%c736, %c0_101] : memref<5216x128xbf16, #tpu.memory_space<vmem>>, vector<64x64xbf16>
    %cst_102 = arith.constant dense<0.000000e+00> : vector<64x64xf32>
    %290 = tpu.matmul %288, %289, %cst_102 {dimension_numbers = #tpu.dot_dimension_numbers<[1], [0], [0], [1], [0, 0, 1, 1], [], []>} : vector<64x64xbf16>, vector<64x64xbf16>, vector<64x64xf32> -> vector<64x64xf32>
    %291 = arith.addf %287, %290 : vector<64x64xf32>
    %292 = vector.extract_strided_slice %278 {offsets = [16, 0], sizes = [64, 64], strides = [1, 1]} : vector<96x64xbf16> to vector<64x64xbf16>
    %c800 = arith.constant 800 : index
    %c0_103 = arith.constant 0 : index
    %293 = vector.load %arg1[%c800, %c0_103] : memref<5216x128xbf16, #tpu.memory_space<vmem>>, vector<64x64xbf16>
    %cst_104 = arith.constant dense<0.000000e+00> : vector<64x64xf32>
    %294 = tpu.matmul %292, %293, %cst_104 {dimension_numbers = #tpu.dot_dimension_numbers<[1], [0], [0], [1], [0, 0, 1, 1], [], []>} : vector<64x64xbf16>, vector<64x64xbf16>, vector<64x64xf32> -> vector<64x64xf32>
    %295 = arith.addf %291, %294 : vector<64x64xf32>
    %296 = vector.extract_strided_slice %279 {offsets = [16, 0], sizes = [64, 64], strides = [1, 1]} : vector<96x64xbf16> to vector<64x64xbf16>
    %c864 = arith.constant 864 : index
    %c0_105 = arith.constant 0 : index
    %297 = vector.load %arg1[%c864, %c0_105] : memref<5216x128xbf16, #tpu.memory_space<vmem>>, vector<64x64xbf16>
    %cst_106 = arith.constant dense<0.000000e+00> : vector<64x64xf32>
    %298 = tpu.matmul %296, %297, %cst_106 {dimension_numbers = #tpu.dot_dimension_numbers<[1], [0], [0], [1], [0, 0, 1, 1], [], []>} : vector<64x64xbf16>, vector<64x64xbf16>, vector<64x64xf32> -> vector<64x64xf32>
    %299 = arith.addf %295, %298 : vector<64x64xf32>
    %300 = vector.extract_strided_slice %280 {offsets = [16, 0], sizes = [64, 64], strides = [1, 1]} : vector<96x64xbf16> to vector<64x64xbf16>
    %c928 = arith.constant 928 : index
    %c0_107 = arith.constant 0 : index
    %301 = vector.load %arg1[%c928, %c0_107] : memref<5216x128xbf16, #tpu.memory_space<vmem>>, vector<64x64xbf16>
    %cst_108 = arith.constant dense<0.000000e+00> : vector<64x64xf32>
    %302 = tpu.matmul %300, %301, %cst_108 {dimension_numbers = #tpu.dot_dimension_numbers<[1], [0], [0], [1], [0, 0, 1, 1], [], []>} : vector<64x64xbf16>, vector<64x64xbf16>, vector<64x64xf32> -> vector<64x64xf32>
    %303 = arith.addf %299, %302 : vector<64x64xf32>
    %304 = vector.extract_strided_slice %278 {offsets = [24, 0], sizes = [64, 64], strides = [1, 1]} : vector<96x64xbf16> to vector<64x64xbf16>
    %c992 = arith.constant 992 : index
    %c0_109 = arith.constant 0 : index
    %305 = vector.load %arg1[%c992, %c0_109] : memref<5216x128xbf16, #tpu.memory_space<vmem>>, vector<64x64xbf16>
    %cst_110 = arith.constant dense<0.000000e+00> : vector<64x64xf32>
    %306 = tpu.matmul %304, %305, %cst_110 {dimension_numbers = #tpu.dot_dimension_numbers<[1], [0], [0], [1], [0, 0, 1, 1], [], []>} : vector<64x64xbf16>, vector<64x64xbf16>, vector<64x64xf32> -> vector<64x64xf32>
    %307 = arith.addf %303, %306 : vector<64x64xf32>
    %308 = vector.extract_strided_slice %279 {offsets = [24, 0], sizes = [64, 64], strides = [1, 1]} : vector<96x64xbf16> to vector<64x64xbf16>
    %c1056 = arith.constant 1056 : index
    %c0_111 = arith.constant 0 : index
    %309 = vector.load %arg1[%c1056, %c0_111] : memref<5216x128xbf16, #tpu.memory_space<vmem>>, vector<64x64xbf16>
    %cst_112 = arith.constant dense<0.000000e+00> : vector<64x64xf32>
    %310 = tpu.matmul %308, %309, %cst_112 {dimension_numbers = #tpu.dot_dimension_numbers<[1], [0], [0], [1], [0, 0, 1, 1], [], []>} : vector<64x64xbf16>, vector<64x64xbf16>, vector<64x64xf32> -> vector<64x64xf32>
    %311 = arith.addf %307, %310 : vector<64x64xf32>
    %312 = vector.extract_strided_slice %280 {offsets = [24, 0], sizes = [64, 64], strides = [1, 1]} : vector<96x64xbf16> to vector<64x64xbf16>
    %c1120 = arith.constant 1120 : index
    %c0_113 = arith.constant 0 : index
    %313 = vector.load %arg1[%c1120, %c0_113] : memref<5216x128xbf16, #tpu.memory_space<vmem>>, vector<64x64xbf16>
    %cst_114 = arith.constant dense<0.000000e+00> : vector<64x64xf32>
    %314 = tpu.matmul %312, %313, %cst_114 {dimension_numbers = #tpu.dot_dimension_numbers<[1], [0], [0], [1], [0, 0, 1, 1], [], []>} : vector<64x64xbf16>, vector<64x64xbf16>, vector<64x64xf32> -> vector<64x64xf32>
    %315 = arith.addf %311, %314 : vector<64x64xf32>
    %c6 = arith.constant 6 : index
    %c0_115 = arith.constant 0 : index
    %316 = vector.load %arg2[%c6, %c0_115] : memref<24x128xf32, #tpu.memory_space<vmem>>, vector<1x64xf32>
    %c7 = arith.constant 7 : index
    %c0_116 = arith.constant 0 : index
    %317 = vector.load %arg2[%c7, %c0_116] : memref<24x128xf32, #tpu.memory_space<vmem>>, vector<1x64xf32>
    %cst_117 = arith.constant dense<0.000000e+00> : vector<64xf32>
    %318 = vector.multi_reduction <add>, %315, %cst_117 [0] : vector<64x64xf32> to vector<64xf32>
    %319 = vector.shape_cast %318 : vector<64xf32> to vector<1x64xf32>
    %cst_118 = arith.constant 1.562500e-02 : f32
    %320 = vector.broadcast %cst_118 : f32 to vector<1x64xf32>
    %321 = arith.mulf %319, %320 : vector<1x64xf32>
    %322 = arith.mulf %315, %315 : vector<64x64xf32>
    %cst_119 = arith.constant dense<0.000000e+00> : vector<64xf32>
    %323 = vector.multi_reduction <add>, %322, %cst_119 [0] : vector<64x64xf32> to vector<64xf32>
    %324 = vector.shape_cast %323 : vector<64xf32> to vector<1x64xf32>
    %cst_120 = arith.constant 1.562500e-02 : f32
    %325 = vector.broadcast %cst_120 : f32 to vector<1x64xf32>
    %326 = arith.mulf %324, %325 : vector<1x64xf32>
    %327 = arith.mulf %321, %321 : vector<1x64xf32>
    %328 = arith.subf %326, %327 : vector<1x64xf32>
    %cst_121 = arith.constant 0.000000e+00 : f32
    %329 = vector.broadcast %cst_121 : f32 to vector<1x64xf32>
    %330 = arith.maximumf %328, %329 : vector<1x64xf32>
    %cst_122 = arith.constant 9.99999974E-6 : f32
    %331 = vector.broadcast %cst_122 : f32 to vector<1x64xf32>
    %332 = arith.addf %330, %331 : vector<1x64xf32>
    %333 = math.rsqrt %332 : vector<1x64xf32>
    %334 = arith.mulf %316, %333 : vector<1x64xf32>
    %335 = arith.mulf %321, %334 : vector<1x64xf32>
    %336 = arith.subf %317, %335 : vector<1x64xf32>
    %337 = vector.broadcast %334 : vector<1x64xf32> to vector<64x64xf32>
    %338 = arith.mulf %315, %337 : vector<64x64xf32>
    %339 = vector.broadcast %336 : vector<1x64xf32> to vector<64x64xf32>
    %340 = arith.addf %338, %339 : vector<64x64xf32>
    %cst_123 = arith.constant 0.000000e+00 : f32
    %341 = vector.broadcast %cst_123 : f32 to vector<64x64xf32>
    %342 = arith.maximumf %340, %341 : vector<64x64xf32>
    %343 = vector.shape_cast %342 : vector<64x64xf32> to vector<32x2x64xf32>
    %344 = vector.extract_strided_slice %343 {offsets = [0, 0, 0], sizes = [32, 1, 64], strides = [1, 1, 1]} : vector<32x2x64xf32> to vector<32x1x64xf32>
    %345 = vector.shape_cast %344 : vector<32x1x64xf32> to vector<32x64xf32>
    %346 = vector.extract_strided_slice %343 {offsets = [0, 1, 0], sizes = [32, 1, 64], strides = [1, 1, 1]} : vector<32x2x64xf32> to vector<32x1x64xf32>
    %347 = vector.shape_cast %346 : vector<32x1x64xf32> to vector<32x64xf32>
    %348 = arith.maximumf %345, %347 : vector<32x64xf32>
    %349 = vector.shape_cast %348 : vector<32x64xf32> to vector<4x2x4x64xf32>
    %350 = vector.extract_strided_slice %349 {offsets = [0, 0, 0, 0], sizes = [4, 1, 4, 64], strides = [1, 1, 1, 1]} : vector<4x2x4x64xf32> to vector<4x1x4x64xf32>
    %351 = vector.shape_cast %350 : vector<4x1x4x64xf32> to vector<4x4x64xf32>
    %352 = vector.extract_strided_slice %349 {offsets = [0, 1, 0, 0], sizes = [4, 1, 4, 64], strides = [1, 1, 1, 1]} : vector<4x2x4x64xf32> to vector<4x1x4x64xf32>
    %353 = vector.shape_cast %352 : vector<4x1x4x64xf32> to vector<4x4x64xf32>
    %354 = arith.maximumf %351, %353 : vector<4x4x64xf32>
    %355 = vector.shape_cast %354 : vector<4x4x64xf32> to vector<16x64xf32>
    %356 = arith.truncf %355 : vector<16x64xf32> to vector<16x64xbf16>
    %357 = tpu.iota {dimensions = array<i32: 0>} : vector<16x1xi32>
    %c4_i32 = arith.constant 4 : i32
    %c0_i32_124 = arith.constant 0 : i32
    %358 = arith.cmpi eq, %c4_i32, %c0_i32_124 : i32
    %c1_i32_125 = arith.constant 1 : i32
    %359 = arith.select %358, %c1_i32_125, %c4_i32 : i32
    %360 = vector.broadcast %359 : i32 to vector<16x1xi32>
    %361 = arith.remsi %357, %360 : vector<16x1xi32>
    %c0_i32_126 = arith.constant 0 : i32
    %362 = vector.broadcast %c0_i32_126 : i32 to vector<16x1xi32>
    %363 = arith.cmpi ne, %361, %362 : vector<16x1xi32>
    %c0_i32_127 = arith.constant 0 : i32
    %364 = vector.broadcast %c0_i32_127 : i32 to vector<16x1xi32>
    %365 = arith.cmpi slt, %361, %364 : vector<16x1xi32>
    %c0_i32_128 = arith.constant 0 : i32
    %366 = arith.cmpi slt, %359, %c0_i32_128 : i32
    %367 = vector.broadcast %366 : i1 to vector<16x1xi1>
    %368 = vector.broadcast %367 : vector<16x1xi1> to vector<16x1xi1>
    %369 = arith.xori %365, %368 : vector<16x1xi1>
    %370 = arith.andi %369, %363 : vector<16x1xi1>
    %371 = vector.broadcast %359 : i32 to vector<16x1xi32>
    %372 = arith.addi %361, %371 : vector<16x1xi32>
    %373 = arith.select %370, %372, %361 : vector<16x1xi1>, vector<16x1xi32>
    %cst_129 = arith.constant 0.000000e+00 : bf16
    %374 = vector.broadcast %cst_129 : bf16 to vector<16x64xbf16>
    %375 = tpu.concatenate %374, %356, %374 in 0 : vector<16x64xbf16>, vector<16x64xbf16>, vector<16x64xbf16> -> vector<48x64xbf16>
    %376 = vector.extract_strided_slice %375 {offsets = [17, 0], sizes = [16, 64], strides = [1, 1]} : vector<48x64xbf16> to vector<16x64xbf16>
    %c3_i32 = arith.constant 3 : i32
    %377 = vector.broadcast %c3_i32 : i32 to vector<16x1xi32>
    %378 = arith.cmpi slt, %373, %377 : vector<16x1xi32>
    %cst_130 = arith.constant 0.000000e+00 : bf16
    %379 = vector.broadcast %cst_130 : bf16 to vector<16x64xbf16>
    %380 = vector.shape_cast %378 : vector<16x1xi1> to vector<16x1xi1>
    %381 = vector.broadcast %380 : vector<16x1xi1> to vector<16x64xi1>
    %382 = arith.select %381, %376, %379 : vector<16x64xi1>, vector<16x64xbf16>
    %383 = vector.extract_strided_slice %375 {offsets = [15, 0], sizes = [16, 64], strides = [1, 1]} : vector<48x64xbf16> to vector<16x64xbf16>
    %c1_i32_131 = arith.constant 1 : i32
    %384 = vector.broadcast %c1_i32_131 : i32 to vector<16x1xi32>
    %385 = arith.cmpi sge, %373, %384 : vector<16x1xi32>
    %cst_132 = arith.constant 0.000000e+00 : bf16
    %386 = vector.broadcast %cst_132 : bf16 to vector<16x64xbf16>
    %387 = vector.shape_cast %385 : vector<16x1xi1> to vector<16x1xi1>
    %388 = vector.broadcast %387 : vector<16x1xi1> to vector<16x64xi1>
    %389 = arith.select %388, %383, %386 : vector<16x64xi1>, vector<16x64xbf16>
    %cst_133 = arith.constant 0.000000e+00 : bf16
    %390 = vector.broadcast %cst_133 : bf16 to vector<16x64xbf16>
    %391 = tpu.concatenate %390, %389, %390 in 0 : vector<16x64xbf16>, vector<16x64xbf16>, vector<16x64xbf16> -> vector<48x64xbf16>
    %392 = tpu.concatenate %390, %356, %390 in 0 : vector<16x64xbf16>, vector<16x64xbf16>, vector<16x64xbf16> -> vector<48x64xbf16>
    %393 = tpu.concatenate %390, %382, %390 in 0 : vector<16x64xbf16>, vector<16x64xbf16>, vector<16x64xbf16> -> vector<48x64xbf16>
    %394 = vector.extract_strided_slice %391 {offsets = [12, 0], sizes = [16, 64], strides = [1, 1]} : vector<48x64xbf16> to vector<16x64xbf16>
    %c1184 = arith.constant 1184 : index
    %c0_134 = arith.constant 0 : index
    %395 = vector.load %arg1[%c1184, %c0_134] : memref<5216x128xbf16, #tpu.memory_space<vmem>>, vector<64x128xbf16>
    %cst_135 = arith.constant dense<0.000000e+00> : vector<16x128xf32>
    %396 = tpu.matmul %394, %395, %cst_135 {dimension_numbers = #tpu.dot_dimension_numbers<[1], [0], [0], [1], [0, 0, 1, 1], [], []>} : vector<16x64xbf16>, vector<64x128xbf16>, vector<16x128xf32> -> vector<16x128xf32>
    %397 = vector.extract_strided_slice %392 {offsets = [12, 0], sizes = [16, 64], strides = [1, 1]} : vector<48x64xbf16> to vector<16x64xbf16>
    %c1248 = arith.constant 1248 : index
    %c0_136 = arith.constant 0 : index
    %398 = vector.load %arg1[%c1248, %c0_136] : memref<5216x128xbf16, #tpu.memory_space<vmem>>, vector<64x128xbf16>
    %cst_137 = arith.constant dense<0.000000e+00> : vector<16x128xf32>
    %399 = tpu.matmul %397, %398, %cst_137 {dimension_numbers = #tpu.dot_dimension_numbers<[1], [0], [0], [1], [0, 0, 1, 1], [], []>} : vector<16x64xbf16>, vector<64x128xbf16>, vector<16x128xf32> -> vector<16x128xf32>
    %400 = arith.addf %396, %399 : vector<16x128xf32>
    %401 = vector.extract_strided_slice %393 {offsets = [12, 0], sizes = [16, 64], strides = [1, 1]} : vector<48x64xbf16> to vector<16x64xbf16>
    %c1312 = arith.constant 1312 : index
    %c0_138 = arith.constant 0 : index
    %402 = vector.load %arg1[%c1312, %c0_138] : memref<5216x128xbf16, #tpu.memory_space<vmem>>, vector<64x128xbf16>
    %cst_139 = arith.constant dense<0.000000e+00> : vector<16x128xf32>
    %403 = tpu.matmul %401, %402, %cst_139 {dimension_numbers = #tpu.dot_dimension_numbers<[1], [0], [0], [1], [0, 0, 1, 1], [], []>} : vector<16x64xbf16>, vector<64x128xbf16>, vector<16x128xf32> -> vector<16x128xf32>
    %404 = arith.addf %400, %403 : vector<16x128xf32>
    %405 = vector.extract_strided_slice %391 {offsets = [16, 0], sizes = [16, 64], strides = [1, 1]} : vector<48x64xbf16> to vector<16x64xbf16>
    %c1376 = arith.constant 1376 : index
    %c0_140 = arith.constant 0 : index
    %406 = vector.load %arg1[%c1376, %c0_140] : memref<5216x128xbf16, #tpu.memory_space<vmem>>, vector<64x128xbf16>
    %cst_141 = arith.constant dense<0.000000e+00> : vector<16x128xf32>
    %407 = tpu.matmul %405, %406, %cst_141 {dimension_numbers = #tpu.dot_dimension_numbers<[1], [0], [0], [1], [0, 0, 1, 1], [], []>} : vector<16x64xbf16>, vector<64x128xbf16>, vector<16x128xf32> -> vector<16x128xf32>
    %408 = arith.addf %404, %407 : vector<16x128xf32>
    %409 = vector.extract_strided_slice %392 {offsets = [16, 0], sizes = [16, 64], strides = [1, 1]} : vector<48x64xbf16> to vector<16x64xbf16>
    %c1440 = arith.constant 1440 : index
    %c0_142 = arith.constant 0 : index
    %410 = vector.load %arg1[%c1440, %c0_142] : memref<5216x128xbf16, #tpu.memory_space<vmem>>, vector<64x128xbf16>
    %cst_143 = arith.constant dense<0.000000e+00> : vector<16x128xf32>
    %411 = tpu.matmul %409, %410, %cst_143 {dimension_numbers = #tpu.dot_dimension_numbers<[1], [0], [0], [1], [0, 0, 1, 1], [], []>} : vector<16x64xbf16>, vector<64x128xbf16>, vector<16x128xf32> -> vector<16x128xf32>
    %412 = arith.addf %408, %411 : vector<16x128xf32>
    %413 = vector.extract_strided_slice %393 {offsets = [16, 0], sizes = [16, 64], strides = [1, 1]} : vector<48x64xbf16> to vector<16x64xbf16>
    %c1504 = arith.constant 1504 : index
    %c0_144 = arith.constant 0 : index
    %414 = vector.load %arg1[%c1504, %c0_144] : memref<5216x128xbf16, #tpu.memory_space<vmem>>, vector<64x128xbf16>
    %cst_145 = arith.constant dense<0.000000e+00> : vector<16x128xf32>
    %415 = tpu.matmul %413, %414, %cst_145 {dimension_numbers = #tpu.dot_dimension_numbers<[1], [0], [0], [1], [0, 0, 1, 1], [], []>} : vector<16x64xbf16>, vector<64x128xbf16>, vector<16x128xf32> -> vector<16x128xf32>
    %416 = arith.addf %412, %415 : vector<16x128xf32>
    %417 = vector.extract_strided_slice %391 {offsets = [20, 0], sizes = [16, 64], strides = [1, 1]} : vector<48x64xbf16> to vector<16x64xbf16>
    %c1568 = arith.constant 1568 : index
    %c0_146 = arith.constant 0 : index
    %418 = vector.load %arg1[%c1568, %c0_146] : memref<5216x128xbf16, #tpu.memory_space<vmem>>, vector<64x128xbf16>
    %cst_147 = arith.constant dense<0.000000e+00> : vector<16x128xf32>
    %419 = tpu.matmul %417, %418, %cst_147 {dimension_numbers = #tpu.dot_dimension_numbers<[1], [0], [0], [1], [0, 0, 1, 1], [], []>} : vector<16x64xbf16>, vector<64x128xbf16>, vector<16x128xf32> -> vector<16x128xf32>
    %420 = arith.addf %416, %419 : vector<16x128xf32>
    %421 = vector.extract_strided_slice %392 {offsets = [20, 0], sizes = [16, 64], strides = [1, 1]} : vector<48x64xbf16> to vector<16x64xbf16>
    %c1632 = arith.constant 1632 : index
    %c0_148 = arith.constant 0 : index
    %422 = vector.load %arg1[%c1632, %c0_148] : memref<5216x128xbf16, #tpu.memory_space<vmem>>, vector<64x128xbf16>
    %cst_149 = arith.constant dense<0.000000e+00> : vector<16x128xf32>
    %423 = tpu.matmul %421, %422, %cst_149 {dimension_numbers = #tpu.dot_dimension_numbers<[1], [0], [0], [1], [0, 0, 1, 1], [], []>} : vector<16x64xbf16>, vector<64x128xbf16>, vector<16x128xf32> -> vector<16x128xf32>
    %424 = arith.addf %420, %423 : vector<16x128xf32>
    %425 = vector.extract_strided_slice %393 {offsets = [20, 0], sizes = [16, 64], strides = [1, 1]} : vector<48x64xbf16> to vector<16x64xbf16>
    %c1696 = arith.constant 1696 : index
    %c0_150 = arith.constant 0 : index
    %426 = vector.load %arg1[%c1696, %c0_150] : memref<5216x128xbf16, #tpu.memory_space<vmem>>, vector<64x128xbf16>
    %cst_151 = arith.constant dense<0.000000e+00> : vector<16x128xf32>
    %427 = tpu.matmul %425, %426, %cst_151 {dimension_numbers = #tpu.dot_dimension_numbers<[1], [0], [0], [1], [0, 0, 1, 1], [], []>} : vector<16x64xbf16>, vector<64x128xbf16>, vector<16x128xf32> -> vector<16x128xf32>
    %428 = arith.addf %424, %427 : vector<16x128xf32>
    %c8 = arith.constant 8 : index
    %c0_152 = arith.constant 0 : index
    %429 = vector.load %arg2[%c8, %c0_152] : memref<24x128xf32, #tpu.memory_space<vmem>>, vector<1x128xf32>
    %c9 = arith.constant 9 : index
    %c0_153 = arith.constant 0 : index
    %430 = vector.load %arg2[%c9, %c0_153] : memref<24x128xf32, #tpu.memory_space<vmem>>, vector<1x128xf32>
    %cst_154 = arith.constant dense<0.000000e+00> : vector<128xf32>
    %431 = vector.multi_reduction <add>, %428, %cst_154 [0] : vector<16x128xf32> to vector<128xf32>
    %432 = vector.shape_cast %431 : vector<128xf32> to vector<1x128xf32>
    %cst_155 = arith.constant 6.250000e-02 : f32
    %433 = vector.broadcast %cst_155 : f32 to vector<1x128xf32>
    %434 = arith.mulf %432, %433 : vector<1x128xf32>
    %435 = arith.mulf %428, %428 : vector<16x128xf32>
    %cst_156 = arith.constant dense<0.000000e+00> : vector<128xf32>
    %436 = vector.multi_reduction <add>, %435, %cst_156 [0] : vector<16x128xf32> to vector<128xf32>
    %437 = vector.shape_cast %436 : vector<128xf32> to vector<1x128xf32>
    %cst_157 = arith.constant 6.250000e-02 : f32
    %438 = vector.broadcast %cst_157 : f32 to vector<1x128xf32>
    %439 = arith.mulf %437, %438 : vector<1x128xf32>
    %440 = arith.mulf %434, %434 : vector<1x128xf32>
    %441 = arith.subf %439, %440 : vector<1x128xf32>
    %cst_158 = arith.constant 0.000000e+00 : f32
    %442 = vector.broadcast %cst_158 : f32 to vector<1x128xf32>
    %443 = arith.maximumf %441, %442 : vector<1x128xf32>
    %cst_159 = arith.constant 9.99999974E-6 : f32
    %444 = vector.broadcast %cst_159 : f32 to vector<1x128xf32>
    %445 = arith.addf %443, %444 : vector<1x128xf32>
    %446 = math.rsqrt %445 : vector<1x128xf32>
    %447 = arith.mulf %429, %446 : vector<1x128xf32>
    %448 = arith.mulf %434, %447 : vector<1x128xf32>
    %449 = arith.subf %430, %448 : vector<1x128xf32>
    %450 = vector.broadcast %447 : vector<1x128xf32> to vector<16x128xf32>
    %451 = arith.mulf %428, %450 : vector<16x128xf32>
    %452 = vector.broadcast %449 : vector<1x128xf32> to vector<16x128xf32>
    %453 = arith.addf %451, %452 : vector<16x128xf32>
    %cst_160 = arith.constant 0.000000e+00 : f32
    %454 = vector.broadcast %cst_160 : f32 to vector<16x128xf32>
    %455 = arith.maximumf %453, %454 : vector<16x128xf32>
    %456 = arith.truncf %455 : vector<16x128xf32> to vector<16x128xbf16>
    %457 = tpu.iota {dimensions = array<i32: 0>} : vector<16x1xi32>
    %c4_i32_161 = arith.constant 4 : i32
    %c0_i32_162 = arith.constant 0 : i32
    %458 = arith.cmpi eq, %c4_i32_161, %c0_i32_162 : i32
    %c1_i32_163 = arith.constant 1 : i32
    %459 = arith.select %458, %c1_i32_163, %c4_i32_161 : i32
    %460 = vector.broadcast %459 : i32 to vector<16x1xi32>
    %461 = arith.remsi %457, %460 : vector<16x1xi32>
    %c0_i32_164 = arith.constant 0 : i32
    %462 = vector.broadcast %c0_i32_164 : i32 to vector<16x1xi32>
    %463 = arith.cmpi ne, %461, %462 : vector<16x1xi32>
    %c0_i32_165 = arith.constant 0 : i32
    %464 = vector.broadcast %c0_i32_165 : i32 to vector<16x1xi32>
    %465 = arith.cmpi slt, %461, %464 : vector<16x1xi32>
    %c0_i32_166 = arith.constant 0 : i32
    %466 = arith.cmpi slt, %459, %c0_i32_166 : i32
    %467 = vector.broadcast %466 : i1 to vector<16x1xi1>
    %468 = vector.broadcast %467 : vector<16x1xi1> to vector<16x1xi1>
    %469 = arith.xori %465, %468 : vector<16x1xi1>
    %470 = arith.andi %469, %463 : vector<16x1xi1>
    %471 = vector.broadcast %459 : i32 to vector<16x1xi32>
    %472 = arith.addi %461, %471 : vector<16x1xi32>
    %473 = arith.select %470, %472, %461 : vector<16x1xi1>, vector<16x1xi32>
    %cst_167 = arith.constant 0.000000e+00 : bf16
    %474 = vector.broadcast %cst_167 : bf16 to vector<16x128xbf16>
    %475 = tpu.concatenate %474, %456, %474 in 0 : vector<16x128xbf16>, vector<16x128xbf16>, vector<16x128xbf16> -> vector<48x128xbf16>
    %476 = vector.extract_strided_slice %475 {offsets = [17, 0], sizes = [16, 128], strides = [1, 1]} : vector<48x128xbf16> to vector<16x128xbf16>
    %c3_i32_168 = arith.constant 3 : i32
    %477 = vector.broadcast %c3_i32_168 : i32 to vector<16x1xi32>
    %478 = arith.cmpi slt, %473, %477 : vector<16x1xi32>
    %cst_169 = arith.constant 0.000000e+00 : bf16
    %479 = vector.broadcast %cst_169 : bf16 to vector<16x128xbf16>
    %480 = vector.shape_cast %478 : vector<16x1xi1> to vector<16x1xi1>
    %481 = vector.broadcast %480 : vector<16x1xi1> to vector<16x128xi1>
    %482 = arith.select %481, %476, %479 : vector<16x128xi1>, vector<16x128xbf16>
    %483 = vector.extract_strided_slice %475 {offsets = [15, 0], sizes = [16, 128], strides = [1, 1]} : vector<48x128xbf16> to vector<16x128xbf16>
    %c1_i32_170 = arith.constant 1 : i32
    %484 = vector.broadcast %c1_i32_170 : i32 to vector<16x1xi32>
    %485 = arith.cmpi sge, %473, %484 : vector<16x1xi32>
    %cst_171 = arith.constant 0.000000e+00 : bf16
    %486 = vector.broadcast %cst_171 : bf16 to vector<16x128xbf16>
    %487 = vector.shape_cast %485 : vector<16x1xi1> to vector<16x1xi1>
    %488 = vector.broadcast %487 : vector<16x1xi1> to vector<16x128xi1>
    %489 = arith.select %488, %483, %486 : vector<16x128xi1>, vector<16x128xbf16>
    %cst_172 = arith.constant 0.000000e+00 : bf16
    %490 = vector.broadcast %cst_172 : bf16 to vector<16x128xbf16>
    %491 = tpu.concatenate %490, %489, %490 in 0 : vector<16x128xbf16>, vector<16x128xbf16>, vector<16x128xbf16> -> vector<48x128xbf16>
    %492 = tpu.concatenate %490, %456, %490 in 0 : vector<16x128xbf16>, vector<16x128xbf16>, vector<16x128xbf16> -> vector<48x128xbf16>
    %493 = tpu.concatenate %490, %482, %490 in 0 : vector<16x128xbf16>, vector<16x128xbf16>, vector<16x128xbf16> -> vector<48x128xbf16>
    %494 = vector.extract_strided_slice %491 {offsets = [12, 0], sizes = [16, 128], strides = [1, 1]} : vector<48x128xbf16> to vector<16x128xbf16>
    %c1760 = arith.constant 1760 : index
    %c0_173 = arith.constant 0 : index
    %495 = vector.load %arg1[%c1760, %c0_173] : memref<5216x128xbf16, #tpu.memory_space<vmem>>, vector<128x128xbf16>
    %cst_174 = arith.constant dense<0.000000e+00> : vector<16x128xf32>
    %496 = tpu.matmul %494, %495, %cst_174 {dimension_numbers = #tpu.dot_dimension_numbers<[1], [0], [0], [1], [0, 0, 1, 1], [], []>} : vector<16x128xbf16>, vector<128x128xbf16>, vector<16x128xf32> -> vector<16x128xf32>
    %497 = vector.extract_strided_slice %492 {offsets = [12, 0], sizes = [16, 128], strides = [1, 1]} : vector<48x128xbf16> to vector<16x128xbf16>
    %c1888 = arith.constant 1888 : index
    %c0_175 = arith.constant 0 : index
    %498 = vector.load %arg1[%c1888, %c0_175] : memref<5216x128xbf16, #tpu.memory_space<vmem>>, vector<128x128xbf16>
    %cst_176 = arith.constant dense<0.000000e+00> : vector<16x128xf32>
    %499 = tpu.matmul %497, %498, %cst_176 {dimension_numbers = #tpu.dot_dimension_numbers<[1], [0], [0], [1], [0, 0, 1, 1], [], []>} : vector<16x128xbf16>, vector<128x128xbf16>, vector<16x128xf32> -> vector<16x128xf32>
    %500 = arith.addf %496, %499 : vector<16x128xf32>
    %501 = vector.extract_strided_slice %493 {offsets = [12, 0], sizes = [16, 128], strides = [1, 1]} : vector<48x128xbf16> to vector<16x128xbf16>
    %c2016 = arith.constant 2016 : index
    %c0_177 = arith.constant 0 : index
    %502 = vector.load %arg1[%c2016, %c0_177] : memref<5216x128xbf16, #tpu.memory_space<vmem>>, vector<128x128xbf16>
    %cst_178 = arith.constant dense<0.000000e+00> : vector<16x128xf32>
    %503 = tpu.matmul %501, %502, %cst_178 {dimension_numbers = #tpu.dot_dimension_numbers<[1], [0], [0], [1], [0, 0, 1, 1], [], []>} : vector<16x128xbf16>, vector<128x128xbf16>, vector<16x128xf32> -> vector<16x128xf32>
    %504 = arith.addf %500, %503 : vector<16x128xf32>
    %505 = vector.extract_strided_slice %491 {offsets = [16, 0], sizes = [16, 128], strides = [1, 1]} : vector<48x128xbf16> to vector<16x128xbf16>
    %c2144 = arith.constant 2144 : index
    %c0_179 = arith.constant 0 : index
    %506 = vector.load %arg1[%c2144, %c0_179] : memref<5216x128xbf16, #tpu.memory_space<vmem>>, vector<128x128xbf16>
    %cst_180 = arith.constant dense<0.000000e+00> : vector<16x128xf32>
    %507 = tpu.matmul %505, %506, %cst_180 {dimension_numbers = #tpu.dot_dimension_numbers<[1], [0], [0], [1], [0, 0, 1, 1], [], []>} : vector<16x128xbf16>, vector<128x128xbf16>, vector<16x128xf32> -> vector<16x128xf32>
    %508 = arith.addf %504, %507 : vector<16x128xf32>
    %509 = vector.extract_strided_slice %492 {offsets = [16, 0], sizes = [16, 128], strides = [1, 1]} : vector<48x128xbf16> to vector<16x128xbf16>
    %c2272 = arith.constant 2272 : index
    %c0_181 = arith.constant 0 : index
    %510 = vector.load %arg1[%c2272, %c0_181] : memref<5216x128xbf16, #tpu.memory_space<vmem>>, vector<128x128xbf16>
    %cst_182 = arith.constant dense<0.000000e+00> : vector<16x128xf32>
    %511 = tpu.matmul %509, %510, %cst_182 {dimension_numbers = #tpu.dot_dimension_numbers<[1], [0], [0], [1], [0, 0, 1, 1], [], []>} : vector<16x128xbf16>, vector<128x128xbf16>, vector<16x128xf32> -> vector<16x128xf32>
    %512 = arith.addf %508, %511 : vector<16x128xf32>
    %513 = vector.extract_strided_slice %493 {offsets = [16, 0], sizes = [16, 128], strides = [1, 1]} : vector<48x128xbf16> to vector<16x128xbf16>
    %c2400 = arith.constant 2400 : index
    %c0_183 = arith.constant 0 : index
    %514 = vector.load %arg1[%c2400, %c0_183] : memref<5216x128xbf16, #tpu.memory_space<vmem>>, vector<128x128xbf16>
    %cst_184 = arith.constant dense<0.000000e+00> : vector<16x128xf32>
    %515 = tpu.matmul %513, %514, %cst_184 {dimension_numbers = #tpu.dot_dimension_numbers<[1], [0], [0], [1], [0, 0, 1, 1], [], []>} : vector<16x128xbf16>, vector<128x128xbf16>, vector<16x128xf32> -> vector<16x128xf32>
    %516 = arith.addf %512, %515 : vector<16x128xf32>
    %517 = vector.extract_strided_slice %491 {offsets = [20, 0], sizes = [16, 128], strides = [1, 1]} : vector<48x128xbf16> to vector<16x128xbf16>
    %c2528 = arith.constant 2528 : index
    %c0_185 = arith.constant 0 : index
    %518 = vector.load %arg1[%c2528, %c0_185] : memref<5216x128xbf16, #tpu.memory_space<vmem>>, vector<128x128xbf16>
    %cst_186 = arith.constant dense<0.000000e+00> : vector<16x128xf32>
    %519 = tpu.matmul %517, %518, %cst_186 {dimension_numbers = #tpu.dot_dimension_numbers<[1], [0], [0], [1], [0, 0, 1, 1], [], []>} : vector<16x128xbf16>, vector<128x128xbf16>, vector<16x128xf32> -> vector<16x128xf32>
    %520 = arith.addf %516, %519 : vector<16x128xf32>
    %521 = vector.extract_strided_slice %492 {offsets = [20, 0], sizes = [16, 128], strides = [1, 1]} : vector<48x128xbf16> to vector<16x128xbf16>
    %c2656 = arith.constant 2656 : index
    %c0_187 = arith.constant 0 : index
    %522 = vector.load %arg1[%c2656, %c0_187] : memref<5216x128xbf16, #tpu.memory_space<vmem>>, vector<128x128xbf16>
    %cst_188 = arith.constant dense<0.000000e+00> : vector<16x128xf32>
    %523 = tpu.matmul %521, %522, %cst_188 {dimension_numbers = #tpu.dot_dimension_numbers<[1], [0], [0], [1], [0, 0, 1, 1], [], []>} : vector<16x128xbf16>, vector<128x128xbf16>, vector<16x128xf32> -> vector<16x128xf32>
    %524 = arith.addf %520, %523 : vector<16x128xf32>
    %525 = vector.extract_strided_slice %493 {offsets = [20, 0], sizes = [16, 128], strides = [1, 1]} : vector<48x128xbf16> to vector<16x128xbf16>
    %c2784 = arith.constant 2784 : index
    %c0_189 = arith.constant 0 : index
    %526 = vector.load %arg1[%c2784, %c0_189] : memref<5216x128xbf16, #tpu.memory_space<vmem>>, vector<128x128xbf16>
    %cst_190 = arith.constant dense<0.000000e+00> : vector<16x128xf32>
    %527 = tpu.matmul %525, %526, %cst_190 {dimension_numbers = #tpu.dot_dimension_numbers<[1], [0], [0], [1], [0, 0, 1, 1], [], []>} : vector<16x128xbf16>, vector<128x128xbf16>, vector<16x128xf32> -> vector<16x128xf32>
    %528 = arith.addf %524, %527 : vector<16x128xf32>
    %c10 = arith.constant 10 : index
    %c0_191 = arith.constant 0 : index
    %529 = vector.load %arg2[%c10, %c0_191] : memref<24x128xf32, #tpu.memory_space<vmem>>, vector<1x128xf32>
    %c11 = arith.constant 11 : index
    %c0_192 = arith.constant 0 : index
    %530 = vector.load %arg2[%c11, %c0_192] : memref<24x128xf32, #tpu.memory_space<vmem>>, vector<1x128xf32>
    %cst_193 = arith.constant dense<0.000000e+00> : vector<128xf32>
    %531 = vector.multi_reduction <add>, %528, %cst_193 [0] : vector<16x128xf32> to vector<128xf32>
    %532 = vector.shape_cast %531 : vector<128xf32> to vector<1x128xf32>
    %cst_194 = arith.constant 6.250000e-02 : f32
    %533 = vector.broadcast %cst_194 : f32 to vector<1x128xf32>
    %534 = arith.mulf %532, %533 : vector<1x128xf32>
    %535 = arith.mulf %528, %528 : vector<16x128xf32>
    %cst_195 = arith.constant dense<0.000000e+00> : vector<128xf32>
    %536 = vector.multi_reduction <add>, %535, %cst_195 [0] : vector<16x128xf32> to vector<128xf32>
    %537 = vector.shape_cast %536 : vector<128xf32> to vector<1x128xf32>
    %cst_196 = arith.constant 6.250000e-02 : f32
    %538 = vector.broadcast %cst_196 : f32 to vector<1x128xf32>
    %539 = arith.mulf %537, %538 : vector<1x128xf32>
    %540 = arith.mulf %534, %534 : vector<1x128xf32>
    %541 = arith.subf %539, %540 : vector<1x128xf32>
    %cst_197 = arith.constant 0.000000e+00 : f32
    %542 = vector.broadcast %cst_197 : f32 to vector<1x128xf32>
    %543 = arith.maximumf %541, %542 : vector<1x128xf32>
    %cst_198 = arith.constant 9.99999974E-6 : f32
    %544 = vector.broadcast %cst_198 : f32 to vector<1x128xf32>
    %545 = arith.addf %543, %544 : vector<1x128xf32>
    %546 = math.rsqrt %545 : vector<1x128xf32>
    %547 = arith.mulf %529, %546 : vector<1x128xf32>
    %548 = arith.mulf %534, %547 : vector<1x128xf32>
    %549 = arith.subf %530, %548 : vector<1x128xf32>
    %550 = vector.broadcast %547 : vector<1x128xf32> to vector<16x128xf32>
    %551 = arith.mulf %528, %550 : vector<16x128xf32>
    %552 = vector.broadcast %549 : vector<1x128xf32> to vector<16x128xf32>
    %553 = arith.addf %551, %552 : vector<16x128xf32>
    %cst_199 = arith.constant 0.000000e+00 : f32
    %554 = vector.broadcast %cst_199 : f32 to vector<16x128xf32>
    %555 = arith.maximumf %553, %554 : vector<16x128xf32>
    %556 = vector.shape_cast %555 : vector<16x128xf32> to vector<8x2x128xf32>
    %557 = vector.extract_strided_slice %556 {offsets = [0, 0, 0], sizes = [8, 1, 128], strides = [1, 1, 1]} : vector<8x2x128xf32> to vector<8x1x128xf32>
    %558 = vector.shape_cast %557 : vector<8x1x128xf32> to vector<8x128xf32>
    %559 = vector.extract_strided_slice %556 {offsets = [0, 1, 0], sizes = [8, 1, 128], strides = [1, 1, 1]} : vector<8x2x128xf32> to vector<8x1x128xf32>
    %560 = vector.shape_cast %559 : vector<8x1x128xf32> to vector<8x128xf32>
    %561 = arith.maximumf %558, %560 : vector<8x128xf32>
    %562 = vector.shape_cast %561 : vector<8x128xf32> to vector<2x2x2x128xf32>
    %563 = vector.extract_strided_slice %562 {offsets = [0, 0, 0, 0], sizes = [2, 1, 2, 128], strides = [1, 1, 1, 1]} : vector<2x2x2x128xf32> to vector<2x1x2x128xf32>
    %564 = vector.shape_cast %563 : vector<2x1x2x128xf32> to vector<2x2x128xf32>
    %565 = vector.extract_strided_slice %562 {offsets = [0, 1, 0, 0], sizes = [2, 1, 2, 128], strides = [1, 1, 1, 1]} : vector<2x2x2x128xf32> to vector<2x1x2x128xf32>
    %566 = vector.shape_cast %565 : vector<2x1x2x128xf32> to vector<2x2x128xf32>
    %567 = arith.maximumf %564, %566 : vector<2x2x128xf32>
    %568 = vector.shape_cast %567 : vector<2x2x128xf32> to vector<4x128xf32>
    %569 = arith.truncf %568 : vector<4x128xf32> to vector<4x128xbf16>
    %570 = tpu.iota {dimensions = array<i32: 0>} : vector<4x1xi32>
    %c2_i32 = arith.constant 2 : i32
    %c0_i32_200 = arith.constant 0 : i32
    %571 = arith.cmpi eq, %c2_i32, %c0_i32_200 : i32
    %c1_i32_201 = arith.constant 1 : i32
    %572 = arith.select %571, %c1_i32_201, %c2_i32 : i32
    %573 = vector.broadcast %572 : i32 to vector<4x1xi32>
    %574 = arith.remsi %570, %573 : vector<4x1xi32>
    %c0_i32_202 = arith.constant 0 : i32
    %575 = vector.broadcast %c0_i32_202 : i32 to vector<4x1xi32>
    %576 = arith.cmpi ne, %574, %575 : vector<4x1xi32>
    %c0_i32_203 = arith.constant 0 : i32
    %577 = vector.broadcast %c0_i32_203 : i32 to vector<4x1xi32>
    %578 = arith.cmpi slt, %574, %577 : vector<4x1xi32>
    %c0_i32_204 = arith.constant 0 : i32
    %579 = arith.cmpi slt, %572, %c0_i32_204 : i32
    %580 = vector.broadcast %579 : i1 to vector<4x1xi1>
    %581 = vector.broadcast %580 : vector<4x1xi1> to vector<4x1xi1>
    %582 = arith.xori %578, %581 : vector<4x1xi1>
    %583 = arith.andi %582, %576 : vector<4x1xi1>
    %584 = vector.broadcast %572 : i32 to vector<4x1xi32>
    %585 = arith.addi %574, %584 : vector<4x1xi32>
    %586 = arith.select %583, %585, %574 : vector<4x1xi1>, vector<4x1xi32>
    %cst_205 = arith.constant 0.000000e+00 : bf16
    %587 = vector.broadcast %cst_205 : bf16 to vector<16x128xbf16>
    %588 = tpu.concatenate %587, %569, %587 in 0 : vector<16x128xbf16>, vector<4x128xbf16>, vector<16x128xbf16> -> vector<36x128xbf16>
    %589 = vector.extract_strided_slice %588 {offsets = [17, 0], sizes = [4, 128], strides = [1, 1]} : vector<36x128xbf16> to vector<4x128xbf16>
    %c1_i32_206 = arith.constant 1 : i32
    %590 = vector.broadcast %c1_i32_206 : i32 to vector<4x1xi32>
    %591 = arith.cmpi slt, %586, %590 : vector<4x1xi32>
    %cst_207 = arith.constant 0.000000e+00 : bf16
    %592 = vector.broadcast %cst_207 : bf16 to vector<4x128xbf16>
    %593 = vector.shape_cast %591 : vector<4x1xi1> to vector<4x1xi1>
    %594 = vector.broadcast %593 : vector<4x1xi1> to vector<4x128xi1>
    %595 = arith.select %594, %589, %592 : vector<4x128xi1>, vector<4x128xbf16>
    %596 = vector.extract_strided_slice %588 {offsets = [15, 0], sizes = [4, 128], strides = [1, 1]} : vector<36x128xbf16> to vector<4x128xbf16>
    %c1_i32_208 = arith.constant 1 : i32
    %597 = vector.broadcast %c1_i32_208 : i32 to vector<4x1xi32>
    %598 = arith.cmpi sge, %586, %597 : vector<4x1xi32>
    %cst_209 = arith.constant 0.000000e+00 : bf16
    %599 = vector.broadcast %cst_209 : bf16 to vector<4x128xbf16>
    %600 = vector.shape_cast %598 : vector<4x1xi1> to vector<4x1xi1>
    %601 = vector.broadcast %600 : vector<4x1xi1> to vector<4x128xi1>
    %602 = arith.select %601, %596, %599 : vector<4x128xi1>, vector<4x128xbf16>
    %cst_210 = arith.constant 0.000000e+00 : bf16
    %603 = vector.broadcast %cst_210 : bf16 to vector<16x128xbf16>
    %604 = tpu.concatenate %603, %602, %603 in 0 : vector<16x128xbf16>, vector<4x128xbf16>, vector<16x128xbf16> -> vector<36x128xbf16>
    %605 = tpu.concatenate %603, %569, %603 in 0 : vector<16x128xbf16>, vector<4x128xbf16>, vector<16x128xbf16> -> vector<36x128xbf16>
    %606 = tpu.concatenate %603, %595, %603 in 0 : vector<16x128xbf16>, vector<4x128xbf16>, vector<16x128xbf16> -> vector<36x128xbf16>
    %607 = vector.extract_strided_slice %604 {offsets = [14, 0], sizes = [4, 128], strides = [1, 1]} : vector<36x128xbf16> to vector<4x128xbf16>
    %c2912 = arith.constant 2912 : index
    %c0_211 = arith.constant 0 : index
    %608 = vector.load %arg1[%c2912, %c0_211] : memref<5216x128xbf16, #tpu.memory_space<vmem>>, vector<128x128xbf16>
    %cst_212 = arith.constant dense<0.000000e+00> : vector<4x128xf32>
    %609 = tpu.matmul %607, %608, %cst_212 {dimension_numbers = #tpu.dot_dimension_numbers<[1], [0], [0], [1], [0, 0, 1, 1], [], []>} : vector<4x128xbf16>, vector<128x128xbf16>, vector<4x128xf32> -> vector<4x128xf32>
    %610 = vector.extract_strided_slice %605 {offsets = [14, 0], sizes = [4, 128], strides = [1, 1]} : vector<36x128xbf16> to vector<4x128xbf16>
    %c3040 = arith.constant 3040 : index
    %c0_213 = arith.constant 0 : index
    %611 = vector.load %arg1[%c3040, %c0_213] : memref<5216x128xbf16, #tpu.memory_space<vmem>>, vector<128x128xbf16>
    %cst_214 = arith.constant dense<0.000000e+00> : vector<4x128xf32>
    %612 = tpu.matmul %610, %611, %cst_214 {dimension_numbers = #tpu.dot_dimension_numbers<[1], [0], [0], [1], [0, 0, 1, 1], [], []>} : vector<4x128xbf16>, vector<128x128xbf16>, vector<4x128xf32> -> vector<4x128xf32>
    %613 = arith.addf %609, %612 : vector<4x128xf32>
    %614 = vector.extract_strided_slice %606 {offsets = [14, 0], sizes = [4, 128], strides = [1, 1]} : vector<36x128xbf16> to vector<4x128xbf16>
    %c3168 = arith.constant 3168 : index
    %c0_215 = arith.constant 0 : index
    %615 = vector.load %arg1[%c3168, %c0_215] : memref<5216x128xbf16, #tpu.memory_space<vmem>>, vector<128x128xbf16>
    %cst_216 = arith.constant dense<0.000000e+00> : vector<4x128xf32>
    %616 = tpu.matmul %614, %615, %cst_216 {dimension_numbers = #tpu.dot_dimension_numbers<[1], [0], [0], [1], [0, 0, 1, 1], [], []>} : vector<4x128xbf16>, vector<128x128xbf16>, vector<4x128xf32> -> vector<4x128xf32>
    %617 = arith.addf %613, %616 : vector<4x128xf32>
    %618 = vector.extract_strided_slice %604 {offsets = [16, 0], sizes = [4, 128], strides = [1, 1]} : vector<36x128xbf16> to vector<4x128xbf16>
    %c3296 = arith.constant 3296 : index
    %c0_217 = arith.constant 0 : index
    %619 = vector.load %arg1[%c3296, %c0_217] : memref<5216x128xbf16, #tpu.memory_space<vmem>>, vector<128x128xbf16>
    %cst_218 = arith.constant dense<0.000000e+00> : vector<4x128xf32>
    %620 = tpu.matmul %618, %619, %cst_218 {dimension_numbers = #tpu.dot_dimension_numbers<[1], [0], [0], [1], [0, 0, 1, 1], [], []>} : vector<4x128xbf16>, vector<128x128xbf16>, vector<4x128xf32> -> vector<4x128xf32>
    %621 = arith.addf %617, %620 : vector<4x128xf32>
    %622 = vector.extract_strided_slice %605 {offsets = [16, 0], sizes = [4, 128], strides = [1, 1]} : vector<36x128xbf16> to vector<4x128xbf16>
    %c3424 = arith.constant 3424 : index
    %c0_219 = arith.constant 0 : index
    %623 = vector.load %arg1[%c3424, %c0_219] : memref<5216x128xbf16, #tpu.memory_space<vmem>>, vector<128x128xbf16>
    %cst_220 = arith.constant dense<0.000000e+00> : vector<4x128xf32>
    %624 = tpu.matmul %622, %623, %cst_220 {dimension_numbers = #tpu.dot_dimension_numbers<[1], [0], [0], [1], [0, 0, 1, 1], [], []>} : vector<4x128xbf16>, vector<128x128xbf16>, vector<4x128xf32> -> vector<4x128xf32>
    %625 = arith.addf %621, %624 : vector<4x128xf32>
    %626 = vector.extract_strided_slice %606 {offsets = [16, 0], sizes = [4, 128], strides = [1, 1]} : vector<36x128xbf16> to vector<4x128xbf16>
    %c3552 = arith.constant 3552 : index
    %c0_221 = arith.constant 0 : index
    %627 = vector.load %arg1[%c3552, %c0_221] : memref<5216x128xbf16, #tpu.memory_space<vmem>>, vector<128x128xbf16>
    %cst_222 = arith.constant dense<0.000000e+00> : vector<4x128xf32>
    %628 = tpu.matmul %626, %627, %cst_222 {dimension_numbers = #tpu.dot_dimension_numbers<[1], [0], [0], [1], [0, 0, 1, 1], [], []>} : vector<4x128xbf16>, vector<128x128xbf16>, vector<4x128xf32> -> vector<4x128xf32>
    %629 = arith.addf %625, %628 : vector<4x128xf32>
    %630 = vector.extract_strided_slice %604 {offsets = [18, 0], sizes = [4, 128], strides = [1, 1]} : vector<36x128xbf16> to vector<4x128xbf16>
    %c3680 = arith.constant 3680 : index
    %c0_223 = arith.constant 0 : index
    %631 = vector.load %arg1[%c3680, %c0_223] : memref<5216x128xbf16, #tpu.memory_space<vmem>>, vector<128x128xbf16>
    %cst_224 = arith.constant dense<0.000000e+00> : vector<4x128xf32>
    %632 = tpu.matmul %630, %631, %cst_224 {dimension_numbers = #tpu.dot_dimension_numbers<[1], [0], [0], [1], [0, 0, 1, 1], [], []>} : vector<4x128xbf16>, vector<128x128xbf16>, vector<4x128xf32> -> vector<4x128xf32>
    %633 = arith.addf %629, %632 : vector<4x128xf32>
    %634 = vector.extract_strided_slice %605 {offsets = [18, 0], sizes = [4, 128], strides = [1, 1]} : vector<36x128xbf16> to vector<4x128xbf16>
    %c3808 = arith.constant 3808 : index
    %c0_225 = arith.constant 0 : index
    %635 = vector.load %arg1[%c3808, %c0_225] : memref<5216x128xbf16, #tpu.memory_space<vmem>>, vector<128x128xbf16>
    %cst_226 = arith.constant dense<0.000000e+00> : vector<4x128xf32>
    %636 = tpu.matmul %634, %635, %cst_226 {dimension_numbers = #tpu.dot_dimension_numbers<[1], [0], [0], [1], [0, 0, 1, 1], [], []>} : vector<4x128xbf16>, vector<128x128xbf16>, vector<4x128xf32> -> vector<4x128xf32>
    %637 = arith.addf %633, %636 : vector<4x128xf32>
    %638 = vector.extract_strided_slice %606 {offsets = [18, 0], sizes = [4, 128], strides = [1, 1]} : vector<36x128xbf16> to vector<4x128xbf16>
    %c3936 = arith.constant 3936 : index
    %c0_227 = arith.constant 0 : index
    %639 = vector.load %arg1[%c3936, %c0_227] : memref<5216x128xbf16, #tpu.memory_space<vmem>>, vector<128x128xbf16>
    %cst_228 = arith.constant dense<0.000000e+00> : vector<4x128xf32>
    %640 = tpu.matmul %638, %639, %cst_228 {dimension_numbers = #tpu.dot_dimension_numbers<[1], [0], [0], [1], [0, 0, 1, 1], [], []>} : vector<4x128xbf16>, vector<128x128xbf16>, vector<4x128xf32> -> vector<4x128xf32>
    %641 = arith.addf %637, %640 : vector<4x128xf32>
    %c12 = arith.constant 12 : index
    %c0_229 = arith.constant 0 : index
    %642 = vector.load %arg2[%c12, %c0_229] : memref<24x128xf32, #tpu.memory_space<vmem>>, vector<1x128xf32>
    %c13 = arith.constant 13 : index
    %c0_230 = arith.constant 0 : index
    %643 = vector.load %arg2[%c13, %c0_230] : memref<24x128xf32, #tpu.memory_space<vmem>>, vector<1x128xf32>
    %cst_231 = arith.constant dense<0.000000e+00> : vector<128xf32>
    %644 = vector.multi_reduction <add>, %641, %cst_231 [0] : vector<4x128xf32> to vector<128xf32>
    %645 = vector.shape_cast %644 : vector<128xf32> to vector<1x128xf32>
    %cst_232 = arith.constant 2.500000e-01 : f32
    %646 = vector.broadcast %cst_232 : f32 to vector<1x128xf32>
    %647 = arith.mulf %645, %646 : vector<1x128xf32>
    %648 = arith.mulf %641, %641 : vector<4x128xf32>
    %cst_233 = arith.constant dense<0.000000e+00> : vector<128xf32>
    %649 = vector.multi_reduction <add>, %648, %cst_233 [0] : vector<4x128xf32> to vector<128xf32>
    %650 = vector.shape_cast %649 : vector<128xf32> to vector<1x128xf32>
    %cst_234 = arith.constant 2.500000e-01 : f32
    %651 = vector.broadcast %cst_234 : f32 to vector<1x128xf32>
    %652 = arith.mulf %650, %651 : vector<1x128xf32>
    %653 = arith.mulf %647, %647 : vector<1x128xf32>
    %654 = arith.subf %652, %653 : vector<1x128xf32>
    %cst_235 = arith.constant 0.000000e+00 : f32
    %655 = vector.broadcast %cst_235 : f32 to vector<1x128xf32>
    %656 = arith.maximumf %654, %655 : vector<1x128xf32>
    %cst_236 = arith.constant 9.99999974E-6 : f32
    %657 = vector.broadcast %cst_236 : f32 to vector<1x128xf32>
    %658 = arith.addf %656, %657 : vector<1x128xf32>
    %659 = math.rsqrt %658 : vector<1x128xf32>
    %660 = arith.mulf %642, %659 : vector<1x128xf32>
    %661 = arith.mulf %647, %660 : vector<1x128xf32>
    %662 = arith.subf %643, %661 : vector<1x128xf32>
    %663 = vector.broadcast %660 : vector<1x128xf32> to vector<4x128xf32>
    %664 = arith.mulf %641, %663 : vector<4x128xf32>
    %665 = vector.broadcast %662 : vector<1x128xf32> to vector<4x128xf32>
    %666 = arith.addf %664, %665 : vector<4x128xf32>
    %cst_237 = arith.constant 0.000000e+00 : f32
    %667 = vector.broadcast %cst_237 : f32 to vector<4x128xf32>
    %668 = arith.maximumf %666, %667 : vector<4x128xf32>
    %669 = arith.truncf %668 : vector<4x128xf32> to vector<4x128xbf16>
    %670 = tpu.iota {dimensions = array<i32: 0>} : vector<4x1xi32>
    %c2_i32_238 = arith.constant 2 : i32
    %c0_i32_239 = arith.constant 0 : i32
    %671 = arith.cmpi eq, %c2_i32_238, %c0_i32_239 : i32
    %c1_i32_240 = arith.constant 1 : i32
    %672 = arith.select %671, %c1_i32_240, %c2_i32_238 : i32
    %673 = vector.broadcast %672 : i32 to vector<4x1xi32>
    %674 = arith.remsi %670, %673 : vector<4x1xi32>
    %c0_i32_241 = arith.constant 0 : i32
    %675 = vector.broadcast %c0_i32_241 : i32 to vector<4x1xi32>
    %676 = arith.cmpi ne, %674, %675 : vector<4x1xi32>
    %c0_i32_242 = arith.constant 0 : i32
    %677 = vector.broadcast %c0_i32_242 : i32 to vector<4x1xi32>
    %678 = arith.cmpi slt, %674, %677 : vector<4x1xi32>
    %c0_i32_243 = arith.constant 0 : i32
    %679 = arith.cmpi slt, %672, %c0_i32_243 : i32
    %680 = vector.broadcast %679 : i1 to vector<4x1xi1>
    %681 = vector.broadcast %680 : vector<4x1xi1> to vector<4x1xi1>
    %682 = arith.xori %678, %681 : vector<4x1xi1>
    %683 = arith.andi %682, %676 : vector<4x1xi1>
    %684 = vector.broadcast %672 : i32 to vector<4x1xi32>
    %685 = arith.addi %674, %684 : vector<4x1xi32>
    %686 = arith.select %683, %685, %674 : vector<4x1xi1>, vector<4x1xi32>
    %cst_244 = arith.constant 0.000000e+00 : bf16
    %687 = vector.broadcast %cst_244 : bf16 to vector<16x128xbf16>
    %688 = tpu.concatenate %687, %669, %687 in 0 : vector<16x128xbf16>, vector<4x128xbf16>, vector<16x128xbf16> -> vector<36x128xbf16>
    %689 = vector.extract_strided_slice %688 {offsets = [17, 0], sizes = [4, 128], strides = [1, 1]} : vector<36x128xbf16> to vector<4x128xbf16>
    %c1_i32_245 = arith.constant 1 : i32
    %690 = vector.broadcast %c1_i32_245 : i32 to vector<4x1xi32>
    %691 = arith.cmpi slt, %686, %690 : vector<4x1xi32>
    %cst_246 = arith.constant 0.000000e+00 : bf16
    %692 = vector.broadcast %cst_246 : bf16 to vector<4x128xbf16>
    %693 = vector.shape_cast %691 : vector<4x1xi1> to vector<4x1xi1>
    %694 = vector.broadcast %693 : vector<4x1xi1> to vector<4x128xi1>
    %695 = arith.select %694, %689, %692 : vector<4x128xi1>, vector<4x128xbf16>
    %696 = vector.extract_strided_slice %688 {offsets = [15, 0], sizes = [4, 128], strides = [1, 1]} : vector<36x128xbf16> to vector<4x128xbf16>
    %c1_i32_247 = arith.constant 1 : i32
    %697 = vector.broadcast %c1_i32_247 : i32 to vector<4x1xi32>
    %698 = arith.cmpi sge, %686, %697 : vector<4x1xi32>
    %cst_248 = arith.constant 0.000000e+00 : bf16
    %699 = vector.broadcast %cst_248 : bf16 to vector<4x128xbf16>
    %700 = vector.shape_cast %698 : vector<4x1xi1> to vector<4x1xi1>
    %701 = vector.broadcast %700 : vector<4x1xi1> to vector<4x128xi1>
    %702 = arith.select %701, %696, %699 : vector<4x128xi1>, vector<4x128xbf16>
    %cst_249 = arith.constant 0.000000e+00 : bf16
    %703 = vector.broadcast %cst_249 : bf16 to vector<16x128xbf16>
    %704 = tpu.concatenate %703, %702, %703 in 0 : vector<16x128xbf16>, vector<4x128xbf16>, vector<16x128xbf16> -> vector<36x128xbf16>
    %705 = tpu.concatenate %703, %669, %703 in 0 : vector<16x128xbf16>, vector<4x128xbf16>, vector<16x128xbf16> -> vector<36x128xbf16>
    %706 = tpu.concatenate %703, %695, %703 in 0 : vector<16x128xbf16>, vector<4x128xbf16>, vector<16x128xbf16> -> vector<36x128xbf16>
    %707 = vector.extract_strided_slice %704 {offsets = [14, 0], sizes = [4, 128], strides = [1, 1]} : vector<36x128xbf16> to vector<4x128xbf16>
    %c4064 = arith.constant 4064 : index
    %c0_250 = arith.constant 0 : index
    %708 = vector.load %arg1[%c4064, %c0_250] : memref<5216x128xbf16, #tpu.memory_space<vmem>>, vector<128x16xbf16>
    %cst_251 = arith.constant dense<0.000000e+00> : vector<4x16xf32>
    %709 = tpu.matmul %707, %708, %cst_251 {dimension_numbers = #tpu.dot_dimension_numbers<[1], [0], [0], [1], [0, 0, 1, 1], [], []>} : vector<4x128xbf16>, vector<128x16xbf16>, vector<4x16xf32> -> vector<4x16xf32>
    %710 = vector.extract_strided_slice %705 {offsets = [14, 0], sizes = [4, 128], strides = [1, 1]} : vector<36x128xbf16> to vector<4x128xbf16>
    %c4192 = arith.constant 4192 : index
    %c0_252 = arith.constant 0 : index
    %711 = vector.load %arg1[%c4192, %c0_252] : memref<5216x128xbf16, #tpu.memory_space<vmem>>, vector<128x16xbf16>
    %cst_253 = arith.constant dense<0.000000e+00> : vector<4x16xf32>
    %712 = tpu.matmul %710, %711, %cst_253 {dimension_numbers = #tpu.dot_dimension_numbers<[1], [0], [0], [1], [0, 0, 1, 1], [], []>} : vector<4x128xbf16>, vector<128x16xbf16>, vector<4x16xf32> -> vector<4x16xf32>
    %713 = arith.addf %709, %712 : vector<4x16xf32>
    %714 = vector.extract_strided_slice %706 {offsets = [14, 0], sizes = [4, 128], strides = [1, 1]} : vector<36x128xbf16> to vector<4x128xbf16>
    %c4320 = arith.constant 4320 : index
    %c0_254 = arith.constant 0 : index
    %715 = vector.load %arg1[%c4320, %c0_254] : memref<5216x128xbf16, #tpu.memory_space<vmem>>, vector<128x16xbf16>
    %cst_255 = arith.constant dense<0.000000e+00> : vector<4x16xf32>
    %716 = tpu.matmul %714, %715, %cst_255 {dimension_numbers = #tpu.dot_dimension_numbers<[1], [0], [0], [1], [0, 0, 1, 1], [], []>} : vector<4x128xbf16>, vector<128x16xbf16>, vector<4x16xf32> -> vector<4x16xf32>
    %717 = arith.addf %713, %716 : vector<4x16xf32>
    %718 = vector.extract_strided_slice %704 {offsets = [16, 0], sizes = [4, 128], strides = [1, 1]} : vector<36x128xbf16> to vector<4x128xbf16>
    %c4448 = arith.constant 4448 : index
    %c0_256 = arith.constant 0 : index
    %719 = vector.load %arg1[%c4448, %c0_256] : memref<5216x128xbf16, #tpu.memory_space<vmem>>, vector<128x16xbf16>
    %cst_257 = arith.constant dense<0.000000e+00> : vector<4x16xf32>
    %720 = tpu.matmul %718, %719, %cst_257 {dimension_numbers = #tpu.dot_dimension_numbers<[1], [0], [0], [1], [0, 0, 1, 1], [], []>} : vector<4x128xbf16>, vector<128x16xbf16>, vector<4x16xf32> -> vector<4x16xf32>
    %721 = arith.addf %717, %720 : vector<4x16xf32>
    %722 = vector.extract_strided_slice %705 {offsets = [16, 0], sizes = [4, 128], strides = [1, 1]} : vector<36x128xbf16> to vector<4x128xbf16>
    %c4576 = arith.constant 4576 : index
    %c0_258 = arith.constant 0 : index
    %723 = vector.load %arg1[%c4576, %c0_258] : memref<5216x128xbf16, #tpu.memory_space<vmem>>, vector<128x16xbf16>
    %cst_259 = arith.constant dense<0.000000e+00> : vector<4x16xf32>
    %724 = tpu.matmul %722, %723, %cst_259 {dimension_numbers = #tpu.dot_dimension_numbers<[1], [0], [0], [1], [0, 0, 1, 1], [], []>} : vector<4x128xbf16>, vector<128x16xbf16>, vector<4x16xf32> -> vector<4x16xf32>
    %725 = arith.addf %721, %724 : vector<4x16xf32>
    %726 = vector.extract_strided_slice %706 {offsets = [16, 0], sizes = [4, 128], strides = [1, 1]} : vector<36x128xbf16> to vector<4x128xbf16>
    %c4704 = arith.constant 4704 : index
    %c0_260 = arith.constant 0 : index
    %727 = vector.load %arg1[%c4704, %c0_260] : memref<5216x128xbf16, #tpu.memory_space<vmem>>, vector<128x16xbf16>
    %cst_261 = arith.constant dense<0.000000e+00> : vector<4x16xf32>
    %728 = tpu.matmul %726, %727, %cst_261 {dimension_numbers = #tpu.dot_dimension_numbers<[1], [0], [0], [1], [0, 0, 1, 1], [], []>} : vector<4x128xbf16>, vector<128x16xbf16>, vector<4x16xf32> -> vector<4x16xf32>
    %729 = arith.addf %725, %728 : vector<4x16xf32>
    %730 = vector.extract_strided_slice %704 {offsets = [18, 0], sizes = [4, 128], strides = [1, 1]} : vector<36x128xbf16> to vector<4x128xbf16>
    %c4832 = arith.constant 4832 : index
    %c0_262 = arith.constant 0 : index
    %731 = vector.load %arg1[%c4832, %c0_262] : memref<5216x128xbf16, #tpu.memory_space<vmem>>, vector<128x16xbf16>
    %cst_263 = arith.constant dense<0.000000e+00> : vector<4x16xf32>
    %732 = tpu.matmul %730, %731, %cst_263 {dimension_numbers = #tpu.dot_dimension_numbers<[1], [0], [0], [1], [0, 0, 1, 1], [], []>} : vector<4x128xbf16>, vector<128x16xbf16>, vector<4x16xf32> -> vector<4x16xf32>
    %733 = arith.addf %729, %732 : vector<4x16xf32>
    %734 = vector.extract_strided_slice %705 {offsets = [18, 0], sizes = [4, 128], strides = [1, 1]} : vector<36x128xbf16> to vector<4x128xbf16>
    %c4960 = arith.constant 4960 : index
    %c0_264 = arith.constant 0 : index
    %735 = vector.load %arg1[%c4960, %c0_264] : memref<5216x128xbf16, #tpu.memory_space<vmem>>, vector<128x16xbf16>
    %cst_265 = arith.constant dense<0.000000e+00> : vector<4x16xf32>
    %736 = tpu.matmul %734, %735, %cst_265 {dimension_numbers = #tpu.dot_dimension_numbers<[1], [0], [0], [1], [0, 0, 1, 1], [], []>} : vector<4x128xbf16>, vector<128x16xbf16>, vector<4x16xf32> -> vector<4x16xf32>
    %737 = arith.addf %733, %736 : vector<4x16xf32>
    %738 = vector.extract_strided_slice %706 {offsets = [18, 0], sizes = [4, 128], strides = [1, 1]} : vector<36x128xbf16> to vector<4x128xbf16>
    %c5088 = arith.constant 5088 : index
    %c0_266 = arith.constant 0 : index
    %739 = vector.load %arg1[%c5088, %c0_266] : memref<5216x128xbf16, #tpu.memory_space<vmem>>, vector<128x16xbf16>
    %cst_267 = arith.constant dense<0.000000e+00> : vector<4x16xf32>
    %740 = tpu.matmul %738, %739, %cst_267 {dimension_numbers = #tpu.dot_dimension_numbers<[1], [0], [0], [1], [0, 0, 1, 1], [], []>} : vector<4x128xbf16>, vector<128x16xbf16>, vector<4x16xf32> -> vector<4x16xf32>
    %741 = arith.addf %737, %740 : vector<4x16xf32>
    %c14 = arith.constant 14 : index
    %c0_268 = arith.constant 0 : index
    %742 = vector.load %arg2[%c14, %c0_268] : memref<24x128xf32, #tpu.memory_space<vmem>>, vector<1x16xf32>
    %c15 = arith.constant 15 : index
    %c0_269 = arith.constant 0 : index
    %743 = vector.load %arg2[%c15, %c0_269] : memref<24x128xf32, #tpu.memory_space<vmem>>, vector<1x16xf32>
    %cst_270 = arith.constant dense<0.000000e+00> : vector<16xf32>
    %744 = vector.multi_reduction <add>, %741, %cst_270 [0] : vector<4x16xf32> to vector<16xf32>
    %745 = vector.shape_cast %744 : vector<16xf32> to vector<1x16xf32>
    %cst_271 = arith.constant 2.500000e-01 : f32
    %746 = vector.broadcast %cst_271 : f32 to vector<1x16xf32>
    %747 = arith.mulf %745, %746 : vector<1x16xf32>
    %748 = arith.mulf %741, %741 : vector<4x16xf32>
    %cst_272 = arith.constant dense<0.000000e+00> : vector<16xf32>
    %749 = vector.multi_reduction <add>, %748, %cst_272 [0] : vector<4x16xf32> to vector<16xf32>
    %750 = vector.shape_cast %749 : vector<16xf32> to vector<1x16xf32>
    %cst_273 = arith.constant 2.500000e-01 : f32
    %751 = vector.broadcast %cst_273 : f32 to vector<1x16xf32>
    %752 = arith.mulf %750, %751 : vector<1x16xf32>
    %753 = arith.mulf %747, %747 : vector<1x16xf32>
    %754 = arith.subf %752, %753 : vector<1x16xf32>
    %cst_274 = arith.constant 0.000000e+00 : f32
    %755 = vector.broadcast %cst_274 : f32 to vector<1x16xf32>
    %756 = arith.maximumf %754, %755 : vector<1x16xf32>
    %cst_275 = arith.constant 9.99999974E-6 : f32
    %757 = vector.broadcast %cst_275 : f32 to vector<1x16xf32>
    %758 = arith.addf %756, %757 : vector<1x16xf32>
    %759 = math.rsqrt %758 : vector<1x16xf32>
    %760 = arith.mulf %742, %759 : vector<1x16xf32>
    %761 = arith.mulf %747, %760 : vector<1x16xf32>
    %762 = arith.subf %743, %761 : vector<1x16xf32>
    %763 = vector.broadcast %760 : vector<1x16xf32> to vector<4x16xf32>
    %764 = arith.mulf %741, %763 : vector<4x16xf32>
    %765 = vector.broadcast %762 : vector<1x16xf32> to vector<4x16xf32>
    %766 = arith.addf %764, %765 : vector<4x16xf32>
    %cst_276 = arith.constant dense<0.000000e+00> : vector<16xf32>
    %767 = vector.multi_reduction <add>, %766, %cst_276 [0] : vector<4x16xf32> to vector<16xf32>
    %768 = vector.shape_cast %767 : vector<16xf32> to vector<1x16xf32>
    %cst_277 = arith.constant 4.000000e+00 : f32
    %769 = vector.broadcast %cst_277 : f32 to vector<1x16xf32>
    %770 = arith.divf %768, %769 : vector<1x16xf32>
    %c16 = arith.constant 16 : index
    %c0_278 = arith.constant 0 : index
    %771 = vector.load %arg2[%c16, %c0_278] : memref<24x128xf32, #tpu.memory_space<vmem>>, vector<1x16xf32>
    %c17 = arith.constant 17 : index
    %c0_279 = arith.constant 0 : index
    %772 = vector.load %arg2[%c17, %c0_279] : memref<24x128xf32, #tpu.memory_space<vmem>>, vector<1x1xf32>
    %773 = arith.mulf %770, %771 : vector<1x16xf32>
    %cst_280 = arith.constant dense<0.000000e+00> : vector<1xf32>
    %774 = vector.multi_reduction <add>, %773, %cst_280 [1] : vector<1x16xf32> to vector<1xf32>
    %775 = vector.shape_cast %774 : vector<1xf32> to vector<1x1xf32>
    %776 = arith.addf %775, %772 : vector<1x1xf32>
    %c0_281 = arith.constant 0 : index
    %c0_282 = arith.constant 0 : index
    %777 = vector.load %arg3[%c0_281, %c0_282] : memref<1x1xf32, #tpu.memory_space<vmem>>, vector<1x1xf32>
    tpu.vector_store %arg3[%c0_281, %c0_282], %776 {strides = array<i32>} : memref<1x1xf32, #tpu.memory_space<vmem>>, vector<1x1xf32>,
    return
  }
}

</mosaic_0001>

<bundles_post_ra>
// kernel: discriminator_forward.1
= control target key start
LH: loop header
LB: loop body
LE: loop exit
PB: predicated region body
PF: predicated region fallthrough
CT: control target
= control target key end

     0   :  { %8 = vsyncpa [#allocation3], 0  ;;  %s21864_s0 = inlined_call_operand.vmem [shape: bf16[256,32], index: 0, kind: input, shape index: {}]   ;;  %s21865_s1 = inlined_call_operand.hbm [shape: bf16[5216,128], index: 1, kind: input, shape index: {}]   ;;  %s21866_s2 = inlined_call_operand.hbm [shape: f32[24,128], index: 2, kind: input, shape index: {}]   ;;  %s21867_s3 = inlined_call_operand.hbm [shape: f32[1,1], index: 3, kind: output, shape index: {}]  }
   0x1   :  { %9 = vsyncpa [#allocation6], 0 }
   0x2   :  { %10 = vsyncpa [#allocation4], 0  ;;  %s16096_s12 = smov [#allocation2]  }
   0x3   :  { %s18_s13 = sshll.u32 %s16096_s12, 4  ;;  %s19_s13 = int_to_ptr.vmem [resolvable:$true] %s18_s13 }
   0x4   :  { %s16038_s14 = scalar_lea.vmem %s19_s13, 41728  ;;  %p16043_p1 = scmp.lt.s32.totalorder %s19_s13, %s19_s13 }
   0x5   :  { %p16039_p0 = scmp.ne.s32.totalorder %s19_s13, %s16038_s14  ;;  %p16044_p2 = scmp.lt.s32.totalorder %s16038_s14, %s16038_s14 }
   0x7   :  { %p16045_p3 = por %p16044_p2, %p16043_p1 }
   0x9   :  { %p16046_p4 = pnand %p16045_p3, %p16039_p0 }
   0xb   :  { %16049 = shalt.err (!%p16046_p4)
}
   0xc   :  { %s16097_s15 = smov 64   ;;  %s16098_s16 = smov 4  }
   0xd   :  { %24 = dma.hbm_to_vmem [thread:$0]  %s21865_s1, 41728, %s19_s13, [#allocation3], %s16097_s15, %s16097_s15, %s16098_s16  }
   0xe   :  { %s16099_s19 = smov [#allocation5]  }
   0xf   :  { %s30_s20 = sshll.u32 %s16099_s19, 4  ;;  %s31_s20 = int_to_ptr.vmem [resolvable:$true] %s30_s20 }
  0x10   :  { %s16058_s21 = scalar_lea.vmem %s31_s20, 384  ;;  %p16063_p6 = scmp.lt.s32.totalorder %s31_s20, %s31_s20 }
  0x11   :  { %p16059_p5 = scmp.ne.s32.totalorder %s31_s20, %s16058_s21  ;;  %p16064_p7 = scmp.lt.s32.totalorder %s16058_s21, %s16058_s21 }
  0x13   :  { %p16065_p8 = por %p16064_p7, %p16063_p6 }
  0x15   :  { %p16066_p9 = pnand %p16065_p8, %p16059_p5 }
  0x17   :  { %16069 = shalt.err (!%p16066_p9)
}
  0x18   :  { %s16100_s22 = smov 128   ;;  %s16101_s23 = smov 8  }
  0x19   :  { %36 = dma.hbm_to_vmem [thread:$0]  %s21866_s2, 384, %s31_s20, [#allocation6], %s16100_s22, %s16100_s22, %s16101_s23  }
  0x1a   :  { %16090 = dma.done.wait [#allocation3], 41728  }
  0x1b   :  { %16091 = vsyncadd [#allocation3], 4294925568 }
  0x1c   :  { %16092 = dma.done.wait [#allocation6], 384  }
  0x1d   :  { %16093 = vsyncadd [#allocation6], 4294966912  ;;  %v15669_v0 = vld [vmem:[#allocation2 + $0x8] sm:$0xff]   ;;  %v15670_v1 = vld [vmem:[#allocation2] sm:$0xff]   ;;  %vm174_vm0 = vcmask 261120   ;;  %v21870_v19 = vmov 0  }
  0x1e   :  { %14393 = vmatprep.subr.bf16.mxu0 %v15669_v0  ;;  %v15671_v2 = vld [vmem:[%s21864_s0] sm:$0xff]   ;;  %v15672_v3 = vld [vmem:[%s21864_s0 + $0x8] sm:$0xff]   ;;  %v15673_v4 = vld [vmem:[%s21864_s0 + $0x10] sm:$0xff]   ;;  %vm16103_vm3 = vmmov 1  }
  0x1f   :  { %14394 = vmatpush3.bf16.msra.mxu0 %v15669_v0  ;;  %14397 = vmatprep.mubr.msk.bf16.mxu0 %vm174_vm0, %v15671_v2  ;;  %v15674_v5 = vld [vmem:[%s21864_s0 + $0x18] sm:$0xff]   ;;  %v15675_v6 = vld [vmem:[%s21864_s0 + $0x20] sm:$0xff]   ;;  %v15676_v7 = vld [vmem:[%s21864_s0 + $0x28] sm:$0xff]  }
  0x20   :  { %14395 = vmatprep.subr.bf16.mxu0 %v15670_v1  ;;  %v15677_v8 = vld [vmem:[%s21864_s0 + $0x30] sm:$0xff]   ;;  %v15678_v9 = vld [vmem:[%s21864_s0 + $0x38] sm:$0xff]   ;;  %v15679_v10 = vld [vmem:[%s21864_s0 + $0x40] sm:$0xff]  }
  0x21   :  { %v15680_v11 = vld [vmem:[%s21864_s0 + $0x48] sm:$0xff]   ;;  %v15681_v12 = vld [vmem:[%s21864_s0 + $0x50] sm:$0xff]   ;;  %v15682_v13 = vld [vmem:[%s21864_s0 + $0x58] sm:$0xff]  }
  0x22   :  { %v15683_v14 = vld [vmem:[%s21864_s0 + $0x60] sm:$0xff]   ;;  %v15684_v15 = vld [vmem:[%s21864_s0 + $0x68] sm:$0xff]   ;;  %v15685_v16 = vld [vmem:[%s21864_s0 + $0x70] sm:$0xff]  }
  0x23   :  { %14396 = vmatpush3.bf16.msra.mxu0 %v15670_v1  ;;  %v15686_v17 = vld [vmem:[%s21864_s0 + $0x78] sm:$0xff]   ;;  %v15687_v21 = vld [vmem:[#allocation2 + $0x28] sm:$0xff]   ;;  %v15688_v25 = vld [vmem:[#allocation2 + $0x20] sm:$0xff]   ;;  %s16107_s0 = smov [#allocation7]  }
  0x24   :  { %14429 = vmatprep.subr.bf16.mxu0 %v15687_v21  ;;  %15653 = vmatprep.subr.bf16.mxu1 %v15687_v21  ;;  %v15689_v39 = vld [vmem:[#allocation2 + $0x18] sm:$0xff]   ;;  %vm1199_vm4 = vmpackc.low %vm16103_vm3, %vm16103_vm3  ;;  %s12994_s28 = sshll.u32 %s16107_s0, 4  ;;  %s12995_s28 = int_to_ptr.vmem [resolvable:$true] %s12994_s28 }
  0x25   :  { %15655 = vmatpush3.bf16.msra.mxu1 %v15687_v21  ;;  %v15690_v40 = vld [vmem:[#allocation2 + $0x38] sm:$0xff]   ;;  %s16070_s2 = scalar_lea.vmem %s12995_s28, 16  ;;  %s16074_s29 = scalar_lea.vmem %s12995_s28, 32 }
  0x26   :  { %14398 = vmatmul.mubr.msk.bf16.vlgmr.msra.gmra.mxu0 %vm174_vm0, %v15672_v3  ;;  %15654 = vmatprep.subr.bf16.mxu1 %v15688_v25  ;;  %p16071_p10 = scmp.ne.s32.totalorder %s12995_s28, %s16070_s2  ;;  %p16075_p11 = scmp.lt.s32.totalorder %s12995_s28, %s12995_s28 }
  0x27   :  { %14401 = vmatprep.mubr.msk.bf16.mxu0 %vm174_vm0, %v15673_v4  ;;  %14430 = vmatpush3.bf16.msra.mxu0 %v15687_v21  ;;  %p16076_p12 = scmp.lt.s32.totalorder %s16074_s29, %s16070_s2 }
  0x28   :  { %14431 = vmatprep.subr.bf16.mxu0 %v15688_v25 }
  0x29   :  { %15656 = vmatpush3.bf16.msra.mxu1 %v15688_v25  ;;  %p16077_p13 = por %p16076_p12, %p16075_p11 }
  0x2a   :  { %14501 = vmatprep.subr.bf16.mxu1 %v15690_v40 }
  0x2b   :  { %14432 = vmatpush3.bf16.msra.mxu0 %v15688_v25  ;;  %p16078_p0 = pnand %p16077_p13, %p16071_p10 }
  0x2c   :  { %14465 = vmatprep.subr.bf16.mxu0 %v15689_v39 }
  0x2e   :  { %14402 = vmatmul.mubr.msk.bf16.gmra.mxu0 %vm174_vm0, %v15674_v5 }
  0x2f   :  { %14405 = vmatprep.mubr.msk.bf16.mxu0 %vm174_vm0, %v15675_v6 }
  0x36   :  { %14406 = vmatmul.mubr.msk.bf16.gmra.mxu0 %vm174_vm0, %v15676_v7 }
  0x37   :  { %14409 = vmatprep.mubr.msk.bf16.mxu0 %vm174_vm0, %v15677_v8 }
  0x3e   :  { %14410 = vmatmul.mubr.msk.bf16.gmra.mxu0 %vm174_vm0, %v15678_v9 }
  0x3f   :  { %14413 = vmatprep.mubr.msk.bf16.mxu0 %vm174_vm0, %v15679_v10 }
  0x46   :  { %14414 = vmatmul.mubr.msk.bf16.gmra.mxu0 %vm174_vm0, %v15680_v11 }
  0x47   :  { %14417 = vmatprep.mubr.msk.bf16.mxu0 %vm174_vm0, %v15681_v12 }
  0x4e   :  { %14418 = vmatmul.mubr.msk.bf16.gmra.mxu0 %vm174_vm0, %v15682_v13 }
  0x4f   :  { %14421 = vmatprep.mubr.msk.bf16.mxu0 %vm174_vm0, %v15683_v14 }
  0x56   :  { %14422 = vmatmul.mubr.msk.bf16.gmra.mxu0 %vm174_vm0, %v15684_v15 }
  0x57   :  { %14425 = vmatprep.mubr.msk.bf16.mxu0 %vm174_vm0, %v15685_v16 }
  0x5e   :  { %14426 = vmatmul.mubr.msk.bf16.gmra.mxu0 %vm174_vm0, %v15686_v17 }
  0x5f   :  { %14433 = vmatprep.mubr.bf16.mxu0 %v21870_v19 }
  0xe6   :  { %v16198_v18 = vpop.f32.mrf.mxu0 }
  0xe7   :  { %v458_v26 = vmul.f32 %v16198_v18, %v16198_v18  ;;  %v389_v32 = vsel %vm174_vm0, %v16198_v18, 0.0 }
  0xe8   :  { %v16201_v20 = vpop.f32.mrf.mxu0 }
  0xe9   :  { %v456_v23 = vmul.f32 %v16201_v20, %v16201_v20  ;;  %v386_v27 = vsel %vm174_vm0, %v16201_v20, 0.0  ;;  %v491_v41 = vsel %vm174_vm0, %v458_v26, 0.0 }
  0xea   :  { %v16203_v22 = vpop.f32.mrf.mxu0 }
  0xeb   :  { %v488_v33 = vsel %vm174_vm0, %v456_v23, 0.0  ;;  %v459_v34 = vmul.f32 %v16203_v22, %v16203_v22  ;;  %v391_v42 = vsel %vm174_vm0, %v16203_v22, 0.0 }
  0xec   :  { %v16207_v24 = vpop.f32.mrf.mxu0 }
  0xed   :  { %v387_v28 = vsel %vm174_vm0, %v16207_v24, 0.0  ;;  %v457_v29 = vmul.f32 %v16207_v24, %v16207_v24  ;;  %v493_v47 = vsel %vm174_vm0, %v459_v34, 0.0 }
  0xee   :  { %v388_v30 = vadd.f32 %v387_v28, %v386_v27  ;;  %v16217_v31 = vpop.f32.mrf.mxu0 }
  0xef   :  { %v489_v35 = vsel %vm174_vm0, %v457_v29, 0.0  ;;  %v462_v52 = vmul.f32 %v16217_v31, %v16217_v31  ;;  %v397_v59 = vsel %vm174_vm0, %v16217_v31, 0.0 }
  0xf0   :  { %v490_v36 = vadd.f32 %v489_v35, %v488_v33  ;;  %v16225_v37 = vpop.f32.mrf.mxu0  ;;  %v390_v38 = vadd.f32 %v389_v32, %v388_v30 }
  0xf1   :  { %v460_v43 = vmul.f32 %v16225_v37, %v16225_v37  ;;  %v393_v48 = vsel %vm174_vm0, %v16225_v37, 0.0  ;;  %v499_v1 = vsel %vm174_vm0, %v462_v52, 0.0 }
  0xf2   :  { %v392_v44 = vadd.f32 %v391_v42, %v390_v38  ;;  %v492_v45 = vadd.f32 %v491_v41, %v490_v36  ;;  %v16232_v46 = vpop.f32.mrf.mxu0 }
  0xf3   :  { %v495_v53 = vsel %vm174_vm0, %v460_v43, 0.0  ;;  %v463_v60 = vmul.f32 %v16232_v46, %v16232_v46  ;;  %v399_v2 = vsel %vm174_vm0, %v16232_v46, 0.0 }
  0xf4   :  { %v394_v49 = vadd.f32 %v393_v48, %v392_v44  ;;  %v494_v50 = vadd.f32 %v493_v47, %v492_v45  ;;  %v16237_v51 = vpop.f32.mrf.mxu0 }
  0xf5   :  { %v395_v54 = vsel %vm174_vm0, %v16237_v51, 0.0  ;;  %v461_v55 = vmul.f32 %v16237_v51, %v16237_v51  ;;  %v501_v7 = vsel %vm174_vm0, %v463_v60, 0.0 }
  0xf6   :  { %v496_v56 = vadd.f32 %v495_v53, %v494_v50  ;;  %v396_v57 = vadd.f32 %v395_v54, %v394_v49  ;;  %v16246_v58 = vpop.f32.mrf.mxu0 }
  0xf7   :  { %v497_v61 = vsel %vm174_vm0, %v461_v55, 0.0  ;;  %v466_v12 = vmul.f32 %v16246_v58, %v16246_v58  ;;  %v405_v23 = vsel %vm174_vm0, %v16246_v58, 0.0 }
  0xf8   :  { %v498_v62 = vadd.f32 %v497_v61, %v496_v56  ;;  %v16253_v63 = vpop.f32.mrf.mxu0  ;;  %v398_v0 = vadd.f32 %v397_v59, %v396_v57  ;;  %v566_v59 = vlaneseq }
  0xf9   :  { %v464_v3 = vmul.f32 %v16253_v63, %v16253_v63  ;;  %v401_v8 = vsel %vm174_vm0, %v16253_v63, 0.0  ;;  %v507_v30 = vsel %vm174_vm0, %v466_v12, 0.0 }
  0xfa   :  { %v400_v4 = vadd.f32 %v399_v2, %v398_v0  ;;  %v500_v5 = vadd.f32 %v499_v1, %v498_v62  ;;  %v16260_v6 = vpop.f32.mrf.mxu0 }
  0xfb   :  { %v503_v13 = vsel %vm174_vm0, %v464_v3, 0.0  ;;  %v467_v25 = vmul.f32 %v16260_v6, %v16260_v6  ;;  %v407_v32 = vsel %vm174_vm0, %v16260_v6, 0.0 }
  0xfc   :  { %v402_v9 = vadd.f32 %v401_v8, %v400_v4  ;;  %v502_v10 = vadd.f32 %v501_v7, %v500_v5  ;;  %v16265_v11 = vpop.f32.mrf.mxu0 }
  0xfd   :  { %v403_v14 = vsel %vm174_vm0, %v16265_v11, 0.0  ;;  %v465_v15 = vmul.f32 %v16265_v11, %v16265_v11  ;;  %v509_v38 = vsel %vm174_vm0, %v467_v25, 0.0 }
  0xfe   :  { %v504_v16 = vadd.f32 %v503_v13, %v502_v10  ;;  %v404_v17 = vadd.f32 %v403_v14, %v402_v9  ;;  %v16274_v21 = vpop.f32.mrf.mxu0  ;;  %v16323_v9 = vshrl.u32 %v566_v59, 7 }
  0xff   :  { %v505_v26 = vsel %vm174_vm0, %v465_v15, 0.0  ;;  %v470_v43 = vmul.f32 %v16274_v21, %v16274_v21  ;;  %v413_v52 = vsel %vm174_vm0, %v16274_v21, 0.0 }
 0x100   :  { %v506_v27 = vadd.f32 %v505_v26, %v504_v16  ;;  %v16281_v28 = vpop.f32.mrf.mxu0  ;;  %v406_v29 = vadd.f32 %v405_v23, %v404_v17  ;;  %22100 = vst [vmem:[#allocation15_spill] sm:$0xff] %v16323_v9 }
 0x101   :  { %v468_v33 = vmul.f32 %v16281_v28, %v16281_v28  ;;  %v409_v39 = vsel %vm174_vm0, %v16281_v28, 0.0  ;;  %v515_v60 = vsel %vm174_vm0, %v470_v43, 0.0  ;;  %v16353_v43 = vadd.s32 32, %v16323_v9 }
 0x102   :  { %v408_v34 = vadd.f32 %v407_v32, %v406_v29  ;;  %v508_v35 = vadd.f32 %v507_v30, %v506_v27  ;;  %v16288_v36 = vpop.f32.mrf.mxu0  ;;  %v16342_v32 = vadd.s32 16, %v16323_v9 }
 0x103   :  { %v511_v44 = vsel %vm174_vm0, %v468_v33, 0.0  ;;  %v471_v53 = vmul.f32 %v16288_v36, %v16288_v36  ;;  %v415_v61 = vsel %vm174_vm0, %v16288_v36, 0.0 }
 0x104   :  { %v410_v40 = vadd.f32 %v409_v39, %v408_v34  ;;  %v510_v41 = vadd.f32 %v509_v38, %v508_v35  ;;  %v16293_v42 = vpop.f32.mrf.mxu0  ;;  %22103 = vst [vmem:[#allocation18_spill] sm:$0xff] %v16342_v32 }
 0x105   :  { %v411_v45 = vsel %vm174_vm0, %v16293_v42, 0.0  ;;  %v469_v47 = vmul.f32 %v16293_v42, %v16293_v42  ;;  %v517_v3 = vsel %vm174_vm0, %v471_v53, 0.0 }
 0x106   :  { %v512_v48 = vadd.f32 %v511_v44, %v510_v41  ;;  %v412_v49 = vadd.f32 %v411_v45, %v410_v40  ;;  %v16302_v50 = vpop.f32.mrf.mxu0  ;;  %v723_v41 = vand.u32 15, %v16323_v9 }
 0x107   :  { %22096 = vst [vmem:[#allocation11_spill] sm:$0xff] %v16302_v50  ;;  %v513_v54 = vsel %vm174_vm0, %v469_v47, 0.0  ;;  %v474_v10 = vmul.f32 %v16302_v50, %v16302_v50  ;;  %v421_v23 = vsel %vm174_vm0, %v16302_v50, 0.0  ;;  %v16359_v47 = vadd.s32 48, %v16323_v9 }
 0x108   :  { %v514_v55 = vadd.f32 %v513_v54, %v512_v48  ;;  %v16309_v56 = vpop.f32.mrf.mxu0  ;;  %v414_v57 = vadd.f32 %v413_v52, %v412_v49  ;;  %v16362_v48 = vadd.s32 64, %v16323_v9  ;;  %v737_v54 = vand.u32 15, %v16342_v32 }
 0x109   :  { %22097 = vst [vmem:[#allocation12_spill] sm:$0xff] %v16309_v56  ;;  %v472_v62 = vmul.f32 %v16309_v56, %v16309_v56  ;;  %v417_v4 = vsel %vm174_vm0, %v16309_v56, 0.0  ;;  %v523_v33 = vsel %vm174_vm0, %v474_v10, 0.0  ;;  %22105 = vst [vmem:[#allocation20_spill] sm:$0xff] %v16359_v47  ;;  %vm16379_vm1 = vcmp.ge.s32.totalorder %v723_v41, 1 }
 0x10a   :  { %v416_v0 = vadd.f32 %v415_v61, %v414_v57  ;;  %v516_v1 = vadd.f32 %v515_v60, %v514_v55  ;;  %v16316_v2 = vpop.f32.mrf.mxu0  ;;  %v16368_v55 = vadd.s32 80, %v16323_v9  ;;  %vm16390_vm2 = vcmp.ge.s32.totalorder %v737_v54, 1  ;;  %vm1567_vm5 = vmpackc.low %vm16379_vm1, %vm16379_vm1 }
 0x10b   :  { %22098 = vst [vmem:[#allocation13_spill] sm:$0xff] %v16316_v2  ;;  %v519_v12 = vsel %vm174_vm0, %v472_v62, 0.0  ;;  %v475_v25 = vmul.f32 %v16316_v2, %v16316_v2  ;;  %v423_v34 = vsel %vm174_vm0, %v16316_v2, 0.0  ;;  %vm1569_vm6 = vmpackc.low %vm16390_vm2, %vm16390_vm2  ;;  %vm1679_vm1 = vsmask.f32 7424 }
 0x10c   :  { %v418_v5 = vadd.f32 %v417_v4, %v416_v0  ;;  %v518_v7 = vadd.f32 %v517_v3, %v516_v1  ;;  %v16321_v8 = vpop.f32.mrf.mxu0  ;;  %v793_v41 = vand.u32 15, %v16368_v55 }
 0x10d   :  { %22099 = vst [vmem:[#allocation14_spill] sm:$0xff] %v16321_v8  ;;  %v419_v13 = vsel %vm174_vm0, %v16321_v8, 0.0  ;;  %v473_v14 = vmul.f32 %v16321_v8, %v16321_v8  ;;  %v525_v44 = vsel %vm174_vm0, %v475_v25, 0.0 }
 0x10e   :  { %v520_v15 = vadd.f32 %v519_v12, %v518_v7  ;;  %v420_v16 = vadd.f32 %v419_v13, %v418_v5  ;;  %v16332_v17 = vpop.f32.mrf.mxu0  ;;  %vm16478_vm11 = vcmp.ge.s32.totalorder %v793_v41, 1 }
 0x10f   :  { %22101 = vst [vmem:[#allocation16_spill] sm:$0xff] %v16332_v17  ;;  %v521_v26 = vsel %vm174_vm0, %v473_v14, 0.0  ;;  %v478_v57 = vmul.f32 %v16332_v17, %v16332_v17  ;;  %v429_v4 = vsel %vm174_vm0, %v16332_v17, 0.0  ;;  %v701_v14 = vadd.s32 112, %v16323_v9  ;;  %vm1577_vm2 = vmpackc.low %vm16478_vm11, %vm16478_vm11 }
 0x110   :  { %v522_v27 = vadd.f32 %v521_v26, %v520_v15  ;;  %v16339_v29 = vpop.f32.mrf.mxu0  ;;  %v422_v30 = vadd.f32 %v421_v23, %v420_v16  ;;  %v751_v15 = vand.u32 15, %v16353_v43 }
 0x111   :  { %22102 = vst [vmem:[#allocation17_spill] sm:$0xff] %v16339_v29  ;;  %v476_v35 = vmul.f32 %v16339_v29, %v16339_v29  ;;  %v425_v45 = vsel %vm174_vm0, %v16339_v29, 0.0  ;;  %v531_v16 = vsel %vm174_vm0, %v478_v57, 0.0 }
 0x112   :  { %v424_v38 = vadd.f32 %v423_v34, %v422_v30  ;;  %v524_v39 = vadd.f32 %v523_v33, %v522_v27  ;;  %v16349_v40 = vpop.f32.mrf.mxu0  ;;  %v765_v33 = vand.u32 15, %v16359_v47  ;;  %v16407_v34 = vadd.s32 96, %v16323_v9 }
 0x113   :  { %22104 = vst [vmem:[#allocation19_spill] sm:$0xff] %v16349_v40  ;;  %v527_v59 = vsel %vm174_vm0, %v476_v35, 0.0  ;;  %v479_v5 = vmul.f32 %v16349_v40, %v16349_v40  ;;  %v431_v23 = vsel %vm174_vm0, %v16349_v40, 0.0  ;;  %vm16422_vm7 = vcmp.ge.s32.totalorder %v751_v15, 1 }
 0x114   :  { %v426_v49 = vadd.f32 %v425_v45, %v424_v38  ;;  %v526_v52 = vadd.f32 %v525_v44, %v524_v39  ;;  %v16364_v53 = vpop.f32.mrf.mxu0  ;;  %v779_v39 = vand.u32 15, %v16362_v48  ;;  %vm16454_vm8 = vcmp.ge.s32.totalorder %v765_v33, 1  ;;  %vm1571_vm9 = vmpackc.low %vm16422_vm7, %vm16422_vm7 }
 0x115   :  { %22106 = vst [vmem:[#allocation21_spill] sm:$0xff] %v16364_v53  ;;  %v427_v60 = vsel %vm174_vm0, %v16364_v53, 0.0  ;;  %v477_v61 = vmul.f32 %v16364_v53, %v16364_v53  ;;  %v533_v35 = vsel %vm174_vm0, %v479_v5, 0.0  ;;  %vm1573_vm12 = vmpackc.low %vm16454_vm8, %vm16454_vm8  ;;  %v16642_v40 = vadd.s32 8, %v16323_v9 }
 0x116   :  { %v528_v62 = vadd.f32 %v527_v59, %v526_v52  ;;  %v428_v0 = vadd.f32 %v427_v60, %v426_v49  ;;  %v16377_v1 = vpop.f32.mrf.mxu0  ;;  %v16420_v52 = vsel %vm1199_vm4, 65537, %v21870_v19  ;;  %vm16467_vm10 = vcmp.ge.s32.totalorder %v779_v39, 1 }
 0x117   :  { %22107 = vst [vmem:[#allocation22_spill] sm:$0xff] %v16377_v1  ;;  %v529_v7 = vsel %vm174_vm0, %v477_v61, 0.0  ;;  %v482_v57 = vmul.f32 %v16377_v1, %v16377_v1  ;;  %v437_v5 = vsel %vm174_vm0, %v16377_v1, 0.0  ;;  %v807_v39 = vand.u32 15, %v16407_v34  ;;  %vm1575_vm13 = vmpackc.low %vm16467_vm10, %vm16467_vm10 }
 0x118   :  { %v530_v10 = vadd.f32 %v529_v7, %v528_v62  ;;  %v16388_v12 = vpop.f32.mrf.mxu0  ;;  %v430_v13 = vadd.f32 %v429_v4, %v428_v0  ;;  %v1599_v0 = vsel %vm1567_vm5, 65537, %v21870_v19  ;;  %v1601_v4 = vsel %vm1569_vm6, 65537, %v21870_v19  ;;  %22145 = vst [vmem:[#allocation31_spill] sm:$0xff] %v16642_v40 }
 0x119   :  { %22110 = vst [vmem:[#allocation23_spill] sm:$0xff] %v16388_v12  ;;  %v480_v25 = vmul.f32 %v16388_v12, %v16388_v12  ;;  %v433_v38 = vsel %vm174_vm0, %v16388_v12, 0.0  ;;  %vm16518_vm14 = vcmp.ge.s32.totalorder %v807_v39, 1  ;;  %v16629_v1 = vadd.s32 24, %v16323_v9 }
 0x11a   :  { %v432_v26 = vadd.f32 %v431_v23, %v430_v13  ;;  %v532_v27 = vadd.f32 %v531_v16, %v530_v10  ;;  %v16400_v30 = vpop.f32.mrf.mxu0  ;;  %v539_v23 = vsel %vm174_vm0, %v482_v57, 0.0  ;;  %vm1579_vm5 = vmpackc.low %vm16518_vm14, %vm16518_vm14 }
 0x11b   :  { %22113 = vst [vmem:[#allocation24_spill] sm:$0xff] %v16400_v30  ;;  %v535_v59 = vsel %vm174_vm0, %v480_v25, 0.0  ;;  %v483_v7 = vmul.f32 %v16400_v30, %v16400_v30  ;;  %v439_v25 = vsel %vm174_vm0, %v16400_v30, 0.0  ;;  %22142 = vst [vmem:[#allocation30_spill] sm:$0xff] %v16629_v1 }
 0x11c   :  { %v434_v44 = vadd.f32 %v433_v38, %v432_v26  ;;  %v534_v45 = vadd.f32 %v533_v35, %v532_v27  ;;  %v16417_v49 = vpop.f32.mrf.mxu0  ;;  %v1607_v27 = vsel %vm1575_vm13, 65537, %v21870_v19 }
 0x11d   :  { %22114 = vst [vmem:[#allocation25_spill] sm:$0xff] %v16417_v49  ;;  %v435_v48 = vsel %vm174_vm0, %v16417_v49, 0.0  ;;  %v481_v55 = vmul.f32 %v16417_v49, %v16417_v49  ;;  %v541_v57 = vsel %vm174_vm0, %v483_v7, 0.0 }
 0x11e   :  { %v536_v60 = vadd.f32 %v535_v59, %v534_v45  ;;  %v436_v61 = vadd.f32 %v435_v48, %v434_v44  ;;  %v16433_v62 = vpop.f32.mrf.mxu0  ;;  %v13054_v44 = vcombine.low %v1599_v0, %v16420_v52  ;;  %v13055_v45 = vcombine.low %v1601_v4, %v16420_v52 }
 0x11f   :  { %v537_v10 = vsel %vm174_vm0, %v481_v55, 0.0  ;;  %v821_v0 = vand.u32 15, %v701_v14  ;;  %v486_v4 = vmul.f32 %v16433_v62, %v16433_v62  ;;  %v445_v16 = vsel %vm174_vm0, %v16433_v62, 0.0 }
 0x120   :  { %v538_v13 = vadd.f32 %v537_v10, %v536_v60  ;;  %v16452_v15 = vpop.f32.mrf.mxu0  ;;  %v438_v3 = vadd.f32 %v437_v5, %v436_v61  ;;  %v1603_v61 = vsel %vm1571_vm9, 65537, %v21870_v19  ;;  %v1692_v47 = vshrl.u32 %v13055_v45, 16 }
 0x121   :  { %22117 = vst [vmem:[#allocation26_spill] sm:$0xff] %v16452_v15  ;;  %v484_v26 = vmul.f32 %v16452_v15, %v16452_v15  ;;  %v441_v59 = vsel %vm174_vm0, %v16452_v15, 0.0  ;;  %vm16522_vm15 = vcmp.ge.s32.totalorder %v821_v0, 1  ;;  %v705_v0 = vadd.s32 144, %v16323_v9 }
 0x122   :  { %v440_v33 = vadd.f32 %v439_v25, %v438_v3  ;;  %v540_v35 = vadd.f32 %v539_v23, %v538_v13  ;;  %v16471_v38 = vpop.f32.mrf.mxu0  ;;  %v1683_v13 = vshll.u32 %v13054_v44, 16  ;;  %v1688_v3 = vshll.u32 %v13055_v45, 16  ;;  %vm1581_vm9 = vmpackc.low %vm16522_vm15, %vm16522_vm15 }
 0x123   :  { %v543_v41 = vsel %vm174_vm0, %v484_v26, 0.0  ;;  %v487_v14 = vmul.f32 %v16471_v38, %v16471_v38  ;;  %v1605_v25 = vsel %vm1573_vm12, 65537, %v21870_v19 }
 0x124   :  { %v442_v48 = vadd.f32 %v441_v59, %v440_v33  ;;  %v542_v55 = vadd.f32 %v541_v57, %v540_v35  ;;  %v16483_v60 = vpop.f32.mrf.mxu0  ;;  %v703_v35 = vadd.s32 128, %v16323_v9  ;;  %v547_v57 = vsel %vm174_vm0, %v486_v4, 0.0 }
 0x125   :  { %22124 = vst [vmem:[#allocation27_spill] sm:$0xff] %v16483_v60  ;;  %v443_v5 = vsel %vm174_vm0, %v16483_v60, 0.0  ;;  %v485_v34 = vmul.f32 %v16483_v60, %v16483_v60  ;;  %v447_v59 = vsel %vm174_vm0, %v16471_v38, 0.0  ;;  %v5727_v4 = vand.u32 7, %v16353_v43 }
 0x126   :  { %v544_v7 = vadd.f32 %v543_v41, %v542_v55  ;;  %v444_v10 = vadd.f32 %v443_v5, %v442_v48  ;;  %v1681_v48 = vshrl.u32 %v13054_v44, 16  ;;  %v13056_v55 = vcombine.low %v1603_v61, %v16420_v52 }
 0x127   :  { %v545_v23 = vsel %vm174_vm0, %v485_v34, 0.0  ;;  %v13057_v34 = vcombine.low %v1605_v25, %v16420_v52  ;;  %v16516_v60 = vsub.s32 0, %v16323_v9  ;;  %vm16529_vm3 = vcmp.lt.s32.totalorder %v5727_v4, 7 }
 0x128   :  { %v446_v26 = vadd.f32 %v445_v16, %v444_v10  ;;  %v546_v33 = vadd.f32 %v545_v23, %v544_v7  ;;  %v549_v10 = vsel %vm174_vm0, %v487_v14, 0.0  ;;  %v1685_v7 = vrot.slane %v1683_v13, 1  ;;  %vm6074_vm6 = vmpackc.low %vm16529_vm3, %vm16529_vm3 }
 0x129   :  { %v1690_v16 = vrot.slane %v1688_v3, 1  ;;  %v13058_v23 = vcombine.low %v1607_v27, %v16420_v52  ;;  %22125 = vst [vmem:[#allocation28_spill] sm:$0xff] %v16516_v60  ;;  %v1696_v44 = vshll.u32 %v13056_v55, 16  ;;  %v1704_v14 = vshll.u32 %v13057_v34, 16 }
 0x12a   :  { %v448_v41 = vadd.f32 %v447_v59, %v446_v26  ;;  %v548_v5 = vadd.f32 %v547_v57, %v546_v33  ;;  %v1686_v43 = vor.u32 %v1685_v7, %v1681_v48  ;;  %v835_v33 = vand.u32 15, %v703_v35 }
 0x12b   :  { %v1694_v25 = vor.u32 %v1692_v47, %v1690_v16  ;;  %v1712_v26 = vshll.u32 %v13058_v23, 16  ;;  %vm16534_vm4 = vcmp.ge.s32.totalorder %v5727_v4, 1  ;;  %v1700_v54 = vshrl.u32 %v13056_v55, 16 }
 0x12c   :  { %v449_v19 = vrot.slane %v448_v41, 4  ;;  %v550_v32 = vadd.f32 %v549_v10, %v548_v5  ;;  %v16539_v10 = vrot.slane %v1704_v14, 1  ;;  %v1708_v35 = vshrl.u32 %v13057_v34, 16  ;;  %vm6165_vm8 = vmpackc.low %vm16534_vm4, %vm16534_vm4 }
 0x12d   :  { %v1716_v7 = vshrl.u32 %v13058_v23, 16  ;;  %vm16549_vm7 = vcmp.ge.s32.totalorder %v835_v33, 1  ;;  %v707_v4 = vadd.s32 160, %v16323_v9  ;;  %v16561_v14 = vsel %vm1679_vm1, %v1686_v43, %v1690_v16 }
 0x12e   :  { %v450_v13 = vadd.f32 %v449_v19, %v448_v41  ;;  %v551_v3 = vrot.slane %v550_v32, 4  ;;  %v1698_v19 = vrot.slane %v1696_v44, 1  ;;  %v22134_v41 = vmov 0   ;;  %vm1583_vm10 = vmpackc.low %vm16549_vm7, %vm16549_vm7 }
 0x12f   :  { %v1609_v5 = vsel %vm1577_vm2, 65537, %v22134_v41  ;;  %v16564_v23 = vrot.slane %v22134_v41, 7  ;;  %v6082_v16 = vsel %vm6074_vm6, 65537, %v22134_v41  ;;  %v1611_v43 = vsel %vm1579_vm5, 65537, %v22134_v41 }
 0x130   :  { %v451_v39 = vrot.slane %v450_v13, 2  ;;  %v552_v27 = vadd.f32 %v551_v3, %v550_v32  ;;  %v16547_v32 = vrot.slane %v1712_v26, 1  ;;  %v16558_v34 = vcombine.low %v1609_v5, %v16420_v52 }
 0x131   :  { %v849_v3 = vand.u32 15, %v705_v0  ;;  %22137 = vst [vmem:[#allocation29_spill] sm:$0xff] %v16564_v23  ;;  %v16567_v26 = vsel %vm1679_vm1, %v1694_v25, %v1698_v19  ;;  %v16569_v33 = vor.u32 %v1700_v54, %v1698_v19  ;;  %v6173_v45 = vsel %vm6165_vm8, 65537, %v22134_v41 }
 0x132   :  { %v452_v48 = vadd.f32 %v451_v39, %v450_v13  ;;  %v553_v47 = vrot.slane %v552_v27, 2  ;;  %v16591_v25 = vor.u32 %v1708_v35, %v16539_v10  ;;  %v16594_v57 = vor.u32 %v1716_v7, %v16547_v32 }
 0x133   :  { %v863_v0 = vand.u32 15, %v707_v4  ;;  %v1720_v61 = vshll.u32 %v16558_v34, 16  ;;  %vm16599_vm11 = vcmp.ge.s32.totalorder %v849_v3, 1  ;;  %v16604_v5 = vcombine.low %v1611_v43, %v16420_v52 }
 0x134   :  { %v453_v44 = vrot.slane %v452_v48, 1  ;;  %v554_v13 = vadd.f32 %v553_v47, %v552_v27  ;;  %v1615_v47 = vsel %vm1583_vm10, 65537, %v22134_v41  ;;  %v709_v35 = vadd.s32 176, %v16323_v9  ;;  %vm1585_vm12 = vmpackc.low %vm16599_vm11, %vm16599_vm11 }
 0x135   :  { %v711_v4 = vadd.s32 192, %v16323_v9  ;;  %vm16617_vm13 = vcmp.ge.s32.totalorder %v863_v0, 1  ;;  %v16625_v30 = vcombine.low %v1615_v47, %v16420_v52  ;;  %v1617_v12 = vsel %vm1585_vm12, 65537, %v22134_v41 }
 0x136   :  { %v454_v39 = vadd.f32 %v453_v44, %v452_v48  ;;  %v555_v27 = vrot.slane %v554_v13, 1  ;;  %v1613_v48 = vsel %vm1581_vm9, 65537, %v22134_v41  ;;  %v713_v44 = vadd.s32 208, %v16323_v9  ;;  %vm1587_vm14 = vmpackc.low %vm16617_vm13, %vm16617_vm13 }
 0x137   :  { %v13061_v15 = vcombine.low %v1613_v48, %v16420_v52  ;;  %v877_v54 = vand.u32 15, %v709_v35  ;;  %v1732_v48 = vshrl.u32 %v16604_v5, 16  ;;  %v16645_v3 = vcombine.low %v1617_v12, %v16420_v52 }
 0x138   :  { %v16596_v19 = vmul.f32 0.00390625, %v454_v39  ;;  %v556_v59 = vadd.f32 %v555_v27, %v554_v13  ;;  %v715_v39 = vadd.s32 224, %v16323_v9  ;;  %v692_v27 = vadd.s32 40, %v16323_v9 }
 0x139   :  { %v1728_v13 = vshll.u32 %v16604_v5, 16  ;;  %v1736_v23 = vshll.u32 %v13061_v15, 16  ;;  %vm16648_vm3 = vcmp.ge.s32.totalorder %v877_v54, 1 }
 0x13a   :  { %v557_v7 = vmul.f32 0.00390625, %v556_v59  ;;  %v558_v55 = vmul.f32 %v16596_v19, %v16596_v19  ;;  %v1722_v59 = vrot.slane %v1720_v61, 1  ;;  %v5734_v0 = vand.u32 7, %v692_v27  ;;  %vm1589_vm9 = vmpackc.low %vm16648_vm3, %vm16648_vm3 }
 0x13b   :  { %v891_v61 = vand.u32 15, %v711_v4  ;;  %v919_v47 = vand.u32 15, %v715_v39  ;;  %v1619_v4 = vsel %vm1587_vm14, 65537, %v22134_v41  ;;  %v1730_v17 = vrot.slane %v1728_v13, 1 }
 0x13c   :  { %v559_v43 = vsub.f32 %v557_v7, %v558_v55  ;;  %v905_v7 = vand.u32 15, %v713_v44  ;;  %vm6051_vm15 = vcmp.lt.s32.totalorder %v5734_v0, 7  ;;  %vm16636_vm2 = vcmp.ge.s32.totalorder %v5734_v0, 1 }
 0x13d   :  { %v744_v44 = vand.u32 15, %v16629_v1  ;;  %vm6075_vm4 = vmpackc.low %vm6051_vm15, %vm6051_vm15  ;;  %vm16653_vm5 = vcmp.ge.s32.totalorder %v891_v61, 1  ;;  %v758_v0 = vand.u32 15, %v692_v27  ;;  %vm16665_vm8 = vcmp.ge.s32.totalorder %v919_v47, 1 }
 0x13e   :  { %v560_v49 = vmax.f32 %v559_v43, 0.0  ;;  %v1744_v43 = vshll.u32 %v16625_v30, 16  ;;  %vm16657_vm6 = vcmp.ge.s32.totalorder %v905_v7, 1  ;;  %v6083_v12 = vsel %vm6075_vm4, 65537, %v22134_v41  ;;  %vm6166_vm7 = vmpackc.low %vm16636_vm2, %vm16636_vm2 }
 0x13f   :  { %v16669_v1 = vcombine.low %v6082_v16, %v6083_v12  ;;  %v6174_v61 = vsel %vm6166_vm7, 65537, %v22134_v41  ;;  %v717_v7 = vadd.s32 240, %v16323_v9  ;;  %v730_v27 = vand.u32 15, %v16642_v40  ;;  %vm1591_vm10 = vmpackc.low %vm16653_vm5, %vm16653_vm5 }
 0x140   :  { %v561_v35 = vadd.f32 1e-05, %v560_v49  ;;  %v16677_v55 = vcombine.low %v6173_v45, %v6174_v61  ;;  %v16680_v47 = vadd.s32 56, %v16323_v9  ;;  %v1738_v53 = vrot.slane %v1736_v23, 1  ;;  %vm1593_vm12 = vmpackc.low %vm16657_vm6, %vm16657_vm6 }
 0x141   :  { %22154 = vst [vmem:[#allocation32_spill] sm:$0xff] %v16669_v1  ;;  %v1740_v16 = vshrl.u32 %v13061_v15, 16  ;;  %vm16685_vm11 = vcmp.lt.s32.totalorder %v744_v44, 15  ;;  %v16692_v12 = vsel %vm1679_vm1, %v16569_v33, %v16539_v10  ;;  %v1746_v45 = vrot.slane %v1744_v43, 1  ;;  %vm1595_vm14 = vmpackc.low %vm16665_vm8, %vm16665_vm8 }
 0x142   :  { %16011 = vrsqrt.f32 %v561_v35  ;;  %22155 = vst [vmem:[#allocation33_spill] sm:$0xff] %v16677_v55  ;;  %22156 = vst [vmem:[#allocation34_spill] sm:$0xff] %v16680_v47  ;;  %v1748_v61 = vshrl.u32 %v16625_v30, 16  ;;  %vm16698_vm13 = vcmp.lt.s32.totalorder %v758_v0, 15  ;;  %v1752_v23 = vshll.u32 %v16645_v3, 16 }
 0x143   :  { %v16704_v13 = vcombine.low %v1619_v4, %v16420_v52  ;;  %v1621_v30 = vsel %vm1589_vm9, 65537, %v22134_v41  ;;  %v933_v10 = vand.u32 15, %v717_v7  ;;  %v16718_v33 = vsel %vm1679_vm1, %v16591_v25, %v16547_v32  ;;  %vm1202_vm2 = vmpackc.low %vm16685_vm11, %vm16685_vm11 }
 0x144   :  { %v16722_v43 = vsel %vm1679_vm1, %v16594_v57, %v1722_v59  ;;  %vm16724_vm15 = vcmp.lt.s32.totalorder %v730_v27, 15  ;;  %v772_v5 = vand.u32 15, %v16680_v47  ;;  %v22163_v44 = vshrl.u32 %v16558_v34, 16  ;;  %vm1204_vm3 = vmpackc.low %vm16698_vm13, %vm16698_vm13 }
 0x145   :  { %v1734_v54 = vor.u32 %v1732_v48, %v1730_v17  ;;  %v1742_v32 = vor.u32 %v1740_v16, %v1738_v53  ;;  %v1623_v25 = vsel %vm1591_vm10, 65537, %v22134_v41  ;;  %v1750_v57 = vor.u32 %v1748_v61, %v1746_v45  ;;  %vm1200_vm4 = vmpackc.low %vm16724_vm15, %vm16724_vm15 }
 0x146   :  { %v1726_v0 = vor.u32 %v22163_v44, %v1722_v59  ;;  %v16744_v7 = vcombine.low %v1621_v30, %v16420_v52  ;;  %v1625_v34 = vsel %vm1593_vm12, 65537, %v22134_v41  ;;  %v1627_v59 = vsel %vm1595_vm14, 65537, %v22134_v41 }
 0x147   :  { %v1754_v48 = vrot.slane %v1752_v23, 1  ;;  %v1756_v49 = vshrl.u32 %v16645_v3, 16  ;;  %v1760_v27 = vshll.u32 %v16704_v13, 16  ;;  %vm16758_vm5 = vcmp.ge.s32.totalorder %v933_v10, 1 }
 0x148   :  { %v13066_v61 = vcombine.low %v1623_v25, %v16420_v52  ;;  %v1234_v39 = vsel %vm1202_vm2, 65537, %v22134_v41  ;;  %v1236_v3 = vsel %vm1204_vm3, 65537, %v22134_v41  ;;  %vm16770_vm6 = vcmp.lt.s32.totalorder %v772_v5, 15  ;;  %vm1597_vm7 = vmpackc.low %vm16758_vm5, %vm16758_vm5 }
 0x149   :  { %v16775_v23 = vsel %vm1679_vm1, %v1726_v0, %v1730_v17  ;;  %v16778_v30 = vsel %vm1679_vm1, %v1734_v54, %v1738_v53  ;;  %v13067_v10 = vcombine.low %v1625_v34, %v16420_v52  ;;  %v16782_v4 = vcombine.low %v1627_v59, %v16420_v52  ;;  %vm1206_vm8 = vmpackc.low %vm16770_vm6, %vm16770_vm6 }
 0x14a   :  { %22168 = vst [vmem:[#allocation35_spill] sm:$0xff] %v16775_v23  ;;  %22169 = vst [vmem:[#allocation36_spill] sm:$0xff] %v16778_v30  ;;  %v16785_v35 = vsel %vm1679_vm1, %v1742_v32, %v1746_v45  ;;  %v1768_v44 = vshll.u32 %v16744_v7, 16  ;;  %v1232_v5 = vsel %vm1200_vm4, 65537, %v22134_v41  ;;  %v696_v17 = vadd.s32 72, %v16323_v9 }
 0x14b   :  { %22170 = vst [vmem:[#allocation37_spill] sm:$0xff] %v16785_v35  ;;  %v16794_v53 = vsel %vm1679_vm1, %v1750_v57, %v1754_v48  ;;  %v16796_v0 = vor.u32 %v1756_v49, %v1754_v48  ;;  %v13039_v54 = vcombine.low %v16420_v52, %v1234_v39  ;;  %v13040_v45 = vcombine.low %v16420_v52, %v1236_v3  ;;  %v384_v57 = vld [vmem:[#allocation5] sm:$0x1] }
 0x14c   :  { %22171 = vst [vmem:[#allocation38_spill] sm:$0xff] %v16794_v53  ;;  %v16803_v32 = vrot.slane %v1760_v27, 1  ;;  %v1764_v25 = vshrl.u32 %v16704_v13, 16  ;;  %v1772_v34 = vshrl.u32 %v16744_v7, 16  ;;  %v1776_v59 = vshll.u32 %v13066_v61, 16 }
 0x14d   :  { %v1784_v55 = vshll.u32 %v13067_v10, 16  ;;  %v1792_v48 = vshll.u32 %v16782_v4, 16  ;;  %v13038_v49 = vcombine.low %v16420_v52, %v1232_v5  ;;  %v1629_v27 = vsel %vm1597_vm7, 65537, %v22134_v41 }
 0x14e   :  { %v1770_v39 = vrot.slane %v1768_v44, 1  ;;  %v1238_v13 = vsel %vm1206_vm8, 65537, %v22134_v41  ;;  %v786_v3 = vand.u32 15, %v696_v17  ;;  %v698_v7 = vadd.s32 88, %v16323_v9 }
 0x14f   :  { %v16012_v1 = vpop.eup %16011  ;;  %v1780_v15 = vshrl.u32 %v13066_v61, 16  ;;  %v1320_v40 = vshrl.u32 %v13039_v54, 16  ;;  %v1328_v47 = vshrl.u32 %v13040_v45, 16  ;;  %v700_v53 = vadd.s32 104, %v16323_v9 }
 0x150   :  { %v563_v35 = vmul.f32 %v16012_v1, %v384_v57  ;;  %vm1311_vm9 = vsmask.f32 256  ;;  %v1778_v5 = vrot.slane %v1776_v59, 1  ;;  %v1788_v29 = vshrl.u32 %v13067_v10, 16 }
 0x151   :  { %v16819_v2 = vcombine.low %v1629_v27, %v16420_v52  ;;  %v1786_v16 = vrot.slane %v1784_v55, 1  ;;  %v1794_v30 = vrot.slane %v1792_v48, 1  ;;  %v1313_v44 = vshrl.u32 %v13038_v49, 16 }
 0x152   :  { %v13041_v50 = vcombine.low %v16420_v52, %v1238_v13  ;;  %v1323_v17 = vshll.u32 %v13039_v54, 16  ;;  %v1796_v8 = vshrl.u32 %v16782_v4, 16  ;;  %vm16823_vm10 = vcmp.lt.s32.totalorder %v786_v3, 15  ;;  %v385_v54 = vld [vmem:[#allocation5 + $0x1] sm:$0x1] }
 0x153   :  { %22172 = vst [vmem:[#allocation39_spill] sm:$0xff] %v16819_v2  ;;  %v800_v23 = vand.u32 15, %v698_v7  ;;  %v1322_v1 = vrot.slane %v1320_v40, 7  ;;  %v16827_v57 = vrot.slane %v1328_v47, 7  ;;  %v1331_v10 = vshll.u32 %v13040_v45, 16  ;;  %vm1208_vm11 = vmpackc.low %vm16823_vm10, %vm16823_vm10 }
 0x154   :  { %v814_v59 = vand.u32 15, %v700_v53  ;;  %v564_v27 = vmul.f32 %v563_v35, %v16596_v19  ;;  %v1766_v55 = vor.u32 %v1764_v25, %v16803_v32  ;;  %v1774_v48 = vor.u32 %v1772_v34, %v1770_v39 }
 0x155   :  { %v1800_v13 = vshll.u32 %v16819_v2, 16  ;;  %v16833_v4 = vrot.slane %v563_v35, %v16516_v60  ;;  %v1782_v3 = vor.u32 %v1780_v15, %v1778_v5  ;;  %v1336_v56 = vshrl.u32 %v13041_v50, 16 }
 0x156   :  { %v702_v40 = vadd.s32 120, %v16323_v9  ;;  %v1790_v47 = vor.u32 %v1788_v29, %v1786_v16  ;;  %v1315_v53 = vrot.slane %v1313_v44, 7  ;;  %v1316_v19 = vshll.u32 %v13038_v49, 16 }
 0x157   :  { %vm16839_vm12 = vcmp.lt.s32.totalorder %v800_v23, 15  ;;  %v1325_v25 = vor.u32 %v1323_v17, %v1322_v1  ;;  %v1333_v34 = vor.u32 %v1331_v10, %v16827_v57  ;;  %v1798_v35 = vor.u32 %v1796_v8, %v1794_v30 }
 0x158   :  { %vm16844_vm13 = vcmp.lt.s32.totalorder %v814_v59, 15  ;;  %v565_v15 = vsub.f32 %v385_v54, %v564_v27  ;;  %v16848_v61 = vrot.slane %v1800_v13, 1  ;;  %v1339_v2 = vshll.u32 %v13041_v50, 16  ;;  %vm1210_vm14 = vmpackc.low %vm16839_vm12, %vm16839_vm12 }
 0x159   :  { %v1240_v29 = vsel %vm1208_vm11, 65537, %v22134_v41  ;;  %v600_v23 = vmul.f32 %v16433_v62, %v16833_v4  ;;  %v601_v49 = vmul.f32 %v16471_v38, %v16833_v4  ;;  %v16855_v44 = vrot.slane %v1336_v56, 7  ;;  %vm1212_vm15 = vmpackc.low %vm16844_vm13, %vm16844_vm13 }
 0x15a   :  { %22179 = vst [vmem:[#allocation40_spill] sm:$0xff] %v16848_v61  ;;  %v828_v8 = vand.u32 15, %v702_v40  ;;  %v16863_v17 = vsel %vm1679_vm1, %v16796_v0, %v16803_v32  ;;  %v16866_v50 = vsel %vm1679_vm1, %v1766_v55, %v1770_v39  ;;  %v16869_v62 = vsel %vm1679_vm1, %v1774_v48, %v1778_v5 }
 0x15b   :  { %v16872_v38 = vsel %vm1679_vm1, %v1782_v3, %v1786_v16  ;;  %v16878_v56 = vsel %vm1679_vm1, %v1790_v47, %v1794_v30  ;;  %v16880_v10 = vor.u32 %v1316_v19, %v1315_v53  ;;  %v16883_v0 = vsel %vm1311_vm9, %v1315_v53, %v1325_v25 }
 0x15c   :  { %v16886_v32 = vadd.s32 136, %v16323_v9  ;;  %v16889_v39 = vrot.slane %v565_v15, %v16516_v60  ;;  %v16892_v5 = vsel %vm1311_vm9, %v1322_v1, %v1333_v34  ;;  %v16896_v16 = vsel %vm1679_vm1, %v1798_v35, %v16848_v61  ;;  %v15695_v60 = vld [vmem:[#allocation2 + $0x40] sm:$0xff]   ;;  %v17093_v61 = vld [vmem:[#allocation2 + $0x68] sm:$0xff]  }
 0x15d   :  { %v16899_v30 = vcombine.low %v16420_v52, %v1240_v29  ;;  %v1341_v59 = vor.u32 %v1339_v2, %v16855_v44  ;;  %v1242_v27 = vsel %vm1210_vm14, 65537, %v22134_v41  ;;  %v1244_v55 = vsel %vm1212_vm15, 65537, %v22134_v41 }
 0x15e   :  { %vm16909_vm2 = vcmp.lt.s32.totalorder %v828_v8, 15  ;;  %v570_v48 = vmul.f32 %v16833_v4, %v16201_v20  ;;  %v571_v13 = vmul.f32 %v16833_v4, %v16207_v24  ;;  %v572_v2 = vmul.f32 %v16198_v18, %v16833_v4 }
 0x15f   :  { %v573_v54 = vmul.f32 %v16203_v22, %v16833_v4  ;;  %v574_v3 = vmul.f32 %v16833_v4, %v16225_v37  ;;  %v575_v40 = vmul.f32 %v16833_v4, %v16237_v51  ;;  %v576_v47 = vmul.f32 %v16217_v31, %v16833_v4  ;;  %vm1214_vm3 = vmpackc.low %vm16909_vm2, %vm16909_vm2 }
 0x160   :  { %v577_v20 = vmul.f32 %v16232_v46, %v16833_v4  ;;  %v606_v24 = vadd.f32 %v16889_v39, %v570_v48  ;;  %v607_v53 = vadd.f32 %v16889_v39, %v571_v13  ;;  %v608_v18 = vadd.f32 %v16889_v39, %v572_v2 }
 0x161   :  { %v636_v22 = vadd.f32 %v16889_v39, %v600_v23  ;;  %v609_v37 = vadd.f32 %v16889_v39, %v573_v54  ;;  %v610_v51 = vadd.f32 %v16889_v39, %v574_v3  ;;  %v611_v31 = vadd.f32 %v16889_v39, %v575_v40 }
 0x162   :  { %v637_v46 = vadd.f32 %v16889_v39, %v601_v49  ;;  %vm1807_vm4 = vcmp.ne.s16.totalorder %v16561_v14, 0  ;;  %vm1808_vm5 = vcmp.ne.s16.totalorder %v16567_v26, 0  ;;  %v612_v19 = vadd.f32 %v16889_v39, %v576_v47 }
 0x163   :  { %v613_v45 = vadd.f32 %v16889_v39, %v577_v20  ;;  %v1344_v25 = vshrl.u32 %v16899_v30, 16  ;;  %vm1809_vm6 = vcmp.ne.s16.totalorder %v16692_v12, 0  ;;  %vm1810_vm7 = vcmp.ne.s16.totalorder %v16718_v33, 0 }
 0x164   :  { %v16950_v35 = vsel %vm1311_vm9, %v16827_v57, %v1341_v59  ;;  %v16953_v7 = vcombine.low %v16420_v52, %v1242_v27  ;;  %v16956_v15 = vsel %vm1214_vm3, 65537, %v22134_v41  ;;  %v578_v23 = vmul.f32 %v16833_v4, %v16253_v63 }
 0x165   :  { %v638_v49 = vmax.f32 %v606_v24, 0.0  ;;  %v639_v8 = vmax.f32 %v607_v53, 0.0  ;;  %v16962_v1 = vcombine.low %v16420_v52, %v1244_v55  ;;  %v640_v48 = vmax.f32 %v608_v18, 0.0 }
 0x166   :  { %v641_v13 = vmax.f32 %v609_v37, 0.0  ;;  %v642_v57 = vmax.f32 %v610_v51, 0.0  ;;  %v643_v59 = vmax.f32 %v611_v31, 0.0  ;;  %v579_v27 = vmul.f32 %v16833_v4, %v16265_v11 }
 0x167   :  { %v580_v2 = vmul.f32 %v16246_v58, %v16833_v4  ;;  %v644_v54 = vmax.f32 %v612_v19, 0.0  ;;  %v645_v3 = vmax.f32 %v613_v45, 0.0  ;;  %v581_v63 = vmul.f32 %v16260_v6, %v16833_v4  ;;  %v22183_v19 = vld [vmem:[#allocation35_spill] sm:$0xff]  ;;  %v22184_v45 = vld [vmem:[#allocation14_spill] sm:$0xff] }
 0x168   :  { %v582_v40 = vmul.f32 %v16833_v4, %v16281_v28  ;;  %v583_v55 = vmul.f32 %v16833_v4, %v16293_v42  ;;  %v614_v47 = vadd.f32 %v16889_v39, %v578_v23  ;;  %v615_v20 = vadd.f32 %v16889_v39, %v579_v27 }
 0x169   :  { %v668_v24 = vmax.f32 %v636_v22, 0.0  ;;  %v669_v11 = vmax.f32 %v637_v46, 0.0  ;;  %v16976_v53 = vpack.c.bf16 %v639_v8, %v638_v49  ;;  %v616_v58 = vadd.f32 %v16889_v39, %v580_v2  ;;  %v22182_v22 = vld [vmem:[#allocation12_spill] sm:$0xff] }
 0x16a   :  { %v617_v18 = vadd.f32 %v16889_v39, %v581_v63  ;;  %v16980_v37 = vpack.c.bf16 %v641_v13, %v640_v48  ;;  %v16982_v6 = vpack.c.bf16 %v643_v59, %v642_v57  ;;  %vm1811_vm8 = vcmp.ne.s16.totalorder %v16722_v43, 0  ;;  %v15691_v46 = vld [vmem:[#allocation2 + $0x10] sm:$0xff]   ;;  %v16027_v59 = vld [vmem:[#allocation2 + $0x18] sm:$0xff]  }
 0x16b   :  { %v584_v28 = vmul.f32 %v16274_v21, %v16833_v4  ;;  %v585_v42 = vmul.f32 %v16288_v36, %v16833_v4  ;;  %v16991_v51 = vmul.f32 %v16833_v4, %v22182_v22  ;;  %v16993_v31 = vpack.c.bf16 %v645_v3, %v644_v54  ;;  %14434 = vmatmul.mubr.msk.bf16.vlgmr.msra.gmra.mxu0 %vm174_vm0, %v16976_v53  ;;  %v22185_v21 = vld [vmem:[#allocation11_spill] sm:$0xff]  ;;  %v16028_v63 = vld [vmem:[#allocation2 + $0x38] sm:$0xff]  }
 0x16c   :  { %vm1812_vm10 = vcmp.ne.s16.totalorder %v22183_v19, 0  ;;  %v17000_v23 = vmul.f32 %v16833_v4, %v22184_v45  ;;  %v17004_v49 = vmul.f32 %v22185_v21, %v16833_v4  ;;  %v17007_v36 = vadd.f32 %v16889_v39, %v582_v40  ;;  %14437 = vmatprep.mubr.msk.bf16.mxu1 %vm174_vm0, %v16980_v37  ;;  %v15692_v48 = vld [vmem:[#allocation2 + $0x30] sm:$0xff]   ;;  %14466 = vmatpush3.bf16.msra.mxu0 %v16027_v59 }
 0x16d   :  { %v646_v8 = vmax.f32 %v614_v47, 0.0  ;;  %v647_v13 = vmax.f32 %v615_v20, 0.0  ;;  %v17011_v57 = vpack.c.bf16 %v669_v11, %v668_v24  ;;  %14438 = vmatmul.mubr.msk.bf16.vlgmr.msra.gmra.mxu1 %vm174_vm0, %v16982_v6  ;;  %v1823_v27 = vsel %vm1807_vm4, %v16976_v53, 0  ;;  %v15693_v20 = vld [vmem:[#allocation2 + $0x48] sm:$0xff]   ;;  %14467 = vmatprep.subr.bf16.mxu0 %v15691_v46 }
 0x16e   :  { %v1824_v2 = vsel %vm1808_vm5, %v16980_v37, 0  ;;  %v648_v54 = vmax.f32 %v616_v58, 0.0  ;;  %v649_v3 = vmax.f32 %v617_v18, 0.0  ;;  %14502 = vmatpush3.bf16.msra.mxu1 %v16028_v63  ;;  %14441 = vmatprep.mubr.msk.bf16.mxu1 %vm174_vm0, %v16993_v31  ;;  %v1844_v40 = vshrl.u32 %v1823_v27, 16  ;;  %v17031_v58 = vld [vmem:[#allocation2 + $0x58] sm:$0xff]  }
 0x16f   :  { %22186 = vst [vmem:[#allocation12_spill] sm:$0xff] %v17011_v57  ;;  %v1852_v47 = vshrl.u32 %v1824_v2, 16  ;;  %v619_v24 = vadd.f32 %v16889_v39, %v583_v55  ;;  %14469 = vmatprep.mubr.bf16.mxu0 %v22134_v41  ;;  %v1847_v14 = vshll.u32 %v1823_v27, 16  ;;  %v1825_v26 = vsel %vm1809_vm6, %v16982_v6, 0  ;;  %22187 = vst [vmem:[#allocation35_spill] sm:$0xff] %v17031_v58  ;;  %14503 = vmatprep.subr.bf16.mxu1 %v15692_v48 }
 0x170   :  { %v1826_v11 = vsel %vm1810_vm7, %v16993_v31, 0  ;;  %v1846_v18 = vrot.slane %v1844_v40, 7  ;;  %v1855_v45 = vshll.u32 %v1824_v2, 16  ;;  %v1860_v21 = vshrl.u32 %v1825_v26, 16  ;;  %14468 = vmatpush3.bf16.msra.mxu0 %v15691_v46  ;;  %v22190_v40 = vld [vmem:[#allocation36_spill] sm:$0xff] }
 0x171   :  { %v17033_v22 = vrot.slane %v1852_v47, 7  ;;  %v620_v55 = vadd.f32 %v16889_v39, %v584_v28  ;;  %v621_v59 = vadd.f32 %v16889_v39, %v585_v42  ;;  %v17037_v27 = vpack.c.bf16 %v647_v13, %v646_v8  ;;  %14537 = vmatprep.subr.bf16.mxu0 %v15693_v20  ;;  %v22191_v28 = vld [vmem:[#allocation13_spill] sm:$0xff] }
 0x172   :  { %v1868_v12 = vshrl.u32 %v1826_v11, 16  ;;  %v17039_v63 = vpack.c.bf16 %v649_v3, %v648_v54  ;;  %v1849_v33 = vor.u32 %v1847_v14, %v1846_v18  ;;  %14504 = vmatpush3.bf16.msra.mxu1 %v15692_v48  ;;  %vm1813_vm11 = vcmp.ne.s16.totalorder %v22190_v40, 0  ;;  %v22192_v8 = vld [vmem:[#allocation17_spill] sm:$0xff]  ;;  %v22194_v3 = vld [vmem:[#allocation16_spill] sm:$0xff]  ;;  %v22196_v14 = vld [vmem:[#allocation19_spill] sm:$0xff] }
 0x173   :  { %22188 = vst [vmem:[#allocation14_spill] sm:$0xff] %v17037_v27  ;;  %v1857_v29 = vor.u32 %v1855_v45, %v17033_v22  ;;  %v17045_v2 = vrot.slane %v1344_v25, 7  ;;  %v589_v42 = vmul.f32 %v22191_v28, %v16833_v4  ;;  %v590_v46 = vmul.f32 %v16833_v4, %v22192_v8  ;;  %v22193_v13 = vld [vmem:[#allocation21_spill] sm:$0xff]  ;;  %14573 = vmatprep.subr.bf16.mxu1 %v17031_v58 }
 0x174   :  { %22189 = vst [vmem:[#allocation11_spill] sm:$0xff] %v17039_v63  ;;  %v591_v54 = vmul.f32 %v16833_v4, %v22193_v13  ;;  %v592_v47 = vmul.f32 %v22194_v3, %v16833_v4  ;;  %v22195_v48 = vld [vmem:[#allocation37_spill] sm:$0xff]  ;;  %v593_v25 = vmul.f32 %v22196_v14, %v16833_v4  ;;  %v1862_v8 = vrot.slane %v1860_v21, 7 }
 0x175   :  { %vm1814_vm12 = vcmp.ne.s16.totalorder %v22195_v48, 0  ;;  %v22197_v45 = vld [vmem:[#allocation29_spill] sm:$0xff]  ;;  %v17064_v28 = vsel %vm1311_vm9, %v1846_v18, %v1857_v29  ;;  %v650_v13 = vmax.f32 %v17007_v36, 0.0  ;;  %v651_v57 = vmax.f32 %v619_v24, 0.0  ;;  %14442 = vmatmul.mubr.msk.bf16.gmra.mxu1 %vm174_vm0, %v17037_v27  ;;  %v22200_v18 = vld [vmem:[#allocation23_spill] sm:$0xff] }
 0x176   :  { %v17061_v34 = vsel %vm1311_vm9, %v22197_v45, %v1849_v33  ;;  %22199 = vst [vmem:[#allocation13_spill] sm:$0xff] %v17064_v28  ;;  %v17071_v3 = vrot.slane %v1868_v12, 7  ;;  %v1827_v33 = vsel %vm1811_vm8, %v17037_v27, 0  ;;  %v652_v14 = vmax.f32 %v620_v55, 0.0  ;;  %14445 = vmatprep.mubr.msk.bf16.mxu1 %vm174_vm0, %v17039_v63  ;;  %v22201_v12 = vld [vmem:[#allocation25_spill] sm:$0xff]  ;;  %v22202_v55 = vld [vmem:[#allocation22_spill] sm:$0xff] }
 0x177   :  { %22198 = vst [vmem:[#allocation36_spill] sm:$0xff] %v17061_v34  ;;  %14470 = vmatmul.mubr.msk.bf16.vlgmr.msra.gmra.mxu0 %vm174_vm0, %v17061_v34  ;;  %v653_v29 = vmax.f32 %v621_v59, 0.0  ;;  %v1863_v36 = vshll.u32 %v1825_v26, 16  ;;  %v1828_v24 = vsel %vm1812_vm10, %v17039_v63, 0  ;;  %v594_v21 = vmul.f32 %v16833_v4, %v22200_v18  ;;  %v22203_v18 = vld [vmem:[#allocation24_spill] sm:$0xff] }
 0x178   :  { %14473 = vmatprep.mubr.msk.bf16.mxu0 %vm174_vm0, %v17064_v28  ;;  %v595_v43 = vmul.f32 %v16833_v4, %v22201_v12  ;;  %v596_v59 = vmul.f32 %v22202_v55, %v16833_v4  ;;  %v1871_v45 = vshll.u32 %v1826_v11, 16  ;;  %14538 = vmatpush3.bf16.msra.mxu0 %v15693_v20  ;;  %v622_v28 = vadd.f32 %v16889_v39, %v16991_v51  ;;  %v22205_v20 = vld [vmem:[#allocation38_spill] sm:$0xff] }
 0x179   :  { %v623_v26 = vadd.f32 %v16889_v39, %v17000_v23  ;;  %v1865_v34 = vor.u32 %v1863_v36, %v1862_v8  ;;  %v1876_v19 = vshrl.u32 %v1827_v33, 16  ;;  %14539 = vmatprep.subr.bf16.mxu0 %v15695_v60  ;;  %v597_v58 = vmul.f32 %v22203_v18, %v16833_v4 }
 0x17a   :  { %v17097_v12 = vpack.c.bf16 %v651_v57, %v650_v13  ;;  %v1873_v55 = vor.u32 %v1871_v45, %v17071_v3  ;;  %v1884_v11 = vshrl.u32 %v1828_v24, 16  ;;  %vm1815_vm13 = vcmp.ne.s16.totalorder %v22205_v20, 0 }
 0x17b   :  { %v624_v51 = vadd.f32 %v16889_v39, %v17004_v49  ;;  %v625_v23 = vadd.f32 %v16889_v39, %v589_v42  ;;  %v626_v36 = vadd.f32 %v16889_v39, %v590_v46  ;;  %v17105_v63 = vpack.c.bf16 %v653_v29, %v652_v14 }
 0x17c   :  { %22204 = vst [vmem:[#allocation17_spill] sm:$0xff] %v17097_v12  ;;  %v627_v27 = vadd.f32 %v16889_v39, %v591_v54  ;;  %v628_v18 = vadd.f32 %v16889_v39, %v592_v47  ;;  %v629_v57 = vadd.f32 %v16889_v39, %v593_v25  ;;  %v17111_v45 = vadd.f32 %v16889_v39, %v594_v21 }
 0x17d   :  { %22206 = vst [vmem:[#allocation21_spill] sm:$0xff] %v17105_v63  ;;  %vm1816_vm14 = vcmp.ne.s16.totalorder %v16863_v17, 0  ;;  %14540 = vmatpush3.bf16.msra.mxu0 %v15695_v60  ;;  %v654_v13 = vmax.f32 %v622_v28, 0.0  ;;  %v655_v49 = vmax.f32 %v623_v26, 0.0  ;;  %v17116_v42 = vsel %vm1311_vm9, %v17033_v22, %v1865_v34  ;;  %14446 = vmatmul.mubr.msk.bf16.gmra.mxu1 %vm174_vm0, %v17097_v12 }
 0x17e   :  { %22207 = vst [vmem:[#allocation16_spill] sm:$0xff] %v17116_v42  ;;  %v1878_v46 = vrot.slane %v1876_v19, 7  ;;  %14609 = vmatprep.subr.bf16.mxu0 %v17093_v61  ;;  %v631_v54 = vadd.f32 %v16889_v39, %v595_v43  ;;  %v17125_v47 = vsel %vm1311_vm9, %v1862_v8, %v1873_v55  ;;  %v17127_v60 = vrot.slane %v1884_v11, 7  ;;  %14449 = vmatprep.mubr.msk.bf16.mxu1 %vm174_vm0, %v17105_v63 }
 0x17f   :  { %14474 = vmatmul.mubr.msk.bf16.gmra.mxu0 %vm174_vm0, %v17116_v42  ;;  %v1829_v34 = vsel %vm1813_vm11, %v17097_v12, 0  ;;  %v656_v22 = vmax.f32 %v624_v51, 0.0  ;;  %v657_v25 = vmax.f32 %v625_v23, 0.0  ;;  %v1879_v28 = vshll.u32 %v1827_v33, 16 }
 0x180   :  { %14477 = vmatprep.mubr.msk.bf16.mxu0 %vm174_vm0, %v17125_v47  ;;  %v1830_v8 = vsel %vm1814_vm12, %v17105_v63, 0  ;;  %vm1817_vm15 = vcmp.ne.s16.totalorder %v16866_v50, 0  ;;  %vm1818_vm2 = vcmp.ne.s16.totalorder %v16869_v62, 0  ;;  %v632_v40 = vadd.f32 %v16889_v39, %v596_v59 }
 0x181   :  { %v633_v14 = vadd.f32 %v16889_v39, %v597_v58  ;;  %v658_v29 = vmax.f32 %v626_v36, 0.0  ;;  %v1887_v21 = vshll.u32 %v1828_v24, 16  ;;  %v659_v43 = vmax.f32 %v627_v27, 0.0 }
 0x182   :  { %v17143_v26 = vpack.c.bf16 %v655_v49, %v654_v13  ;;  %v1881_v19 = vor.u32 %v1879_v28, %v1878_v46  ;;  %v1892_v55 = vshrl.u32 %v1829_v34, 16  ;;  %vm1819_vm3 = vcmp.ne.s16.totalorder %v16872_v38, 0 }
 0x183   :  { %vm1820_vm4 = vcmp.ne.s16.totalorder %v16878_v56, 0  ;;  %v660_v48 = vmax.f32 %v628_v18, 0.0  ;;  %v661_v33 = vmax.f32 %v629_v57, 0.0  ;;  %v1889_v11 = vor.u32 %v1887_v21, %v17127_v60 }
 0x184   :  { %v1900_v51 = vshrl.u32 %v1830_v8, 16  ;;  %v17148_v23 = vpack.c.bf16 %v657_v25, %v656_v22  ;;  %v1352_v58 = vshrl.u32 %v16953_v7, 16  ;;  %v1355_v24 = vshll.u32 %v16953_v7, 16 }
 0x185   :  { %v17154_v27 = vcombine.low %v16420_v52, %v16956_v15  ;;  %v662_v59 = vmax.f32 %v17111_v45, 0.0  ;;  %v663_v36 = vmax.f32 %v631_v54, 0.0  ;;  %v664_v13 = vmax.f32 %v632_v40, 0.0  ;;  %14450 = vmatmul.mubr.msk.bf16.gmra.mxu1 %vm174_vm0, %v17143_v26  ;;  %v22209_v54 = vld [vmem:[#allocation26_spill] sm:$0xff]  ;;  %v22210_v40 = vld [vmem:[#allocation27_spill] sm:$0xff] }
 0x186   :  { %v665_v49 = vmax.f32 %v633_v14, 0.0  ;;  %v17159_v18 = vsel %vm1311_vm9, %v17071_v3, %v1881_v19  ;;  %v1894_v57 = vrot.slane %v1892_v55, 7  ;;  %v1831_v22 = vsel %vm1815_vm13, %v17143_v26, 0  ;;  %14453 = vmatprep.mubr.msk.bf16.mxu1 %vm174_vm0, %v17148_v23 }
 0x187   :  { %vm1439_vm5 = vcmp.ne.s16.totalorder %v16880_v10, 0  ;;  %v22208_v15 = vshll.u32 %v16899_v30, 16  ;;  %v17168_v28 = vpack.c.bf16 %v659_v43, %v658_v29  ;;  %v17170_v45 = vpack.c.bf16 %v661_v33, %v660_v48  ;;  %14478 = vmatmul.mubr.msk.bf16.gmra.mxu0 %vm174_vm0, %v17159_v18 }
 0x188   :  { %v17177_v3 = vsel %vm1311_vm9, %v1878_v46, %v1889_v11  ;;  %v17179_v20 = vrot.slane %v1900_v51, 7  ;;  %vm1440_vm6 = vcmp.ne.s16.totalorder %v16883_v0, 0  ;;  %v598_v30 = vmul.f32 %v16833_v4, %v22209_v54 }
 0x189   :  { %v1349_v25 = vor.u32 %v22208_v15, %v17045_v2  ;;  %v599_v14 = vmul.f32 %v16833_v4, %v22210_v40  ;;  %14481 = vmatprep.mubr.msk.bf16.mxu0 %vm174_vm0, %v17177_v3  ;;  %v1895_v29 = vshll.u32 %v1829_v34, 16  ;;  %v1832_v46 = vsel %vm1816_vm14, %v17148_v23, 0 }
 0x18a   :  { %v17193_v21 = vpack.c.bf16 %v663_v36, %v662_v59  ;;  %v17195_v43 = vpack.c.bf16 %v665_v49, %v664_v13  ;;  %v1903_v19 = vshll.u32 %v1830_v8, 16  ;;  %v1908_v55 = vshrl.u32 %v1831_v22, 16 }
 0x18b   :  { %v634_v48 = vadd.f32 %v16889_v39, %v598_v30  ;;  %v635_v4 = vadd.f32 %v16889_v39, %v599_v14  ;;  %v1897_v33 = vor.u32 %v1895_v29, %v1894_v57  ;;  %vm1441_vm7 = vcmp.ne.s16.totalorder %v16892_v5, 0 }
 0x18c   :  { %v22211_v11 = vand.u32 15, %v16886_v32  ;;  %v1905_v17 = vor.u32 %v1903_v19, %v17179_v20  ;;  %v1916_v51 = vshrl.u32 %v1832_v46, 16  ;;  %v1833_v8 = vsel %vm1817_vm15, %v17168_v28, 0 }
 0x18d   :  { %v1834_v39 = vsel %vm1818_vm2, %v17170_v45, 0  ;;  %vm1821_vm10 = vcmp.ne.s16.totalorder %v16896_v16, 0  ;;  %v17214_v59 = vrot.slane %v1352_v58, 7  ;;  %v1360_v32 = vshrl.u32 %v16962_v1, 16  ;;  %14454 = vmatmul.mubr.msk.bf16.gmra.mxu1 %vm174_vm0, %v17168_v28 }
 0x18e   :  { %vm17202_vm8 = vcmp.lt.s32.totalorder %v22211_v11, 15  ;;  %v1363_v36 = vshll.u32 %v16962_v1, 16  ;;  %v1368_v13 = vshrl.u32 %v17154_v27, 16  ;;  %v1910_v49 = vrot.slane %v1908_v55, 7  ;;  %14457 = vmatprep.mubr.msk.bf16.mxu1 %vm174_vm0, %v17170_v45 }
 0x18f   :  { %v1835_v50 = vsel %vm1819_vm3, %v17193_v21, 0  ;;  %v1836_v62 = vsel %vm1820_vm4, %v17195_v43, 0  ;;  %v17227_v15 = vsel %vm1311_vm9, %v16855_v44, %v1349_v25  ;;  %vm1216_vm11 = vmpackc.low %vm17202_vm8, %vm17202_vm8  ;;  %v666_v58 = vmax.f32 %v634_v48, 0.0 }
 0x190   :  { %v17234_v54 = vsel %vm1311_vm9, %v17127_v60, %v1897_v33  ;;  %v1924_v30 = vshrl.u32 %v1833_v8, 16  ;;  %v1932_v38 = vshrl.u32 %v1834_v39, 16  ;;  %v667_v40 = vmax.f32 %v635_v4, 0.0 }
 0x191   :  { %14482 = vmatmul.mubr.msk.bf16.gmra.mxu0 %vm174_vm0, %v17234_v54  ;;  %v17241_v44 = vsel %vm1311_vm9, %v1894_v57, %v1905_v17  ;;  %v1911_v56 = vshll.u32 %v1831_v22, 16  ;;  %v1918_v25 = vrot.slane %v1916_v51, 7  ;;  %v1940_v60 = vshrl.u32 %v1835_v50, 16 }
 0x192   :  { %14485 = vmatprep.mubr.msk.bf16.mxu0 %vm174_vm0, %v17241_v44  ;;  %v1948_v14 = vshrl.u32 %v1836_v62, 16  ;;  %vm1442_vm12 = vcmp.ne.s16.totalorder %v16950_v35, 0  ;;  %v1248_v57 = vsel %vm1216_vm11, 65537, %v22134_v41  ;;  %v1919_v19 = vshll.u32 %v1832_v46, 16 }
 0x193   :  { %v1913_v22 = vor.u32 %v1911_v56, %v1910_v49  ;;  %v1455_v55 = vsel %vm1439_vm5, %v16976_v53, 0  ;;  %v17258_v48 = vrot.slane %v1360_v32, 7  ;;  %v1926_v4 = vrot.slane %v1924_v30, 7 }
 0x194   :  { %v1934_v33 = vrot.slane %v1932_v38, 7  ;;  %v1456_v11 = vsel %vm1440_vm6, %v16980_v37, 0  ;;  %vm1443_vm13 = vcmp.ne.s16.totalorder %v17227_v15, 0  ;;  %v1357_v34 = vor.u32 %v1355_v24, %v17214_v59 }
 0x195   :  { %v17267_v17 = vpack.c.bf16 %v667_v40, %v666_v58  ;;  %v1921_v46 = vor.u32 %v1919_v19, %v1918_v25  ;;  %v1927_v51 = vshll.u32 %v1833_v8, 16  ;;  %v706_v10 = vadd.s32 152, %v16323_v9  ;;  %14458 = vmatmul.mubr.msk.bf16.gmra.mxu1 %vm174_vm0, %v17193_v21 }
 0x196   :  { %v1935_v32 = vshll.u32 %v1834_v39, 16  ;;  %v1942_v56 = vrot.slane %v1940_v60, 7  ;;  %v17270_v30 = vrot.slane %v1948_v14, 7  ;;  %v1974_v38 = vshll.u32 %v1455_v55, 16  ;;  %14461 = vmatprep.mubr.msk.bf16.mxu1 %vm174_vm0, %v17195_v43 }
 0x197   :  { %v17274_v0 = vsel %vm1311_vm9, %v17179_v20, %v1913_v22  ;;  %v1979_v29 = vshll.u32 %v1456_v11, 16  ;;  %v17279_v7 = vsel %vm1441_vm7, %v16982_v6, 0  ;;  %v856_v24 = vand.u32 15, %v706_v10 }
 0x198   :  { %v1929_v58 = vor.u32 %v1927_v51, %v1926_v4  ;;  %v1937_v8 = vor.u32 %v1935_v32, %v1934_v33  ;;  %v1943_v40 = vshll.u32 %v1835_v50, 16  ;;  %v1951_v19 = vshll.u32 %v1836_v62, 16 }
 0x199   :  { %14486 = vmatmul.mubr.msk.bf16.gmra.mxu0 %vm174_vm0, %v17274_v0  ;;  %v17286_v20 = vsel %vm1311_vm9, %v1910_v49, %v1921_v46  ;;  %v1837_v5 = vsel %vm1821_vm10, %v17267_v17, 0  ;;  %v17291_v39 = vrot.slane %v1368_v13, 7  ;;  %v708_v60 = vadd.s32 168, %v16323_v9  ;;  %v22220_v13 = vld [vmem:[#allocation11_spill] sm:$0xff] }
 0x19a   :  { %14489 = vmatprep.mubr.msk.bf16.mxu0 %vm174_vm0, %v17286_v20  ;;  %v1945_v50 = vor.u32 %v1943_v40, %v1942_v56  ;;  %v1953_v62 = vor.u32 %v1951_v19, %v17270_v30  ;;  %v1976_v14 = vrot.slane %v1974_v38, 1  ;;  %v1987_v49 = vshll.u32 %v17279_v7, 16 }
 0x19b   :  { %v1981_v22 = vrot.slane %v1979_v29, 1  ;;  %v17301_v16 = vcombine.low %v16420_v52, %v1248_v57  ;;  %vm17303_vm14 = vcmp.lt.s32.totalorder %v856_v24, 15  ;;  %v710_v46 = vadd.s32 184, %v16323_v9 }
 0x19c   :  { %v17309_v51 = vsel %vm1311_vm9, %v1918_v25, %v1929_v58  ;;  %v17312_v10 = vsel %vm1311_vm9, %v1926_v4, %v1937_v8  ;;  %v1972_v32 = vshrl.u32 %v1455_v55, 16  ;;  %v1956_v38 = vshrl.u32 %v1837_v5, 16  ;;  %vm1218_vm15 = vmpackc.low %vm17303_vm14, %vm17303_vm14 }
 0x19d   :  { %v1983_v40 = vshrl.u32 %v1456_v11, 16  ;;  %v1458_v29 = vsel %vm1442_vm12, %v16993_v31, 0  ;;  %v1358_v57 = vsel %vm1311_vm9, %v17045_v2, %v1357_v34  ;;  %v870_v24 = vand.u32 15, %v708_v60  ;;  %v22216_v11 = vld [vmem:[#allocation14_spill] sm:$0xff]  ;;  %14462 = vmatmul.mubr.msk.bf16.gmra.mxu1 %vm174_vm0, %v17267_v17 }
 0x19e   :  { %v17320_v19 = vsel %vm1311_vm9, %v1934_v33, %v1945_v50  ;;  %v17323_v25 = vsel %vm1311_vm9, %v1942_v56, %v1953_v62  ;;  %v1977_v58 = vor.u32 %v1976_v14, %v1972_v32  ;;  %v1989_v4 = vrot.slane %v1987_v49, 1  ;;  %14505 = vmatprep.mubr.bf16.mxu1 %v22134_v41 }
 0x19f   :  { %v1985_v55 = vor.u32 %v1983_v40, %v1981_v22  ;;  %v1459_v35 = vsel %vm1443_vm13, %v22216_v11, 0  ;;  %v1365_v2 = vor.u32 %v1363_v36, %v17258_v48  ;;  %v884_v33 = vand.u32 15, %v710_v46 }
 0x1a0   :  { %v17334_v34 = vrot.slane %v1956_v38, 7  ;;  %v1959_v56 = vshll.u32 %v1837_v5, 16  ;;  %vm1444_vm2 = vcmp.ne.s16.totalorder %v1358_v57, 0  ;;  %v716_v8 = vadd.s32 232, %v16323_v9 }
 0x1a1   :  { %14490 = vmatmul.mubr.msk.bf16.gmra.mxu0 %vm174_vm0, %v17309_v51  ;;  %v1995_v60 = vshll.u32 %v1458_v29, 16  ;;  %v1250_v15 = vsel %vm1218_vm15, 65537, %v22134_v41  ;;  %vm17342_vm3 = vcmp.lt.s32.totalorder %v870_v24, 15  ;;  %v712_v1 = vadd.s32 200, %v16323_v9 }
 0x1a2   :  { %14493 = vmatprep.mubr.msk.bf16.mxu0 %vm174_vm0, %v17312_v10  ;;  %v1991_v36 = vshrl.u32 %v17279_v7, 16  ;;  %v1999_v5 = vshrl.u32 %v1458_v29, 16  ;;  %v2003_v62 = vshll.u32 %v1459_v35, 16  ;;  %v22219_v14 = vshll.u32 %v17154_v27, 16  ;;  %vm1220_vm5 = vmpackc.low %vm17342_vm3, %vm17342_vm3 }
 0x1a3   :  { %v17355_v46 = vsel %vm1444_vm2, %v22220_v13, 0  ;;  %v1366_v32 = vsel %vm1311_vm9, %v17214_v59, %v1365_v2  ;;  %vm17359_vm4 = vcmp.lt.s32.totalorder %v884_v33, 15  ;;  %v714_v40 = vadd.s32 216, %v16323_v9 }
 0x1a4   :  { %v1373_v49 = vor.u32 %v22219_v14, %v17291_v39  ;;  %v17365_v7 = vsel %vm1679_vm1, %v1977_v58, %v1981_v22  ;;  %v1376_v29 = vshrl.u32 %v17301_v16, 16  ;;  %v17369_v27 = vcombine.low %v16420_v52, %v1250_v15  ;;  %vm1222_vm7 = vmpackc.low %vm17359_vm4, %vm17359_vm4 }
 0x1a5   :  { %v926_v57 = vand.u32 15, %v716_v8  ;;  %v17375_v59 = vsel %vm1679_vm1, %v1985_v55, %v1989_v4  ;;  %v1961_v24 = vor.u32 %v1959_v56, %v17334_v34  ;;  %v1997_v2 = vrot.slane %v1995_v60, 1  ;;  %v15696_v8 = vld [vmem:[#allocation2 + $0x50] sm:$0xff]   ;;  %14506 = vmatmul.mubr.msk.bf16.vlgmr.msra.gmra.mxu1 %vm174_vm0, %v17365_v7 }
 0x1a6   :  { %22223 = vst [vmem:[#allocation37_spill] sm:$0xff] %v17375_v59  ;;  %v898_v33 = vand.u32 15, %v712_v1  ;;  %v2005_v14 = vrot.slane %v2003_v62, 1  ;;  %v2007_v22 = vshrl.u32 %v1459_v35, 16  ;;  %v2011_v58 = vshll.u32 %v17355_v46, 16  ;;  %14509 = vmatprep.mubr.msk.bf16.mxu1 %vm174_vm0, %v17375_v59  ;;  %v22237_v59 = vld [vmem:[#allocation13_spill] sm:$0xff] }
 0x1a7   :  { %vm1445_vm6 = vcmp.ne.s16.totalorder %v1366_v32, 0  ;;  %v1374_v15 = vsel %vm1311_vm9, %v17258_v48, %v1373_v49  ;;  %v1252_v55 = vsel %vm1220_vm5, 65537, %v22134_v41  ;;  %v912_v50 = vand.u32 15, %v714_v40  ;;  %v17424_v32 = vld [vmem:[#allocation2 + $0x78] sm:$0xff]  }
 0x1a8   :  { %v718_v56 = vadd.s32 248, %v16323_v9  ;;  %v17386_v60 = vrot.slane %v1376_v29, 7  ;;  %v1379_v35 = vshll.u32 %v17301_v16, 16  ;;  %v1384_v1 = vshrl.u32 %v17369_v27, 16  ;;  %v22228_v16 = vld [vmem:[#allocation35_spill] sm:$0xff] }
 0x1a9   :  { %vm17390_vm8 = vcmp.lt.s32.totalorder %v926_v57, 15  ;;  %14494 = vmatmul.mubr.msk.bf16.gmra.mxu0 %vm174_vm0, %v17320_v19  ;;  %v1993_v48 = vor.u32 %v1991_v36, %v1989_v4  ;;  %v2001_v49 = vor.u32 %v1999_v5, %v1997_v2  ;;  %v1254_v38 = vsel %vm1222_vm7, 65537, %v22134_v41  ;;  %14574 = vmatpush3.bf16.msra.mxu1 %v22228_v16 }
 0x1aa   :  { %vm17399_vm10 = vcmp.lt.s32.totalorder %v898_v33, 15  ;;  %14497 = vmatprep.mubr.msk.bf16.mxu0 %vm174_vm0, %v17323_v25  ;;  %v17408_v29 = vsel %vm1311_vm9, %v17270_v30, %v1961_v24  ;;  %v2009_v57 = vor.u32 %v2007_v22, %v2005_v14  ;;  %v17412_v4 = vsel %vm1445_vm6, %v17097_v12, 0  ;;  %14575 = vmatprep.subr.bf16.mxu1 %v15696_v8  ;;  %vm1228_vm13 = vmpackc.low %vm17390_vm8, %vm17390_vm8 }
 0x1ab   :  { %v13048_v36 = vcombine.low %v16420_v52, %v1252_v55  ;;  %v2013_v5 = vrot.slane %v2011_v58, 1  ;;  %vm1446_vm11 = vcmp.ne.s16.totalorder %v1374_v15, 0  ;;  %vm17417_vm12 = vcmp.lt.s32.totalorder %v912_v50, 15  ;;  %vm1224_vm14 = vmpackc.low %vm17399_vm10, %vm17399_vm10 }
 0x1ac   :  { %v940_v30 = vand.u32 15, %v718_v56  ;;  %v1381_v24 = vor.u32 %v1379_v35, %v17386_v60  ;;  %v17427_v22 = vrot.slane %v1384_v1, 7  ;;  %v1387_v55 = vshll.u32 %v17369_v27, 16  ;;  %vm1226_vm15 = vmpackc.low %vm17417_vm12, %vm17417_vm12 }
 0x1ad   :  { %v13049_v58 = vcombine.low %v16420_v52, %v1254_v38  ;;  %v17435_v15 = vsel %vm1679_vm1, %v1993_v48, %v1997_v2  ;;  %v17438_v50 = vsel %vm1679_vm1, %v2001_v49, %v2005_v14  ;;  %v2015_v56 = vshrl.u32 %v17355_v46, 16  ;;  %14576 = vmatpush3.bf16.msra.mxu1 %v15696_v8  ;;  %v22233_v8 = vld [vmem:[#allocation39_spill] sm:$0xff] }
 0x1ae   :  { %22231 = vst [vmem:[#allocation19_spill] sm:$0xff] %v17435_v15  ;;  %22232 = vst [vmem:[#allocation23_spill] sm:$0xff] %v17438_v50  ;;  %v2019_v35 = vshll.u32 %v17412_v4, 16  ;;  %v17443_v1 = vsel %vm1446_vm11, %v17105_v63, 0  ;;  %v1392_v38 = vshrl.u32 %v13048_v36, 16  ;;  %v1260_v46 = vsel %vm1228_vm13, 65537, %v22134_v41  ;;  %14645 = vmatprep.subr.bf16.mxu1 %v17424_v32  ;;  %14510 = vmatmul.mubr.msk.bf16.gmra.mxu1 %vm174_vm0, %v17435_v15 }
 0x1af   :  { %v17456_v2 = vsel %vm1679_vm1, %v2009_v57, %v2013_v5  ;;  %v1256_v14 = vsel %vm1224_vm14, 65537, %v22134_v41  ;;  %vm1134_vm2 = vcmp.lt.s32.totalorder %v940_v30, 15  ;;  %v1804_v48 = vshrl.u32 %v22233_v8, 16  ;;  %v22234_v30 = vld [vmem:[#allocation40_spill] sm:$0xff]  ;;  %14513 = vmatprep.mubr.msk.bf16.mxu1 %vm174_vm0, %v17438_v50 }
 0x1b0   :  { %v2017_v49 = vor.u32 %v2015_v56, %v2013_v5  ;;  %v1382_v40 = vsel %vm1311_vm9, %v17291_v39, %v1381_v24  ;;  %v1389_v16 = vor.u32 %v1387_v55, %v17427_v22  ;;  %v1400_v33 = vshrl.u32 %v13049_v58, 16  ;;  %vm1230_vm3 = vmpackc.low %vm1134_vm2, %vm1134_vm2  ;;  %v22235_v39 = vld [vmem:[#allocation36_spill] sm:$0xff] }
 0x1b1   :  { %14498 = vmatmul.mubr.msk.bf16.gmra.mxu0 %vm174_vm0, %v17408_v29  ;;  %v1258_v62 = vsel %vm1226_vm15, 65537, %v22134_v41  ;;  %v17470_v57 = vcombine.low %v16420_v52, %v1260_v46  ;;  %v1262_v5 = vsel %vm1230_vm3, 65537, %v22134_v41  ;;  %v1806_v56 = vor.u32 %v1804_v48, %v22234_v30  ;;  %v22236_v41 = vld [vmem:[#allocation12_spill] sm:$0xff] }
 0x1b2   :  { %14541 = vmatprep.mubr.msk.bf16.mxu0 %vm174_vm0, %v22235_v39  ;;  %v2027_v24 = vshll.u32 %v17443_v1, 16  ;;  %v1394_v55 = vrot.slane %v1392_v38, 7  ;;  %v1395_v8 = vshll.u32 %v13048_v36, 16  ;;  %v13050_v27 = vcombine.low %v16420_v52, %v1256_v14 }
 0x1b3   :  { %vm1447_vm4 = vcmp.ne.s16.totalorder %v1382_v40, 0  ;;  %v1403_v9 = vshll.u32 %v13049_v58, 16  ;;  %v13053_v46 = vcombine.low %v16420_v52, %v1262_v5  ;;  %vm1822_vm5 = vcmp.ne.s16.totalorder %v1806_v56, 0 }
 0x1b4   :  { %v1390_v48 = vsel %vm1311_vm9, %v17386_v60, %v1389_v16  ;;  %v17483_v30 = vrot.slane %v1400_v33, 7  ;;  %v13051_v39 = vcombine.low %v16420_v52, %v1258_v62  ;;  %v1838_v63 = vsel %vm1822_vm5, %v22236_v41, 0 }
 0x1b5   :  { %v2031_v50 = vshrl.u32 %v17443_v1, 16  ;;  %v1424_v36 = vshrl.u32 %v17470_v57, 16  ;;  %v1432_v38 = vshrl.u32 %v13053_v46, 16  ;;  %v1435_v14 = vshll.u32 %v13053_v46, 16  ;;  %v15699_v1 = vld [vmem:[#allocation2 + $0x60] sm:$0xff]  }
 0x1b6   :  { %v2021_v12 = vrot.slane %v2019_v35, 1  ;;  %v1397_v58 = vor.u32 %v1395_v8, %v1394_v55  ;;  %v1408_v15 = vshrl.u32 %v13050_v27, 16  ;;  %v1964_v5 = vshrl.u32 %v1838_v63, 16  ;;  %14514 = vmatmul.mubr.msk.bf16.gmra.mxu1 %vm174_vm0, %v17456_v2 }
 0x1b7   :  { %v2029_v56 = vrot.slane %v2027_v24, 1  ;;  %v1463_v60 = vsel %vm1447_vm4, %v17143_v26, 0  ;;  %vm1448_vm6 = vcmp.ne.s16.totalorder %v1390_v48, 0  ;;  %v1434_v16 = vrot.slane %v1432_v38, 7 }
 0x1b8   :  { %v1405_v52 = vor.u32 %v1403_v9, %v17483_v30  ;;  %v1416_v33 = vshrl.u32 %v13051_v39, 16  ;;  %v1966_v62 = vrot.slane %v1964_v5, 7  ;;  %v1967_v13 = vshll.u32 %v1838_v63, 16 }
 0x1b9   :  { %14542 = vmatmul.mubr.msk.bf16.vlgmr.msra.gmra.mxu0 %vm174_vm0, %v22237_v59  ;;  %v17497_v35 = vsel %vm1679_vm1, %v2017_v49, %v2021_v12  ;;  %v1411_v24 = vshll.u32 %v13050_v27, 16  ;;  %v1426_v40 = vrot.slane %v1424_v36, 7  ;;  %v1437_v8 = vor.u32 %v1435_v14, %v1434_v16 }
 0x1ba   :  { %14545 = vmatprep.mubr.msk.bf16.mxu0 %vm174_vm0, %v17116_v42  ;;  %14517 = vmatprep.mubr.msk.bf16.mxu1 %vm174_vm0, %v17497_v35  ;;  %v1464_v9 = vsel %vm1448_vm6, %v17148_v23, 0  ;;  %v1398_v63 = vsel %vm1311_vm9, %v17427_v22, %v1397_v58  ;;  %v1410_v46 = vrot.slane %v1408_v15, 7  ;;  %v1969_v48 = vor.u32 %v1967_v13, %v1966_v62  ;;  %v17515_v22 = vld [vmem:[#allocation2 + $0x88] sm:$0xff]  }
 0x1bb   :  { %v22238_v38 = vshrl.u32 %v17412_v4, 16  ;;  %v2035_v5 = vshll.u32 %v1463_v60, 16  ;;  %v1419_v27 = vshll.u32 %v13051_v39, 16  ;;  %v1438_v36 = vsel %vm1311_vm9, %v1426_v40, %v1437_v8  ;;  %14610 = vmatpush3.bf16.msra.mxu0 %v17093_v61 }
 0x1bc   :  { %v1406_v14 = vsel %vm1311_vm9, %v1394_v55, %v1405_v52  ;;  %v1418_v16 = vrot.slane %v1416_v33, 7  ;;  %vm1454_vm7 = vcmp.ne.s16.totalorder %v1438_v36, 0  ;;  %v17513_v42 = vsel %vm1311_vm9, %v17334_v34, %v1969_v48  ;;  %14611 = vmatprep.subr.bf16.mxu0 %v15699_v1 }
 0x1bd   :  { %v2025_v49 = vor.u32 %v22238_v38, %v2021_v12  ;;  %v2033_v13 = vor.u32 %v2031_v50, %v2029_v56  ;;  %v2043_v4 = vshll.u32 %v1464_v9, 16  ;;  %vm1449_vm8 = vcmp.ne.s16.totalorder %v1398_v63, 0 }
 0x1be   :  { %v1470_v12 = vsel %vm1454_vm7, %v22236_v41, 0  ;;  %v1413_v15 = vor.u32 %v1411_v24, %v1410_v46  ;;  %v2037_v55 = vrot.slane %v2035_v5, 1  ;;  %vm1450_vm10 = vcmp.ne.s16.totalorder %v1406_v14, 0 }
 0x1bf   :  { %v2091_v39 = vshll.u32 %v1470_v12, 16  ;;  %v17519_v61 = vsel %vm1679_vm1, %v2025_v49, %v2029_v56  ;;  %14612 = vmatpush3.bf16.msra.mxu0 %v15699_v1  ;;  %v1465_v58 = vsel %vm1449_vm8, %v17168_v28, 0  ;;  %v1421_v34 = vor.u32 %v1419_v27, %v1418_v16 }
 0x1c0   :  { %v2095_v33 = vshrl.u32 %v1470_v12, 16  ;;  %14681 = vmatprep.subr.bf16.mxu0 %v17515_v22  ;;  %14518 = vmatmul.mubr.msk.bf16.gmra.mxu1 %vm174_vm0, %v17519_v61  ;;  %v17530_v50 = vsel %vm1679_vm1, %v2033_v13, %v2037_v55  ;;  %v2039_v56 = vshrl.u32 %v1463_v60, 16  ;;  %v2045_v62 = vrot.slane %v2043_v4, 1 }
 0x1c1   :  { %v17522_v52 = vrot.slane %v2091_v39, 1  ;;  %14546 = vmatmul.mubr.msk.bf16.gmra.mxu0 %vm174_vm0, %v17125_v47  ;;  %14521 = vmatprep.mubr.msk.bf16.mxu1 %vm174_vm0, %v17530_v50  ;;  %v1466_v1 = vsel %vm1450_vm10, %v17170_v45, 0  ;;  %v1414_v24 = vsel %vm1311_vm9, %v17483_v30, %v1413_v15  ;;  %v1427_v8 = vshll.u32 %v17470_v57, 16 }
 0x1c2   :  { %14549 = vmatprep.mubr.msk.bf16.mxu0 %vm174_vm0, %v17159_v18  ;;  %v2047_v48 = vshrl.u32 %v1464_v9, 16  ;;  %v2051_v38 = vshll.u32 %v1465_v58, 16  ;;  %v2041_v60 = vor.u32 %v2039_v56, %v2037_v55  ;;  %v1422_v49 = vsel %vm1311_vm9, %v1410_v46, %v1421_v34 }
 0x1c3   :  { %v17541_v63 = vor.u32 %v2095_v33, %v17522_v52  ;;  %v2059_v27 = vshll.u32 %v1466_v1, 16  ;;  %vm1451_vm11 = vcmp.ne.s16.totalorder %v1414_v24, 0  ;;  %v1429_v36 = vor.u32 %v1427_v8, %v1426_v40 }
 0x1c4   :  { %v2049_v5 = vor.u32 %v2047_v48, %v2045_v62  ;;  %v2053_v14 = vrot.slane %v2051_v38, 1  ;;  %vm1452_vm12 = vcmp.ne.s16.totalorder %v1422_v49, 0  ;;  %v17545_v13 = vsel %vm1679_vm1, %v2041_v60, %v2045_v62 }
 0x1c5   :  { %v1467_v30 = vsel %vm1451_vm11, %v17193_v21, 0  ;;  %v2061_v9 = vrot.slane %v2059_v27, 1  ;;  %v2055_v40 = vshrl.u32 %v1465_v58, 16  ;;  %v1468_v46 = vsel %vm1452_vm12, %v17195_v43, 0 }
 0x1c6   :  { %v17553_v57 = vsel %vm1679_vm1, %v2049_v5, %v2053_v14  ;;  %v1430_v4 = vsel %vm1311_vm9, %v1418_v16, %v1429_v36  ;;  %v2063_v12 = vshrl.u32 %v1466_v1, 16  ;;  %v2067_v15 = vshll.u32 %v1467_v30, 16 }
 0x1c7   :  { %v2057_v39 = vor.u32 %v2055_v40, %v2053_v14  ;;  %v2075_v34 = vshll.u32 %v1468_v46, 16  ;;  %vm1453_vm13 = vcmp.ne.s16.totalorder %v1430_v4, 0  ;;  %v2071_v1 = vshrl.u32 %v1467_v30, 16  ;;  %v15700_v30 = vld [vmem:[#allocation2 + $0x70] sm:$0xff]   ;;  %v22244_v4 = vld [vmem:[#allocation21_spill] sm:$0xff] }
 0x1c8   :  { %14522 = vmatmul.mubr.msk.bf16.gmra.mxu1 %vm174_vm0, %v17545_v13  ;;  %v2065_v55 = vor.u32 %v2063_v12, %v2061_v9  ;;  %v2069_v33 = vrot.slane %v2067_v15, 1  ;;  %v1469_v62 = vsel %vm1453_vm13, %v17267_v17, 0  ;;  %v2079_v24 = vshrl.u32 %v1468_v46, 16  ;;  %v22241_v40 = vld [vmem:[#allocation19_spill] sm:$0xff]  ;;  %v22242_v46 = vld [vmem:[#allocation17_spill] sm:$0xff]  ;;  %v22245_v12 = vld [vmem:[#allocation16_spill] sm:$0xff] }
 0x1c9   :  { %14550 = vmatmul.mubr.msk.bf16.gmra.mxu0 %vm174_vm0, %v17177_v3  ;;  %14525 = vmatprep.mubr.msk.bf16.mxu1 %vm174_vm0, %v17553_v57  ;;  %v17562_v56 = vsel %vm1679_vm1, %v2057_v39, %v2061_v9  ;;  %v2077_v58 = vrot.slane %v2075_v34, 1  ;;  %v2083_v8 = vshll.u32 %v1469_v62, 16  ;;  %v2087_v27 = vshrl.u32 %v1469_v62, 16  ;;  %v22240_v9 = vld [vmem:[#allocation11_spill] sm:$0xff] }
 0x1ca   :  { %14553 = vmatprep.mubr.msk.bf16.mxu0 %vm174_vm0, %v17234_v54  ;;  %v17570_v16 = vsel %vm1679_vm1, %v2065_v55, %v2069_v33  ;;  %v2073_v48 = vor.u32 %v2071_v1, %v2069_v33  ;;  %v22246_v15 = vmov 0   ;;  %vm5920_vm14 = vcmask 1041409  }
 0x1cb   :  { %v2081_v38 = vor.u32 %v2079_v24, %v2077_v58  ;;  %v2085_v60 = vrot.slane %v2083_v8, 1  ;;  %v17677_v39 = vrot.slane %v22246_v15, 1  ;;  %vm22075_vm15 = vcmask 1042434  }
 0x1cc   :  { %v17577_v49 = vsel %vm1679_vm1, %v2073_v48, %v2077_v58  ;;  %vm22074_vm2 = vcmask 1043459   ;;  %vm22070_vm3 = vcmask 1044484   ;;  %vm22073_vm4 = vcmask 1045509  }
 0x1cd   :  { %v17584_v5 = vsel %vm1679_vm1, %v2081_v38, %v2085_v60  ;;  %v2089_v36 = vor.u32 %v2087_v27, %v2085_v60  ;;  %22247 = vst [vmem:[#allocation25_spill] sm:$0xff] %v17677_v39  ;;  %v17682_v55 = vsel %vm1679_vm1, %v17541_v63, %v17677_v39  ;;  %vm22072_vm5 = vcmask 1046534  }
 0x1ce   :  { %vm22071_vm6 = vcmask 1047559   ;;  %vm6301_vm7 = vcmask 1043456  }
 0x1cf   :  { %v17592_v14 = vsel %vm1679_vm1, %v2089_v36, %v17522_v52  ;;  %v15702_v52 = vld [vmem:[#allocation2 + $0x98] sm:$0xff]  }
 0x1d0   :  { %14526 = vmatmul.mubr.msk.bf16.gmra.mxu1 %vm174_vm0, %v17562_v56 }
 0x1d1   :  { %14554 = vmatmul.mubr.msk.bf16.gmra.mxu0 %vm174_vm0, %v17241_v44  ;;  %14529 = vmatprep.mubr.msk.bf16.mxu1 %vm174_vm0, %v17570_v16 }
 0x1d2   :  { %14557 = vmatprep.mubr.msk.bf16.mxu0 %vm174_vm0, %v17274_v0 }
 0x1d8   :  { %14530 = vmatmul.mubr.msk.bf16.gmra.mxu1 %vm174_vm0, %v17577_v49 }
 0x1d9   :  { %14558 = vmatmul.mubr.msk.bf16.gmra.mxu0 %vm174_vm0, %v17286_v20  ;;  %14533 = vmatprep.mubr.msk.bf16.mxu1 %vm174_vm0, %v17584_v5 }
 0x1da   :  { %14561 = vmatprep.mubr.msk.bf16.mxu0 %vm174_vm0, %v17309_v51 }
 0x1e0   :  { %14534 = vmatmul.mubr.msk.bf16.gmra.mxu1 %vm174_vm0, %v17592_v14 }
 0x1e1   :  { %14562 = vmatmul.mubr.msk.bf16.gmra.mxu0 %vm174_vm0, %v17312_v10  ;;  %14577 = vmatprep.mubr.msk.bf16.mxu1 %vm174_vm0, %v16976_v53  ;;  %v15703_v53 = vld [vmem:[#allocation2 + $0x80] sm:$0xff]  }
 0x1e2   :  { %14565 = vmatprep.mubr.msk.bf16.mxu0 %vm174_vm0, %v17320_v19 }
 0x1e8   :  { %14578 = vmatmul.mubr.msk.bf16.vlgmr.msra.gmra.mxu1 %vm174_vm0, %v16980_v37 }
 0x1e9   :  { %14566 = vmatmul.mubr.msk.bf16.gmra.mxu0 %vm174_vm0, %v17323_v25  ;;  %14646 = vmatpush3.bf16.msra.mxu1 %v17424_v32  ;;  %v22239_v32 = vld [vmem:[#allocation37_spill] sm:$0xff] }
 0x1ea   :  { %14569 = vmatprep.mubr.msk.bf16.mxu0 %vm174_vm0, %v17408_v29  ;;  %14581 = vmatprep.mubr.msk.bf16.mxu1 %vm174_vm0, %v16982_v6 }
 0x1eb   :  { %14647 = vmatprep.subr.bf16.mxu1 %v15700_v30 }
 0x1ed   :  { %14648 = vmatpush3.bf16.msra.mxu1 %v15700_v30 }
 0x1ee   :  { %14717 = vmatprep.subr.bf16.mxu1 %v15702_v52 }
 0x1f0   :  { %14582 = vmatmul.mubr.msk.bf16.gmra.mxu1 %vm174_vm0, %v16993_v31 }
 0x1f1   :  { %14570 = vmatmul.mubr.msk.bf16.gmra.mxu0 %vm174_vm0, %v17513_v42  ;;  %14585 = vmatprep.mubr.msk.bf16.mxu1 %vm174_vm0, %v22216_v11 }
 0x1f2   :  { %14613 = vmatprep.mubr.msk.bf16.mxu0 %vm174_vm0, %v17365_v7  ;;  %v22243_v7 = vld [vmem:[#allocation23_spill] sm:$0xff] }
 0x1f8   :  { %14586 = vmatmul.mubr.msk.bf16.gmra.mxu1 %vm174_vm0, %v22240_v9 }
 0x1f9   :  { %14614 = vmatmul.mubr.msk.bf16.vlgmr.msra.gmra.mxu0 %vm174_vm0, %v22239_v32  ;;  %14589 = vmatprep.mubr.msk.bf16.mxu1 %vm174_vm0, %v22242_v46 }
 0x1fa   :  { %14617 = vmatprep.mubr.msk.bf16.mxu0 %vm174_vm0, %v22241_v40  ;;  %14682 = vmatpush3.bf16.msra.mxu0 %v17515_v22  ;;  %v15704_v22 = vld [vmem:[#allocation2 + $0x90] sm:$0xff]  }
 0x1fb   :  { %14683 = vmatprep.subr.bf16.mxu0 %v15703_v53 }
 0x1fe   :  { %14684 = vmatpush3.bf16.msra.mxu0 %v15703_v53 }
 0x200   :  { %14590 = vmatmul.mubr.msk.bf16.gmra.mxu1 %vm174_vm0, %v22244_v4 }
 0x201   :  { %14618 = vmatmul.mubr.msk.bf16.gmra.mxu0 %vm174_vm0, %v22243_v7  ;;  %14593 = vmatprep.mubr.msk.bf16.mxu1 %vm174_vm0, %v17143_v26 }
 0x202   :  { %14621 = vmatprep.mubr.msk.bf16.mxu0 %vm174_vm0, %v17456_v2 }
 0x208   :  { %14594 = vmatmul.mubr.msk.bf16.gmra.mxu1 %vm174_vm0, %v17148_v23 }
 0x209   :  { %14622 = vmatmul.mubr.msk.bf16.gmra.mxu0 %vm174_vm0, %v17497_v35  ;;  %14597 = vmatprep.mubr.msk.bf16.mxu1 %vm174_vm0, %v17168_v28 }
 0x20a   :  { %14625 = vmatprep.mubr.msk.bf16.mxu0 %vm174_vm0, %v17519_v61 }
 0x210   :  { %14598 = vmatmul.mubr.msk.bf16.gmra.mxu1 %vm174_vm0, %v17170_v45 }
 0x211   :  { %14626 = vmatmul.mubr.msk.bf16.gmra.mxu0 %vm174_vm0, %v17530_v50  ;;  %14601 = vmatprep.mubr.msk.bf16.mxu1 %vm174_vm0, %v17193_v21 }
 0x212   :  { %14629 = vmatprep.mubr.msk.bf16.mxu0 %vm174_vm0, %v17545_v13 }
 0x218   :  { %14602 = vmatmul.mubr.msk.bf16.gmra.mxu1 %vm174_vm0, %v17195_v43 }
 0x219   :  { %14630 = vmatmul.mubr.msk.bf16.gmra.mxu0 %vm174_vm0, %v17553_v57  ;;  %14605 = vmatprep.mubr.msk.bf16.mxu1 %vm174_vm0, %v17267_v17 }
 0x21a   :  { %14633 = vmatprep.mubr.msk.bf16.mxu0 %vm174_vm0, %v17562_v56 }
 0x220   :  { %14606 = vmatmul.mubr.msk.bf16.gmra.mxu1 %vm174_vm0, %v22236_v41 }
 0x221   :  { %14634 = vmatmul.mubr.msk.bf16.gmra.mxu0 %vm174_vm0, %v17570_v16  ;;  %14649 = vmatprep.mubr.msk.bf16.mxu1 %vm174_vm0, %v22237_v59 }
 0x222   :  { %14637 = vmatprep.mubr.msk.bf16.mxu0 %vm174_vm0, %v17577_v49 }
 0x228   :  { %14650 = vmatmul.mubr.msk.bf16.vlgmr.msra.gmra.mxu1 %vm174_vm0, %v22245_v12 }
 0x229   :  { %14638 = vmatmul.mubr.msk.bf16.gmra.mxu0 %vm174_vm0, %v17584_v5  ;;  %14718 = vmatpush3.bf16.msra.mxu1 %v15702_v52 }
 0x22a   :  { %14641 = vmatprep.mubr.msk.bf16.mxu0 %vm174_vm0, %v17592_v14  ;;  %14653 = vmatprep.mubr.msk.bf16.mxu1 %vm174_vm0, %v17125_v47 }
 0x22b   :  { %14719 = vmatprep.subr.bf16.mxu1 %v15704_v22  ;;  %v14435_v59 = vpop.f32.mrf.mxu0 }
 0x22d   :  { %14720 = vmatpush3.bf16.msra.mxu1 %v15704_v22  ;;  %v14439_v34 = vpop.f32.mrf.mxu1  ;;  %v2203_v33 = vpop.f32.mrf.mxu0 }
 0x22f   :  { %v2219_v47 = vpop.f32.mrf.mxu1  ;;  %v14436_v62 = vpop.f32.mrf.mxu0 }
 0x230   :  { %14654 = vmatmul.mubr.msk.bf16.gmra.mxu1 %vm174_vm0, %v17159_v18 }
 0x231   :  { %14642 = vmatmul.mubr.msk.bf16.gmra.mxu0 %vm174_vm0, %v17682_v55  ;;  %14657 = vmatprep.mubr.msk.bf16.mxu1 %vm174_vm0, %v17177_v3  ;;  %v14440_v58 = vpop.f32.mrf.mxu1  ;;  %v2206_v1 = vpop.f32.mrf.mxu0 }
 0x232   :  { %14685 = vmatprep.mubr.msk.bf16.mxu0 %vm174_vm0, %v16980_v37 }
 0x233   :  { %v2222_v63 = vpop.f32.mrf.mxu1 }
 0x235   :  { %v14443_v8 = vpop.f32.mrf.mxu1 }
 0x237   :  { %v14471_v24 = vpop.f32.mrf.mxu0  ;;  %v2235_v3 = vpop.f32.mrf.mxu1 }
 0x238   :  { %14658 = vmatmul.mubr.msk.bf16.gmra.mxu1 %vm174_vm0, %v17234_v54  ;;  %v17696_v18 = vadd.f32 %v14471_v24, %v14435_v59 }
 0x239   :  { %14686 = vmatmul.mubr.msk.bf16.vlgmr.msra.gmra.mxu0 %vm174_vm0, %v16982_v6  ;;  %14661 = vmatprep.mubr.msk.bf16.mxu1 %vm174_vm0, %v17241_v44  ;;  %v2421_v37 = vpop.f32.mrf.mxu0  ;;  %v14444_v60 = vpop.f32.mrf.mxu1 }
 0x23a   :  { %14689 = vmatprep.mubr.msk.bf16.mxu0 %vm174_vm0, %v16993_v31  ;;  %v17702_v48 = vadd.f32 %v2421_v37, %v2203_v33 }
 0x23b   :  { %v14472_v38 = vpop.f32.mrf.mxu0  ;;  %v2238_v36 = vpop.f32.mrf.mxu1 }
 0x23c   :  { %v17704_v27 = vadd.f32 %v14472_v38, %v14436_v62 }
 0x23d   :  { %v2424_v6 = vpop.f32.mrf.mxu0  ;;  %v14447_v31 = vpop.f32.mrf.mxu1 }
 0x23e   :  { %v17706_v30 = vadd.f32 %v2424_v6, %v2206_v1 }
 0x23f   :  { %v14475_v54 = vpop.f32.mrf.mxu0  ;;  %v2251_v53 = vpop.f32.mrf.mxu1 }
 0x240   :  { %14662 = vmatmul.mubr.msk.bf16.gmra.mxu1 %vm174_vm0, %v17274_v0  ;;  %v17712_v44 = vadd.f32 %v14475_v54, %v14439_v34 }
 0x241   :  { %14690 = vmatmul.mubr.msk.bf16.gmra.mxu0 %vm174_vm0, %v22216_v11  ;;  %14665 = vmatprep.mubr.msk.bf16.mxu1 %vm174_vm0, %v17286_v20  ;;  %v2437_v52 = vpop.f32.mrf.mxu0  ;;  %v14448_v59 = vpop.f32.mrf.mxu1 }
 0x242   :  { %14693 = vmatprep.mubr.msk.bf16.mxu0 %vm174_vm0, %v22240_v9  ;;  %v17718_v22 = vadd.f32 %v2437_v52, %v2219_v47 }
 0x243   :  { %v14476_v12 = vpop.f32.mrf.mxu0  ;;  %v2254_v62 = vpop.f32.mrf.mxu1 }
 0x244   :  { %v17720_v33 = vadd.f32 %v14476_v12, %v14440_v58 }
 0x245   :  { %v2440_v11 = vpop.f32.mrf.mxu0  ;;  %v14451_v9 = vpop.f32.mrf.mxu1 }
 0x246   :  { %v17722_v1 = vadd.f32 %v2440_v11, %v2222_v63 }
 0x247   :  { %v14479_v0 = vpop.f32.mrf.mxu0  ;;  %v2267_v47 = vpop.f32.mrf.mxu1 }
 0x248   :  { %14666 = vmatmul.mubr.msk.bf16.gmra.mxu1 %vm174_vm0, %v17309_v51  ;;  %v17728_v20 = vadd.f32 %v14479_v0, %v14443_v8 }
 0x249   :  { %14694 = vmatmul.mubr.msk.bf16.gmra.mxu0 %vm174_vm0, %v22242_v46  ;;  %14669 = vmatprep.mubr.msk.bf16.mxu1 %vm174_vm0, %v17312_v10  ;;  %v2453_v34 = vpop.f32.mrf.mxu0  ;;  %v14452_v24 = vpop.f32.mrf.mxu1 }
 0x24a   :  { %14697 = vmatprep.mubr.msk.bf16.mxu0 %vm174_vm0, %v22244_v4  ;;  %v17734_v58 = vadd.f32 %v2453_v34, %v2235_v3 }
 0x24b   :  { %v14480_v63 = vpop.f32.mrf.mxu0  ;;  %v17738_v38 = vpop.f32.mrf.mxu1 }
 0x24c   :  { %v17736_v37 = vadd.f32 %v14480_v63, %v14444_v60 }
 0x24d   :  { %v2456_v46 = vpop.f32.mrf.mxu0  ;;  %v14455_v4 = vpop.f32.mrf.mxu1 }
 0x24e   :  { %v17740_v51 = vadd.f32 %v2456_v46, %v2238_v36 }
 0x24f   :  { %v2283_v60 = vpop.f32.mrf.mxu1 }
 0x250   :  { %14670 = vmatmul.mubr.msk.bf16.gmra.mxu1 %vm174_vm0, %v17320_v19 }
 0x251   :  { %v14483_v8 = vpop.f32.mrf.mxu0  ;;  %14698 = vmatmul.mubr.msk.bf16.gmra.mxu0 %vm174_vm0, %v17143_v26  ;;  %14673 = vmatprep.mubr.msk.bf16.mxu1 %vm174_vm0, %v17323_v25  ;;  %v14456_v54 = vpop.f32.mrf.mxu1 }
 0x252   :  { %v17746_v10 = vadd.f32 %v14483_v8, %v14447_v31  ;;  %14701 = vmatprep.mubr.msk.bf16.mxu0 %vm174_vm0, %v17148_v23 }
 0x253   :  { %v2469_v3 = vpop.f32.mrf.mxu0  ;;  %v17756_v12 = vpop.f32.mrf.mxu1 }
 0x254   :  { %v17752_v6 = vadd.f32 %v2469_v3, %v2251_v53 }
 0x255   :  { %v14484_v36 = vpop.f32.mrf.mxu0  ;;  %v14459_v23 = vpop.f32.mrf.mxu1 }
 0x256   :  { %v17754_v52 = vadd.f32 %v14484_v36, %v14448_v59 }
 0x257   :  { %v2472_v26 = vpop.f32.mrf.mxu0  ;;  %v2299_v59 = vpop.f32.mrf.mxu1 }
 0x258   :  { %v17758_v19 = vadd.f32 %v2472_v26, %v2254_v62  ;;  %14674 = vmatmul.mubr.msk.bf16.gmra.mxu1 %vm174_vm0, %v17408_v29 }
 0x259   :  { %v14487_v31 = vpop.f32.mrf.mxu0  ;;  %14702 = vmatmul.mubr.msk.bf16.gmra.mxu0 %vm174_vm0, %v17168_v28  ;;  %14677 = vmatprep.mubr.msk.bf16.mxu1 %vm174_vm0, %v17513_v42  ;;  %v14460_v0 = vpop.f32.mrf.mxu1 }
 0x25a   :  { %v17764_v25 = vadd.f32 %v14487_v31, %v14451_v9  ;;  %14705 = vmatprep.mubr.msk.bf16.mxu0 %vm174_vm0, %v17170_v45 }
 0x25b   :  { %v2485_v53 = vpop.f32.mrf.mxu0  ;;  %v17776_v63 = vpop.f32.mrf.mxu1 }
 0x25c   :  { %v17770_v11 = vadd.f32 %v2485_v53, %v2267_v47 }
 0x25d   :  { %v14488_v62 = vpop.f32.mrf.mxu0  ;;  %v14463_v45 = vpop.f32.mrf.mxu1 }
 0x25e   :  { %v17772_v34 = vadd.f32 %v14488_v62, %v14452_v24 }
 0x25f   :  { %v17774_v28 = vpop.f32.mrf.mxu0  ;;  %v2315_v47 = vpop.f32.mrf.mxu1 }
 0x260   :  { %14678 = vmatmul.mubr.bf16.gmra.mxu1 %v22246_v15 }
 0x261   :  { %v14491_v29 = vpop.f32.mrf.mxu0  ;;  %14706 = vmatmul.mubr.msk.bf16.gmra.mxu0 %vm174_vm0, %v17193_v21  ;;  %14721 = vmatprep.mubr.msk.bf16.mxu1 %vm174_vm0, %v22239_v32  ;;  %v14464_v8 = vpop.f32.mrf.mxu1 }
 0x262   :  { %v17781_v42 = vadd.f32 %v14491_v29, %v14455_v4  ;;  %14709 = vmatprep.mubr.msk.bf16.mxu0 %vm174_vm0, %v17195_v43 }
 0x263   :  { %v2501_v9 = vpop.f32.mrf.mxu0  ;;  %v17793_v36 = vpop.f32.mrf.mxu1 }
 0x264   :  { %v17787_v24 = vadd.f32 %v2501_v9, %v2283_v60 }
 0x265   :  { %v14492_v46 = vpop.f32.mrf.mxu0  ;;  %v14507_v43 = vpop.f32.mrf.mxu1 }
 0x266   :  { %v17789_v3 = vadd.f32 %v14492_v46, %v14456_v54  ;;  %v2772_v60 = vadd.f32 %v14507_v43, %v17696_v18 }
 0x267   :  { %v17791_v21 = vpop.f32.mrf.mxu0  ;;  %v2643_v26 = vpop.f32.mrf.mxu1 }
 0x268   :  { %14722 = vmatmul.mubr.msk.bf16.vlgmr.msra.gmra.mxu1 %vm174_vm0, %v22241_v40 }
 0x269   :  { %v14495_v4 = vpop.f32.mrf.mxu0  ;;  %14710 = vmatmul.mubr.msk.bf16.gmra.mxu0 %vm174_vm0, %v17267_v17  ;;  %14725 = vmatprep.mubr.msk.bf16.mxu1 %vm174_vm0, %v22243_v7  ;;  %v2770_v17 = vadd.f32 %v2643_v26, %v17702_v48  ;;  %v14508_v62 = vpop.f32.mrf.mxu1 }
 0x26a   :  { %v17799_v32 = vadd.f32 %v14495_v4, %v14459_v23  ;;  %14713 = vmatprep.mubr.msk.bf16.mxu0 %vm174_vm0, %v22236_v41  ;;  %v2773_v40 = vadd.f32 %v14508_v62, %v17704_v27 }
 0x26b   :  { %v2517_v54 = vpop.f32.mrf.mxu0  ;;  %v2646_v18 = vpop.f32.mrf.mxu1 }
 0x26c   :  { %v17806_v31 = vadd.f32 %v2517_v54, %v2299_v59  ;;  %v17815_v41 = vadd.f32 %v2646_v18, %v17706_v30 }
 0x26d   :  { %v14496_v53 = vpop.f32.mrf.mxu0 }
 0x26e   :  { %v17809_v29 = vadd.f32 %v14496_v53, %v14460_v0  ;;  %v14511_v7 = vpop.f32.mrf.mxu1 }
 0x26f   :  { %v17812_v23 = vpop.f32.mrf.mxu0  ;;  %v2776_v59 = vadd.f32 %v14511_v7, %v17712_v44 }
 0x270   :  { %14726 = vmatmul.mubr.msk.bf16.gmra.mxu1 %vm174_vm0, %v17456_v2  ;;  %v2659_v0 = vpop.f32.mrf.mxu1 }
 0x271   :  { %v14499_v9 = vpop.f32.mrf.mxu0  ;;  %14714 = vmatmul.mubr.bf16.gmra.mxu0 %v22246_v15  ;;  %14729 = vmatprep.mubr.msk.bf16.mxu1 %vm174_vm0, %v17497_v35  ;;  %v2774_v30 = vadd.f32 %v2659_v0, %v17718_v22 }
 0x272   :  { %v17820_v48 = vadd.f32 %v14499_v9, %v14463_v45  ;;  %v14512_v43 = vpop.f32.mrf.mxu1 }
 0x273   :  { %v2533_v27 = vpop.f32.mrf.mxu0  ;;  %v2777_v26 = vadd.f32 %v14512_v43, %v17720_v33 }
 0x274   :  { %v17825_v46 = vadd.f32 %v2533_v27, %v2315_v47  ;;  %v2662_v45 = vpop.f32.mrf.mxu1 }
 0x275   :  { %v14500_v4 = vpop.f32.mrf.mxu0  ;;  %v17834_v44 = vadd.f32 %v2662_v45, %v17722_v1 }
 0x276   :  { %v17828_v54 = vadd.f32 %v14500_v4, %v14464_v8  ;;  %v14515_v35 = vpop.f32.mrf.mxu1 }
 0x277   :  { %v17831_v2 = vpop.f32.mrf.mxu0  ;;  %v2780_v22 = vadd.f32 %v14515_v35, %v17728_v20 }
 0x278   :  { %14730 = vmatmul.mubr.msk.bf16.gmra.mxu1 %vm174_vm0, %v17519_v61  ;;  %v2675_v33 = vpop.f32.mrf.mxu1 }
 0x279   :  { %v14543_v53 = vpop.f32.mrf.mxu0  ;;  %14733 = vmatprep.mubr.msk.bf16.mxu1 %vm174_vm0, %v17530_v50  ;;  %v2778_v18 = vadd.f32 %v2675_v33, %v17734_v58 }
 0x27a   :  { %v17838_v47 = vadd.f32 %v14543_v53, %v2772_v60  ;;  %v14516_v9 = vpop.f32.mrf.mxu1 }
 0x27b   :  { %v2855_v8 = vpop.f32.mrf.mxu0  ;;  %v2781_v27 = vadd.f32 %v14516_v9, %v17736_v37 }
 0x27c   :  { %v17843_v62 = vadd.f32 %v2855_v8, %v2770_v17  ;;  %v2678_v60 = vpop.f32.mrf.mxu1 }
 0x27d   :  { %v14544_v1 = vpop.f32.mrf.mxu0  ;;  %v17852_v20 = vadd.f32 %v2678_v60, %v17740_v51 }
 0x27e   :  { %v17846_v7 = vadd.f32 %v14544_v1, %v2773_v40 }
 0x27f   :  { %v17849_v61 = vpop.f32.mrf.mxu0 }
 0x280   :  { %v14519_v50 = vpop.f32.mrf.mxu1  ;;  %14734 = vmatmul.mubr.msk.bf16.gmra.mxu1 %vm174_vm0, %v17545_v13 }
 0x281   :  { %v14547_v0 = vpop.f32.mrf.mxu0  ;;  %v2784_v58 = vadd.f32 %v14519_v50, %v17746_v10  ;;  %14737 = vmatprep.mubr.msk.bf16.mxu1 %vm174_vm0, %v17553_v57 }
 0x282   :  { %v17856_v17 = vadd.f32 %v14547_v0, %v2776_v59  ;;  %v2691_v37 = vpop.f32.mrf.mxu1 }
 0x283   :  { %v2871_v40 = vpop.f32.mrf.mxu0  ;;  %v2782_v43 = vadd.f32 %v2691_v37, %v17752_v6 }
 0x284   :  { %v17861_v4 = vadd.f32 %v2871_v40, %v2774_v30  ;;  %v14520_v45 = vpop.f32.mrf.mxu1 }
 0x285   :  { %v14548_v51 = vpop.f32.mrf.mxu0  ;;  %v2785_v35 = vadd.f32 %v14520_v45, %v17754_v52 }
 0x286   :  { %v17864_v53 = vadd.f32 %v14548_v51, %v2777_v26  ;;  %v2694_v59 = vpop.f32.mrf.mxu1 }
 0x287   :  { %v17867_v13 = vpop.f32.mrf.mxu0  ;;  %v17870_v10 = vadd.f32 %v2694_v59, %v17758_v19 }
 0x288   :  { %v14523_v57 = vpop.f32.mrf.mxu1  ;;  %14738 = vmatmul.mubr.msk.bf16.gmra.mxu1 %vm174_vm0, %v17562_v56 }
 0x289   :  { %v14551_v8 = vpop.f32.mrf.mxu0  ;;  %v2788_v6 = vadd.f32 %v14523_v57, %v17764_v25  ;;  %14741 = vmatprep.mubr.msk.bf16.mxu1 %vm174_vm0, %v17570_v16 }
 0x28a   :  { %v17874_v30 = vadd.f32 %v14551_v8, %v2780_v22  ;;  %v2707_v52 = vpop.f32.mrf.mxu1 }
 0x28b   :  { %v2887_v26 = vpop.f32.mrf.mxu0  ;;  %v2786_v1 = vadd.f32 %v2707_v52, %v17770_v11 }
 0x28c   :  { %v17879_v33 = vadd.f32 %v2887_v26, %v2778_v18  ;;  %v14524_v9 = vpop.f32.mrf.mxu1 }
 0x28d   :  { %v14552_v19 = vpop.f32.mrf.mxu0  ;;  %v2789_v0 = vadd.f32 %v14524_v9, %v17772_v34 }
 0x28e   :  { %v17882_v60 = vadd.f32 %v14552_v19, %v2781_v27  ;;  %v17887_v22 = vpop.f32.mrf.mxu1 }
 0x28f   :  { %v17885_v56 = vpop.f32.mrf.mxu0 }
 0x290   :  { %v14527_v50 = vpop.f32.mrf.mxu1  ;;  %14742 = vmatmul.mubr.msk.bf16.gmra.mxu1 %vm174_vm0, %v17577_v49 }
 0x291   :  { %v14555_v25 = vpop.f32.mrf.mxu0  ;;  %v2792_v18 = vadd.f32 %v14527_v50, %v17781_v42  ;;  %14745 = vmatprep.mubr.msk.bf16.mxu1 %vm174_vm0, %v17584_v5 }
 0x292   :  { %v17891_v16 = vadd.f32 %v14555_v25, %v2784_v58  ;;  %v2723_v27 = vpop.f32.mrf.mxu1 }
 0x293   :  { %v2903_v11 = vpop.f32.mrf.mxu0  ;;  %v2790_v34 = vadd.f32 %v2723_v27, %v17787_v24 }
 0x294   :  { %v17896_v40 = vadd.f32 %v2903_v11, %v2782_v43  ;;  %v14528_v51 = vpop.f32.mrf.mxu1 }
 0x295   :  { %v14556_v37 = vpop.f32.mrf.mxu0  ;;  %v2793_v59 = vadd.f32 %v14528_v51, %v17789_v3 }
 0x296   :  { %v17899_v45 = vadd.f32 %v14556_v37, %v2785_v35  ;;  %v17904_v58 = vpop.f32.mrf.mxu1 }
 0x297   :  { %v17902_v49 = vpop.f32.mrf.mxu0 }
 0x298   :  { %v14531_v8 = vpop.f32.mrf.mxu1  ;;  %14746 = vmatmul.mubr.msk.bf16.gmra.mxu1 %vm174_vm0, %v17592_v14 }
 0x299   :  { %v14559_v42 = vpop.f32.mrf.mxu0  ;;  %v2796_v43 = vadd.f32 %v14531_v8, %v17799_v32  ;;  %14749 = vmatprep.mubr.msk.bf16.mxu1 %vm174_vm0, %v17682_v55 }
 0x29a   :  { %v17908_v5 = vadd.f32 %v14559_v42, %v2788_v6  ;;  %v2739_v35 = vpop.f32.mrf.mxu1 }
 0x29b   :  { %v2919_v24 = vpop.f32.mrf.mxu0  ;;  %v2794_v3 = vadd.f32 %v2739_v35, %v17806_v31 }
 0x29c   :  { %v17913_v57 = vadd.f32 %v2919_v24, %v2786_v1  ;;  %v14532_v52 = vpop.f32.mrf.mxu1 }
 0x29d   :  { %v14560_v26 = vpop.f32.mrf.mxu0  ;;  %v2797_v9 = vadd.f32 %v14532_v52, %v17809_v29 }
 0x29e   :  { %v17916_v19 = vadd.f32 %v14560_v26, %v2789_v0  ;;  %v17921_v6 = vpop.f32.mrf.mxu1 }
 0x29f   :  { %v17919_v14 = vpop.f32.mrf.mxu0 }
 0x2a0   :  { %v14535_v25 = vpop.f32.mrf.mxu1  ;;  %14750 = vmatmul.mubr.bf16.gmra.mxu1 %v22246_v15 }
 0x2a1   :  { %v14563_v32 = vpop.f32.mrf.mxu0  ;;  %v2800_v1 = vadd.f32 %v14535_v25, %v17820_v48 }
 0x2a2   :  { %v17924_v55 = vadd.f32 %v14563_v32, %v2792_v18  ;;  %v2755_v31 = vpop.f32.mrf.mxu1 }
 0x2a3   :  { %v2935_v50 = vpop.f32.mrf.mxu0  ;;  %v2798_v0 = vadd.f32 %v2755_v31, %v17825_v46 }
 0x2a4   :  { %v17927_v11 = vadd.f32 %v2935_v50, %v2790_v34  ;;  %v14536_v29 = vpop.f32.mrf.mxu1 }
 0x2a5   :  { %v14564_v27 = vpop.f32.mrf.mxu0  ;;  %v2801_v51 = vadd.f32 %v14536_v29, %v17828_v54 }
 0x2a6   :  { %v17930_v37 = vadd.f32 %v14564_v27, %v2793_v59  ;;  %v17935_v8 = vpop.f32.mrf.mxu1 }
 0x2a7   :  { %v17933_v42 = vpop.f32.mrf.mxu0 }
 0x2a8   :  { %v14579_v24 = vpop.f32.mrf.mxu1 }
 0x2a9   :  { %v14567_v18 = vpop.f32.mrf.mxu0  ;;  %v3196_v48 = vadd.f32 %v14579_v24, %v17838_v47 }
 0x2aa   :  { %v17937_v35 = vadd.f32 %v14567_v18, %v2796_v43  ;;  %v3067_v26 = vpop.f32.mrf.mxu1 }
 0x2ab   :  { %v2951_v34 = vpop.f32.mrf.mxu0  ;;  %v3194_v46 = vadd.f32 %v3067_v26, %v17843_v62 }
 0x2ac   :  { %v17940_v52 = vadd.f32 %v2951_v34, %v2794_v3  ;;  %v14580_v32 = vpop.f32.mrf.mxu1 }
 0x2ad   :  { %v14568_v59 = vpop.f32.mrf.mxu0  ;;  %v3197_v54 = vadd.f32 %v14580_v32, %v17846_v7 }
 0x2ae   :  { %v17943_v25 = vadd.f32 %v14568_v59, %v2797_v9  ;;  %v17948_v31 = vpop.f32.mrf.mxu1 }
 0x2af   :  { %v17946_v50 = vpop.f32.mrf.mxu0 }
 0x2b0   :  { %v14583_v27 = vpop.f32.mrf.mxu1 }
 0x2b1   :  { %v14571_v43 = vpop.f32.mrf.mxu0  ;;  %v3200_v47 = vadd.f32 %v14583_v27, %v17856_v17 }
 0x2b2   :  { %v17950_v29 = vadd.f32 %v14571_v43, %v2800_v1  ;;  %v3083_v18 = vpop.f32.mrf.mxu1 }
 0x2b3   :  { %v2967_v3 = vpop.f32.mrf.mxu0  ;;  %v17956_v62 = vadd.f32 %v3083_v18, %v17861_v4 }
 0x2b4   :  { %v17953_v24 = vadd.f32 %v2967_v3, %v2798_v0  ;;  %v14584_v34 = vpop.f32.mrf.mxu1 }
 0x2b5   :  { %22248 = vst [vmem:[#allocation22_spill] sm:$0xff] %v17956_v62  ;;  %v14572_v9 = vpop.f32.mrf.mxu0  ;;  %v3201_v26 = vadd.f32 %v14584_v34, %v17864_v53 }
 0x2b6   :  { %v17958_v7 = vadd.f32 %v14572_v9, %v2801_v51  ;;  %v17963_v32 = vpop.f32.mrf.mxu1 }
 0x2b7   :  { %v17961_v59 = vpop.f32.mrf.mxu0 }
 0x2b8   :  { %v14587_v43 = vpop.f32.mrf.mxu1 }
 0x2b9   :  { %v14615_v1 = vpop.f32.mrf.mxu0  ;;  %v3204_v0 = vadd.f32 %v14587_v43, %v17874_v30 }
 0x2ba   :  { %v17965_v17 = vadd.f32 %v14615_v1, %v3196_v48  ;;  %v3099_v3 = vpop.f32.mrf.mxu1 }
 0x2bb   :  { %v3279_v27 = vpop.f32.mrf.mxu0  ;;  %v17971_v18 = vadd.f32 %v3099_v3, %v17879_v33 }
 0x2bc   :  { %v17968_v4 = vadd.f32 %v3279_v27, %v3194_v46  ;;  %v14588_v9 = vpop.f32.mrf.mxu1 }
 0x2bd   :  { %22249 = vst [vmem:[#allocation24_spill] sm:$0xff] %v17971_v18  ;;  %v14616_v51 = vpop.f32.mrf.mxu0  ;;  %v3205_v34 = vadd.f32 %v14588_v9, %v17882_v60 }
 0x2be   :  { %v17973_v53 = vadd.f32 %v14616_v51, %v3197_v54  ;;  %v17978_v15 = vpop.f32.mrf.mxu1 }
 0x2bf   :  { %v17976_v39 = vpop.f32.mrf.mxu0 }
 0x2c0   :  { %v14591_v1 = vpop.f32.mrf.mxu1 }
 0x2c1   :  { %v14619_v48 = vpop.f32.mrf.mxu0  ;;  %v3208_v46 = vadd.f32 %v14591_v1, %v17891_v16 }
 0x2c2   :  { %v17980_v30 = vadd.f32 %v14619_v48, %v3200_v47  ;;  %v3115_v33 = vpop.f32.mrf.mxu1 }
 0x2c3   :  { %v17983_v43 = vpop.f32.mrf.mxu0  ;;  %v17986_v27 = vadd.f32 %v3115_v33, %v17896_v40 }
 0x2c4   :  { %v14592_v3 = vpop.f32.mrf.mxu1 }
 0x2c5   :  { %22250 = vst [vmem:[#allocation38_spill] sm:$0xff] %v17986_v27  ;;  %v14620_v54 = vpop.f32.mrf.mxu0  ;;  %v3209_v60 = vadd.f32 %v14592_v3, %v17899_v45 }
 0x2c6   :  { %v17988_v51 = vadd.f32 %v14620_v54, %v3201_v26  ;;  %v17993_v18 = vpop.f32.mrf.mxu1 }
 0x2c7   :  { %v17991_v9 = vpop.f32.mrf.mxu0  ;;  %22252 = vst [vmem:[#allocation27_spill] sm:$0xff] %v17993_v18 }
 0x2c8   :  { %22251 = vst [vmem:[#allocation26_spill] sm:$0xff] %v17991_v9  ;;  %v14595_v48 = vpop.f32.mrf.mxu1 }
 0x2c9   :  { %v14623_v47 = vpop.f32.mrf.mxu0  ;;  %v3212_v16 = vadd.f32 %v14595_v48, %v17908_v5 }
 0x2ca   :  { %v17995_v62 = vadd.f32 %v14623_v47, %v3204_v0  ;;  %v3131_v40 = vpop.f32.mrf.mxu1 }
 0x2cb   :  { %v17998_v1 = vpop.f32.mrf.mxu0  ;;  %v18001_v33 = vadd.f32 %v3131_v40, %v17913_v57 }
 0x2cc   :  { %v14596_v54 = vpop.f32.mrf.mxu1 }
 0x2cd   :  { %22253 = vst [vmem:[#allocation14_spill] sm:$0xff] %v18001_v33  ;;  %v14624_v26 = vpop.f32.mrf.mxu0  ;;  %v3213_v45 = vadd.f32 %v14596_v54, %v17916_v19 }
 0x2ce   :  { %v18003_v27 = vadd.f32 %v14624_v26, %v3205_v34  ;;  %v18008_v18 = vpop.f32.mrf.mxu1 }
 0x2cf   :  { %v18006_v3 = vpop.f32.mrf.mxu0  ;;  %22255 = vst [vmem:[#allocation39_spill] sm:$0xff] %v18008_v18 }
 0x2d0   :  { %22254 = vst [vmem:[#allocation35_spill] sm:$0xff] %v18006_v3  ;;  %v14599_v47 = vpop.f32.mrf.mxu1 }
 0x2d1   :  { %v14627_v0 = vpop.f32.mrf.mxu0  ;;  %v3216_v5 = vadd.f32 %v14599_v47, %v17924_v55 }
 0x2d2   :  { %v18010_v9 = vadd.f32 %v14627_v0, %v3208_v46  ;;  %v3147_v57 = vpop.f32.mrf.mxu1 }
 0x2d3   :  { %v18013_v48 = vpop.f32.mrf.mxu0  ;;  %v18016_v40 = vadd.f32 %v3147_v57, %v17927_v11 }
 0x2d4   :  { %v14600_v26 = vpop.f32.mrf.mxu1 }
 0x2d5   :  { %22256 = vst [vmem:[#allocation40_spill] sm:$0xff] %v18016_v40  ;;  %v14628_v34 = vpop.f32.mrf.mxu0  ;;  %v3217_v19 = vadd.f32 %v14600_v26, %v17930_v37 }
 0x2d6   :  { %v18018_v33 = vadd.f32 %v14628_v34, %v3209_v60  ;;  %v18023_v18 = vpop.f32.mrf.mxu1 }
 0x2d7   :  { %v18021_v54 = vpop.f32.mrf.mxu0  ;;  %22258 = vst [vmem:[#allocation12_spill] sm:$0xff] %v18023_v18 }
 0x2d8   :  { %22257 = vst [vmem:[#allocation36_spill] sm:$0xff] %v18021_v54  ;;  %v14603_v0 = vpop.f32.mrf.mxu1 }
 0x2d9   :  { %v14631_v46 = vpop.f32.mrf.mxu0  ;;  %v3220_v55 = vadd.f32 %v14603_v0, %v17937_v35 }
 0x2da   :  { %v18025_v3 = vadd.f32 %v14631_v46, %v3212_v16  ;;  %v3163_v11 = vpop.f32.mrf.mxu1 }
 0x2db   :  { %v18028_v47 = vpop.f32.mrf.mxu0  ;;  %v18031_v57 = vadd.f32 %v3163_v11, %v17940_v52 }
 0x2dc   :  { %22259 = vst [vmem:[#allocation13_spill] sm:$0xff] %v18028_v47  ;;  %v14604_v34 = vpop.f32.mrf.mxu1 }
 0x2dd   :  { %22260 = vst [vmem:[#allocation37_spill] sm:$0xff] %v18031_v57  ;;  %v14632_v60 = vpop.f32.mrf.mxu0  ;;  %v3221_v37 = vadd.f32 %v14604_v34, %v17943_v25 }
 0x2de   :  { %v18033_v40 = vadd.f32 %v14632_v60, %v3213_v45  ;;  %v18038_v18 = vpop.f32.mrf.mxu1 }
 0x2df   :  { %v18036_v26 = vpop.f32.mrf.mxu0  ;;  %22262 = vst [vmem:[#allocation19_spill] sm:$0xff] %v18038_v18 }
 0x2e0   :  { %22261 = vst [vmem:[#allocation11_spill] sm:$0xff] %v18036_v26  ;;  %v14607_v46 = vpop.f32.mrf.mxu1 }
 0x2e1   :  { %v14635_v16 = vpop.f32.mrf.mxu0  ;;  %v3224_v35 = vadd.f32 %v14607_v46, %v17950_v29 }
 0x2e2   :  { %v18040_v54 = vadd.f32 %v14635_v16, %v3216_v5  ;;  %v3179_v52 = vpop.f32.mrf.mxu1 }
 0x2e3   :  { %v18043_v0 = vpop.f32.mrf.mxu0  ;;  %v18046_v11 = vadd.f32 %v3179_v52, %v17953_v24 }
 0x2e4   :  { %22263 = vst [vmem:[#allocation17_spill] sm:$0xff] %v18043_v0  ;;  %v14608_v60 = vpop.f32.mrf.mxu1 }
 0x2e5   :  { %22264 = vst [vmem:[#allocation23_spill] sm:$0xff] %v18046_v11  ;;  %v14636_v45 = vpop.f32.mrf.mxu0  ;;  %v3225_v25 = vadd.f32 %v14608_v60, %v17958_v7 }
 0x2e6   :  { %v18048_v57 = vadd.f32 %v14636_v45, %v3217_v19  ;;  %v18053_v18 = vpop.f32.mrf.mxu1 }
 0x2e7   :  { %v18051_v34 = vpop.f32.mrf.mxu0  ;;  %22266 = vst [vmem:[#allocation16_spill] sm:$0xff] %v18053_v18 }
 0x2e8   :  { %22265 = vst [vmem:[#allocation21_spill] sm:$0xff] %v18051_v34  ;;  %v14651_v16 = vpop.f32.mrf.mxu1 }
 0x2e9   :  { %v14639_v5 = vpop.f32.mrf.mxu0  ;;  %v18056_v29 = vadd.f32 %v14651_v16, %v17965_v17 }
 0x2ea   :  { %v3432_v26 = vadd.f32 %v14639_v5, %v3220_v55  ;;  %v3488_v24 = vpop.f32.mrf.mxu1 }
 0x2eb   :  { %v18058_v46 = vpop.f32.mrf.mxu0  ;;  %v18061_v52 = vadd.f32 %v3488_v24, %v17968_v4 }
 0x2ec   :  { %22267 = vst [vmem:[#allocation41_spill] sm:$0xff] %v18058_v46  ;;  %v14652_v45 = vpop.f32.mrf.mxu1 }
 0x2ed   :  { %v14640_v19 = vpop.f32.mrf.mxu0  ;;  %v18064_v7 = vadd.f32 %v14652_v45, %v17973_v53 }
 0x2ee   :  { %v3433_v11 = vadd.f32 %v14640_v19, %v3221_v37  ;;  %v18068_v18 = vpop.f32.mrf.mxu1 }
 0x2ef   :  { %v18066_v60 = vpop.f32.mrf.mxu0 }
 0x2f0   :  { %22268 = vst [vmem:[#allocation42_spill] sm:$0xff] %v18066_v60  ;;  %v14655_v5 = vpop.f32.mrf.mxu1 }
 0x2f1   :  { %v14643_v55 = vpop.f32.mrf.mxu0  ;;  %v18071_v16 = vadd.f32 %v14655_v5, %v17980_v30 }
 0x2f2   :  { %v3436_v17 = vadd.f32 %v14643_v55, %v3224_v35  ;;  %v18075_v4 = vpop.f32.mrf.mxu1 }
 0x2f3   :  { %v18073_v46 = vpop.f32.mrf.mxu0 }
 0x2f4   :  { %22269 = vst [vmem:[#allocation43_spill] sm:$0xff] %v18073_v46  ;;  %v14656_v34 = vpop.f32.mrf.mxu1 }
 0x2f5   :  { %v14644_v24 = vpop.f32.mrf.mxu0  ;;  %v18078_v53 = vadd.f32 %v14656_v34, %v17988_v51 }
 0x2f6   :  { %v3437_v37 = vadd.f32 %v14644_v24, %v3225_v25  ;;  %v18082_v45 = vpop.f32.mrf.mxu1 }
 0x2f7   :  { %22270 = vst [vmem:[#allocation44_spill] sm:$0xff] %v18078_v53  ;;  %v18080_v19 = vpop.f32.mrf.mxu0 }
 0x2f8   :  { %22271 = vst [vmem:[#allocation45_spill] sm:$0xff] %v18080_v19  ;;  %v14659_v35 = vpop.f32.mrf.mxu1 }
 0x2f9   :  { %v18084_v60 = vpop.f32.mrf.mxu0  ;;  %v18087_v30 = vadd.f32 %v14659_v35, %v17995_v62 }
 0x2fa   :  { %v18089_v5 = vpop.f32.mrf.mxu1 }
 0x2fb   :  { %22272 = vst [vmem:[#allocation46_spill] sm:$0xff] %v18087_v30  ;;  %v3697_v55 = vpop.f32.mrf.mxu0  ;;  %22273 = vst [vmem:[#allocation47_spill] sm:$0xff] %v18089_v5 }
 0x2fc   :  { %v14660_v0 = vpop.f32.mrf.mxu1 }
 0x2fd   :  { %v18091_v46 = vpop.f32.mrf.mxu0  ;;  %v18094_v25 = vadd.f32 %v14660_v0, %v18003_v27 }
 0x2fe   :  { %v18098_v34 = vpop.f32.mrf.mxu1 }
 0x2ff   :  { %22274 = vst [vmem:[#allocation48_spill] sm:$0xff] %v18094_v25  ;;  %v18096_v51 = vpop.f32.mrf.mxu0  ;;  %22275 = vst [vmem:[#allocation49_spill] sm:$0xff] %v18098_v34 }
 0x300   :  { %v14663_v19 = vpop.f32.mrf.mxu1 }
 0x301   :  { %v18100_v24 = vpop.f32.mrf.mxu0  ;;  %v18103_v47 = vadd.f32 %v14663_v19, %v18010_v9 }
 0x302   :  { %v18107_v35 = vpop.f32.mrf.mxu1 }
 0x303   :  { %22276 = vst [vmem:[#allocation50_spill] sm:$0xff] %v18103_v47  ;;  %v18105_v62 = vpop.f32.mrf.mxu0  ;;  %22277 = vst [vmem:[#allocation51_spill] sm:$0xff] %v18107_v35 }
 0x304   :  { %v14664_v5 = vpop.f32.mrf.mxu1 }
 0x305   :  { %v18109_v30 = vpop.f32.mrf.mxu0  ;;  %v18112_v27 = vadd.f32 %v14664_v5, %v18018_v33 }
 0x306   :  { %22278 = vst [vmem:[#allocation52_spill] sm:$0xff] %v18109_v30  ;;  %v18116_v25 = vpop.f32.mrf.mxu1 }
 0x307   :  { %22279 = vst [vmem:[#allocation53_spill] sm:$0xff] %v18112_v27  ;;  %v18114_v0 = vpop.f32.mrf.mxu0  ;;  %22280 = vst [vmem:[#allocation54_spill] sm:$0xff] %v18116_v25 }
 0x308   :  { %v14667_v53 = vpop.f32.mrf.mxu1 }
 0x309   :  { %v18118_v34 = vpop.f32.mrf.mxu0  ;;  %v18121_v9 = vadd.f32 %v14667_v53, %v18025_v3 }
 0x30a   :  { %22281 = vst [vmem:[#allocation55_spill] sm:$0xff] %v18118_v34  ;;  %v18125_v47 = vpop.f32.mrf.mxu1 }
 0x30b   :  { %22282 = vst [vmem:[#allocation56_spill] sm:$0xff] %v18121_v9  ;;  %v18123_v19 = vpop.f32.mrf.mxu0  ;;  %22283 = vst [vmem:[#allocation57_spill] sm:$0xff] %v18125_v47 }
 0x30c   :  { %v14668_v35 = vpop.f32.mrf.mxu1 }
 0x30d   :  { %v18127_v30 = vpop.f32.mrf.mxu0  ;;  %v18130_v33 = vadd.f32 %v14668_v35, %v18033_v40 }
 0x30e   :  { %22284 = vst [vmem:[#allocation58_spill] sm:$0xff] %v18127_v30  ;;  %v18132_v5 = vpop.f32.mrf.mxu1 }
 0x30f   :  { %22285 = vst [vmem:[#allocation59_spill] sm:$0xff] %v18130_v33  ;;  %22286 = vst [vmem:[#allocation60_spill] sm:$0xff] %v18132_v5  ;;  %v18134_v25 = vpop.f32.mrf.mxu0 }
 0x310   :  { %v14671_v27 = vpop.f32.mrf.mxu1  ;;  %22287 = vst [vmem:[#allocation61_spill] sm:$0xff] %v18134_v25 }
 0x311   :  { %v18137_v34 = vadd.f32 %v14671_v27, %v18040_v54  ;;  %v18141_v9 = vpop.f32.mrf.mxu0 }
 0x312   :  { %v18139_v3 = vpop.f32.mrf.mxu1  ;;  %22290 = vst [vmem:[#allocation64_spill] sm:$0xff] %v18141_v9 }
 0x313   :  { %22288 = vst [vmem:[#allocation62_spill] sm:$0xff] %v18137_v34  ;;  %22289 = vst [vmem:[#allocation63_spill] sm:$0xff] %v18139_v3  ;;  %v18148_v35 = vpop.f32.mrf.mxu0 }
 0x314   :  { %v14672_v53 = vpop.f32.mrf.mxu1 }
 0x315   :  { %v18144_v47 = vadd.f32 %v14672_v53, %v18048_v57  ;;  %v18154_v54 = vpop.f32.mrf.mxu0 }
 0x316   :  { %v18146_v30 = vpop.f32.mrf.mxu1 }
 0x317   :  { %22291 = vst [vmem:[#allocation65_spill] sm:$0xff] %v18144_v47  ;;  %v18160_v9 = vpop.f32.mrf.mxu0 }
 0x318   :  { %v14675_v40 = vpop.f32.mrf.mxu1 }
 0x319   :  { %v18150_v33 = vadd.f32 %v14675_v40, %v3432_v26  ;;  %v2983_v26 = vadd.f32 %v17849_v61, %v17815_v41  ;;  %v18168_v40 = vpop.f32.mrf.mxu0  ;;  %v2537_v41 = vadd.f32 %v17831_v2, %v17793_v36  ;;  %v2987_v61 = vadd.f32 %v17867_v13, %v17834_v44 }
 0x31a   :  { %v18152_v5 = vpop.f32.mrf.mxu1 }
 0x31b   :  { %22292 = vst [vmem:[#allocation66_spill] sm:$0xff] %v18150_v33  ;;  %22293 = vst [vmem:[#allocation67_spill] sm:$0xff] %v18152_v5 }
 0x31c   :  { %v14676_v25 = vpop.f32.mrf.mxu1 }
 0x31d   :  { %v18156_v27 = vadd.f32 %v14676_v25, %v3433_v11  ;;  %v2489_v11 = vadd.f32 %v17774_v28, %v17738_v38  ;;  %v3195_v25 = vadd.f32 %v17948_v31, %v2983_v26  ;;  %v3824_v31 = vadd.f32 %v3697_v55, %v18061_v52  ;;  %v22295_v52 = vld [vmem:[#allocation26_spill] sm:$0xff] }
 0x31e   :  { %v18158_v34 = vpop.f32.mrf.mxu1 }
 0x31f   :  { %v2787_v38 = vadd.f32 %v17887_v22, %v2489_v11  ;;  %v3407_v28 = vadd.f32 %v17976_v39, %v3195_v25  ;;  %v3826_v39 = vadd.f32 %v18084_v60, %v18056_v29  ;;  %v22296_v60 = vld [vmem:[#allocation27_spill] sm:$0xff] }
 0x320   :  { %v14679_v3 = vpop.f32.mrf.mxu1  ;;  %v22298_v11 = vld [vmem:[#allocation35_spill] sm:$0xff] }
 0x321   :  { %v18162_v57 = vadd.f32 %v14679_v3, %v3436_v17  ;;  %v2505_v17 = vadd.f32 %v17791_v21, %v17756_v12  ;;  %v2521_v3 = vadd.f32 %v17812_v23, %v17776_v63  ;;  %v18190_v12 = vpop.f32.mrf.mxu0  ;;  %v2995_v63 = vadd.f32 %v17902_v49, %v17870_v10 }
 0x322   :  { %v18164_v53 = vpop.f32.mrf.mxu1  ;;  %v2799_v23 = vadd.f32 %v17935_v8, %v2537_v41  ;;  %v2999_v44 = vadd.f32 %v17919_v14, %v2787_v38  ;;  %v3199_v49 = vadd.f32 %v17963_v32, %v2987_v61  ;;  %v22297_v32 = vld [vmem:[#allocation24_spill] sm:$0xff] }
 0x323   :  { %v2791_v21 = vadd.f32 %v17904_v58, %v2505_v17  ;;  %v2795_v36 = vadd.f32 %v17921_v6, %v2521_v3  ;;  %v3827_v6 = vadd.f32 %v18091_v46, %v18064_v7  ;;  %v3207_v55 = vadd.f32 %v22296_v60, %v2995_v63  ;;  %v22299_v17 = vld [vmem:[#allocation39_spill] sm:$0xff]  ;;  %v22301_v61 = vld [vmem:[#allocation36_spill] sm:$0xff] }
 0x324   :  { %v14680_v47 = vpop.f32.mrf.mxu1  ;;  %v18208_v22 = vadd.f32 %v17961_v59, %v2799_v23  ;;  %v3411_v59 = vadd.f32 %v22295_v52, %v3199_v49  ;;  %v3414_v26 = vadd.f32 %v17998_v1, %v22297_v32  ;;  %v18233_v3 = vadd.f32 %v22299_v17, %v2999_v44  ;;  %v22304_v60 = vld [vmem:[#allocation47_spill] sm:$0xff] }
 0x325   :  { %v18170_v33 = vadd.f32 %v14680_v47, %v3437_v37  ;;  %v2991_v37 = vadd.f32 %v17885_v56, %v17852_v20  ;;  %v3616_v20 = vadd.f32 %v18068_v18, %v3407_v28  ;;  %v3003_v56 = vadd.f32 %v17933_v42, %v2791_v21  ;;  %v18215_v18 = vpop.f32.mrf.mxu0  ;;  %v22294_v42 = vld [vmem:[#allocation22_spill] sm:$0xff] }
 0x326   :  { %v18172_v5 = vpop.f32.mrf.mxu1  ;;  %v18205_v10 = vadd.f32 %v17946_v50, %v2795_v36  ;;  %v3410_v50 = vadd.f32 %v17983_v43, %v22294_v42  ;;  %v22300_v43 = vld [vmem:[#allocation38_spill] sm:$0xff]  ;;  %v3620_v21 = vadd.f32 %v18082_v45, %v3411_v59 }
 0x327   :  { %v3203_v14 = vadd.f32 %v17978_v15, %v2991_v37  ;;  %v3825_v8 = vadd.f32 %v18096_v51, %v3616_v20  ;;  %v18237_v41 = vadd.f32 %v18013_v48, %v22300_v43  ;;  %v18243_v38 = vpop.f32.mrf.mxu0 }
 0x328   :  { %v14723_v47 = vpop.f32.mrf.mxu1  ;;  %v3619_v1 = vadd.f32 %v18075_v4, %v3410_v50  ;;  %v3830_v4 = vadd.f32 %v18100_v24, %v18071_v16 }
 0x329   :  { %v18217_v29 = vadd.f32 %v14723_v47, %v3826_v39  ;;  %v3415_v25 = vadd.f32 %v22298_v11, %v3203_v14  ;;  %v18240_v47 = vadd.f32 %v22301_v61, %v3207_v55  ;;  %v22303_v14 = vld [vmem:[#allocation52_spill] sm:$0xff]  ;;  %v18268_v42 = vpop.f32.mrf.mxu0  ;;  %v3623_v55 = vadd.f32 %v22304_v60, %v3414_v26 }
 0x32a   :  { %v3906_v2 = vpop.f32.mrf.mxu1  ;;  %v3828_v36 = vadd.f32 %v18105_v62, %v3619_v1  ;;  %v3829_v62 = vadd.f32 %v18114_v0, %v3620_v21  ;;  %v22305_v1 = vld [vmem:[#allocation12_spill] sm:$0xff] }
 0x32b   :  { %v18201_v13 = vadd.f32 %v3906_v2, %v3824_v31  ;;  %v4139_v28 = vmul.f32 %v18217_v29, %v18217_v29  ;;  %v4070_v44 = vsel %vm174_vm0, %v18217_v29, 0.0  ;;  %v3832_v26 = vadd.f32 %v18123_v19, %v3623_v55  ;;  %v22308_v19 = vld [vmem:[#allocation55_spill] sm:$0xff] }
 0x32c   :  { %v14724_v58 = vpop.f32.mrf.mxu1 }
 0x32d   :  { %v4137_v46 = vmul.f32 %v18201_v13, %v18201_v13  ;;  %v18228_v7 = vadd.f32 %v14724_v58, %v3827_v6  ;;  %v4067_v31 = vsel %vm174_vm0, %v18201_v13, 0.0  ;;  %v22302_v58 = vld [vmem:[#allocation44_spill] sm:$0xff]  ;;  %v4172_v50 = vsel %vm174_vm0, %v4139_v28, 0.0 }
 0x32e   :  { %v3909_v15 = vpop.f32.mrf.mxu1  ;;  %v3831_v45 = vadd.f32 %v22303_v14, %v22302_v58 }
 0x32f   :  { %v18230_v51 = vadd.f32 %v3909_v15, %v3825_v8  ;;  %v4169_v20 = vsel %vm174_vm0, %v4137_v46, 0.0  ;;  %v4140_v39 = vmul.f32 %v18228_v7, %v18228_v7  ;;  %v4072_v52 = vsel %vm174_vm0, %v18228_v7, 0.0 }
 0x330   :  { %v14727_v37 = vpop.f32.mrf.mxu1 }
 0x331   :  { %v4068_v63 = vsel %vm174_vm0, %v18230_v51, 0.0  ;;  %v4138_v48 = vmul.f32 %v18230_v51, %v18230_v51  ;;  %v18273_v59 = vadd.f32 %v14727_v37, %v3830_v4  ;;  %v4174_v17 = vsel %vm174_vm0, %v4140_v39, 0.0 }
 0x332   :  { %v4069_v23 = vadd.f32 %v4068_v63, %v4067_v31  ;;  %v3922_v2 = vpop.f32.mrf.mxu1  ;;  %v18286_v37 = vadd.f32 %v22305_v1, %v3003_v56  ;;  %v22306_v56 = vld [vmem:[#allocation49_spill] sm:$0xff]  ;;  %v22312_v1 = vld [vmem:[#allocation14_spill] sm:$0xff] }
 0x333   :  { %v4170_v49 = vsel %vm174_vm0, %v4138_v48, 0.0  ;;  %v18265_v16 = vadd.f32 %v3922_v2, %v3828_v36  ;;  %v18289_v48 = vpop.f32.mrf.mxu0  ;;  %v4143_v21 = vmul.f32 %v18273_v59, %v18273_v59  ;;  %v3624_v2 = vadd.f32 %v22306_v56, %v3415_v25  ;;  %v22311_v25 = vld [vmem:[#allocation61_spill] sm:$0xff] }
 0x334   :  { %v4071_v6 = vadd.f32 %v4070_v44, %v4069_v23  ;;  %v4171_v8 = vadd.f32 %v4170_v49, %v4169_v20  ;;  %v14728_v24 = vpop.f32.mrf.mxu1  ;;  %v22307_v44 = vld [vmem:[#allocation46_spill] sm:$0xff]  ;;  %v4078_v14 = vsel %vm174_vm0, %v18273_v59, 0.0 }
 0x335   :  { %v4141_v11 = vmul.f32 %v18265_v16, %v18265_v16  ;;  %v4074_v0 = vsel %vm174_vm0, %v18265_v16, 0.0  ;;  %v18281_v43 = vadd.f32 %v14728_v24, %v3831_v45  ;;  %v3834_v20 = vadd.f32 %v22308_v19, %v22307_v44  ;;  %v22309_v24 = vld [vmem:[#allocation48_spill] sm:$0xff]  ;;  %v22315_v19 = vld [vmem:[#allocation11_spill] sm:$0xff] }
 0x336   :  { %v4173_v32 = vadd.f32 %v4172_v50, %v4171_v8  ;;  %v4073_v15 = vadd.f32 %v4072_v52, %v4071_v6  ;;  %v3925_v46 = vpop.f32.mrf.mxu1  ;;  %v3833_v52 = vadd.f32 %v22311_v25, %v3624_v2  ;;  %v22318_v25 = vld [vmem:[#allocation64_spill] sm:$0xff] }
 0x337   :  { %v18283_v61 = vadd.f32 %v3925_v46, %v3829_v62  ;;  %v4176_v4 = vsel %vm174_vm0, %v4141_v11, 0.0  ;;  %v4144_v45 = vmul.f32 %v18281_v43, %v18281_v43  ;;  %v22310_v62 = vld [vmem:[#allocation58_spill] sm:$0xff]  ;;  %v4180_v11 = vsel %vm174_vm0, %v4143_v21, 0.0 }
 0x338   :  { %v4075_v28 = vadd.f32 %v4074_v0, %v4073_v15  ;;  %v4175_v31 = vadd.f32 %v4174_v17, %v4173_v32  ;;  %v14731_v63 = vpop.f32.mrf.mxu1  ;;  %v3835_v50 = vadd.f32 %v22310_v62, %v22309_v24  ;;  %v18311_v15 = vpop.f32.mrf.mxu0  ;;  %v4080_v46 = vsel %vm174_vm0, %v18281_v43, 0.0 }
 0x339   :  { %v4076_v36 = vsel %vm174_vm0, %v18283_v61, 0.0  ;;  %v4142_v23 = vmul.f32 %v18283_v61, %v18283_v61  ;;  %v18316_v17 = vadd.f32 %v14731_v63, %v3834_v20  ;;  %v4182_v2 = vsel %vm174_vm0, %v4144_v45, 0.0 }
 0x33a   :  { %v4177_v39 = vadd.f32 %v4176_v4, %v4175_v31  ;;  %v4077_v49 = vadd.f32 %v4076_v36, %v4075_v28  ;;  %v3938_v58 = vpop.f32.mrf.mxu1  ;;  %v22314_v31 = vld [vmem:[#allocation51_spill] sm:$0xff]  ;;  %v3423_v20 = vadd.f32 %v22315_v19, %v18233_v3  ;;  %v22316_v3 = vld [vmem:[#allocation54_spill] sm:$0xff] }
 0x33b   :  { %v4178_v6 = vsel %vm174_vm0, %v4142_v23, 0.0  ;;  %v18306_v8 = vadd.f32 %v3938_v58, %v3832_v26  ;;  %v22313_v26 = vld [vmem:[#allocation13_spill] sm:$0xff]  ;;  %v3627_v4 = vadd.f32 %v22314_v31, %v18237_v41  ;;  %v4147_v45 = vmul.f32 %v18316_v17, %v18316_v17 }
 0x33c   :  { %v4079_v60 = vadd.f32 %v4078_v14, %v4077_v49  ;;  %v4179_v55 = vadd.f32 %v4178_v6, %v4177_v39  ;;  %v14732_v32 = vpop.f32.mrf.mxu1  ;;  %v3422_v28 = vadd.f32 %v22313_v26, %v22312_v1  ;;  %v18334_v14 = vpop.f32.mrf.mxu0  ;;  %v22319_v26 = vld [vmem:[#allocation53_spill] sm:$0xff] }
 0x33d   :  { %v4145_v0 = vmul.f32 %v18306_v8, %v18306_v8  ;;  %v4082_v21 = vsel %vm174_vm0, %v18306_v8, 0.0  ;;  %v18327_v44 = vadd.f32 %v14732_v32, %v3835_v50  ;;  %v3836_v39 = vadd.f32 %v18148_v35, %v3627_v4  ;;  %v22317_v35 = vld [vmem:[#allocation50_spill] sm:$0xff] }
 0x33e   :  { %v4181_v36 = vadd.f32 %v4180_v11, %v4179_v55  ;;  %v4081_v23 = vadd.f32 %v4080_v46, %v4079_v60  ;;  %v3941_v56 = vpop.f32.mrf.mxu1  ;;  %v3628_v50 = vadd.f32 %v22316_v3, %v18240_v47  ;;  %v4086_v11 = vsel %vm174_vm0, %v18316_v17, 0.0 }
 0x33f   :  { %v18329_v63 = vadd.f32 %v3941_v56, %v3833_v52  ;;  %v4184_v6 = vsel %vm174_vm0, %v4145_v0, 0.0  ;;  %v3838_v52 = vadd.f32 %v22318_v25, %v22317_v35  ;;  %v4148_v46 = vmul.f32 %v18327_v44, %v18327_v44  ;;  %v18357_v56 = vpop.f32.mrf.mxu0  ;;  %v22322_v35 = vld [vmem:[#allocation40_spill] sm:$0xff]  ;;  %v22323_v25 = vld [vmem:[#allocation17_spill] sm:$0xff] }
 0x340   :  { %v4083_v49 = vadd.f32 %v4082_v21, %v4081_v23  ;;  %v4183_v58 = vadd.f32 %v4182_v2, %v4181_v36  ;;  %v14735_v41 = vpop.f32.mrf.mxu1  ;;  %v3839_v31 = vadd.f32 %v18154_v54, %v22319_v26  ;;  %v3837_v47 = vadd.f32 %v18160_v9, %v3628_v50  ;;  %v22321_v9 = vld [vmem:[#allocation57_spill] sm:$0xff] }
 0x341   :  { %v4084_v24 = vsel %vm174_vm0, %v18329_v63, 0.0  ;;  %v4146_v62 = vmul.f32 %v18329_v63, %v18329_v63  ;;  %v4188_v2 = vsel %vm174_vm0, %v4147_v45, 0.0  ;;  %v4088_v21 = vsel %vm174_vm0, %v18327_v44, 0.0 }
 0x342   :  { %v4185_v60 = vadd.f32 %v4184_v6, %v4183_v58  ;;  %v4085_v55 = vadd.f32 %v4084_v24, %v4083_v49  ;;  %v3954_v32 = vpop.f32.mrf.mxu1  ;;  %v18362_v19 = vadd.f32 %v14735_v41, %v3838_v52  ;;  %v22320_v49 = vld [vmem:[#allocation19_spill] sm:$0xff]  ;;  %v3631_v58 = vadd.f32 %v22321_v9, %v3422_v28 }
 0x343   :  { %v4186_v0 = vsel %vm174_vm0, %v4146_v62, 0.0  ;;  %v18352_v1 = vadd.f32 %v3954_v32, %v3836_v39  ;;  %v18368_v54 = vadd.f32 %v22320_v49, %v18205_v10  ;;  %v4190_v3 = vsel %vm174_vm0, %v4148_v46, 0.0  ;;  %v18381_v32 = vpop.f32.mrf.mxu0 }
 0x344   :  { %v4087_v4 = vadd.f32 %v4086_v11, %v4085_v55  ;;  %v4187_v36 = vadd.f32 %v4186_v0, %v4185_v60  ;;  %v14736_v23 = vpop.f32.mrf.mxu1  ;;  %v3426_v52 = vadd.f32 %v22323_v25, %v22322_v35  ;;  %v3840_v10 = vadd.f32 %v18190_v12, %v3631_v58  ;;  %v22326_v58 = vld [vmem:[#allocation59_spill] sm:$0xff] }
 0x345   :  { %v4149_v39 = vmul.f32 %v18352_v1, %v18352_v1  ;;  %v4090_v45 = vsel %vm174_vm0, %v18352_v1, 0.0  ;;  %v18374_v50 = vadd.f32 %v14736_v23, %v3839_v31  ;;  %v4151_v11 = vmul.f32 %v18362_v19, %v18362_v19  ;;  %v22324_v31 = vld [vmem:[#allocation60_spill] sm:$0xff] }
 0x346   :  { %v4189_v6 = vadd.f32 %v4188_v2, %v4187_v36  ;;  %v4089_v24 = vadd.f32 %v4088_v21, %v4087_v4  ;;  %v3957_v62 = vpop.f32.mrf.mxu1  ;;  %v22325_v4 = vld [vmem:[#allocation56_spill] sm:$0xff]  ;;  %v4094_v21 = vsel %vm174_vm0, %v18362_v19, 0.0 }
 0x347   :  { %v18376_v41 = vadd.f32 %v3957_v62, %v3837_v47  ;;  %v4192_v46 = vsel %vm174_vm0, %v4149_v39, 0.0  ;;  %v3632_v47 = vadd.f32 %v22324_v31, %v3423_v20  ;;  %v3842_v12 = vadd.f32 %v18168_v40, %v22325_v4  ;;  %v22329_v4 = vld [vmem:[#allocation37_spill] sm:$0xff] }
 0x348   :  { %v4091_v60 = vadd.f32 %v4090_v45, %v4089_v24  ;;  %v4191_v55 = vadd.f32 %v4190_v3, %v4189_v6  ;;  %v14739_v28 = vpop.f32.mrf.mxu1  ;;  %v4152_v39 = vmul.f32 %v18374_v50, %v18374_v50  ;;  %v3843_v6 = vadd.f32 %v18215_v18, %v22326_v58  ;;  %v18403_v3 = vpop.f32.mrf.mxu0 }
 0x349   :  { %v4092_v0 = vsel %vm174_vm0, %v18376_v41, 0.0  ;;  %v4150_v26 = vmul.f32 %v18376_v41, %v18376_v41  ;;  %v3841_v20 = vadd.f32 %v18243_v38, %v3632_v47  ;;  %v4196_v45 = vsel %vm174_vm0, %v4151_v11, 0.0 }
 0x34a   :  { %v4193_v36 = vadd.f32 %v4192_v46, %v4191_v55  ;;  %v4093_v23 = vadd.f32 %v4092_v0, %v4091_v60  ;;  %v3970_v2 = vpop.f32.mrf.mxu1  ;;  %v4096_v35 = vsel %vm174_vm0, %v18374_v50, 0.0  ;;  %v18408_v25 = vadd.f32 %v14739_v28, %v3842_v12  ;;  %v22327_v60 = vld [vmem:[#allocation21_spill] sm:$0xff]  ;;  %v22328_v55 = vld [vmem:[#allocation63_spill] sm:$0xff] }
 0x34b   :  { %v4194_v49 = vsel %vm174_vm0, %v4150_v26, 0.0  ;;  %v18398_v9 = vadd.f32 %v3970_v2, %v3840_v10  ;;  %v3427_v18 = vadd.f32 %v22327_v60, %v18286_v37  ;;  %v3635_v38 = vadd.f32 %v22328_v55, %v3426_v52  ;;  %v22330_v12 = vld [vmem:[#allocation41_spill] sm:$0xff] }
 0x34c   :  { %v4095_v24 = vadd.f32 %v4094_v21, %v4093_v23  ;;  %v4195_v40 = vadd.f32 %v4194_v49, %v4193_v36  ;;  %v14740_v62 = vpop.f32.mrf.mxu1  ;;  %v4198_v31 = vsel %vm174_vm0, %v4152_v39, 0.0  ;;  %v3430_v36 = vadd.f32 %v22330_v12, %v22329_v4  ;;  %v3796_v21 = vpop.f32.mrf.mxu0 }
 0x34d   :  { %v4153_v10 = vmul.f32 %v18398_v9, %v18398_v9  ;;  %v4098_v11 = vsel %vm174_vm0, %v18398_v9, 0.0  ;;  %v18418_v47 = vadd.f32 %v14740_v62, %v3843_v6  ;;  %v3844_v23 = vadd.f32 %v18289_v48, %v3635_v38  ;;  %v22332_v38 = vld [vmem:[#allocation65_spill] sm:$0xff] }
 0x34e   :  { %v4197_v46 = vadd.f32 %v4196_v45, %v4195_v40  ;;  %v4097_v0 = vadd.f32 %v4096_v35, %v4095_v24  ;;  %v3973_v26 = vpop.f32.mrf.mxu1  ;;  %v4155_v49 = vmul.f32 %v18408_v25, %v18408_v25  ;;  %v22331_v24 = vld [vmem:[#allocation62_spill] sm:$0xff]  ;;  %v4102_v35 = vsel %vm174_vm0, %v18408_v25, 0.0 }
 0x34f   :  { %v18420_v28 = vadd.f32 %v3973_v26, %v3841_v20  ;;  %v4200_v39 = vsel %vm174_vm0, %v4153_v10, 0.0  ;;  %v3636_v20 = vadd.f32 %v18146_v30, %v3427_v18  ;;  %v3846_v48 = vadd.f32 %v18268_v42, %v22331_v24  ;;  %v18445_v26 = vpop.f32.mrf.mxu0  ;;  %v22335_v24 = vld [vmem:[#allocation23_spill] sm:$0xff] }
 0x350   :  { %v4099_v37 = vadd.f32 %v4098_v11, %v4097_v0  ;;  %v4199_v2 = vadd.f32 %v4198_v31, %v4197_v46  ;;  %v14743_v52 = vpop.f32.mrf.mxu1  ;;  %v4156_v10 = vmul.f32 %v18418_v47, %v18418_v47  ;;  %v3847_v46 = vadd.f32 %v18311_v15, %v22332_v38 }
 0x351   :  { %v4100_v58 = vsel %vm174_vm0, %v18420_v28, 0.0  ;;  %v4154_v6 = vmul.f32 %v18420_v28, %v18420_v28  ;;  %v3845_v30 = vadd.f32 %v18334_v14, %v3636_v20  ;;  %v4204_v31 = vsel %vm174_vm0, %v4155_v49, 0.0 }
 0x352   :  { %v4201_v40 = vadd.f32 %v4200_v39, %v4199_v2  ;;  %v4101_v62 = vadd.f32 %v4100_v58, %v4099_v37  ;;  %v3986_v45 = vpop.f32.mrf.mxu1  ;;  %v4104_v11 = vsel %vm174_vm0, %v18418_v47, 0.0  ;;  %v18450_v4 = vadd.f32 %v14743_v52, %v3846_v48  ;;  %v22334_v37 = vld [vmem:[#allocation67_spill] sm:$0xff] }
 0x353   :  { %v4202_v60 = vsel %vm174_vm0, %v4154_v6, 0.0  ;;  %v18440_v55 = vadd.f32 %v3986_v45, %v3844_v23  ;;  %v22333_v23 = vld [vmem:[#allocation42_spill] sm:$0xff]  ;;  %v3639_v14 = vadd.f32 %v22334_v37, %v3430_v36  ;;  %v4206_v6 = vsel %vm174_vm0, %v4156_v10, 0.0  ;;  %v22336_v48 = vld [vmem:[#allocation43_spill] sm:$0xff] }
 0x354   :  { %v4103_v18 = vadd.f32 %v4102_v35, %v4101_v62  ;;  %v4203_v42 = vadd.f32 %v4202_v60, %v4201_v40  ;;  %v14744_v0 = vpop.f32.mrf.mxu1  ;;  %v3431_v15 = vadd.f32 %v22333_v23, %v18368_v54  ;;  %v3434_v40 = vadd.f32 %v22336_v48, %v22335_v24  ;;  %v3809_v35 = vpop.f32.mrf.mxu0  ;;  %v22338_v48 = vld [vmem:[#allocation16_spill] sm:$0xff] }
 0x355   :  { %v4157_v12 = vmul.f32 %v18440_v55, %v18440_v55  ;;  %v4106_v49 = vsel %vm174_vm0, %v18440_v55, 0.0  ;;  %v18460_v20 = vadd.f32 %v14744_v0, %v3847_v46  ;;  %v3848_v62 = vadd.f32 %v18381_v32, %v3639_v14 }
 0x356   :  { %v4205_v2 = vadd.f32 %v4204_v31, %v4203_v42  ;;  %v4105_v39 = vadd.f32 %v4104_v11, %v4103_v18  ;;  %v3989_v58 = vpop.f32.mrf.mxu1  ;;  %v4159_v60 = vmul.f32 %v18450_v4, %v18450_v4  ;;  %v22337_v18 = vld [vmem:[#allocation66_spill] sm:$0xff]  ;;  %v4110_v11 = vsel %vm174_vm0, %v18450_v4, 0.0 }
 0x357   :  { %v18462_v52 = vadd.f32 %v3989_v58, %v3845_v30  ;;  %v4208_v10 = vsel %vm174_vm0, %v4157_v12, 0.0  ;;  %v3640_v30 = vadd.f32 %v18158_v34, %v3431_v15  ;;  %v3850_v32 = vadd.f32 %v18357_v56, %v22337_v18 }
 0x358   :  { %v4107_v54 = vadd.f32 %v4106_v49, %v4105_v39  ;;  %v4207_v45 = vadd.f32 %v4206_v6, %v4205_v2  ;;  %v14747_v36 = vpop.f32.mrf.mxu1  ;;  %v4160_v12 = vmul.f32 %v18460_v20, %v18460_v20  ;;  %v3851_v14 = vadd.f32 %v18403_v3, %v18156_v27  ;;  %v14716_v39 = vpop.f32.mrf.mxu0 }
 0x359   :  { %v4108_v38 = vsel %vm174_vm0, %v18462_v52, 0.0  ;;  %v4158_v46 = vmul.f32 %v18462_v52, %v18462_v52  ;;  %v3849_v34 = vadd.f32 %v3796_v21, %v3640_v30  ;;  %v4212_v58 = vsel %vm174_vm0, %v4159_v60, 0.0 }
 0x35a   :  { %v4209_v42 = vadd.f32 %v4208_v10, %v4207_v45  ;;  %v4109_v0 = vadd.f32 %v4108_v38, %v4107_v54  ;;  %v4002_v31 = vpop.f32.mrf.mxu1  ;;  %v4112_v6 = vsel %vm174_vm0, %v18460_v20, 0.0  ;;  %v18489_v49 = vadd.f32 %v14747_v36, %v3850_v32  ;;  %v22339_v38 = vld [vmem:[#allocation45_spill] sm:$0xff] }
 0x35b   :  { %v4210_v23 = vsel %vm174_vm0, %v4158_v46, 0.0  ;;  %v18482_v37 = vadd.f32 %v4002_v31, %v3848_v62  ;;  %v3223_v62 = vadd.f32 %v22338_v48, %v18208_v22  ;;  %v3643_v27 = vadd.f32 %v18164_v53, %v3434_v40 }
 0x35c   :  { %v4111_v15 = vadd.f32 %v4110_v11, %v4109_v0  ;;  %v4211_v2 = vadd.f32 %v4210_v23, %v4209_v42  ;;  %v14748_v56 = vpop.f32.mrf.mxu1  ;;  %v4214_v45 = vsel %vm174_vm0, %v4160_v12, 0.0  ;;  %v3812_v42 = vpop.f32.mrf.mxu0  ;;  %v4163_v53 = vmul.f32 %v18489_v49, %v18489_v49 }
 0x35d   :  { %v4161_v24 = vmul.f32 %v18482_v37, %v18482_v37  ;;  %v4114_v60 = vsel %vm174_vm0, %v18482_v37, 0.0  ;;  %v18499_v10 = vadd.f32 %v14748_v56, %v3851_v14  ;;  %v3435_v46 = vadd.f32 %v22339_v38, %v3223_v62 }
 0x35e   :  { %v4213_v3 = vadd.f32 %v4212_v58, %v4211_v2  ;;  %v4113_v21 = vadd.f32 %v4112_v6, %v4111_v15  ;;  %v4005_v54 = vpop.f32.mrf.mxu1  ;;  %v3852_v30 = vadd.f32 %v3809_v35, %v3643_v27  ;;  %v3854_v35 = vadd.f32 %v18445_v26, %v18162_v57 }
 0x35f   :  { %v18501_v36 = vadd.f32 %v4005_v54, %v3849_v34  ;;  %v4216_v40 = vsel %vm174_vm0, %v4161_v24, 0.0  ;;  %v3644_v11 = vadd.f32 %v18172_v5, %v3435_v46  ;;  %v4118_v34 = vsel %vm174_vm0, %v18489_v49, 0.0 }
 0x360   :  { %v4115_v18 = vadd.f32 %v4114_v60, %v4113_v21  ;;  %v4215_v32 = vadd.f32 %v4214_v45, %v4213_v3  ;;  %v14751_v22 = vpop.f32.mrf.mxu1  ;;  %v4164_v15 = vmul.f32 %v18499_v10, %v18499_v10  ;;  %v3855_v58 = vadd.f32 %v14716_v39, %v18170_v33 }
 0x361   :  { %v4116_v0 = vsel %vm174_vm0, %v18501_v36, 0.0  ;;  %v4162_v31 = vmul.f32 %v18501_v36, %v18501_v36  ;;  %v3853_v6 = vadd.f32 %v3812_v42, %v3644_v11  ;;  %v4220_v57 = vsel %vm174_vm0, %v4163_v53, 0.0 }
 0x362   :  { %v4217_v12 = vadd.f32 %v4216_v40, %v4215_v32  ;;  %v4117_v23 = vadd.f32 %v4116_v0, %v4115_v18  ;;  %v4018_v14 = vpop.f32.mrf.mxu1  ;;  %v4120_v26 = vsel %vm174_vm0, %v18499_v10, 0.0  ;;  %v18525_v62 = vadd.f32 %v14751_v22, %v3854_v35 }
 0x363   :  { %v4218_v2 = vsel %vm174_vm0, %v4162_v31, 0.0  ;;  %v18519_v56 = vadd.f32 %v4018_v14, %v3852_v30  ;;  %v4222_v45 = vsel %vm174_vm0, %v4164_v15, 0.0 }
 0x364   :  { %v4119_v5 = vadd.f32 %v4118_v34, %v4117_v23  ;;  %v4219_v24 = vadd.f32 %v4218_v2, %v4217_v12  ;;  %v14752_v48 = vpop.f32.mrf.mxu1  ;;  %v4167_v30 = vmul.f32 %v18525_v62, %v18525_v62  ;;  %v4126_v40 = vsel %vm174_vm0, %v18525_v62, 0.0 }
 0x365   :  { %v4165_v27 = vmul.f32 %v18519_v56, %v18519_v56  ;;  %v4122_v33 = vsel %vm174_vm0, %v18519_v56, 0.0  ;;  %v4064_v39 = vadd.f32 %v14752_v48, %v3855_v58 }
 0x366   :  { %v4221_v3 = vadd.f32 %v4220_v57, %v4219_v24  ;;  %v4121_v21 = vadd.f32 %v4120_v26, %v4119_v5  ;;  %v4021_v54 = vpop.f32.mrf.mxu1  ;;  %v4228_v12 = vsel %vm174_vm0, %v4167_v30, 0.0 }
 0x367   :  { %v4062_v60 = vadd.f32 %v4021_v54, %v3853_v6  ;;  %v4224_v18 = vsel %vm174_vm0, %v4165_v27, 0.0  ;;  %v4168_v0 = vmul.f32 %v4064_v39, %v4064_v39  ;;  %v4128_v23 = vsel %vm174_vm0, %v4064_v39, 0.0 }
 0x368   :  { %v4123_v38 = vadd.f32 %v4122_v33, %v4121_v21  ;;  %v4223_v46 = vadd.f32 %v4222_v45, %v4221_v3 }
 0x369   :  { %v4124_v32 = vsel %vm174_vm0, %v4062_v60, 0.0  ;;  %v4166_v22 = vmul.f32 %v4062_v60, %v4062_v60  ;;  %v4230_v15 = vsel %vm174_vm0, %v4168_v0, 0.0 }
 0x36a   :  { %v4225_v42 = vadd.f32 %v4224_v18, %v4223_v46  ;;  %v4125_v53 = vadd.f32 %v4124_v32, %v4123_v38 }
 0x36b   :  { %v4226_v31 = vsel %vm174_vm0, %v4166_v22, 0.0  ;;  %v16104_v22 = vmov 1983009808  }
 0x36c   :  { %v4127_v11 = vadd.f32 %v4126_v40, %v4125_v53  ;;  %v4227_v35 = vadd.f32 %v4226_v31, %v4225_v42  ;;  %v4385_v42 = vunpack.c.l.s4 %v16104_v22  ;;  %v4065_v53 = vld [vmem:[#allocation5 + $0x2] sm:$0x1] }
 0x36e   :  { %v4129_v14 = vadd.f32 %v4128_v23, %v4127_v11  ;;  %v4229_v34 = vadd.f32 %v4228_v12, %v4227_v35  ;;  %v4386_v0 = vunpack.c.0.s8 %v4385_v42  ;;  %v4066_v11 = vld [vmem:[#allocation5 + $0x3] sm:$0x1] }
 0x36f   :  { %v22340_v12 = vld [vmem:[#allocation28_spill] sm:$0xff] }
 0x370   :  { %v4130_v2 = vrot.slane %v4129_v14, 4  ;;  %v4231_v58 = vadd.f32 %v4230_v15, %v4229_v34 }
 0x372   :  { %v4131_v6 = vadd.f32 %v4130_v2, %v4129_v14  ;;  %v4232_v5 = vrot.slane %v4231_v58, 4 }
 0x374   :  { %v4132_v24 = vrot.slane %v4131_v6, 2  ;;  %v4233_v48 = vadd.f32 %v4232_v5, %v4231_v58  ;;  %v22344_v5 = vld [vmem:[#allocation15_spill] sm:$0xff] }
 0x376   :  { %v4133_v57 = vadd.f32 %v4132_v24, %v4131_v6  ;;  %v4234_v26 = vrot.slane %v4233_v48, 2  ;;  %v18549_v24 = vsub.s32 %v4386_v0, %v22344_v5 }
 0x378   :  { %v4134_v27 = vrot.slane %v4133_v57, 1  ;;  %v4235_v3 = vadd.f32 %v4234_v26, %v4233_v48  ;;  %22345 = vst [vmem:[#allocation22_spill] sm:$0xff] %v18549_v24 }
 0x37a   :  { %v4135_v21 = vadd.f32 %v4134_v27, %v4133_v57  ;;  %v4236_v54 = vrot.slane %v4235_v3, 1 }
 0x37c   :  { %v4136_v45 = vmul.f32 0.00390625, %v4135_v21  ;;  %v4237_v33 = vadd.f32 %v4236_v54, %v4235_v3 }
 0x37e   :  { %v4238_v38 = vmul.f32 0.00390625, %v4237_v33  ;;  %v4239_v46 = vmul.f32 %v4136_v45, %v4136_v45 }
 0x380   :  { %v4240_v30 = vsub.f32 %v4238_v38, %v4239_v46 }
 0x382   :  { %v4241_v18 = vmax.f32 %v4240_v30, 0.0 }
 0x384   :  { %v4242_v32 = vadd.f32 1e-05, %v4241_v18 }
 0x386   :  { %16013 = vrsqrt.f32 %v4242_v32 }
 0x393   :  { %v16014_v40 = vpop.eup %16013 }
 0x394   :  { %v4244_v31 = vmul.f32 %v16014_v40, %v4065_v53 }
 0x396   :  { %v4245_v35 = vmul.f32 %v4244_v31, %v4136_v45  ;;  %v18543_v23 = vrot.slane %v4244_v31, %v22340_v12 }
 0x398   :  { %v4246_v48 = vsub.f32 %v4066_v11, %v4245_v35  ;;  %v4279_v57 = vmul.f32 %v18543_v23, %v18519_v56  ;;  %v4280_v26 = vmul.f32 %v18543_v23, %v4062_v60  ;;  %v4281_v27 = vmul.f32 %v18543_v23, %v18525_v62 }
 0x399   :  { %v4282_v3 = vmul.f32 %v18543_v23, %v4064_v39  ;;  %v18559_v21 = vmul.f32 %v18543_v23, %v18201_v13  ;;  %v18563_v54 = vmul.f32 %v18543_v23, %v18230_v51  ;;  %v18567_v45 = vmul.f32 %v18543_v23, %v18217_v29 }
 0x39a   :  { %v18570_v56 = vrot.slane %v4246_v48, %v22340_v12  ;;  %v18574_v62 = vmul.f32 %v18543_v23, %v18228_v7  ;;  %v18578_v39 = vmul.f32 %v18543_v23, %v18265_v16  ;;  %v18582_v13 = vmul.f32 %v18543_v23, %v18283_v61 }
 0x39b   :  { %v18586_v51 = vmul.f32 %v18543_v23, %v18273_v59  ;;  %v18590_v29 = vmul.f32 %v18543_v23, %v18281_v43  ;;  %v18594_v7 = vmul.f32 %v18543_v23, %v18306_v8  ;;  %v18598_v16 = vmul.f32 %v18543_v23, %v18329_v63 }
 0x39c   :  { %22346 = vst [vmem:[#allocation26_spill] sm:$0xff] %v18578_v39  ;;  %22347 = vst [vmem:[#allocation27_spill] sm:$0xff] %v18582_v13  ;;  %v4315_v60 = vadd.f32 %v18570_v56, %v4279_v57  ;;  %v4316_v61 = vadd.f32 %v18570_v56, %v4280_v26  ;;  %v4317_v33 = vadd.f32 %v18570_v56, %v4281_v27 }
 0x39d   :  { %22348 = vst [vmem:[#allocation24_spill] sm:$0xff] %v18586_v51  ;;  %22349 = vst [vmem:[#allocation35_spill] sm:$0xff] %v18590_v29  ;;  %v4318_v59 = vadd.f32 %v18570_v56, %v4282_v3  ;;  %v18606_v43 = vmul.f32 %v18543_v23, %v18316_v17  ;;  %v18610_v8 = vmul.f32 %v18543_v23, %v18327_v44 }
 0x39e   :  { %22350 = vst [vmem:[#allocation39_spill] sm:$0xff] %v18594_v7  ;;  %22351 = vst [vmem:[#allocation38_spill] sm:$0xff] %v18598_v16  ;;  %v18614_v63 = vmul.f32 %v18543_v23, %v18352_v1  ;;  %v18618_v38 = vmul.f32 %v18543_v23, %v18376_v41  ;;  %v4347_v46 = vmax.f32 %v4315_v60, 0.0  ;;  %v4348_v30 = vmax.f32 %v4316_v61, 0.0 }
 0x39f   :  { %22352 = vst [vmem:[#allocation36_spill] sm:$0xff] %v18606_v43  ;;  %22353 = vst [vmem:[#allocation44_spill] sm:$0xff] %v18610_v8  ;;  %v4349_v18 = vmax.f32 %v4317_v33, 0.0  ;;  %v4350_v32 = vmax.f32 %v4318_v59, 0.0  ;;  %v18622_v17 = vmul.f32 %v18543_v23, %v18362_v19  ;;  %v18626_v44 = vmul.f32 %v18543_v23, %v18374_v50 }
 0x3a0   :  { %22354 = vst [vmem:[#allocation52_spill] sm:$0xff] %v18614_v63  ;;  %22355 = vst [vmem:[#allocation47_spill] sm:$0xff] %v18618_v38  ;;  %v18630_v1 = vmul.f32 %v18543_v23, %v18398_v9  ;;  %v18634_v41 = vmul.f32 %v18543_v23, %v18420_v28  ;;  %v4859_v22 = vcombine.high %v4347_v46, %v4347_v46 }
 0x3a1   :  { %22356 = vst [vmem:[#allocation12_spill] sm:$0xff] %v18622_v17  ;;  %22357 = vst [vmem:[#allocation49_spill] sm:$0xff] %v18626_v44  ;;  %v4866_v42 = vrot.slane %v4347_v46, %v18549_v24  ;;  %v4876_v53 = vcombine.high %v4348_v30, %v4348_v30  ;;  %v4883_v40 = vrot.slane %v4348_v30, %v18549_v24 }
 0x3a2   :  { %22358 = vst [vmem:[#allocation46_spill] sm:$0xff] %v18630_v1  ;;  %22359 = vst [vmem:[#allocation55_spill] sm:$0xff] %v18634_v41  ;;  %v4893_v19 = vcombine.high %v4349_v18, %v4349_v18  ;;  %v4900_v0 = vrot.slane %v4349_v18, %v18549_v24  ;;  %v4910_v31 = vcombine.high %v4350_v32, %v4350_v32 }
 0x3a3   :  { %v4917_v50 = vrot.slane %v4350_v32, %v18549_v24  ;;  %v4873_v11 = vrot.slane %v4859_v22, %v18549_v24  ;;  %v4874_v9 = vcombine.high %v4866_v42, %v4866_v42  ;;  %v4890_v35 = vrot.slane %v4876_v53, %v18549_v24 }
 0x3a4   :  { %v4891_v48 = vcombine.high %v4883_v40, %v4883_v40  ;;  %v4907_v28 = vrot.slane %v4893_v19, %v18549_v24  ;;  %v4908_v57 = vcombine.high %v4900_v0, %v4900_v0  ;;  %v4924_v26 = vrot.slane %v4910_v31, %v18549_v24 }
 0x3a5   :  { %v4925_v27 = vcombine.high %v4917_v50, %v4917_v50  ;;  %v4875_v3 = vcombine.high %v4873_v11, %v4873_v11  ;;  %v4892_v60 = vcombine.high %v4890_v35, %v4890_v35  ;;  %v13338_v61 = vrot.slane %v4866_v42, 9 }
 0x3a6   :  { %v13339_v33 = vrot.slane %v4874_v9, 9  ;;  %v4909_v59 = vcombine.high %v4907_v28, %v4907_v28  ;;  %v4926_v46 = vcombine.high %v4924_v26, %v4924_v26  ;;  %v13340_v30 = vrot.slane %v4873_v11, 9 }
 0x3a7   :  { %v13342_v18 = vrot.slane %v4883_v40, 9  ;;  %v13341_v32 = vrot.slane %v4875_v3, 9  ;;  %v13343_v22 = vrot.slane %v4891_v48, 9  ;;  %v13344_v6 = vrot.slane %v4890_v35, 9 }
 0x3a8   :  { %v13345_v2 = vrot.slane %v4892_v60, 9  ;;  %v13346_v53 = vrot.slane %v4900_v0, 9  ;;  %v13347_v34 = vrot.slane %v4908_v57, 9  ;;  %v13348_v12 = vrot.slane %v4907_v28, 9 }
 0x3a9   :  { %v13349_v19 = vrot.slane %v4909_v59, 9  ;;  %v13350_v58 = vrot.slane %v4917_v50, 9  ;;  %v13351_v15 = vrot.slane %v4925_v27, 9  ;;  %v13352_v31 = vrot.slane %v4924_v26, 9 }
 0x3aa   :  { %v13353_v14 = vrot.slane %v4926_v46, 9  ;;  %v5551_v5 = vmax.f32 %v4866_v42, %v13338_v61  ;;  %v5552_v24 = vmax.f32 %v4874_v9, %v13339_v33  ;;  %v5553_v41 = vmax.f32 %v4873_v11, %v13340_v30  ;;  %v22364_v30 = vld [vmem:[#allocation26_spill] sm:$0xff] }
 0x3ab   :  { %v5554_v1 = vmax.f32 %v4875_v3, %v13341_v32  ;;  %v5555_v44 = vmax.f32 %v4883_v40, %v13342_v18  ;;  %v5556_v17 = vmax.f32 %v4891_v48, %v13343_v22  ;;  %v5557_v38 = vmax.f32 %v4890_v35, %v13344_v6  ;;  %v22365_v18 = vld [vmem:[#allocation27_spill] sm:$0xff] }
 0x3ac   :  { %v5558_v63 = vmax.f32 %v4892_v60, %v13345_v2  ;;  %v5559_v8 = vmax.f32 %v4900_v0, %v13346_v53  ;;  %v5560_v43 = vmax.f32 %v4908_v57, %v13347_v34  ;;  %v5561_v16 = vmax.f32 %v4907_v28, %v13348_v12  ;;  %v22367_v22 = vld [vmem:[#allocation35_spill] sm:$0xff] }
 0x3ad   :  { %v5562_v7 = vmax.f32 %v4909_v59, %v13349_v19  ;;  %v5563_v29 = vmax.f32 %v4917_v50, %v13350_v58  ;;  %v5564_v51 = vmax.f32 %v4925_v27, %v13351_v15  ;;  %v5565_v13 = vmax.f32 %v4924_v26, %v13352_v31  ;;  %v22368_v53 = vld [vmem:[#allocation39_spill] sm:$0xff]  ;;  %v22369_v19 = vld [vmem:[#allocation38_spill] sm:$0xff]  ;;  %v22370_v31 = vld [vmem:[#allocation36_spill] sm:$0xff] }
 0x3ae   :  { %v5566_v39 = vmax.f32 %v4926_v46, %v13353_v14  ;;  %v5623_v42 = vmax.f32 %v5551_v5, %v5559_v8  ;;  %v5624_v9 = vmax.f32 %v5552_v24, %v5560_v43  ;;  %v5625_v11 = vmax.f32 %v5553_v41, %v5561_v16 }
 0x3af   :  { %v5626_v3 = vmax.f32 %v5554_v1, %v5562_v7  ;;  %v5627_v61 = vmax.f32 %v5555_v44, %v5563_v29  ;;  %v5628_v40 = vmax.f32 %v5556_v17, %v5564_v51  ;;  %v5629_v48 = vmax.f32 %v5557_v38, %v5565_v13 }
 0x3b0   :  { %v5630_v6 = vmax.f32 %v5558_v63, %v5566_v39  ;;  %v5687_v2 = vpack.c.bf16 %v5623_v42, %v5623_v42  ;;  %v5688_v35 = vpack.c.bf16 %v5624_v9, %v5624_v9  ;;  %v5689_v0 = vpack.c.bf16 %v5625_v11, %v5625_v11  ;;  %v22371_v42 = vld [vmem:[#allocation44_spill] sm:$0xff] }
 0x3b1   :  { %v5690_v34 = vpack.c.bf16 %v5626_v3, %v5626_v3  ;;  %v5691_v12 = vpack.c.bf16 %v5627_v61, %v5627_v61  ;;  %v5692_v28 = vpack.c.bf16 %v5628_v40, %v5628_v40  ;;  %v5693_v57 = vpack.c.bf16 %v5629_v48, %v5629_v48  ;;  %v22372_v11 = vld [vmem:[#allocation52_spill] sm:$0xff]  ;;  %v22373_v61 = vld [vmem:[#allocation47_spill] sm:$0xff] }
 0x3b2   :  { %v5694_v58 = vpack.c.bf16 %v5630_v6, %v5630_v6  ;;  %v5911_v15 = vunpack.c.l.b16 %v5687_v2  ;;  %v5912_v50 = vunpack.c.l.b16 %v5688_v35  ;;  %v5913_v14 = vunpack.c.l.b16 %v5689_v0  ;;  %v22374_v48 = vld [vmem:[#allocation12_spill] sm:$0xff]  ;;  %v22375_v2 = vld [vmem:[#allocation49_spill] sm:$0xff]  ;;  %v22376_v0 = vld [vmem:[#allocation46_spill] sm:$0xff] }
 0x3b3   :  { %v5914_v26 = vunpack.c.l.b16 %v5690_v34  ;;  %v5915_v5 = vunpack.c.l.b16 %v5691_v12  ;;  %v18644_v24 = vunpack.c.l.b16 %v5692_v28  ;;  %v18646_v7 = vunpack.c.l.b16 %v5693_v57  ;;  %v22377_v12 = vld [vmem:[#allocation55_spill] sm:$0xff] }
 0x3b4   :  { %v18648_v51 = vunpack.c.l.b16 %v5694_v58  ;;  %v6024_v39 = vrot.slane %v5912_v50, 7  ;;  %v6026_v13 = vrot.slane %v5913_v14, 6  ;;  %v4269_v16 = vmul.f32 %v18543_v23, %v18408_v25 }
 0x3b5   :  { %22360 = vst [vmem:[#allocation48_spill] sm:$0xff] %v18644_v24  ;;  %22361 = vst [vmem:[#allocation58_spill] sm:$0xff] %v18646_v7  ;;  %v6028_v29 = vrot.slane %v5914_v26, 5  ;;  %v6030_v43 = vrot.slane %v5915_v5, 4  ;;  %v4270_v44 = vmul.f32 %v18543_v23, %v18418_v47  ;;  %v4271_v1 = vmul.f32 %v18543_v23, %v18440_v55 }
 0x3b6   :  { %22362 = vst [vmem:[#allocation61_spill] sm:$0xff] %v18648_v51  ;;  %v6025_v17 = vsel %vm5920_vm14, %v6024_v39, %v5911_v15  ;;  %v4272_v41 = vmul.f32 %v18543_v23, %v18462_v52  ;;  %v4273_v27 = vmul.f32 %v18543_v23, %v18450_v4  ;;  %v4274_v60 = vmul.f32 %v18543_v23, %v18460_v20 }
 0x3b7   :  { %v6027_v25 = vsel %vm22075_vm15, %v6026_v13, %v6025_v17  ;;  %v4275_v33 = vmul.f32 %v18543_v23, %v18482_v37  ;;  %v4276_v47 = vmul.f32 %v18543_v23, %v18501_v36  ;;  %v4277_v55 = vmul.f32 %v18543_v23, %v18489_v49 }
 0x3b8   :  { %v6029_v59 = vsel %vm22074_vm2, %v6028_v29, %v6027_v25  ;;  %v4278_v52 = vmul.f32 %v18543_v23, %v18499_v10  ;;  %v4287_v4 = vadd.f32 %v18570_v56, %v18559_v21  ;;  %v4288_v20 = vadd.f32 %v18570_v56, %v18563_v54  ;;  %v22366_v23 = vld [vmem:[#allocation24_spill] sm:$0xff] }
 0x3b9   :  { %v18677_v46 = vsel %vm22070_vm3, %v6030_v43, %v6029_v59  ;;  %v4289_v37 = vadd.f32 %v18570_v56, %v18567_v45  ;;  %v4290_v36 = vadd.f32 %v18570_v56, %v18574_v62  ;;  %v4291_v49 = vadd.f32 %v18570_v56, %v22364_v30 }
 0x3ba   :  { %22363 = vst [vmem:[#allocation14_spill] sm:$0xff] %v18677_v46  ;;  %v4292_v10 = vadd.f32 %v18570_v56, %v22365_v18  ;;  %v4293_v32 = vadd.f32 %v18570_v56, %v22366_v23  ;;  %v4294_v21 = vadd.f32 %v18570_v56, %v22367_v22  ;;  %v4295_v54 = vadd.f32 %v18570_v56, %v22368_v53 }
 0x3bb   :  { %v4296_v45 = vadd.f32 %v18570_v56, %v22369_v19  ;;  %v4297_v62 = vadd.f32 %v18570_v56, %v22370_v31  ;;  %v4298_v9 = vadd.f32 %v18570_v56, %v22371_v42  ;;  %v4299_v3 = vadd.f32 %v18570_v56, %v22372_v11  ;;  %v22378_v19 = vld [vmem:[#allocation22_spill] sm:$0xff] }
 0x3bc   :  { %v4300_v40 = vadd.f32 %v18570_v56, %v22373_v61  ;;  %v4301_v6 = vadd.f32 %v18570_v56, %v22374_v48  ;;  %v4302_v35 = vadd.f32 %v18570_v56, %v22375_v2  ;;  %v4303_v34 = vadd.f32 %v18570_v56, %v22376_v0 }
 0x3bd   :  { %v4304_v28 = vadd.f32 %v18570_v56, %v22377_v12  ;;  %v4305_v57 = vadd.f32 %v18570_v56, %v4269_v16  ;;  %v4306_v58 = vadd.f32 %v18570_v56, %v4270_v44  ;;  %v4307_v15 = vadd.f32 %v18570_v56, %v4271_v1 }
 0x3be   :  { %v4308_v50 = vadd.f32 %v18570_v56, %v4272_v41  ;;  %v4309_v14 = vadd.f32 %v18570_v56, %v4273_v27  ;;  %v4310_v26 = vadd.f32 %v18570_v56, %v4274_v60  ;;  %v4311_v5 = vadd.f32 %v18570_v56, %v4275_v33 }
 0x3bf   :  { %v4312_v39 = vadd.f32 %v18570_v56, %v4276_v47  ;;  %v4313_v13 = vadd.f32 %v18570_v56, %v4277_v55  ;;  %v4314_v29 = vadd.f32 %v18570_v56, %v4278_v52  ;;  %v4319_v43 = vmax.f32 %v4287_v4, 0.0 }
 0x3c0   :  { %v4320_v16 = vmax.f32 %v4288_v20, 0.0  ;;  %v4321_v17 = vmax.f32 %v4289_v37, 0.0  ;;  %v4322_v44 = vmax.f32 %v4290_v36, 0.0  ;;  %v4323_v25 = vmax.f32 %v4291_v49, 0.0 }
 0x3c1   :  { %v4324_v1 = vmax.f32 %v4292_v10, 0.0  ;;  %v4325_v59 = vmax.f32 %v4293_v32, 0.0  ;;  %v4326_v41 = vmax.f32 %v4294_v21, 0.0  ;;  %v18725_v30 = vmax.f32 %v4295_v54, 0.0 }
 0x3c2   :  { %v18727_v27 = vmax.f32 %v4296_v45, 0.0  ;;  %v18729_v60 = vmax.f32 %v4297_v62, 0.0  ;;  %v18731_v33 = vmax.f32 %v4298_v9, 0.0  ;;  %v18733_v47 = vmax.f32 %v4299_v3, 0.0 }
 0x3c3   :  { %v18735_v55 = vmax.f32 %v4300_v40, 0.0  ;;  %v18737_v56 = vmax.f32 %v4301_v6, 0.0  ;;  %v18739_v52 = vmax.f32 %v4302_v35, 0.0  ;;  %v18741_v4 = vmax.f32 %v4303_v34, 0.0 }
 0x3c4   :  { %v18743_v20 = vmax.f32 %v4304_v28, 0.0  ;;  %v18745_v37 = vmax.f32 %v4305_v57, 0.0  ;;  %v18747_v36 = vmax.f32 %v4306_v58, 0.0  ;;  %v18749_v49 = vmax.f32 %v4307_v15, 0.0 }
 0x3c5   :  { %v18751_v18 = vmax.f32 %v4308_v50, 0.0  ;;  %v18753_v10 = vmax.f32 %v4309_v14, 0.0  ;;  %v18755_v23 = vmax.f32 %v4310_v26, 0.0  ;;  %v18757_v32 = vmax.f32 %v4311_v5, 0.0 }
 0x3c6   :  { %v18759_v22 = vmax.f32 %v4312_v39, 0.0  ;;  %v18761_v21 = vmax.f32 %v4313_v13, 0.0  ;;  %v18763_v53 = vmax.f32 %v4314_v29, 0.0  ;;  %v4383_v54 = vcombine.high %v4319_v43, %v4319_v43 }
 0x3c7   :  { %v18766_v45 = vrot.slane %v4319_v43, %v22378_v19  ;;  %v4400_v31 = vcombine.high %v4320_v16, %v4320_v16  ;;  %v18769_v62 = vrot.slane %v4320_v16, %v22378_v19  ;;  %v4417_v42 = vcombine.high %v4321_v17, %v4321_v17 }
 0x3c8   :  { %v18772_v9 = vrot.slane %v4321_v17, %v22378_v19  ;;  %v4434_v11 = vcombine.high %v4322_v44, %v4322_v44  ;;  %v18775_v3 = vrot.slane %v4383_v54, %v22378_v19  ;;  %v18785_v48 = vrot.slane %v4322_v44, %v22378_v19 }
 0x3c9   :  { %22379 = vst [vmem:[#allocation13_spill] sm:$0xff] %v18766_v45  ;;  %v18779_v61 = vcombine.high %v18766_v45, %v18766_v45  ;;  %v18782_v40 = vrot.slane %v4400_v31, %v22378_v19  ;;  %v18789_v6 = vcombine.high %v18769_v62, %v18769_v62  ;;  %v18792_v2 = vrot.slane %v4417_v42, %v22378_v19 }
 0x3ca   :  { %v18796_v35 = vcombine.high %v18772_v9, %v18772_v9  ;;  %v18799_v0 = vrot.slane %v4434_v11, %v22378_v19  ;;  %v18803_v34 = vcombine.high %v18775_v3, %v18775_v3  ;;  %v18811_v28 = vcombine.high %v18785_v48, %v18785_v48 }
 0x3cb   :  { %22380 = vst [vmem:[#allocation51_spill] sm:$0xff] %v18779_v61  ;;  %v18807_v12 = vcombine.high %v18782_v40, %v18782_v40  ;;  %v4451_v57 = vcombine.high %v4323_v25, %v4323_v25  ;;  %v18815_v58 = vcombine.high %v18792_v2, %v18792_v2  ;;  %v18822_v50 = vrot.slane %v4323_v25, %v22378_v19 }
 0x3cc   :  { %22381 = vst [vmem:[#allocation11_spill] sm:$0xff] %v18803_v34  ;;  %v18819_v15 = vcombine.high %v18799_v0, %v18799_v0  ;;  %v4468_v14 = vcombine.high %v4324_v1, %v4324_v1  ;;  %v18828_v5 = vrot.slane %v4324_v1, %v22378_v19  ;;  %v4485_v39 = vcombine.high %v4325_v59, %v4325_v59 }
 0x3cd   :  { %v18825_v26 = vrot.slane %v4451_v57, %v22378_v19  ;;  %v18831_v13 = vrot.slane %v4325_v59, %v22378_v19  ;;  %v18835_v29 = vcombine.high %v18822_v50, %v18822_v50  ;;  %v4502_v16 = vcombine.high %v4326_v41, %v4326_v41 }
 0x3ce   :  { %v18838_v43 = vrot.slane %v4468_v14, %v22378_v19  ;;  %v18841_v17 = vrot.slane %v4326_v41, %v22378_v19  ;;  %v18849_v25 = vcombine.high %v18828_v5, %v18828_v5  ;;  %v18852_v1 = vrot.slane %v4485_v39, %v22378_v19 }
 0x3cf   :  { %v18845_v44 = vcombine.high %v18825_v26, %v18825_v26  ;;  %v18856_v59 = vcombine.high %v18831_v13, %v18831_v13  ;;  %v18863_v41 = vrot.slane %v4502_v16, %v22378_v19  ;;  %v4519_v42 = vcombine.high %v18725_v30, %v18725_v30 }
 0x3d0   :  { %22382 = vst [vmem:[#allocation54_spill] sm:$0xff] %v18841_v17  ;;  %22383 = vst [vmem:[#allocation50_spill] sm:$0xff] %v18852_v1  ;;  %v18860_v54 = vcombine.high %v18838_v43, %v18838_v43  ;;  %v18867_v31 = vcombine.high %v18841_v17, %v18841_v17  ;;  %v18873_v11 = vcombine.high %v18852_v1, %v18852_v1 }
 0x3d1   :  { %22384 = vst [vmem:[#allocation64_spill] sm:$0xff] %v18856_v59  ;;  %22385 = vst [vmem:[#allocation53_spill] sm:$0xff] %v18863_v41  ;;  %v18877_v57 = vrot.slane %v18725_v30, %v22378_v19  ;;  %v4536_v14 = vcombine.high %v18727_v27, %v18727_v27  ;;  %v18883_v39 = vrot.slane %v18727_v27, %v22378_v19 }
 0x3d2   :  { %22386 = vst [vmem:[#allocation19_spill] sm:$0xff] %v18867_v31  ;;  %v18887_v16 = vcombine.high %v18863_v41, %v18863_v41  ;;  %v18890_v38 = vrot.slane %v4519_v42, %v22378_v19  ;;  %v4553_v63 = vcombine.high %v18729_v60, %v18729_v60  ;;  %v18896_v30 = vrot.slane %v18729_v60, %v22378_v19 }
 0x3d3   :  { %22387 = vst [vmem:[#allocation57_spill] sm:$0xff] %v18877_v57  ;;  %22388 = vst [vmem:[#allocation40_spill] sm:$0xff] %v18883_v39  ;;  %v18900_v8 = vcombine.high %v18877_v57, %v18877_v57  ;;  %v18903_v27 = vrot.slane %v4536_v14, %v22378_v19  ;;  %v18907_v51 = vcombine.high %v18883_v39, %v18883_v39 }
 0x3d4   :  { %22389 = vst [vmem:[#allocation17_spill] sm:$0xff] %v18890_v38  ;;  %22390 = vst [vmem:[#allocation60_spill] sm:$0xff] %v18896_v30  ;;  %v4570_v42 = vcombine.high %v18731_v33, %v18731_v33  ;;  %v18913_v7 = vcombine.high %v18890_v38, %v18890_v38  ;;  %v18916_v60 = vrot.slane %v4553_v63, %v22378_v19 }
 0x3d5   :  { %22391 = vst [vmem:[#allocation56_spill] sm:$0xff] %v18900_v8  ;;  %22392 = vst [vmem:[#allocation59_spill] sm:$0xff] %v18903_v27  ;;  %v18920_v24 = vcombine.high %v18896_v30, %v18896_v30  ;;  %v18924_v14 = vrot.slane %v18731_v33, %v22378_v19  ;;  %v18928_v46 = vcombine.high %v18903_v27, %v18903_v27 }
 0x3d6   :  { %22393 = vst [vmem:[#allocation21_spill] sm:$0xff] %v18907_v51  ;;  %22394 = vst [vmem:[#allocation63_spill] sm:$0xff] %v18916_v60  ;;  %v18931_v51 = vrot.slane %v4570_v42, %v22378_v19  ;;  %v4587_v39 = vcombine.high %v18733_v47, %v18733_v47  ;;  %v18937_v63 = vrot.slane %v18733_v47, %v22378_v19 }
 0x3d7   :  { %22395 = vst [vmem:[#allocation37_spill] sm:$0xff] %v18920_v24  ;;  %22396 = vst [vmem:[#allocation41_spill] sm:$0xff] %v18924_v14  ;;  %v18941_v24 = vcombine.high %v18916_v60, %v18916_v60  ;;  %v18945_v33 = vcombine.high %v18924_v14, %v18924_v14  ;;  %v4604_v30 = vcombine.high %v18735_v55, %v18735_v55 }
 0x3d8   :  { %22397 = vst [vmem:[#allocation62_spill] sm:$0xff] %v18928_v46  ;;  %22398 = vst [vmem:[#allocation65_spill] sm:$0xff] %v18931_v51  ;;  %v18951_v42 = vrot.slane %v18735_v55, %v22378_v19  ;;  %v18955_v46 = vcombine.high %v18931_v51, %v18931_v51  ;;  %v18958_v47 = vrot.slane %v4587_v39, %v22378_v19 }
 0x3d9   :  { %22399 = vst [vmem:[#allocation42_spill] sm:$0xff] %v18937_v63  ;;  %22400 = vst [vmem:[#allocation67_spill] sm:$0xff] %v18941_v24  ;;  %v18962_v24 = vcombine.high %v18937_v63, %v18937_v63  ;;  %v18967_v14 = vrot.slane %v4604_v30, %v22378_v19  ;;  %v4638_v39 = vcombine.high %v18739_v52, %v18739_v52 }
 0x3da   :  { %22401 = vst [vmem:[#allocation23_spill] sm:$0xff] %v18945_v33  ;;  %22402 = vst [vmem:[#allocation43_spill] sm:$0xff] %v18951_v42  ;;  %v4621_v33 = vcombine.high %v18737_v56, %v18737_v56  ;;  %v18971_v55 = vcombine.high %v18951_v42, %v18951_v42  ;;  %v18988_v30 = vrot.slane %v18739_v52, %v22378_v19 }
 0x3db   :  { %22403 = vst [vmem:[#allocation66_spill] sm:$0xff] %v18955_v46  ;;  %22404 = vst [vmem:[#allocation16_spill] sm:$0xff] %v18958_v47  ;;  %v18975_v46 = vrot.slane %v18737_v56, %v22378_v19  ;;  %v18994_v56 = vcombine.high %v18967_v14, %v18967_v14 }
 0x3dc   :  { %22405 = vst [vmem:[#allocation45_spill] sm:$0xff] %v18962_v24  ;;  %22406 = vst [vmem:[#allocation26_spill] sm:$0xff] %v18967_v14  ;;  %v18981_v24 = vcombine.high %v18958_v47, %v18958_v47  ;;  %v18984_v63 = vrot.slane %v4621_v33, %v22378_v19  ;;  %v19005_v33 = vrot.slane %v18741_v4, %v22378_v19 }
 0x3dd   :  { %22407 = vst [vmem:[#allocation27_spill] sm:$0xff] %v18971_v55  ;;  %22408 = vst [vmem:[#allocation24_spill] sm:$0xff] %v18975_v46  ;;  %v4655_v55 = vcombine.high %v18741_v4, %v18741_v4  ;;  %v18998_v42 = vcombine.high %v18975_v46, %v18975_v46  ;;  %v19013_v47 = vcombine.high %v18988_v30, %v18988_v30 }
 0x3de   :  { %22409 = vst [vmem:[#allocation35_spill] sm:$0xff] %v18981_v24  ;;  %22410 = vst [vmem:[#allocation39_spill] sm:$0xff] %v18984_v63  ;;  %v19001_v24 = vrot.slane %v4638_v39, %v22378_v19  ;;  %v19009_v52 = vcombine.high %v18984_v63, %v18984_v63  ;;  %v19026_v4 = vcombine.high %v19005_v33, %v19005_v33 }
 0x3df   :  { %22411 = vst [vmem:[#allocation38_spill] sm:$0xff] %v18988_v30  ;;  %22412 = vst [vmem:[#allocation36_spill] sm:$0xff] %v18994_v56  ;;  %v19016_v56 = vrot.slane %v4655_v55, %v22378_v19 }
 0x3e0   :  { %22413 = vst [vmem:[#allocation44_spill] sm:$0xff] %v18998_v42  ;;  %22414 = vst [vmem:[#allocation52_spill] sm:$0xff] %v19001_v24  ;;  %v4672_v42 = vcombine.high %v18743_v20, %v18743_v20  ;;  %v19022_v39 = vcombine.high %v19001_v24, %v19001_v24  ;;  %v22463_v57 = vld [vmem:[#allocation67_spill] sm:$0xff] }
 0x3e1   :  { %22415 = vst [vmem:[#allocation47_spill] sm:$0xff] %v19005_v33  ;;  %22416 = vst [vmem:[#allocation12_spill] sm:$0xff] %v19009_v52  ;;  %v19030_v52 = vrot.slane %v18743_v20, %v22378_v19  ;;  %v19036_v55 = vcombine.high %v19016_v56, %v19016_v56  ;;  %v22465_v38 = vld [vmem:[#allocation23_spill] sm:$0xff] }
 0x3e2   :  { %22417 = vst [vmem:[#allocation49_spill] sm:$0xff] %v19013_v47  ;;  %22418 = vst [vmem:[#allocation46_spill] sm:$0xff] %v19016_v56  ;;  %v4689_v47 = vcombine.high %v18745_v37, %v18745_v37  ;;  %v19039_v30 = vrot.slane %v4672_v42, %v22378_v19  ;;  %v4723_v42 = vcombine.high %v18749_v49, %v18749_v49  ;;  %v22466_v59 = vld [vmem:[#allocation66_spill] sm:$0xff] }
 0x3e3   :  { %22419 = vst [vmem:[#allocation55_spill] sm:$0xff] %v19022_v39  ;;  %22420 = vst [vmem:[#allocation68_spill] sm:$0xff] %v19026_v4  ;;  %v19043_v39 = vrot.slane %v18745_v37, %v22378_v19  ;;  %v4706_v4 = vcombine.high %v18747_v36, %v18747_v36  ;;  %v19049_v20 = vcombine.high %v19030_v52, %v19030_v52 }
 0x3e4   :  { %22421 = vst [vmem:[#allocation69_spill] sm:$0xff] %v19030_v52  ;;  %22422 = vst [vmem:[#allocation70_spill] sm:$0xff] %v19036_v55  ;;  %v19052_v33 = vrot.slane %v4689_v47, %v22378_v19  ;;  %v19056_v55 = vrot.slane %v18747_v36, %v22378_v19  ;;  %v19062_v37 = vcombine.high %v19039_v30, %v19039_v30 }
 0x3e5   :  { %22423 = vst [vmem:[#allocation71_spill] sm:$0xff] %v19039_v30  ;;  %22424 = vst [vmem:[#allocation72_spill] sm:$0xff] %v19043_v39  ;;  %v19066_v56 = vcombine.high %v19043_v39, %v19043_v39  ;;  %v19073_v47 = vrot.slane %v18749_v49, %v22378_v19  ;;  %v15706_v39 = vld [vmem:[#allocation2 + $0xa8] sm:$0xff]  }
 0x3e6   :  { %22425 = vst [vmem:[#allocation73_spill] sm:$0xff] %v19049_v20  ;;  %22426 = vst [vmem:[#allocation74_spill] sm:$0xff] %v19052_v33  ;;  %v19069_v20 = vrot.slane %v4706_v4, %v22378_v19  ;;  %v19077_v36 = vcombine.high %v19052_v33, %v19052_v33  ;;  %v19081_v52 = vcombine.high %v19056_v55, %v19056_v55  ;;  %v15705_v4 = vld [vmem:[#allocation2 + $0xb8] sm:$0xff]   ;;  %14765 = vmatprep.subr.bf16.mxu1 %v15706_v39  ;;  %v22470_v31 = vld [vmem:[#allocation35_spill] sm:$0xff] }
 0x3e7   :  { %22427 = vst [vmem:[#allocation75_spill] sm:$0xff] %v19056_v55  ;;  %22428 = vst [vmem:[#allocation76_spill] sm:$0xff] %v19062_v37  ;;  %v19084_v37 = vrot.slane %v4723_v42, %v22378_v19  ;;  %v19094_v33 = vcombine.high %v19073_v47, %v19073_v47  ;;  %v19098_v55 = vrot.slane %v18751_v18, %v22378_v19  ;;  %14753 = vmatprep.subr.bf16.mxu0 %v15705_v4 }
 0x3e8   :  { %22429 = vst [vmem:[#allocation77_spill] sm:$0xff] %v19066_v56  ;;  %22430 = vst [vmem:[#allocation78_spill] sm:$0xff] %v19069_v20  ;;  %v4740_v56 = vcombine.high %v18751_v18, %v18751_v18  ;;  %v19090_v49 = vcombine.high %v19069_v20, %v19069_v20  ;;  %v4757_v42 = vcombine.high %v18753_v10, %v18753_v10  ;;  %v15707_v18 = vld [vmem:[#allocation2 + $0xb0] sm:$0xff]   ;;  %14754 = vmatpush3.bf16.msra.mxu0 %v15705_v4 }
 0x3e9   :  { %22431 = vst [vmem:[#allocation79_spill] sm:$0xff] %v19073_v47  ;;  %22432 = vst [vmem:[#allocation80_spill] sm:$0xff] %v19077_v36  ;;  %v19117_v47 = vcombine.high %v19098_v55, %v19098_v55  ;;  %14766 = vmatpush3.bf16.msra.mxu1 %v15706_v39  ;;  %14755 = vmatprep.subr.bf16.mxu0 %v15707_v18  ;;  %v22475_v1 = vld [vmem:[#allocation12_spill] sm:$0xff] }
 0x3ea   :  { %22433 = vst [vmem:[#allocation81_spill] sm:$0xff] %v19081_v52  ;;  %22434 = vst [vmem:[#allocation82_spill] sm:$0xff] %v19084_v37  ;;  %v19104_v52 = vcombine.high %v19084_v37, %v19084_v37  ;;  %v19107_v36 = vrot.slane %v4740_v56, %v22378_v19  ;;  %v19120_v20 = vrot.slane %v4757_v42, %v22378_v19 }
 0x3eb   :  { %22435 = vst [vmem:[#allocation83_spill] sm:$0xff] %v19090_v49  ;;  %22436 = vst [vmem:[#allocation84_spill] sm:$0xff] %v19094_v33  ;;  %v19111_v49 = vrot.slane %v18753_v10, %v22378_v19  ;;  %v4774_v33 = vcombine.high %v18755_v23, %v18755_v23  ;;  %v19124_v56 = vrot.slane %v18755_v23, %v22378_v19  ;;  %v15708_v23 = vld [vmem:[#allocation2 + $0xa0] sm:$0xff]  }
 0x3ec   :  { %22437 = vst [vmem:[#allocation85_spill] sm:$0xff] %v19098_v55  ;;  %22438 = vst [vmem:[#allocation86_spill] sm:$0xff] %v19104_v52  ;;  %v4791_v10 = vcombine.high %v18757_v32, %v18757_v32  ;;  %v19130_v52 = vcombine.high %v19107_v36, %v19107_v36  ;;  %v19141_v42 = vrot.slane %v18757_v32, %v22378_v19  ;;  %14756 = vmatpush3.bf16.msra.mxu0 %v15707_v18 }
 0x3ed   :  { %22439 = vst [vmem:[#allocation87_spill] sm:$0xff] %v19107_v36  ;;  %22440 = vst [vmem:[#allocation88_spill] sm:$0xff] %v19111_v49  ;;  %v19134_v37 = vcombine.high %v19111_v49, %v19111_v49  ;;  %v19145_v4 = vcombine.high %v19120_v20, %v19120_v20  ;;  %14767 = vmatprep.subr.bf16.mxu1 %v15708_v23 }
 0x3ee   :  { %22441 = vst [vmem:[#allocation89_spill] sm:$0xff] %v19117_v47  ;;  %22442 = vst [vmem:[#allocation90_spill] sm:$0xff] %v19120_v20  ;;  %v19137_v47 = vrot.slane %v4774_v33, %v22378_v19  ;;  %v19152_v49 = vrot.slane %v4791_v10, %v22378_v19  ;;  %v4808_v33 = vcombine.high %v18759_v22, %v18759_v22  ;;  %14768 = vmatpush3.bf16.msra.mxu1 %v15708_v23 }
 0x3ef   :  { %22443 = vst [vmem:[#allocation91_spill] sm:$0xff] %v19124_v56  ;;  %22444 = vst [vmem:[#allocation92_spill] sm:$0xff] %v19130_v52  ;;  %v19149_v52 = vcombine.high %v19124_v56, %v19124_v56  ;;  %v4825_v10 = vcombine.high %v18761_v21, %v18761_v21  ;;  %v22487_v24 = vld [vmem:[#allocation77_spill] sm:$0xff]  ;;  %v22513_v20 = vmov %v18766_v45 }
 0x3f0   :  { %22445 = vst [vmem:[#allocation93_spill] sm:$0xff] %v19134_v37  ;;  %22446 = vst [vmem:[#allocation94_spill] sm:$0xff] %v19141_v42  ;;  %v19158_v32 = vcombine.high %v19137_v47, %v19137_v47  ;;  %v19162_v37 = vcombine.high %v19141_v42, %v19141_v42  ;;  %v19175_v39 = vrot.slane %v4808_v33, %v22378_v19  ;;  %v22489_v60 = vld [vmem:[#allocation80_spill] sm:$0xff] }
 0x3f1   :  { %22447 = vst [vmem:[#allocation95_spill] sm:$0xff] %v19145_v4  ;;  %22448 = vst [vmem:[#allocation96_spill] sm:$0xff] %v19149_v52  ;;  %v19166_v4 = vrot.slane %v18759_v22, %v22378_v19  ;;  %v19172_v52 = vcombine.high %v19152_v49, %v19152_v49  ;;  %v19188_v42 = vrot.slane %v4825_v10, %v22378_v19  ;;  %v22515_v10 = vmov %v18779_v61 }
 0x3f2   :  { %22449 = vst [vmem:[#allocation97_spill] sm:$0xff] %v19152_v49  ;;  %22450 = vst [vmem:[#allocation98_spill] sm:$0xff] %v19158_v32  ;;  %v19179_v32 = vrot.slane %v18761_v21, %v22378_v19  ;;  %v15709_v21 = vld [vmem:[#allocation2 + $0xc8] sm:$0xff]   ;;  %v19197_v49 = vcombine.high %v19175_v39, %v19175_v39  ;;  %v22495_v30 = vld [vmem:[#allocation84_spill] sm:$0xff]  ;;  %v22517_v61 = vrot.slane %v18775_v3, 9 }
 0x3f3   :  { %22451 = vst [vmem:[#allocation99_spill] sm:$0xff] %v19162_v37  ;;  %22452 = vst [vmem:[#allocation100_spill] sm:$0xff] %v19172_v52  ;;  %v4842_v37 = vcombine.high %v18763_v53, %v18763_v53  ;;  %v19185_v22 = vcombine.high %v19166_v4, %v19166_v4  ;;  %v19192_v52 = vrot.slane %v18763_v53, %v22378_v19  ;;  %14777 = vmatprep.subr.bf16.mxu0 %v15709_v21  ;;  %v22493_v51 = vld [vmem:[#allocation83_spill] sm:$0xff]  ;;  %v22497_v17 = vld [vmem:[#allocation86_spill] sm:$0xff] }
 0x3f4   :  { %22453 = vst [vmem:[#allocation101_spill] sm:$0xff] %v19179_v32  ;;  %22456 = vst [vmem:[#allocation104_spill] sm:$0xff] %v19197_v49  ;;  %v19201_v18 = vcombine.high %v19179_v32, %v19179_v32  ;;  %v19209_v53 = vcombine.high %v19188_v42, %v19188_v42  ;;  %v22510_v56 = vmov %v19197_v49  ;;  %v22514_v49 = vrot.slane %v22513_v20, 9 }
 0x3f5   :  { %22454 = vst [vmem:[#allocation102_spill] sm:$0xff] %v19185_v22  ;;  %22455 = vst [vmem:[#allocation103_spill] sm:$0xff] %v19192_v52  ;;  %v19204_v22 = vrot.slane %v4842_v37, %v22378_v19  ;;  %v19213_v33 = vcombine.high %v19192_v52, %v19192_v52  ;;  %v22511_v36 = vmov %v19192_v52  ;;  %v22516_v32 = vrot.slane %v22515_v10, 9 }
 0x3f6   :  { %v19332_v34 = vmax.f32 %v22513_v20, %v22514_v49  ;;  %v19342_v52 = vmax.f32 %v18775_v3, %v22517_v61  ;;  %v22520_v21 = vrot.slane %v18769_v62, 9  ;;  %v22521_v49 = vrot.slane %v18789_v6, 9 }
 0x3f7   :  { %22457 = vst [vmem:[#allocation105_spill] sm:$0xff] %v19213_v33  ;;  %v19219_v37 = vcombine.high %v19204_v22, %v19204_v22  ;;  %v22501_v46 = vld [vmem:[#allocation93_spill] sm:$0xff]  ;;  %v22505_v41 = vld [vmem:[#allocation94_spill] sm:$0xff]  ;;  %v22512_v14 = vmov %v19213_v33  ;;  %v19337_v23 = vmax.f32 %v22515_v10, %v22516_v32  ;;  %v22518_v33 = vld [vmem:[#allocation11_spill] sm:$0xff]  ;;  %v22522_v10 = vrot.slane %v18782_v40, 9 }
 0x3f8   :  { %v22502_v63 = vld [vmem:[#allocation95_spill] sm:$0xff]  ;;  %v22503_v27 = vld [vmem:[#allocation96_spill] sm:$0xff]  ;;  %v22519_v19 = vrot.slane %v22518_v33, 9  ;;  %v19352_v20 = vmax.f32 %v18769_v62, %v22520_v21  ;;  %v19357_v32 = vmax.f32 %v18789_v6, %v22521_v49  ;;  %v22523_v61 = vrot.slane %v18807_v12, 9 }
 0x3f9   :  { %v22504_v55 = vld [vmem:[#allocation98_spill] sm:$0xff]  ;;  %v19362_v3 = vmax.f32 %v18782_v40, %v22522_v10  ;;  %v22526_v21 = vrot.slane %v18796_v35, 9  ;;  %v22527_v49 = vrot.slane %v18792_v2, 9  ;;  %v22528_v10 = vrot.slane %v18815_v58, 9 }
 0x3fa   :  { %v22508_v8 = vld [vmem:[#allocation100_spill] sm:$0xff]  ;;  %v19347_v45 = vmax.f32 %v22518_v33, %v22519_v19  ;;  %v19367_v19 = vmax.f32 %v18807_v12, %v22523_v61  ;;  %v22525_v33 = vrot.slane %v18772_v9, 9  ;;  %v22529_v61 = vrot.slane %v18785_v48, 9 }
 0x3fb   :  { %v19377_v6 = vmax.f32 %v18796_v35, %v22526_v21  ;;  %v19382_v40 = vmax.f32 %v18792_v2, %v22527_v49  ;;  %v19387_v12 = vmax.f32 %v18815_v58, %v22528_v10  ;;  %v22531_v21 = vrot.slane %v18799_v0, 9  ;;  %v19404_v49 = vld [vmem:[#allocation2 + $0xd8] sm:$0xff]  }
 0x3fc   :  { %22524 = vst [vmem:[#allocation67_spill] sm:$0xff] %v19367_v19  ;;  %v19372_v62 = vmax.f32 %v18772_v9, %v22525_v33  ;;  %v19392_v9 = vmax.f32 %v18785_v48, %v22529_v61  ;;  %v22530_v33 = vrot.slane %v18811_v28, 9  ;;  %22532 = vst [vmem:[#allocation23_spill] sm:$0xff] %v19404_v49  ;;  %v22533_v58 = vrot.slane %v18819_v15, 9  ;;  %14789 = vmatprep.subr.bf16.mxu1 %v19404_v49 }
 0x3fd   :  { %v19402_v2 = vmax.f32 %v18799_v0, %v22531_v21  ;;  %v22534_v48 = vrot.slane %v18822_v50, 9  ;;  %v22536_v0 = vrot.slane %v18825_v26, 9  ;;  %v22537_v19 = vrot.slane %v18845_v44, 9 }
 0x3fe   :  { %v19397_v35 = vmax.f32 %v18811_v28, %v22530_v33  ;;  %v19409_v10 = vmax.f32 %v18819_v15, %v22533_v58  ;;  %v22535_v28 = vrot.slane %v18835_v29, 9  ;;  %v22539_v58 = vrot.slane %v18828_v5, 9 }
 0x3ff   :  { %v19414_v61 = vmax.f32 %v18822_v50, %v22534_v48  ;;  %v19424_v21 = vmax.f32 %v18825_v26, %v22536_v0  ;;  %v19429_v15 = vmax.f32 %v18845_v44, %v22537_v19  ;;  %v22541_v48 = vrot.slane %v18849_v25, 9 }
 0x400   :  { %v19419_v33 = vmax.f32 %v18835_v29, %v22535_v28  ;;  %v19434_v50 = vmax.f32 %v18828_v5, %v22539_v58  ;;  %v22543_v28 = vrot.slane %v18838_v43, 9  ;;  %v22545_v44 = vrot.slane %v18860_v54, 9  ;;  %v22548_v58 = vld [vmem:[#allocation64_spill] sm:$0xff] }
 0x401   :  { %22538 = vst [vmem:[#allocation66_spill] sm:$0xff] %v19429_v15  ;;  %v19439_v29 = vmax.f32 %v18849_v25, %v22541_v48  ;;  %v22547_v5 = vrot.slane %v18831_v13, 9  ;;  %v22549_v25 = vrot.slane %v22548_v58, 9  ;;  %v22552_v49 = vrot.slane %v18873_v11, 9 }
 0x402   :  { %22540 = vst [vmem:[#allocation35_spill] sm:$0xff] %v19434_v50  ;;  %v19444_v26 = vmax.f32 %v18838_v43, %v22543_v28  ;;  %v19450_v19 = vmax.f32 %v18860_v54, %v22545_v44  ;;  %v22553_v44 = vld [vmem:[#allocation54_spill] sm:$0xff] }
 0x403   :  { %22542 = vst [vmem:[#allocation12_spill] sm:$0xff] %v19439_v29  ;;  %v19455_v0 = vmax.f32 %v18831_v13, %v22547_v5  ;;  %v19460_v48 = vmax.f32 %v22548_v58, %v22549_v25  ;;  %v22550_v29 = vld [vmem:[#allocation50_spill] sm:$0xff]  ;;  %v19470_v54 = vmax.f32 %v18873_v11, %v22552_v49  ;;  %v22556_v5 = vld [vmem:[#allocation19_spill] sm:$0xff]  ;;  %v22559_v25 = vld [vmem:[#allocation53_spill] sm:$0xff] }
 0x404   :  { %22544 = vst [vmem:[#allocation77_spill] sm:$0xff] %v19444_v26  ;;  %22546 = vst [vmem:[#allocation80_spill] sm:$0xff] %v19450_v19  ;;  %v22551_v43 = vrot.slane %v22550_v29, 9  ;;  %v22554_v19 = vrot.slane %v22553_v44, 9  ;;  %v22557_v26 = vrot.slane %v22556_v5, 9  ;;  %v22560_v50 = vrot.slane %v22559_v25, 9 }
 0x405   :  { %v22563_v49 = vld [vmem:[#allocation57_spill] sm:$0xff] }
 0x406   :  { %v19465_v28 = vmax.f32 %v22550_v29, %v22551_v43  ;;  %v19475_v13 = vmax.f32 %v22553_v44, %v22554_v19  ;;  %v19480_v58 = vmax.f32 %v22556_v5, %v22557_v26  ;;  %v19485_v29 = vmax.f32 %v22559_v25, %v22560_v50  ;;  %v22566_v44 = vld [vmem:[#allocation56_spill] sm:$0xff]  ;;  %v22569_v5 = vld [vmem:[#allocation17_spill] sm:$0xff] }
 0x407   :  { %v22561_v43 = vrot.slane %v18887_v16, 9  ;;  %v22564_v15 = vrot.slane %v22563_v49, 9  ;;  %v22572_v25 = vrot.slane %v18913_v7, 9 }
 0x408   :  { %22555 = vst [vmem:[#allocation83_spill] sm:$0xff] %v19475_v13  ;;  %22558 = vst [vmem:[#allocation84_spill] sm:$0xff] %v19480_v58  ;;  %v22567_v13 = vrot.slane %v22566_v44, 9  ;;  %v22570_v58 = vrot.slane %v22569_v5, 9 }
 0x409   :  { %v19490_v11 = vmax.f32 %v18887_v16, %v22561_v43  ;;  %v19495_v19 = vmax.f32 %v22563_v49, %v22564_v15  ;;  %v19510_v16 = vmax.f32 %v18913_v7, %v22572_v25  ;;  %v22574_v43 = vld [vmem:[#allocation40_spill] sm:$0xff]  ;;  %v22577_v49 = vld [vmem:[#allocation21_spill] sm:$0xff] }
 0x40a   :  { %v19500_v26 = vmax.f32 %v22566_v44, %v22567_v13  ;;  %v19505_v50 = vmax.f32 %v22569_v5, %v22570_v58  ;;  %v22580_v44 = vld [vmem:[#allocation59_spill] sm:$0xff]  ;;  %v22583_v5 = vld [vmem:[#allocation62_spill] sm:$0xff]  ;;  %v22586_v25 = vld [vmem:[#allocation60_spill] sm:$0xff] }
 0x40b   :  { %22562 = vst [vmem:[#allocation86_spill] sm:$0xff] %v19490_v11  ;;  %22565 = vst [vmem:[#allocation93_spill] sm:$0xff] %v19495_v19  ;;  %v22575_v11 = vrot.slane %v22574_v43, 9  ;;  %v22578_v19 = vrot.slane %v22577_v49, 9 }
 0x40c   :  { %22568 = vst [vmem:[#allocation95_spill] sm:$0xff] %v19500_v26  ;;  %22571 = vst [vmem:[#allocation96_spill] sm:$0xff] %v19505_v50  ;;  %v22581_v26 = vrot.slane %v22580_v44, 9  ;;  %v22584_v50 = vrot.slane %v22583_v5, 9 }
 0x40d   :  { %22573 = vst [vmem:[#allocation98_spill] sm:$0xff] %v19510_v16  ;;  %v19515_v15 = vmax.f32 %v22574_v43, %v22575_v11  ;;  %v19520_v13 = vmax.f32 %v22577_v49, %v22578_v19  ;;  %v22587_v16 = vrot.slane %v22586_v25, 9  ;;  %v22588_v43 = vld [vmem:[#allocation37_spill] sm:$0xff]  ;;  %v22590_v49 = vld [vmem:[#allocation63_spill] sm:$0xff] }
 0x40e   :  { %v19525_v58 = vmax.f32 %v22580_v44, %v22581_v26  ;;  %v19530_v7 = vmax.f32 %v22583_v5, %v22584_v50  ;;  %v22592_v44 = vrot.slane %v22463_v57, 9  ;;  %v22594_v5 = vld [vmem:[#allocation41_spill] sm:$0xff] }
 0x40f   :  { %22576 = vst [vmem:[#allocation94_spill] sm:$0xff] %v19515_v15  ;;  %22579 = vst [vmem:[#allocation100_spill] sm:$0xff] %v19520_v13  ;;  %v19535_v11 = vmax.f32 %v22586_v25, %v22587_v16  ;;  %v22589_v15 = vrot.slane %v22588_v43, 9  ;;  %v22591_v13 = vrot.slane %v22590_v49, 9  ;;  %v22597_v25 = vrot.slane %v22465_v38, 9 }
 0x410   :  { %22582 = vst [vmem:[#allocation104_spill] sm:$0xff] %v19525_v58  ;;  %22585 = vst [vmem:[#allocation103_spill] sm:$0xff] %v19530_v7  ;;  %v19550_v50 = vmax.f32 %v22463_v57, %v22592_v44  ;;  %v22595_v7 = vrot.slane %v22594_v5, 9  ;;  %v22603_v44 = vld [vmem:[#allocation42_spill] sm:$0xff] }
 0x411   :  { %v19540_v19 = vmax.f32 %v22588_v43, %v22589_v15  ;;  %v19545_v26 = vmax.f32 %v22590_v49, %v22591_v13  ;;  %v19560_v15 = vmax.f32 %v22465_v38, %v22597_v25  ;;  %v22599_v43 = vld [vmem:[#allocation65_spill] sm:$0xff]  ;;  %v22601_v49 = vrot.slane %v22466_v59, 9  ;;  %v22609_v25 = vld [vmem:[#allocation16_spill] sm:$0xff] }
 0x412   :  { %22593 = vst [vmem:[#allocation105_spill] sm:$0xff] %v19550_v50  ;;  %v19555_v16 = vmax.f32 %v22594_v5, %v22595_v7  ;;  %v22600_v58 = vrot.slane %v22599_v43, 9  ;;  %v22604_v50 = vrot.slane %v22603_v44, 9  ;;  %v22606_v5 = vld [vmem:[#allocation45_spill] sm:$0xff] }
 0x413   :  { %22598 = vst [vmem:[#allocation51_spill] sm:$0xff] %v19560_v15  ;;  %v19570_v57 = vmax.f32 %v22466_v59, %v22601_v49  ;;  %v22610_v15 = vrot.slane %v22609_v25, 9  ;;  %v22614_v49 = vld [vmem:[#allocation43_spill] sm:$0xff] }
 0x414   :  { %22596 = vst [vmem:[#allocation13_spill] sm:$0xff] %v19555_v16  ;;  %v19565_v13 = vmax.f32 %v22599_v43, %v22600_v58  ;;  %v19575_v7 = vmax.f32 %v22603_v44, %v22604_v50  ;;  %v22607_v16 = vrot.slane %v22606_v5, 9  ;;  %v22612_v43 = vrot.slane %v22470_v31, 9  ;;  %v22617_v44 = vld [vmem:[#allocation27_spill] sm:$0xff] }
 0x415   :  { %22602 = vst [vmem:[#allocation11_spill] sm:$0xff] %v19570_v57  ;;  %v19585_v58 = vmax.f32 %v22609_v25, %v22610_v15  ;;  %v22615_v57 = vrot.slane %v22614_v49, 9  ;;  %v22623_v25 = vld [vmem:[#allocation36_spill] sm:$0xff] }
 0x416   :  { %22605 = vst [vmem:[#allocation64_spill] sm:$0xff] %v19575_v7  ;;  %v19580_v38 = vmax.f32 %v22606_v5, %v22607_v16  ;;  %v19590_v59 = vmax.f32 %v22470_v31, %v22612_v43  ;;  %v22618_v7 = vrot.slane %v22617_v44, 9  ;;  %v22620_v5 = vld [vmem:[#allocation26_spill] sm:$0xff]  ;;  %v22626_v43 = vld [vmem:[#allocation24_spill] sm:$0xff] }
 0x417   :  { %22611 = vst [vmem:[#allocation54_spill] sm:$0xff] %v19585_v58  ;;  %v19595_v50 = vmax.f32 %v22614_v49, %v22615_v57  ;;  %v22624_v58 = vrot.slane %v22623_v25, 9  ;;  %v22628_v49 = vld [vmem:[#allocation44_spill] sm:$0xff] }
 0x418   :  { %22608 = vst [vmem:[#allocation50_spill] sm:$0xff] %v19580_v38  ;;  %22613 = vst [vmem:[#allocation19_spill] sm:$0xff] %v19590_v59  ;;  %v19600_v16 = vmax.f32 %v22617_v44, %v22618_v7  ;;  %v22621_v38 = vrot.slane %v22620_v5, 9  ;;  %v22627_v59 = vrot.slane %v22626_v43, 9  ;;  %v22631_v44 = vld [vmem:[#allocation39_spill] sm:$0xff] }
 0x419   :  { %22616 = vst [vmem:[#allocation53_spill] sm:$0xff] %v19595_v50  ;;  %v19610_v31 = vmax.f32 %v22623_v25, %v22624_v58  ;;  %v22629_v50 = vrot.slane %v22628_v49, 9  ;;  %v22636_v25 = vld [vmem:[#allocation38_spill] sm:$0xff] }
 0x41a   :  { %22619 = vst [vmem:[#allocation57_spill] sm:$0xff] %v19600_v16  ;;  %v19605_v15 = vmax.f32 %v22620_v5, %v22621_v38  ;;  %v19615_v57 = vmax.f32 %v22626_v43, %v22627_v59  ;;  %v22632_v16 = vrot.slane %v22631_v44, 9  ;;  %v22634_v5 = vrot.slane %v22475_v1, 9  ;;  %v22639_v43 = vld [vmem:[#allocation49_spill] sm:$0xff] }
 0x41b   :  { %22625 = vst [vmem:[#allocation17_spill] sm:$0xff] %v19610_v31  ;;  %v19620_v7 = vmax.f32 %v22628_v49, %v22629_v50  ;;  %v22637_v31 = vrot.slane %v22636_v25, 9  ;;  %v22642_v49 = vld [vmem:[#allocation52_spill] sm:$0xff] }
 0x41c   :  { %22622 = vst [vmem:[#allocation56_spill] sm:$0xff] %v19605_v15  ;;  %v19625_v38 = vmax.f32 %v22631_v44, %v22632_v16  ;;  %v19630_v58 = vmax.f32 %v22475_v1, %v22634_v5  ;;  %v22640_v15 = vrot.slane %v22639_v43, 9  ;;  %v22645_v44 = vld [vmem:[#allocation55_spill] sm:$0xff] }
 0x41d   :  { %22630 = vst [vmem:[#allocation40_spill] sm:$0xff] %v19620_v7  ;;  %v19635_v59 = vmax.f32 %v22636_v25, %v22637_v31  ;;  %v22643_v7 = vrot.slane %v22642_v49, 9  ;;  %v22648_v5 = vld [vmem:[#allocation47_spill] sm:$0xff]  ;;  %v22651_v25 = vld [vmem:[#allocation68_spill] sm:$0xff] }
 0x41e   :  { %22633 = vst [vmem:[#allocation21_spill] sm:$0xff] %v19625_v38  ;;  %22635 = vst [vmem:[#allocation59_spill] sm:$0xff] %v19630_v58  ;;  %v19640_v50 = vmax.f32 %v22639_v43, %v22640_v15  ;;  %v22646_v38 = vrot.slane %v22645_v44, 9  ;;  %v22649_v58 = vrot.slane %v22648_v5, 9  ;;  %v22654_v43 = vld [vmem:[#allocation46_spill] sm:$0xff] }
 0x41f   :  { %22638 = vst [vmem:[#allocation62_spill] sm:$0xff] %v19635_v59  ;;  %v19645_v16 = vmax.f32 %v22642_v49, %v22643_v7  ;;  %v22652_v59 = vrot.slane %v22651_v25, 9  ;;  %v22657_v49 = vld [vmem:[#allocation70_spill] sm:$0xff] }
 0x420   :  { %22641 = vst [vmem:[#allocation60_spill] sm:$0xff] %v19640_v50  ;;  %v19650_v1 = vmax.f32 %v22645_v44, %v22646_v38  ;;  %v19655_v31 = vmax.f32 %v22648_v5, %v22649_v58  ;;  %v22655_v50 = vrot.slane %v22654_v43, 9  ;;  %v22660_v44 = vld [vmem:[#allocation69_spill] sm:$0xff] }
 0x421   :  { %22644 = vst [vmem:[#allocation37_spill] sm:$0xff] %v19645_v16  ;;  %v19660_v15 = vmax.f32 %v22651_v25, %v22652_v59  ;;  %v22658_v16 = vrot.slane %v22657_v49, 9  ;;  %v22663_v5 = vld [vmem:[#allocation73_spill] sm:$0xff]  ;;  %v22666_v25 = vld [vmem:[#allocation71_spill] sm:$0xff] }
 0x422   :  { %22647 = vst [vmem:[#allocation63_spill] sm:$0xff] %v19650_v1  ;;  %22650 = vst [vmem:[#allocation41_spill] sm:$0xff] %v19655_v31  ;;  %v19665_v7 = vmax.f32 %v22654_v43, %v22655_v50  ;;  %v22661_v1 = vrot.slane %v22660_v44, 9  ;;  %v22664_v31 = vrot.slane %v22663_v5, 9  ;;  %v22669_v43 = vld [vmem:[#allocation76_spill] sm:$0xff] }
 0x423   :  { %22653 = vst [vmem:[#allocation65_spill] sm:$0xff] %v19660_v15  ;;  %v19670_v38 = vmax.f32 %v22657_v49, %v22658_v16  ;;  %v22667_v15 = vrot.slane %v22666_v25, 9  ;;  %v22672_v49 = vld [vmem:[#allocation72_spill] sm:$0xff] }
 0x424   :  { %22656 = vst [vmem:[#allocation42_spill] sm:$0xff] %v19665_v7  ;;  %v19675_v58 = vmax.f32 %v22660_v44, %v22661_v1  ;;  %v19680_v59 = vmax.f32 %v22663_v5, %v22664_v31  ;;  %v22670_v7 = vrot.slane %v22669_v43, 9  ;;  %v22674_v44 = vrot.slane %v22487_v24, 9  ;;  %v22675_v5 = vld [vmem:[#allocation74_spill] sm:$0xff] }
 0x425   :  { %22659 = vst [vmem:[#allocation45_spill] sm:$0xff] %v19670_v38  ;;  %v19685_v50 = vmax.f32 %v22666_v25, %v22667_v15  ;;  %v22673_v38 = vrot.slane %v22672_v49, 9  ;;  %v22677_v25 = vrot.slane %v22489_v60, 9 }
 0x426   :  { %22662 = vst [vmem:[#allocation16_spill] sm:$0xff] %v19675_v58  ;;  %22665 = vst [vmem:[#allocation43_spill] sm:$0xff] %v19680_v59  ;;  %v19690_v16 = vmax.f32 %v22669_v43, %v22670_v7  ;;  %v19700_v31 = vmax.f32 %v22487_v24, %v22674_v44  ;;  %v22676_v59 = vrot.slane %v22675_v5, 9  ;;  %v22679_v43 = vld [vmem:[#allocation75_spill] sm:$0xff]  ;;  %v22684_v44 = vld [vmem:[#allocation78_spill] sm:$0xff] }
 0x427   :  { %22668 = vst [vmem:[#allocation27_spill] sm:$0xff] %v19685_v50  ;;  %v19695_v1 = vmax.f32 %v22672_v49, %v22673_v38  ;;  %v19710_v7 = vmax.f32 %v22489_v60, %v22677_v25  ;;  %v22681_v49 = vld [vmem:[#allocation81_spill] sm:$0xff]  ;;  %v22685_v58 = vrot.slane %v22684_v44, 9  ;;  %v22688_v25 = vld [vmem:[#allocation79_spill] sm:$0xff] }
 0x428   :  { %22671 = vst [vmem:[#allocation26_spill] sm:$0xff] %v19690_v16  ;;  %v19705_v15 = vmax.f32 %v22675_v5, %v22676_v59  ;;  %v22680_v16 = vrot.slane %v22679_v43, 9  ;;  %v22682_v50 = vrot.slane %v22681_v49, 9  ;;  %v22686_v5 = vrot.slane %v22493_v51, 9 }
 0x429   :  { %22678 = vst [vmem:[#allocation36_spill] sm:$0xff] %v19710_v7  ;;  %v19725_v59 = vmax.f32 %v22684_v44, %v22685_v58  ;;  %v22689_v7 = vrot.slane %v22688_v25, 9  ;;  %v22696_v44 = vrot.slane %v22497_v17, 9 }
 0x42a   :  { %v19715_v38 = vmax.f32 %v22679_v43, %v22680_v16  ;;  %v19720_v24 = vmax.f32 %v22681_v49, %v22682_v50  ;;  %v19730_v60 = vmax.f32 %v22493_v51, %v22686_v5  ;;  %v22691_v43 = vrot.slane %v22495_v30, 9  ;;  %v22693_v49 = vld [vmem:[#allocation82_spill] sm:$0xff]  ;;  %v22698_v5 = vld [vmem:[#allocation85_spill] sm:$0xff] }
 0x42b   :  { %v19735_v16 = vmax.f32 %v22688_v25, %v22689_v7  ;;  %v19750_v51 = vmax.f32 %v22497_v17, %v22696_v44  ;;  %v22700_v25 = vld [vmem:[#allocation89_spill] sm:$0xff]  ;;  %v22709_v44 = vld [vmem:[#allocation88_spill] sm:$0xff] }
 0x42c   :  { %22683 = vst [vmem:[#allocation24_spill] sm:$0xff] %v19720_v24  ;;  %22687 = vst [vmem:[#allocation44_spill] sm:$0xff] %v19730_v60  ;;  %v19740_v50 = vmax.f32 %v22495_v30, %v22691_v43  ;;  %v22694_v24 = vrot.slane %v22693_v49, 9  ;;  %v22699_v60 = vrot.slane %v22698_v5, 9  ;;  %v22703_v43 = vld [vmem:[#allocation87_spill] sm:$0xff] }
 0x42d   :  { %22690 = vst [vmem:[#allocation39_spill] sm:$0xff] %v19735_v16  ;;  %22697 = vst [vmem:[#allocation52_spill] sm:$0xff] %v19750_v51  ;;  %v22701_v16 = vrot.slane %v22700_v25, 9  ;;  %v22710_v51 = vrot.slane %v22709_v44, 9 }
 0x42e   :  { %22692 = vst [vmem:[#allocation38_spill] sm:$0xff] %v19740_v50  ;;  %v19745_v58 = vmax.f32 %v22693_v49, %v22694_v24  ;;  %v19755_v7 = vmax.f32 %v22698_v5, %v22699_v60  ;;  %v22704_v50 = vrot.slane %v22703_v43, 9  ;;  %v22706_v49 = vld [vmem:[#allocation92_spill] sm:$0xff]  ;;  %v22711_v5 = vrot.slane %v22501_v46, 9 }
 0x42f   :  { %v19760_v30 = vmax.f32 %v22700_v25, %v22701_v16  ;;  %v19775_v60 = vmax.f32 %v22709_v44, %v22710_v51  ;;  %v22712_v25 = vld [vmem:[#allocation90_spill] sm:$0xff]  ;;  %v22717_v44 = vrot.slane %v22503_v27, 9 }
 0x430   :  { %22695 = vst [vmem:[#allocation49_spill] sm:$0xff] %v19745_v58  ;;  %v19765_v24 = vmax.f32 %v22703_v43, %v22704_v50  ;;  %v22707_v58 = vrot.slane %v22706_v49, 9  ;;  %v19780_v16 = vmax.f32 %v22501_v46, %v22711_v5  ;;  %v22714_v43 = vrot.slane %v22502_v63, 9 }
 0x431   :  { %22702 = vst [vmem:[#allocation55_spill] sm:$0xff] %v19760_v30  ;;  %v22713_v30 = vrot.slane %v22712_v25, 9  ;;  %v19800_v46 = vmax.f32 %v22503_v27, %v22717_v44  ;;  %v22719_v5 = vrot.slane %v19137_v47, 9  ;;  %v22725_v44 = vld [vmem:[#allocation97_spill] sm:$0xff] }
 0x432   :  { %22705 = vst [vmem:[#allocation47_spill] sm:$0xff] %v19765_v24  ;;  %v19770_v17 = vmax.f32 %v22706_v49, %v22707_v58  ;;  %v19790_v58 = vmax.f32 %v22502_v63, %v22714_v43  ;;  %v22715_v49 = vld [vmem:[#allocation91_spill] sm:$0xff]  ;;  %v22721_v43 = vrot.slane %v22505_v41, 9 }
 0x433   :  { %v19785_v50 = vmax.f32 %v22712_v25, %v22713_v30  ;;  %22718 = vst [vmem:[#allocation46_spill] sm:$0xff] %v19800_v46  ;;  %v19805_v30 = vmax.f32 %v19137_v47, %v22719_v5  ;;  %v22720_v25 = vrot.slane %v22504_v55, 9  ;;  %v22726_v46 = vrot.slane %v22725_v44, 9 }
 0x434   :  { %22708 = vst [vmem:[#allocation68_spill] sm:$0xff] %v19770_v17  ;;  %v22716_v17 = vrot.slane %v22715_v49, 9  ;;  %v22727_v5 = vrot.slane %v22508_v8, 9 }
 0x435   :  { %v19810_v63 = vmax.f32 %v22504_v55, %v22720_v25  ;;  %v19825_v47 = vmax.f32 %v22725_v44, %v22726_v46  ;;  %v22729_v25 = vrot.slane %v19166_v4, 9  ;;  %v22735_v44 = vrot.slane %v22510_v56, 9 }
 0x436   :  { %v19795_v51 = vmax.f32 %v22715_v49, %v22716_v17  ;;  %v19815_v17 = vmax.f32 %v22505_v41, %v22721_v43  ;;  %v22723_v49 = vld [vmem:[#allocation99_spill] sm:$0xff]  ;;  %v19830_v55 = vmax.f32 %v22508_v8, %v22727_v5  ;;  %v22731_v43 = vld [vmem:[#allocation102_spill] sm:$0xff]  ;;  %v22736_v5 = vld [vmem:[#allocation101_spill] sm:$0xff] }
 0x437   :  { %v22724_v24 = vrot.slane %v22723_v49, 9  ;;  %v19835_v41 = vmax.f32 %v19166_v4, %v22729_v25  ;;  %v19850_v8 = vmax.f32 %v22510_v56, %v22735_v44  ;;  %v22738_v25 = vrot.slane %v19201_v18, 9 }
 0x438   :  { %22722 = vst [vmem:[#allocation70_spill] sm:$0xff] %v19815_v17  ;;  %22728 = vst [vmem:[#allocation69_spill] sm:$0xff] %v19830_v55  ;;  %v22732_v17 = vrot.slane %v22731_v43, 9  ;;  %v22737_v55 = vrot.slane %v22736_v5, 9  ;;  %v22742_v44 = vrot.slane %v22512_v14, 9 }
 0x439   :  { %v19820_v27 = vmax.f32 %v22723_v49, %v22724_v24  ;;  %22730 = vst [vmem:[#allocation73_spill] sm:$0xff] %v19835_v41  ;;  %v22733_v49 = vrot.slane %v19175_v39, 9  ;;  %v5544_v41 = vmax.f32 %v19201_v18, %v22738_v25  ;;  %v22744_v25 = vrot.slane %v19219_v37, 9 }
 0x43a   :  { %v19840_v24 = vmax.f32 %v22731_v43, %v22732_v17  ;;  %v5543_v4 = vmax.f32 %v22736_v5, %v22737_v55  ;;  %v22739_v17 = vrot.slane %v19188_v42, 9  ;;  %v5548_v55 = vmax.f32 %v22512_v14, %v22742_v44 }
 0x43b   :  { %v19845_v46 = vmax.f32 %v19175_v39, %v22733_v49  ;;  %v22740_v39 = vrot.slane %v19209_v53, 9  ;;  %v22743_v5 = vrot.slane %v19204_v22, 9  ;;  %v19890_v14 = vmax.f32 %v19347_v45, %v19387_v12 }
 0x43c   :  { %v5545_v43 = vmax.f32 %v19188_v42, %v22739_v17  ;;  %v5550_v42 = vmax.f32 %v19219_v37, %v22744_v25  ;;  %v19878_v17 = vmax.f32 %v19332_v34, %v19372_v62  ;;  %v19898_v34 = vmax.f32 %v19357_v32, %v19397_v35  ;;  %v22747_v62 = vld [vmem:[#allocation66_spill] sm:$0xff]  ;;  %v22751_v35 = vld [vmem:[#allocation12_spill] sm:$0xff] }
 0x43d   :  { %22734 = vst [vmem:[#allocation71_spill] sm:$0xff] %v19845_v46  ;;  %v5546_v49 = vmax.f32 %v19209_v53, %v22740_v39  ;;  %v22741_v46 = vrot.slane %v22511_v36, 9  ;;  %v5549_v18 = vmax.f32 %v19204_v22, %v22743_v5  ;;  %v19882_v53 = vmax.f32 %v19337_v23, %v19377_v6  ;;  %v22745_v23 = vld [vmem:[#allocation67_spill] sm:$0xff]  ;;  %v22758_v39 = vld [vmem:[#allocation96_spill] sm:$0xff]  ;;  %v22759_v5 = vld [vmem:[#allocation105_spill] sm:$0xff] }
 0x43e   :  { %v19894_v22 = vmax.f32 %v19352_v20, %v19392_v9  ;;  %v19902_v37 = vmax.f32 %v19362_v3, %v19402_v2  ;;  %v19910_v45 = vmax.f32 %v19414_v61, %v19455_v0  ;;  %v19914_v20 = vmax.f32 %v19419_v33, %v19460_v48  ;;  %v22748_v6 = vld [vmem:[#allocation83_spill] sm:$0xff]  ;;  %v22750_v9 = vld [vmem:[#allocation84_spill] sm:$0xff]  ;;  %v22753_v33 = vld [vmem:[#allocation86_spill] sm:$0xff] }
 0x43f   :  { %v5547_v56 = vmax.f32 %v22511_v36, %v22741_v46  ;;  %v19886_v36 = vmax.f32 %v19342_v52, %v19382_v40  ;;  %v19906_v52 = vmax.f32 %v22745_v23, %v19409_v10  ;;  %v19918_v32 = vmax.f32 %v19424_v21, %v19465_v28  ;;  %v22749_v40 = vld [vmem:[#allocation35_spill] sm:$0xff]  ;;  %v22752_v10 = vld [vmem:[#allocation77_spill] sm:$0xff]  ;;  %v22754_v0 = vld [vmem:[#allocation80_spill] sm:$0xff] }
 0x440   :  { %v19922_v3 = vmax.f32 %v22747_v62, %v19470_v54  ;;  %v19926_v12 = vmax.f32 %v22749_v40, %v22748_v6  ;;  %v19930_v2 = vmax.f32 %v22751_v35, %v22750_v9  ;;  %v19934_v61 = vmax.f32 %v22752_v10, %v19485_v29  ;;  %v22756_v48 = vld [vmem:[#allocation93_spill] sm:$0xff]  ;;  %v22757_v54 = vld [vmem:[#allocation95_spill] sm:$0xff]  ;;  %v22760_v25 = vld [vmem:[#allocation98_spill] sm:$0xff] }
 0x441   :  { %22746 = vst [vmem:[#allocation76_spill] sm:$0xff] %v19906_v52  ;;  %v19938_v21 = vmax.f32 %v22754_v0, %v22753_v33  ;;  %v19942_v28 = vmax.f32 %v22756_v48, %v19535_v11  ;;  %v19946_v46 = vmax.f32 %v22757_v54, %v19540_v19  ;;  %v19950_v44 = vmax.f32 %v22758_v39, %v19545_v26  ;;  %v22761_v23 = vld [vmem:[#allocation13_spill] sm:$0xff]  ;;  %v22762_v62 = vld [vmem:[#allocation94_spill] sm:$0xff]  ;;  %v22763_v40 = vld [vmem:[#allocation51_spill] sm:$0xff] }
 0x442   :  { %v19954_v29 = vmax.f32 %v22760_v25, %v22759_v5  ;;  %v19958_v6 = vmax.f32 %v22762_v62, %v22761_v23  ;;  %v22764_v9 = vld [vmem:[#allocation100_spill] sm:$0xff]  ;;  %v22767_v10 = vld [vmem:[#allocation11_spill] sm:$0xff]  ;;  %v22773_v39 = vld [vmem:[#allocation50_spill] sm:$0xff] }
 0x443   :  { %22755 = vst [vmem:[#allocation72_spill] sm:$0xff] %v19938_v21  ;;  %v19962_v11 = vmax.f32 %v22764_v9, %v22763_v40  ;;  %v22765_v35 = vld [vmem:[#allocation104_spill] sm:$0xff]  ;;  %v22768_v33 = vld [vmem:[#allocation103_spill] sm:$0xff]  ;;  %v22775_v25 = vld [vmem:[#allocation21_spill] sm:$0xff] }
 0x444   :  { %v19966_v19 = vmax.f32 %v22765_v35, %v19565_v13  ;;  %v19970_v26 = vmax.f32 %v22768_v33, %v22767_v10  ;;  %v22770_v0 = vld [vmem:[#allocation64_spill] sm:$0xff]  ;;  %v22776_v23 = vld [vmem:[#allocation54_spill] sm:$0xff]  ;;  %v22777_v40 = vld [vmem:[#allocation59_spill] sm:$0xff] }
 0x445   :  { %v19974_v48 = vmax.f32 %v22770_v0, %v19615_v57  ;;  %v22772_v54 = vld [vmem:[#allocation40_spill] sm:$0xff]  ;;  %v19982_v62 = vmax.f32 %v22776_v23, %v22775_v25  ;;  %v22778_v9 = vld [vmem:[#allocation19_spill] sm:$0xff]  ;;  %v22779_v35 = vld [vmem:[#allocation62_spill] sm:$0xff] }
 0x446   :  { %22766 = vst [vmem:[#allocation74_spill] sm:$0xff] %v19966_v19  ;;  %22769 = vst [vmem:[#allocation75_spill] sm:$0xff] %v19970_v26  ;;  %v19978_v5 = vmax.f32 %v22773_v39, %v22772_v54  ;;  %v19986_v13 = vmax.f32 %v22778_v9, %v22777_v40  ;;  %v22780_v19 = vld [vmem:[#allocation53_spill] sm:$0xff]  ;;  %v22781_v33 = vld [vmem:[#allocation60_spill] sm:$0xff] }
 0x447   :  { %22771 = vst [vmem:[#allocation81_spill] sm:$0xff] %v19974_v48  ;;  %v19990_v10 = vmax.f32 %v22780_v19, %v22779_v35  ;;  %v22782_v26 = vld [vmem:[#allocation57_spill] sm:$0xff]  ;;  %v22785_v48 = vld [vmem:[#allocation56_spill] sm:$0xff]  ;;  %v22786_v39 = vld [vmem:[#allocation63_spill] sm:$0xff] }
 0x448   :  { %22774 = vst [vmem:[#allocation78_spill] sm:$0xff] %v19978_v5  ;;  %v19994_v57 = vmax.f32 %v22782_v26, %v22781_v33  ;;  %v22784_v0 = vld [vmem:[#allocation37_spill] sm:$0xff]  ;;  %v22792_v35 = vld [vmem:[#allocation42_spill] sm:$0xff]  ;;  %v22793_v33 = vld [vmem:[#allocation36_spill] sm:$0xff] }
 0x449   :  { %v19998_v54 = vmax.f32 %v22785_v48, %v22784_v0  ;;  %v22787_v5 = vld [vmem:[#allocation17_spill] sm:$0xff]  ;;  %v20014_v26 = vmax.f32 %v22792_v35, %v19705_v15  ;;  %v22795_v0 = vld [vmem:[#allocation16_spill] sm:$0xff]  ;;  %v22802_v35 = vld [vmem:[#allocation39_spill] sm:$0xff] }
 0x44a   :  { %22783 = vst [vmem:[#allocation79_spill] sm:$0xff] %v19994_v57  ;;  %v20002_v25 = vmax.f32 %v22787_v5, %v22786_v39  ;;  %v22789_v23 = vld [vmem:[#allocation41_spill] sm:$0xff]  ;;  %v20022_v5 = vmax.f32 %v22795_v0, %v19715_v38  ;;  %v22796_v39 = vld [vmem:[#allocation24_spill] sm:$0xff] }
 0x44b   :  { %v20006_v40 = vmax.f32 %v22789_v23, %v19695_v1  ;;  %v22790_v9 = vld [vmem:[#allocation65_spill] sm:$0xff]  ;;  %v22798_v23 = vld [vmem:[#allocation27_spill] sm:$0xff] }
 0x44c   :  { %22788 = vst [vmem:[#allocation82_spill] sm:$0xff] %v20002_v25  ;;  %v20010_v19 = vmax.f32 %v22790_v9, %v19700_v31  ;;  %v22794_v57 = vld [vmem:[#allocation45_spill] sm:$0xff]  ;;  %v22797_v25 = vld [vmem:[#allocation43_spill] sm:$0xff]  ;;  %v20030_v31 = vmax.f32 %v22798_v23, %v19725_v59  ;;  %v22799_v9 = vld [vmem:[#allocation44_spill] sm:$0xff] }
 0x44d   :  { %v20018_v48 = vmax.f32 %v22794_v57, %v22793_v33  ;;  %v20026_v1 = vmax.f32 %v22797_v25, %v22796_v39  ;;  %v20038_v57 = vmax.f32 %v22802_v35, %v19775_v60  ;;  %v22803_v33 = vld [vmem:[#allocation38_spill] sm:$0xff]  ;;  %v22804_v0 = vld [vmem:[#allocation49_spill] sm:$0xff]  ;;  %v22806_v39 = vld [vmem:[#allocation52_spill] sm:$0xff] }
 0x44e   :  { %22791 = vst [vmem:[#allocation85_spill] sm:$0xff] %v20010_v19  ;;  %v22800_v19 = vld [vmem:[#allocation26_spill] sm:$0xff]  ;;  %v20042_v38 = vmax.f32 %v22803_v33, %v19780_v16  ;;  %v20046_v25 = vmax.f32 %v22804_v0, %v19785_v50  ;;  %v20050_v59 = vmax.f32 %v22806_v39, %v19790_v58  ;;  %v22809_v35 = vld [vmem:[#allocation47_spill] sm:$0xff]  ;;  %v22810_v33 = vld [vmem:[#allocation68_spill] sm:$0xff]  ;;  %v20072_v58 = vmax.f32 %v19820_v27, %v5544_v41 }
 0x44f   :  { %v20034_v15 = vmax.f32 %v22800_v19, %v22799_v9  ;;  %v20054_v19 = vmax.f32 %v19755_v7, %v19795_v51  ;;  %v22807_v23 = vld [vmem:[#allocation46_spill] sm:$0xff]  ;;  %v22808_v9 = vld [vmem:[#allocation55_spill] sm:$0xff]  ;;  %v20062_v16 = vmax.f32 %v22809_v35, %v19805_v30  ;;  %v20066_v50 = vmax.f32 %v22810_v33, %v19810_v63  ;;  %v22813_v51 = vld [vmem:[#allocation69_spill] sm:$0xff] }
 0x450   :  { %22805 = vst [vmem:[#allocation87_spill] sm:$0xff] %v20046_v25  ;;  %v20058_v60 = vmax.f32 %v22808_v9, %v22807_v23  ;;  %v22812_v0 = vld [vmem:[#allocation70_spill] sm:$0xff]  ;;  %v20075_v7 = vmax.f32 %v19825_v47, %v5545_v43  ;;  %v20078_v39 = vmax.f32 %v22813_v51, %v5546_v49  ;;  %v22814_v23 = vld [vmem:[#allocation73_spill] sm:$0xff]  ;;  %v20084_v30 = vmax.f32 %v19840_v24, %v5548_v55  ;;  %v22815_v63 = vld [vmem:[#allocation71_spill] sm:$0xff] }
 0x451   :  { %22801 = vst [vmem:[#allocation89_spill] sm:$0xff] %v20034_v15  ;;  %22811 = vst [vmem:[#allocation92_spill] sm:$0xff] %v20066_v50  ;;  %v20069_v25 = vmax.f32 %v22812_v0, %v5543_v4  ;;  %v20081_v9 = vmax.f32 %v22814_v23, %v5547_v56  ;;  %v20087_v35 = vmax.f32 %v22815_v63, %v5549_v18  ;;  %v22818_v33 = vld [vmem:[#allocation81_spill] sm:$0xff]  ;;  %v22819_v0 = vld [vmem:[#allocation78_spill] sm:$0xff] }
 0x452   :  { %v20090_v4 = vmax.f32 %v19850_v8, %v5550_v42  ;;  %v5631_v27 = vpack.c.bf16 %v19878_v17, %v19878_v17  ;;  %v5632_v47 = vpack.c.bf16 %v19882_v53, %v19882_v53  ;;  %v5633_v41 = vpack.c.bf16 %v19886_v36, %v19886_v36  ;;  %v22820_v51 = vld [vmem:[#allocation79_spill] sm:$0xff] }
 0x453   :  { %v5634_v43 = vpack.c.bf16 %v19890_v14, %v19890_v14  ;;  %v5635_v24 = vpack.c.bf16 %v19894_v22, %v19894_v22  ;;  %v5636_v49 = vpack.c.bf16 %v19898_v34, %v19898_v34  ;;  %v5637_v8 = vpack.c.bf16 %v19902_v37, %v19902_v37 }
 0x454   :  { %v5639_v55 = vpack.c.bf16 %v19910_v45, %v19910_v45  ;;  %v5640_v18 = vpack.c.bf16 %v19914_v20, %v19914_v20  ;;  %v5641_v42 = vpack.c.bf16 %v19918_v32, %v19918_v32  ;;  %v5642_v17 = vpack.c.bf16 %v19922_v3, %v19922_v3 }
 0x455   :  { %v5643_v53 = vpack.c.bf16 %v19926_v12, %v19926_v12  ;;  %v5644_v36 = vpack.c.bf16 %v19930_v2, %v19930_v2  ;;  %v5645_v14 = vpack.c.bf16 %v19934_v61, %v19934_v61  ;;  %v5647_v34 = vpack.c.bf16 %v19942_v28, %v19942_v28  ;;  %v22816_v12 = vld [vmem:[#allocation74_spill] sm:$0xff]  ;;  %v22817_v61 = vld [vmem:[#allocation75_spill] sm:$0xff] }
 0x456   :  { %v5648_v37 = vpack.c.bf16 %v19946_v46, %v19946_v46  ;;  %v5649_v45 = vpack.c.bf16 %v19950_v44, %v19950_v44  ;;  %v5650_v20 = vpack.c.bf16 %v19954_v29, %v19954_v29  ;;  %v5651_v32 = vpack.c.bf16 %v19958_v6, %v19958_v6 }
 0x457   :  { %v5652_v3 = vpack.c.bf16 %v19962_v11, %v19962_v11  ;;  %v5653_v2 = vpack.c.bf16 %v22816_v12, %v22816_v12  ;;  %v5654_v28 = vpack.c.bf16 %v22817_v61, %v22817_v61  ;;  %v5655_v46 = vpack.c.bf16 %v22818_v33, %v22818_v33  ;;  %v22821_v12 = vld [vmem:[#allocation82_spill] sm:$0xff]  ;;  %v22823_v22 = vld [vmem:[#allocation87_spill] sm:$0xff] }
 0x458   :  { %v5656_v44 = vpack.c.bf16 %v22819_v0, %v22819_v0  ;;  %v5657_v29 = vpack.c.bf16 %v19982_v62, %v19982_v62  ;;  %v5658_v6 = vpack.c.bf16 %v19986_v13, %v19986_v13  ;;  %v5659_v11 = vpack.c.bf16 %v19990_v10, %v19990_v10  ;;  %v22822_v0 = vld [vmem:[#allocation85_spill] sm:$0xff] }
 0x459   :  { %v5660_v23 = vpack.c.bf16 %v22820_v51, %v22820_v51  ;;  %v5661_v63 = vpack.c.bf16 %v19998_v54, %v19998_v54  ;;  %v5662_v61 = vpack.c.bf16 %v22821_v12, %v22821_v12  ;;  %v5663_v33 = vpack.c.bf16 %v20006_v40, %v20006_v40 }
 0x45a   :  { %v5664_v62 = vpack.c.bf16 %v22822_v0, %v22822_v0  ;;  %v5665_v13 = vpack.c.bf16 %v20014_v26, %v20014_v26  ;;  %v5666_v10 = vpack.c.bf16 %v20018_v48, %v20018_v48  ;;  %v5667_v51 = vpack.c.bf16 %v20022_v5, %v20022_v5 }
 0x45b   :  { %v5668_v54 = vpack.c.bf16 %v20026_v1, %v20026_v1  ;;  %v5669_v12 = vpack.c.bf16 %v20030_v31, %v20030_v31  ;;  %v5671_v0 = vpack.c.bf16 %v20038_v57, %v20038_v57  ;;  %v5672_v26 = vpack.c.bf16 %v20042_v38, %v20042_v38 }
 0x45c   :  { %v5673_v48 = vpack.c.bf16 %v22823_v22, %v22823_v22  ;;  %v5674_v5 = vpack.c.bf16 %v20050_v59, %v20050_v59  ;;  %v5675_v1 = vpack.c.bf16 %v20054_v19, %v20054_v19  ;;  %v5676_v31 = vpack.c.bf16 %v20058_v60, %v20058_v60 }
 0x45d   :  { %v5677_v40 = vpack.c.bf16 %v20062_v16, %v20062_v16  ;;  %v5679_v38 = vpack.c.bf16 %v20069_v25, %v20069_v25  ;;  %v5680_v22 = vpack.c.bf16 %v20072_v58, %v20072_v58  ;;  %v5681_v59 = vpack.c.bf16 %v20075_v7, %v20075_v7 }
 0x45e   :  { %v5682_v19 = vpack.c.bf16 %v20078_v39, %v20078_v39  ;;  %v5683_v60 = vpack.c.bf16 %v20081_v9, %v20081_v9  ;;  %v5684_v16 = vpack.c.bf16 %v20084_v30, %v20084_v30  ;;  %v5685_v57 = vpack.c.bf16 %v20087_v35, %v20087_v35 }
 0x45f   :  { %v5686_v25 = vpack.c.bf16 %v20090_v4, %v20090_v4  ;;  %v5855_v56 = vunpack.c.l.b16 %v5631_v27  ;;  %v5856_v58 = vunpack.c.l.b16 %v5632_v47  ;;  %v20204_v50 = vunpack.c.l.b16 %v5633_v41 }
 0x460   :  { %v20206_v7 = vunpack.c.l.b16 %v5634_v43  ;;  %v20208_v15 = vunpack.c.l.b16 %v5635_v24  ;;  %v20210_v39 = vunpack.c.l.b16 %v5636_v49  ;;  %v20212_v9 = vunpack.c.l.b16 %v5637_v8 }
 0x461   :  { %v5863_v21 = vunpack.c.l.b16 %v5639_v55  ;;  %v5864_v30 = vunpack.c.l.b16 %v5640_v18  ;;  %v20214_v52 = vunpack.c.l.b16 %v5641_v42  ;;  %v20216_v35 = vunpack.c.l.b16 %v5642_v17 }
 0x462   :  { %v20218_v4 = vunpack.c.l.b16 %v5643_v53  ;;  %v20220_v27 = vunpack.c.l.b16 %v5644_v36  ;;  %v20222_v47 = vunpack.c.l.b16 %v5645_v14  ;;  %v20224_v41 = vunpack.c.l.b16 %v5647_v34 }
 0x463   :  { %v20226_v43 = vunpack.c.l.b16 %v5648_v37  ;;  %v20228_v24 = vunpack.c.l.b16 %v5649_v45  ;;  %v20230_v49 = vunpack.c.l.b16 %v5650_v20  ;;  %v20232_v8 = vunpack.c.l.b16 %v5651_v32 }
 0x464   :  { %v20234_v55 = vunpack.c.l.b16 %v5652_v3  ;;  %v20236_v18 = vunpack.c.l.b16 %v5653_v2  ;;  %v20238_v42 = vunpack.c.l.b16 %v5654_v28  ;;  %v20240_v17 = vunpack.c.l.b16 %v5655_v46 }
 0x465   :  { %v20242_v53 = vunpack.c.l.b16 %v5656_v44  ;;  %v20244_v36 = vunpack.c.l.b16 %v5657_v29  ;;  %v20246_v14 = vunpack.c.l.b16 %v5658_v6  ;;  %v20248_v34 = vunpack.c.l.b16 %v5659_v11 }
 0x466   :  { %v20250_v37 = vunpack.c.l.b16 %v5660_v23  ;;  %v20252_v45 = vunpack.c.l.b16 %v5661_v63  ;;  %v20254_v20 = vunpack.c.l.b16 %v5662_v61  ;;  %v20256_v32 = vunpack.c.l.b16 %v5663_v33 }
 0x467   :  { %v20258_v3 = vunpack.c.l.b16 %v5664_v62  ;;  %v20260_v2 = vunpack.c.l.b16 %v5665_v13  ;;  %v20262_v28 = vunpack.c.l.b16 %v5666_v10  ;;  %v20264_v46 = vunpack.c.l.b16 %v5667_v51 }
 0x468   :  { %v20266_v44 = vunpack.c.l.b16 %v5668_v54  ;;  %v20268_v29 = vunpack.c.l.b16 %v5669_v12  ;;  %v20270_v6 = vunpack.c.l.b16 %v5671_v0  ;;  %v20272_v11 = vunpack.c.l.b16 %v5672_v26 }
 0x469   :  { %v20274_v23 = vunpack.c.l.b16 %v5673_v48  ;;  %v20276_v63 = vunpack.c.l.b16 %v5674_v5  ;;  %v20278_v61 = vunpack.c.l.b16 %v5675_v1  ;;  %v20280_v33 = vunpack.c.l.b16 %v5676_v31 }
 0x46a   :  { %v20282_v62 = vunpack.c.l.b16 %v5677_v40  ;;  %v20284_v13 = vunpack.c.l.b16 %v5679_v38  ;;  %v20286_v10 = vunpack.c.l.b16 %v5680_v22  ;;  %v20288_v51 = vunpack.c.l.b16 %v5681_v59 }
 0x46b   :  { %v20290_v54 = vunpack.c.l.b16 %v5682_v19  ;;  %v20292_v12 = vunpack.c.l.b16 %v5683_v60  ;;  %v20294_v0 = vunpack.c.l.b16 %v5684_v16  ;;  %v20296_v26 = vunpack.c.l.b16 %v5685_v57 }
 0x46c   :  { %v20298_v48 = vunpack.c.l.b16 %v5686_v25  ;;  %v5919_v40 = vrot.slane %v5856_v58, 7  ;;  %v5922_v5 = vrot.slane %v20204_v50, 6  ;;  %v5925_v1 = vrot.slane %v20206_v7, 5 }
 0x46d   :  { %v5928_v31 = vrot.slane %v20208_v15, 4  ;;  %v5931_v38 = vrot.slane %v20210_v39, 3  ;;  %v5934_v22 = vrot.slane %v20212_v9, 2  ;;  %v5940_v59 = vrot.slane %v5864_v30, 7 }
 0x46e   :  { %v5921_v19 = vsel %vm5920_vm14, %v5919_v40, %v5855_v56  ;;  %v5942_v57 = vrot.slane %v20214_v52, 6  ;;  %v5944_v60 = vrot.slane %v20216_v35, 5  ;;  %v5946_v16 = vrot.slane %v20218_v4, 4 }
 0x46f   :  { %v5924_v25 = vsel %vm22075_vm15, %v5922_v5, %v5921_v19  ;;  %v5941_v50 = vsel %vm5920_vm14, %v5940_v59, %v5863_v21  ;;  %v5948_v58 = vrot.slane %v20220_v27, 3  ;;  %v5950_v15 = vrot.slane %v20222_v47, 2 }
 0x470   :  { %v5927_v7 = vsel %vm22074_vm2, %v5925_v1, %v5924_v25  ;;  %v5943_v30 = vsel %vm22075_vm15, %v5942_v57, %v5941_v50  ;;  %v5954_v56 = vrot.slane %v20226_v43, 7  ;;  %v5956_v52 = vrot.slane %v20228_v24, 6 }
 0x471   :  { %v5930_v35 = vsel %vm22070_vm3, %v5928_v31, %v5927_v7  ;;  %v5945_v4 = vsel %vm22074_vm2, %v5944_v60, %v5943_v30  ;;  %v5958_v40 = vrot.slane %v20230_v49, 5  ;;  %v5960_v21 = vrot.slane %v20232_v8, 4 }
 0x472   :  { %v5947_v5 = vsel %vm22070_vm3, %v5946_v16, %v5945_v4  ;;  %v5955_v59 = vsel %vm5920_vm14, %v5954_v56, %v20224_v41  ;;  %v5962_v1 = vrot.slane %v20234_v55, 3  ;;  %v5964_v19 = vrot.slane %v20236_v18, 2 }
 0x473   :  { %v5957_v43 = vsel %vm22075_vm15, %v5956_v52, %v5955_v59  ;;  %v5966_v24 = vrot.slane %v20238_v42, 1  ;;  %v5968_v31 = vrot.slane %v20242_v53, 7  ;;  %v5970_v57 = vrot.slane %v20244_v36, 6 }
 0x474   :  { %v5959_v49 = vsel %vm22074_vm2, %v5958_v40, %v5957_v43  ;;  %v5972_v8 = vrot.slane %v20246_v14, 5  ;;  %v5974_v60 = vrot.slane %v20248_v34, 4  ;;  %v5976_v41 = vrot.slane %v20250_v37, 3 }
 0x475   :  { %v5961_v55 = vsel %vm22070_vm3, %v5960_v21, %v5959_v49  ;;  %v5969_v18 = vsel %vm5920_vm14, %v5968_v31, %v20240_v17  ;;  %v5978_v16 = vrot.slane %v20252_v45, 2  ;;  %v5980_v42 = vrot.slane %v20254_v20, 1 }
 0x476   :  { %v5963_v53 = vsel %vm22073_vm4, %v5962_v1, %v5961_v55  ;;  %v5971_v36 = vsel %vm22075_vm15, %v5970_v57, %v5969_v18  ;;  %v5982_v25 = vrot.slane %v20258_v3, 7  ;;  %v5984_v14 = vrot.slane %v20260_v2, 6  ;;  %v22826_v57 = vld [vmem:[#allocation72_spill] sm:$0xff] }
 0x477   :  { %v5965_v34 = vsel %vm22072_vm5, %v5964_v19, %v5963_v53  ;;  %v5973_v37 = vsel %vm22074_vm2, %v5972_v8, %v5971_v36  ;;  %v5986_v50 = vrot.slane %v20262_v28, 5  ;;  %v5988_v17 = vrot.slane %v20264_v46, 4 }
 0x478   :  { %v5975_v45 = vsel %vm22070_vm3, %v5974_v60, %v5973_v37  ;;  %v5983_v20 = vsel %vm5920_vm14, %v5982_v25, %v20256_v32  ;;  %v5990_v7 = vrot.slane %v20266_v44, 3  ;;  %v5992_v30 = vrot.slane %v20268_v29, 2 }
 0x479   :  { %v5977_v3 = vsel %vm22073_vm4, %v5976_v41, %v5975_v45  ;;  %v5985_v2 = vsel %vm22075_vm15, %v5984_v14, %v5983_v20  ;;  %v5996_v56 = vrot.slane %v20272_v11, 7  ;;  %v5998_v52 = vrot.slane %v20274_v23, 6  ;;  %v22834_v14 = vld [vmem:[#allocation15_spill] sm:$0xff] }
 0x47a   :  { %v5979_v28 = vsel %vm22072_vm5, %v5978_v16, %v5977_v3  ;;  %v5987_v46 = vsel %vm22074_vm2, %v5986_v50, %v5985_v2  ;;  %v6000_v4 = vrot.slane %v20276_v63, 5  ;;  %v6002_v32 = vrot.slane %v20278_v61, 4  ;;  %v22835_v3 = vld [vmem:[#allocation31_spill] sm:$0xff] }
 0x47b   :  { %v5989_v44 = vsel %vm22070_vm3, %v5988_v17, %v5987_v46  ;;  %v5997_v29 = vsel %vm5920_vm14, %v5996_v56, %v20270_v6  ;;  %v6004_v40 = vrot.slane %v20280_v33, 3  ;;  %v6006_v21 = vrot.slane %v20282_v62, 2  ;;  %v22836_v56 = vld [vmem:[#allocation30_spill] sm:$0xff] }
 0x47c   :  { %v5999_v11 = vsel %vm22075_vm15, %v5998_v52, %v5997_v29  ;;  %v6010_v23 = vrot.slane %v20286_v10, 7  ;;  %v6012_v59 = vrot.slane %v20288_v51, 6  ;;  %v6014_v1 = vrot.slane %v20290_v54, 5  ;;  %v22824_v10 = vld [vmem:[#allocation76_spill] sm:$0xff] }
 0x47d   :  { %v6001_v63 = vsel %vm22074_vm2, %v6000_v4, %v5999_v11  ;;  %v6016_v61 = vrot.slane %v20292_v12, 4  ;;  %v6018_v19 = vrot.slane %v20294_v0, 3  ;;  %v6020_v6 = vrot.slane %v20296_v26, 2 }
 0x47e   :  { %v6003_v33 = vsel %vm22070_vm3, %v6002_v32, %v6001_v63  ;;  %v6011_v62 = vsel %vm5920_vm14, %v6010_v23, %v20284_v13  ;;  %v6022_v43 = vrot.slane %v20298_v48, 1  ;;  %v22825_v51 = vpack.c.bf16 %v22824_v10, %v22824_v10  ;;  %v22846_v10 = vld [vmem:[#allocation33_spill] sm:$0xff] }
 0x47f   :  { %v6013_v54 = vsel %vm22075_vm15, %v6012_v59, %v6011_v62  ;;  %v22827_v12 = vpack.c.bf16 %v22826_v57, %v22826_v57  ;;  %v5933_v0 = vsel %vm22073_vm4, %v5931_v38, %v5930_v35  ;;  %v5949_v8 = vsel %vm22073_vm4, %v5948_v58, %v5947_v5  ;;  %v22830_v5 = vld [vmem:[#allocation89_spill] sm:$0xff] }
 0x480   :  { %v5862_v31 = vunpack.c.l.b16 %v22825_v51  ;;  %v6015_v26 = vsel %vm22074_vm2, %v6014_v1, %v6013_v54  ;;  %v5936_v13 = vsel %vm22072_vm5, %v5934_v22, %v5933_v0  ;;  %v5951_v39 = vsel %vm22072_vm5, %v5950_v15, %v5949_v8  ;;  %v22832_v15 = vld [vmem:[#allocation92_spill] sm:$0xff] }
 0x481   :  { %v5870_v49 = vunpack.c.l.b16 %v22827_v12  ;;  %v6017_v60 = vsel %vm22070_vm3, %v6016_v61, %v6015_v26  ;;  %v22828_v35 = vmov 0   ;;  %v5967_v9 = vsel %vm22071_vm6, %v5966_v24, %v5965_v34  ;;  %v22843_v61 = vld [vmem:[#allocation14_spill] sm:$0xff]  ;;  %v22849_v26 = vld [vmem:[#allocation61_spill] sm:$0xff] }
 0x482   :  { %v5937_v48 = vrot.slane %v5862_v31, 1  ;;  %v20400_v55 = vrot.slane %v22828_v35, 4  ;;  %v5981_v22 = vsel %vm22071_vm6, %v5980_v42, %v5979_v28  ;;  %v22831_v47 = vpack.c.bf16 %v22830_v5, %v22830_v5  ;;  %v22837_v28 = vld [vmem:[#allocation18_spill] sm:$0xff] }
 0x483   :  { %v5952_v41 = vrot.slane %v5870_v49, 1  ;;  %v20405_v58 = vpack.c.b16 %v5981_v22, %v5967_v9  ;;  %v22833_v16 = vpack.c.bf16 %v22832_v15, %v22832_v15  ;;  %v5991_v25 = vsel %vm22073_vm4, %v5990_v7, %v5989_v44  ;;  %v16029_v31 = vld [vmem:[#allocation2 + $0xc8] sm:$0xff]  }
 0x484   :  { %v5939_v38 = vsel %vm22071_vm6, %v5937_v48, %v5936_v13  ;;  %22829 = vst [vmem:[#allocation88_spill] sm:$0xff] %v20400_v55  ;;  %v5894_v18 = vunpack.c.l.b16 %v22831_v47  ;;  %v6005_v24 = vsel %vm22073_vm4, %v6004_v40, %v6003_v33  ;;  %v5699_v42 = vand.u32 7, %v22834_v14  ;;  %v15710_v40 = vld [vmem:[#allocation2 + $0xc0] sm:$0xff]  }
 0x485   :  { %v5953_v27 = vsel %vm22071_vm6, %v5952_v41, %v5951_v39  ;;  %v5902_v53 = vunpack.c.l.b16 %v22833_v16  ;;  %v6305_v34 = vrot.slane %v20405_v58, 4  ;;  %v5993_v37 = vsel %vm22072_vm5, %v5992_v30, %v5991_v25  ;;  %v22847_v12 = vld [vmem:[#allocation58_spill] sm:$0xff] }
 0x486   :  { %v20413_v36 = vpack.c.b16 %v5953_v27, %v5939_v38  ;;  %v5994_v50 = vrot.slane %v5894_v18, 1  ;;  %v6007_v17 = vsel %vm22072_vm5, %v6006_v21, %v6005_v24  ;;  %v5706_v2 = vand.u32 7, %v22835_v3  ;;  %v20475_v41 = vld [vmem:[#allocation2 + $0xe8] sm:$0xff]  }
 0x487   :  { %v6008_v20 = vrot.slane %v5902_v53, 1  ;;  %v5720_v52 = vand.u32 7, %v22836_v56  ;;  %vm6137_vm8 = vcmp.ge.s32.totalorder %v5699_v42, 1  ;;  %v22838_v46 = vand.u32 7, %v22837_v28  ;;  %v22853_v47 = vld [vmem:[#allocation34_spill] sm:$0xff] }
 0x488   :  { %v6303_v45 = vrot.slane %v20413_v36, 4  ;;  %v5995_v7 = vsel %vm22071_vm6, %v5994_v50, %v5993_v37  ;;  %v6019_v30 = vsel %vm22073_vm4, %v6018_v19, %v6017_v60  ;;  %vm6138_vm11 = vcmp.ge.s32.totalorder %v5706_v2, 1  ;;  %vm6161_vm12 = vmpackc.low %vm6137_vm8, %vm6137_vm8  ;;  %v22844_v19 = vld [vmem:[#allocation48_spill] sm:$0xff] }
 0x489   :  { %vm20427_vm10 = vcmp.ge.s32.totalorder %v22838_v46, 1  ;;  %v6009_v29 = vsel %vm22071_vm6, %v6008_v20, %v6007_v17  ;;  %vm20443_vm13 = vcmp.ge.s32.totalorder %v5720_v52, 1  ;;  %vm6162_vm3 = vmpackc.low %vm6138_vm11, %vm6138_vm11  ;;  %v6169_v23 = vsel %vm6161_vm12, 65537, %v22828_v35  ;;  %v22851_v60 = vld [vmem:[#allocation20_spill] sm:$0xff] }
 0x48a   :  { %v6304_v32 = vsel %vm6301_vm7, %v20400_v55, %v6303_v45  ;;  %v20435_v44 = vsel %vm6301_vm7, %v6303_v45, %v6305_v34  ;;  %v20439_v21 = vpack.c.b16 %v6009_v29, %v5995_v7  ;;  %v6021_v59 = vsel %vm22072_vm5, %v6020_v6, %v6019_v30  ;;  %vm6163_vm8 = vmpackc.low %vm20427_vm10, %vm20427_vm10 }
 0x48b   :  { %14757 = vmatprep.mubr.msk.bf16.mxu0 %vm174_vm0, %v6304_v32  ;;  %v6170_v1 = vsel %vm6162_vm3, 65537, %v22828_v35  ;;  %v6023_v63 = vsel %vm22071_vm6, %v6022_v43, %v6021_v59  ;;  %v22845_v33 = vrot.slane %v22844_v19, 3  ;;  %v6205_v51 = vshll.u32 %v22846_v10, 16  ;;  %vm6164_vm11 = vmpackc.low %vm20443_vm13, %vm20443_vm13 }
 0x48c   :  { %14758 = vmatmul.mubr.msk.bf16.vlgmr.msra.gmra.mxu0 %vm174_vm0, %v20435_v44  ;;  %v6307_v6 = vrot.slane %v20439_v21, 4  ;;  %v6171_v54 = vsel %vm6163_vm8, 65537, %v22828_v35  ;;  %v13358_v57 = vcombine.low %v6169_v23, %v6170_v1  ;;  %v22848_v43 = vrot.slane %v22847_v12, 2 }
 0x48d   :  { %v6033_v62 = vsel %vm22073_vm4, %v22845_v33, %v22843_v61  ;;  %14778 = vmatpush3.bf16.msra.mxu0 %v16029_v31  ;;  %v6172_v0 = vsel %vm6164_vm11, 65537, %v22828_v35  ;;  %v22850_v13 = vrot.slane %v22849_v26, 1  ;;  %v6207_v8 = vrot.slane %v6205_v51, 1 }
 0x48e   :  { %v6035_v49 = vsel %vm22072_vm5, %v22848_v43, %v6033_v62  ;;  %14779 = vmatprep.subr.bf16.mxu0 %v15710_v40  ;;  %v22852_v39 = vand.u32 7, %v22851_v60  ;;  %v20478_v38 = vsel %vm6301_vm7, %v6305_v34, %v6307_v6  ;;  %v13359_v9 = vcombine.low %v6171_v54, %v6172_v0 }
 0x48f   :  { %v6037_v48 = vsel %vm22071_vm6, %v22850_v13, %v6035_v49  ;;  %v6190_v22 = vshrl.u32 %v13358_v57, 16  ;;  %v6192_v27 = vshll.u32 %v13358_v57, 16  ;;  %14761 = vmatprep.mubr.msk.bf16.mxu0 %vm174_vm0, %v20478_v38  ;;  %v22854_v18 = vand.u32 7, %v22853_v47 }
 0x490   :  { %vm6143_vm3 = vcmp.ge.s32.totalorder %v22852_v39, 1  ;;  %v20482_v5 = vpack.c.b16 %v6037_v48, %v6023_v63  ;;  %v6209_v16 = vshrl.u32 %v22846_v10, 16  ;;  %v6197_v25 = vshll.u32 %v13359_v9, 16 }
 0x491   :  { %vm6167_vm10 = vmpackc.low %vm6143_vm3, %vm6143_vm3  ;;  %vm6144_vm12 = vcmp.ge.s32.totalorder %v22854_v18, 1  ;;  %v6194_v53 = vrot.slane %v6192_v27, 1  ;;  %v6201_v24 = vshrl.u32 %v13359_v9, 16  ;;  %14780 = vmatpush3.bf16.msra.mxu0 %v15710_v40  ;;  %vm20488_vm8 = vcmp.lt.s32.totalorder %v5699_v42, 7 }
 0x492   :  { %v6175_v15 = vsel %vm6167_vm10, 65537, %v22828_v35  ;;  %vm6168_vm13 = vmpackc.low %vm6144_vm12, %vm6144_vm12  ;;  %v6309_v37 = vrot.slane %v20482_v5, 4  ;;  %v6211_v17 = vor.u32 %v6209_v16, %v6207_v8  ;;  %vm6047_vm11 = vcmp.lt.s32.totalorder %v5706_v2, 7  ;;  %14801 = vmatprep.subr.bf16.mxu0 %v20475_v41  ;;  %v22864_v16 = vld [vmem:[#allocation32_spill] sm:$0xff] }
 0x493   :  { %v6176_v50 = vsel %vm6168_vm13, 65537, %v22828_v35  ;;  %vm6070_vm3 = vmpackc.low %vm20488_vm8, %vm20488_vm8  ;;  %v6195_v45 = vor.u32 %v6194_v53, %v6190_v22  ;;  %v6199_v20 = vrot.slane %v6197_v25, 1  ;;  %v22857_v42 = vmov %v22838_v46  ;;  %v22863_v22 = vld [vmem:[#allocation29_spill] sm:$0xff] }
 0x494   :  { %v13361_v7 = vcombine.low %v6175_v15, %v6176_v50  ;;  %vm6048_vm10 = vcmp.lt.s32.totalorder %v22857_v42, 7  ;;  %vm6071_vm12 = vmpackc.low %vm6047_vm11, %vm6047_vm11  ;;  %v20503_v46 = vsel %vm6301_vm7, %v6307_v6, %v6309_v37  ;;  %vm6049_vm13 = vcmp.lt.s32.totalorder %v5720_v52, 7 }
 0x495   :  { %vm6072_vm6 = vmpackc.low %vm6048_vm10, %vm6048_vm10  ;;  %v6078_v2 = vsel %vm6070_vm3, 65537, %v22828_v35  ;;  %v6079_v4 = vsel %vm6071_vm12, 65537, %v22828_v35  ;;  %v20510_v30 = vsel %vm1679_vm1, %v6195_v45, %v6199_v20  ;;  %v6203_v32 = vor.u32 %v6201_v24, %v6199_v20  ;;  %14762 = vmatmul.mubr.msk.bf16.gmra.mxu0 %vm174_vm0, %v20503_v46 }
 0x496   :  { %22858 = vst [vmem:[#allocation90_spill] sm:$0xff] %v20510_v30  ;;  %v6213_v28 = vshll.u32 %v13361_v7, 16  ;;  %vm6073_vm8 = vmpackc.low %vm6049_vm13, %vm6049_vm13  ;;  %v6080_v29 = vsel %vm6072_vm6, 65537, %v22828_v35  ;;  %vm6220_vm11 = vcmp.ne.s16.totalorder %v20510_v30, 0  ;;  %v13354_v52 = vcombine.low %v6078_v2, %v6079_v4 }
 0x497   :  { %v6081_v56 = vsel %vm6073_vm8, 65537, %v22828_v35  ;;  %v6224_v40 = vsel %vm6220_vm11, %v20413_v36, 0  ;;  %v20521_v11 = vsel %vm1679_vm1, %v6203_v32, %v6207_v8  ;;  %v6217_v61 = vshrl.u32 %v13361_v7, 16 }
 0x498   :  { %22859 = vst [vmem:[#allocation91_spill] sm:$0xff] %v20521_v11  ;;  %v6215_v23 = vrot.slane %v6213_v28, 1  ;;  %v13355_v59 = vcombine.low %v6080_v29, %v6081_v56  ;;  %v6229_v1 = vshrl.u32 %v6224_v40, 16  ;;  %vm6221_vm3 = vcmp.ne.s16.totalorder %v20521_v11, 0  ;;  %v15713_v28 = vld [vmem:[#allocation2 + $0xd0] sm:$0xff]  }
 0x499   :  { %v6099_v63 = vshrl.u32 %v13354_v52, 16  ;;  %v6225_v19 = vsel %vm6221_vm3, %v20405_v58, 0  ;;  %v6102_v62 = vshll.u32 %v13354_v52, 16  ;;  %v6232_v31 = vshll.u32 %v6224_v40, 16 }
 0x49a   :  { %v20528_v33 = vsel %vm1679_vm1, %v6211_v17, %v6215_v23  ;;  %v6106_v10 = vshrl.u32 %v13355_v59, 16  ;;  %v6231_v51 = vrot.slane %v6229_v1, 7  ;;  %v6237_v6 = vshrl.u32 %v6225_v19, 16 }
 0x49b   :  { %22860 = vst [vmem:[#allocation99_spill] sm:$0xff] %v20528_v33  ;;  %vm6222_vm6 = vcmp.ne.s16.totalorder %v20528_v33, 0  ;;  %v6101_v57 = vrot.slane %v6099_v63, 7  ;;  %v6109_v43 = vshll.u32 %v13355_v59, 16  ;;  %v6240_v26 = vshll.u32 %v6225_v19, 16 }
 0x49c   :  { %v6226_v54 = vsel %vm6222_vm6, %v20439_v21, 0  ;;  %v6108_v12 = vrot.slane %v6106_v10, 7  ;;  %v6234_v49 = vor.u32 %v6232_v31, %v6231_v51  ;;  %v6239_v0 = vrot.slane %v6237_v6, 7 }
 0x49d   :  { %v6245_v13 = vshrl.u32 %v6226_v54, 16  ;;  %v6248_v48 = vshll.u32 %v6226_v54, 16  ;;  %v20534_v8 = vor.u32 %v6102_v62, %v6101_v57  ;;  %v20536_v9 = vor.u32 %v6217_v61, %v6215_v23  ;;  %v22866_v61 = vld [vmem:[#allocation23_spill] sm:$0xff] }
 0x49e   :  { %v6111_v39 = vor.u32 %v6109_v43, %v6108_v12  ;;  %v20540_v27 = vsel %vm1311_vm9, %v22863_v22, %v6234_v49  ;;  %v6242_v18 = vor.u32 %v6240_v26, %v6239_v0  ;;  %v6114_v53 = vshrl.u32 %v22864_v16, 16  ;;  %v15715_v43 = vld [vmem:[#allocation2 + $0xf8] sm:$0xff]  }
 0x49f   :  { %22861 = vst [vmem:[#allocation97_spill] sm:$0xff] %v20534_v8  ;;  %22862 = vst [vmem:[#allocation102_spill] sm:$0xff] %v20536_v9  ;;  %v6247_v15 = vrot.slane %v6245_v13, 7  ;;  %v6400_v25 = vrot.slane %v20540_v27, 4  ;;  %vm6129_vm10 = vcmp.ne.s16.totalorder %v20534_v8, 0  ;;  %vm6223_vm12 = vcmp.ne.s16.totalorder %v20536_v9, 0 }
 0x4a0   :  { %v20545_v24 = vsel %vm1311_vm9, %v6101_v57, %v6111_v39  ;;  %v20550_v34 = vsel %vm1311_vm9, %v6231_v51, %v6242_v18  ;;  %v6133_v17 = vsel %vm6129_vm10, %v20413_v36, 0  ;;  %v6117_v42 = vshll.u32 %v22864_v16, 16 }
 0x4a1   :  { %22865 = vst [vmem:[#allocation101_spill] sm:$0xff] %v20545_v24  ;;  %v6250_v50 = vor.u32 %v6248_v48, %v6247_v15  ;;  %vm6130_vm13 = vcmp.ne.s16.totalorder %v20545_v24, 0  ;;  %v6401_v45 = vsel %vm6301_vm7, %v20400_v55, %v6400_v25  ;;  %v6402_v20 = vrot.slane %v20550_v34, 4 }
 0x4a2   :  { %v6134_v7 = vsel %vm6130_vm13, %v20405_v58, 0  ;;  %14769 = vmatprep.mubr.msk.bf16.mxu1 %vm174_vm0, %v6401_v45  ;;  %v6263_v4 = vshll.u32 %v6133_v17, 16  ;;  %v6227_v52 = vsel %vm6223_vm12, %v20482_v5, 0  ;;  %v6116_v40 = vrot.slane %v6114_v53, 7 }
 0x4a3   :  { %v20565_v2 = vsel %vm1311_vm9, %v6239_v0, %v6250_v50  ;;  %v6268_v32 = vshll.u32 %v6134_v7, 16  ;;  %v20568_v29 = vsel %vm6301_vm7, %v6400_v25, %v6402_v20  ;;  %v6261_v23 = vshrl.u32 %v6133_v17, 16 }
 0x4a4   :  { %v6404_v56 = vrot.slane %v20565_v2, 4  ;;  %14770 = vmatmul.mubr.msk.bf16.vlgmr.msra.gmra.mxu1 %vm174_vm0, %v20568_v29  ;;  %v6265_v59 = vrot.slane %v6263_v4, 1  ;;  %v6253_v1 = vshrl.u32 %v6227_v52, 16  ;;  %v6119_v19 = vor.u32 %v6117_v42, %v6116_v40 }
 0x4a5   :  { %14790 = vmatpush3.bf16.msra.mxu1 %v22866_v61  ;;  %v22867_v62 = vand.u32 7, %v22851_v60  ;;  %v22868_v10 = vand.u32 7, %v22853_v47  ;;  %v6270_v6 = vrot.slane %v6268_v32, 1  ;;  %v6256_v57 = vshll.u32 %v6227_v52, 16  ;;  %v15716_v61 = vld [vmem:[#allocation2 + $0x108] sm:$0xff]  }
 0x4a6   :  { %v20577_v63 = vsel %vm6301_vm7, %v6402_v20, %v6404_v56  ;;  %v6266_v31 = vor.u32 %v6265_v59, %v6261_v23  ;;  %v6255_v54 = vrot.slane %v6253_v1, 7  ;;  %14791 = vmatprep.subr.bf16.mxu1 %v15713_v28  ;;  %v6272_v49 = vshrl.u32 %v6134_v7, 16 }
 0x4a7   :  { %vm6052_vm8 = vcmp.lt.s32.totalorder %v22867_v62, 7  ;;  %vm20584_vm5 = vcmp.lt.s32.totalorder %v22868_v10, 7  ;;  %14773 = vmatprep.mubr.msk.bf16.mxu1 %vm174_vm0, %v20577_v63  ;;  %v20591_v60 = vsel %vm1311_vm9, %v6108_v12, %v6119_v19  ;;  %v15717_v19 = vld [vmem:[#allocation2 + $0xf0] sm:$0xff]  }
 0x4a8   :  { %vm6076_vm4 = vmpackc.low %vm6052_vm8, %vm6052_vm8  ;;  %22871 = vst [vmem:[#allocation67_spill] sm:$0xff] %v20591_v60  ;;  %v6271_v0 = vsel %vm1679_vm1, %v6266_v31, %v6270_v6  ;;  %v6258_v26 = vor.u32 %v6256_v57, %v6255_v54  ;;  %vm6131_vm15 = vcmp.ne.s16.totalorder %v20591_v60, 0  ;;  %v6274_v18 = vor.u32 %v6272_v49, %v6270_v6  ;;  %v15719_v31 = vld [vmem:[#allocation2 + $0x118] sm:$0xff]  }
 0x4a9   :  { %vm6077_vm2 = vmpackc.low %vm20584_vm5, %vm20584_vm5  ;;  %v6084_v47 = vsel %vm6076_vm4, 65537, %v22828_v35  ;;  %v6501_v48 = vrot.slane %v6271_v0, 4  ;;  %v6135_v39 = vsel %vm6131_vm15, %v20439_v21, 0  ;;  %14792 = vmatpush3.bf16.msra.mxu1 %v15713_v28  ;;  %v15714_v28 = vld [vmem:[#allocation2 + $0xe0] sm:$0xff]   ;;  %vm22902_vm8 = vcmask 1042434  }
 0x4aa   :  { %v6085_v13 = vsel %vm6077_vm2, 65537, %v22828_v35  ;;  %v20604_v16 = vsel %vm1311_vm9, %v6247_v15, %v6258_v26  ;;  %v6276_v53 = vshll.u32 %v6135_v39, 16  ;;  %14813 = vmatprep.subr.bf16.mxu1 %v15715_v43  ;;  %v22873_v6 = vld [vmem:[#allocation25_spill] sm:$0xff] }
 0x4ab   :  { %v13357_v12 = vcombine.low %v6084_v47, %v6085_v13  ;;  %v6502_v25 = vsel %vm6301_vm7, %v20400_v55, %v6501_v48  ;;  %v6406_v50 = vrot.slane %v20604_v16, 4  ;;  %v15720_v47 = vld [vmem:[#allocation2 + $0x128] sm:$0xff]  }
 0x4ac   :  { %14781 = vmatprep.mubr.msk.bf16.mxu0 %vm174_vm0, %v6502_v25  ;;  %v6278_v20 = vrot.slane %v6276_v53, 1 }
 0x4ad   :  { %v6122_v17 = vshrl.u32 %v13357_v12, 16  ;;  %v6125_v45 = vshll.u32 %v13357_v12, 16  ;;  %v20613_v7 = vsel %vm6301_vm7, %v6404_v56, %v6406_v50  ;;  %v6280_v56 = vshrl.u32 %v6135_v39, 16 }
 0x4ae   :  { %14774 = vmatmul.mubr.msk.bf16.gmra.mxu1 %vm174_vm0, %v20613_v7  ;;  %v6279_v15 = vsel %vm1679_vm1, %v6274_v18, %v6278_v20 }
 0x4af   :  { %v6124_v42 = vrot.slane %v6122_v17, 7  ;;  %v6503_v4 = vrot.slane %v6279_v15, 4  ;;  %14793 = vmatprep.mubr.msk.bf16.mxu1 %vm174_vm0, %v20540_v27  ;;  %v6282_v27 = vor.u32 %v6280_v56, %v6278_v20  ;;  %v15724_v17 = vld [vmem:[#allocation2 + $0x160] sm:$0xff]  }
 0x4b1   :  { %v6127_v32 = vor.u32 %v6125_v45, %v6124_v42  ;;  %v20621_v52 = vsel %vm6301_vm7, %v6501_v48, %v6503_v4  ;;  %v15728_v42 = vld [vmem:[#allocation2 + $0x140] sm:$0xff]  }
 0x4b2   :  { %14782 = vmatmul.mubr.msk.bf16.vlgmr.msra.gmra.mxu0 %vm174_vm0, %v20621_v52 }
 0x4b3   :  { %v20624_v23 = vsel %vm1311_vm9, %v6116_v40, %v6127_v32  ;;  %14802 = vmatpush3.bf16.msra.mxu0 %v20475_v41  ;;  %v15725_v32 = vld [vmem:[#allocation2 + $0x158] sm:$0xff]  }
 0x4b4   :  { %22872 = vst [vmem:[#allocation66_spill] sm:$0xff] %v20624_v23  ;;  %vm6132_vm2 = vcmp.ne.s16.totalorder %v20624_v23, 0  ;;  %14803 = vmatprep.subr.bf16.mxu0 %v15714_v28 }
 0x4b5   :  { %v6136_v59 = vsel %vm6132_vm2, %v20482_v5, 0 }
 0x4b6   :  { %v6284_v1 = vshll.u32 %v6136_v59, 16  ;;  %v6288_v40 = vshrl.u32 %v6136_v59, 16  ;;  %14794 = vmatmul.mubr.msk.bf16.vlgmr.msra.gmra.mxu1 %vm174_vm0, %v20550_v34 }
 0x4b7   :  { %14804 = vmatpush3.bf16.msra.mxu0 %v15714_v28  ;;  %14797 = vmatprep.mubr.msk.bf16.mxu1 %vm174_vm0, %v20565_v2  ;;  %v15718_v2 = vld [vmem:[#allocation2 + $0x100] sm:$0xff]  }
 0x4b8   :  { %v6286_v62 = vrot.slane %v6284_v1, 1  ;;  %14814 = vmatpush3.bf16.msra.mxu1 %v15715_v43  ;;  %14825 = vmatprep.subr.bf16.mxu0 %v15716_v61  ;;  %v15721_v43 = vld [vmem:[#allocation2 + $0x110] sm:$0xff]  }
 0x4b9   :  { %14815 = vmatprep.subr.bf16.mxu1 %v15717_v19 }
 0x4ba   :  { %v6287_v41 = vsel %vm1679_vm1, %v6282_v27, %v6286_v62  ;;  %v6290_v10 = vor.u32 %v6288_v40, %v6286_v62  ;;  %v15727_v27 = vld [vmem:[#allocation2 + $0x150] sm:$0xff]   ;;  %v20733_v40 = vld [vmem:[#allocation2 + $0x188] sm:$0xff]  }
 0x4bb   :  { %v6505_v51 = vrot.slane %v6287_v41, 4  ;;  %22874 = vst [vmem:[#allocation83_spill] sm:$0xff] %v20733_v40 }
 0x4bc   :  { %v6291_v54 = vsel %vm1679_vm1, %v6290_v10, %v22873_v6  ;;  %14816 = vmatpush3.bf16.msra.mxu1 %v15717_v19 }
 0x4bd   :  { %v6506_v57 = vsel %vm6301_vm7, %v6503_v4, %v6505_v51  ;;  %v6507_v49 = vrot.slane %v6291_v54, 4  ;;  %14837 = vmatprep.subr.bf16.mxu1 %v15719_v31 }
 0x4be   :  { %14785 = vmatprep.mubr.msk.bf16.mxu0 %vm174_vm0, %v6506_v57  ;;  %14798 = vmatmul.mubr.msk.bf16.gmra.mxu1 %vm174_vm0, %v20604_v16 }
 0x4bf   :  { %v6508_v34 = vsel %vm6301_vm7, %v6505_v51, %v6507_v49  ;;  %14817 = vmatprep.mubr.msk.bf16.mxu1 %vm174_vm0, %v6271_v0  ;;  %v20737_v51 = vld [vmem:[#allocation2 + $0x1a8] sm:$0xff]  }
 0x4c0   :  { %14786 = vmatmul.mubr.msk.bf16.gmra.mxu0 %vm174_vm0, %v6508_v34  ;;  %22875 = vst [vmem:[#allocation35_spill] sm:$0xff] %v20737_v51 }
 0x4c1   :  { %14805 = vmatprep.mubr.msk.bf16.mxu0 %vm174_vm0, %v20413_v36  ;;  %v6913_v36 = vsel %vm6301_vm7, %v6406_v50, %v20400_v55  ;;  %v15723_v50 = vld [vmem:[#allocation2 + $0x168] sm:$0xff]  }
 0x4c6   :  { %14818 = vmatmul.mubr.msk.bf16.vlgmr.msra.gmra.mxu1 %vm174_vm0, %v6279_v15 }
 0x4c7   :  { %14821 = vmatprep.mubr.msk.bf16.mxu1 %vm174_vm0, %v6287_v41  ;;  %14838 = vmatpush3.bf16.msra.mxu1 %v15719_v31 }
 0x4c8   :  { %14806 = vmatmul.mubr.msk.bf16.vlgmr.msra.gmra.mxu0 %vm174_vm0, %v20405_v58  ;;  %14839 = vmatprep.subr.bf16.mxu1 %v15721_v43  ;;  %v15722_v58 = vld [vmem:[#allocation2 + $0x120] sm:$0xff]  }
 0x4c9   :  { %14826 = vmatpush3.bf16.msra.mxu0 %v15716_v61  ;;  %14809 = vmatprep.mubr.msk.bf16.mxu0 %vm174_vm0, %v20439_v21  ;;  %v7099_v21 = vsel %vm6301_vm7, %v6507_v49, %v20400_v55  ;;  %v15732_v61 = vld [vmem:[#allocation2 + $0x130] sm:$0xff]  }
 0x4ca   :  { %14827 = vmatprep.subr.bf16.mxu0 %v15718_v2 }
 0x4cb   :  { %14840 = vmatpush3.bf16.msra.mxu1 %v15721_v43 }
 0x4cc   :  { %14861 = vmatprep.subr.bf16.mxu1 %v15723_v50 }
 0x4cd   :  { %14828 = vmatpush3.bf16.msra.mxu0 %v15718_v2 }
 0x4ce   :  { %14849 = vmatprep.subr.bf16.mxu0 %v15720_v47  ;;  %14822 = vmatmul.mubr.msk.bf16.gmra.mxu1 %vm174_vm0, %v6291_v54 }
 0x4cf   :  { %14841 = vmatprep.mubr.msk.bf16.mxu1 %vm174_vm0, %v20435_v44  ;;  %v7006_v44 = vsel %vm6301_vm7, %v6309_v37, %v20400_v55 }
 0x4d0   :  { %14810 = vmatmul.mubr.msk.bf16.gmra.mxu0 %vm174_vm0, %v20482_v5 }
 0x4d1   :  { %14829 = vmatprep.mubr.msk.bf16.mxu0 %vm174_vm0, %v20568_v29 }
 0x4d6   :  { %14842 = vmatmul.mubr.msk.bf16.vlgmr.msra.gmra.mxu1 %vm174_vm0, %v20478_v38 }
 0x4d7   :  { %14845 = vmatprep.mubr.msk.bf16.mxu1 %vm174_vm0, %v20503_v46  ;;  %14862 = vmatpush3.bf16.msra.mxu1 %v15723_v50 }
 0x4d8   :  { %14830 = vmatmul.mubr.msk.bf16.vlgmr.msra.gmra.mxu0 %vm174_vm0, %v20577_v63  ;;  %14863 = vmatprep.subr.bf16.mxu1 %v15724_v17 }
 0x4d9   :  { %14850 = vmatpush3.bf16.msra.mxu0 %v15720_v47  ;;  %14833 = vmatprep.mubr.msk.bf16.mxu0 %vm174_vm0, %v20613_v7  ;;  %v15726_v7 = vld [vmem:[#allocation2 + $0x148] sm:$0xff]  }
 0x4da   :  { %14851 = vmatprep.subr.bf16.mxu0 %v15722_v58 }
 0x4db   :  { %14864 = vmatpush3.bf16.msra.mxu1 %v15724_v17 }
 0x4dc   :  { %14865 = vmatprep.subr.bf16.mxu1 %v15725_v32 }
 0x4dd   :  { %14852 = vmatpush3.bf16.msra.mxu0 %v15722_v58 }
 0x4de   :  { %14846 = vmatmul.mubr.msk.bf16.gmra.mxu1 %vm174_vm0, %v7006_v44  ;;  %14877 = vmatprep.subr.bf16.mxu0 %v15726_v7 }
 0x4df   :  { %14866 = vmatpush3.bf16.msra.mxu1 %v15725_v32 }
 0x4e0   :  { %14834 = vmatmul.mubr.msk.bf16.gmra.mxu0 %vm174_vm0, %v6913_v36  ;;  %14867 = vmatprep.subr.bf16.mxu1 %v15727_v27 }
 0x4e1   :  { %14853 = vmatprep.mubr.msk.bf16.mxu0 %vm174_vm0, %v20621_v52  ;;  %v15730_v52 = vld [vmem:[#allocation2 + $0x138] sm:$0xff]  }
 0x4e3   :  { %14868 = vmatpush3.bf16.msra.mxu1 %v15727_v27 }
 0x4e4   :  { %14893 = vmatprep.subr.bf16.mxu1 %v20733_v40 }
 0x4e8   :  { %14854 = vmatmul.mubr.msk.bf16.vlgmr.msra.gmra.mxu0 %vm174_vm0, %v6506_v57 }
 0x4e9   :  { %14857 = vmatprep.mubr.msk.bf16.mxu0 %vm174_vm0, %v6508_v34  ;;  %14878 = vmatpush3.bf16.msra.mxu0 %v15726_v7 }
 0x4ea   :  { %14879 = vmatprep.subr.bf16.mxu0 %v15728_v42 }
 0x4ed   :  { %14880 = vmatpush3.bf16.msra.mxu0 %v15728_v42 }
 0x4ee   :  { %14881 = vmatprep.subr.bf16.mxu0 %v15730_v52 }
 0x4f0   :  { %14858 = vmatmul.mubr.msk.bf16.gmra.mxu0 %vm174_vm0, %v7099_v21  ;;  %vm7190_vm0 = vcmask 523264  }
 0x4f1   :  { %14882 = vmatpush3.bf16.msra.mxu0 %v15730_v52 }
 0x4f2   :  { %14883 = vmatprep.subr.bf16.mxu0 %v15732_v61 }
 0x4f5   :  { %14884 = vmatpush3.bf16.msra.mxu0 %v15732_v61 }
 0x4f6   :  { %14909 = vmatprep.subr.bf16.mxu0 %v20737_v51 }
 0x54c   :  { %v20687_v38 = vpop.f32.mrf.mxu0 }
 0x54e   :  { %v20689_v5 = vpop.f32.mrf.mxu0 }
 0x550   :  { %v20691_v37 = vpop.f32.mrf.mxu0 }
 0x552   :  { %v20693_v46 = vpop.f32.mrf.mxu0 }
 0x555   :  { %v20695_v29 = vpop.f32.mrf.mxu0 }
 0x557   :  { %v20699_v0 = vpop.f32.mrf.mxu0 }
 0x559   :  { %v20705_v48 = vpop.f32.mrf.mxu0 }
 0x55b   :  { %v20709_v12 = vpop.f32.mrf.mxu0 }
 0x564   :  { %v20697_v63 = vpop.f32.mrf.mxu1 }
 0x565   :  { %v6475_v24 = vadd.f32 %v20697_v63, %v20687_v38 }
 0x566   :  { %v20701_v26 = vpop.f32.mrf.mxu1 }
 0x567   :  { %v6467_v23 = vadd.f32 %v20701_v26, %v20689_v5 }
 0x568   :  { %v20703_v13 = vpop.f32.mrf.mxu1 }
 0x569   :  { %v6478_v33 = vadd.f32 %v20703_v13, %v20691_v37 }
 0x56a   :  { %v20707_v39 = vpop.f32.mrf.mxu1 }
 0x56b   :  { %v6470_v11 = vadd.f32 %v20707_v39, %v20693_v46 }
 0x56e   :  { %v20711_v18 = vpop.f32.mrf.mxu1 }
 0x570   :  { %v20713_v16 = vpop.f32.mrf.mxu1 }
 0x571   :  { %v6483_v37 = vadd.f32 %v20713_v16, %v20699_v0 }
 0x572   :  { %v20715_v53 = vpop.f32.mrf.mxu0  ;;  %v20717_v25 = vpop.f32.mrf.mxu1 }
 0x573   :  { %v6600_v55 = vadd.f32 %v20715_v53, %v6475_v24 }
 0x574   :  { %v20719_v45 = vpop.f32.mrf.mxu0  ;;  %v20721_v20 = vpop.f32.mrf.mxu1 }
 0x575   :  { %v6598_v8 = vadd.f32 %v20719_v45, %v6467_v23  ;;  %v6491_v23 = vadd.f32 %v20711_v18, %v20695_v29  ;;  %v6494_v29 = vadd.f32 %v20717_v25, %v20705_v48  ;;  %v6486_v0 = vadd.f32 %v20721_v20, %v20709_v12 }
 0x576   :  { %v20723_v15 = vpop.f32.mrf.mxu0  ;;  %v20725_v4 = vpop.f32.mrf.mxu1 }
 0x577   :  { %v6601_v5 = vadd.f32 %v20723_v15, %v6478_v33 }
 0x578   :  { %v6668_v28 = vpop.f32.mrf.mxu1  ;;  %v6570_v56 = vpop.f32.mrf.mxu0 }
 0x579   :  { %v6699_v30 = vadd.f32 %v6668_v28, %v6598_v8  ;;  %v6599_v26 = vadd.f32 %v6570_v56, %v6470_v11 }
 0x57a   :  { %v20727_v59 = vpop.f32.mrf.mxu1 }
 0x57b   :  { %v6702_v46 = vadd.f32 %v20727_v59, %v6601_v5 }
 0x57c   :  { %v6671_v1 = vpop.f32.mrf.mxu1 }
 0x57d   :  { %v6700_v13 = vadd.f32 %v6671_v1, %v6599_v26 }
 0x57e   :  { %v20731_v62 = vpop.f32.mrf.mxu1 }
 0x580   :  { %v20729_v19 = vpop.f32.mrf.mxu0  ;;  %v20735_v10 = vpop.f32.mrf.mxu1 }
 0x581   :  { %v6604_v53 = vadd.f32 %v20729_v19, %v6491_v23 }
 0x582   :  { %v6583_v41 = vpop.f32.mrf.mxu0  ;;  %v20741_v54 = vpop.f32.mrf.mxu1 }
 0x583   :  { %v6602_v33 = vadd.f32 %v6583_v41, %v6483_v37  ;;  %v6705_v18 = vadd.f32 %v20731_v62, %v6604_v53 }
 0x584   :  { %v20739_v31 = vpop.f32.mrf.mxu0  ;;  %v20746_v49 = vpop.f32.mrf.mxu1 }
 0x585   :  { %v6703_v16 = vadd.f32 %v20735_v10, %v6602_v33  ;;  %v6605_v41 = vadd.f32 %v20739_v31, %v6494_v29 }
 0x586   :  { %v20744_v57 = vpop.f32.mrf.mxu0  ;;  %v14819_v2 = vpop.f32.mrf.mxu1 }
 0x587   :  { %v6706_v62 = vadd.f32 %v20741_v54, %v6605_v41 }
 0x588   :  { %v14807_v34 = vpop.f32.mrf.mxu0  ;;  %v6870_v47 = vpop.f32.mrf.mxu1 }
 0x58a   :  { %v6769_v43 = vpop.f32.mrf.mxu0  ;;  %v14820_v36 = vpop.f32.mrf.mxu1 }
 0x58b   :  { %v6800_v38 = vadd.f32 %v6769_v43, %v6699_v30 }
 0x58c   :  { %v14808_v58 = vpop.f32.mrf.mxu0  ;;  %v6873_v21 = vpop.f32.mrf.mxu1 }
 0x58d   :  { %v6901_v8 = vadd.f32 %v6870_v47, %v6800_v38  ;;  %v6803_v45 = vadd.f32 %v14808_v58, %v6702_v46 }
 0x58e   :  { %v6772_v44 = vpop.f32.mrf.mxu0  ;;  %v20749_v17 = vpop.f32.mrf.mxu1 }
 0x58f   :  { %v6904_v28 = vadd.f32 %v14820_v36, %v6803_v45 }
 0x590   :  { %v14811_v50 = vpop.f32.mrf.mxu0  ;;  %v20751_v42 = vpop.f32.mrf.mxu1 }
 0x592   :  { %v6785_v7 = vpop.f32.mrf.mxu0  ;;  %v20755_v52 = vpop.f32.mrf.mxu1 }
 0x593   :  { %22876 = vst [vmem:[#allocation84_spill] sm:$0xff] %v20755_v52  ;;  %v6701_v52 = vadd.f32 %v20725_v4, %v6600_v55  ;;  %v6801_v55 = vadd.f32 %v6772_v44, %v6700_v13 }
 0x594   :  { %v20753_v32 = vpop.f32.mrf.mxu0  ;;  %v20759_v61 = vpop.f32.mrf.mxu1 }
 0x595   :  { %22877 = vst [vmem:[#allocation12_spill] sm:$0xff] %v20759_v61  ;;  %v6802_v24 = vadd.f32 %v14807_v34, %v6701_v52  ;;  %v6902_v56 = vadd.f32 %v6873_v21, %v6801_v55  ;;  %v6806_v34 = vadd.f32 %v14811_v50, %v6705_v18 }
 0x596   :  { %v20757_v27 = vpop.f32.mrf.mxu0  ;;  %v14843_v3 = vpop.f32.mrf.mxu1 }
 0x597   :  { %v6903_v30 = vadd.f32 %v14819_v2, %v6802_v24  ;;  %v6804_v2 = vadd.f32 %v6785_v7, %v6703_v16 }
 0x598   :  { %v14831_v35 = vpop.f32.mrf.mxu0  ;;  %v7056_v6 = vpop.f32.mrf.mxu1 }
 0x599   :  { %v6996_v59 = vadd.f32 %v14831_v35, %v6903_v30  ;;  %v6907_v35 = vadd.f32 %v20749_v17, %v6806_v34 }
 0x59a   :  { %v6963_v14 = vpop.f32.mrf.mxu0  ;;  %v14844_v9 = vpop.f32.mrf.mxu1 }
 0x59b   :  { %v6994_v15 = vadd.f32 %v6963_v14, %v6901_v8  ;;  %v6603_v14 = vadd.f32 %v20744_v57, %v6486_v0  ;;  %v7089_v12 = vadd.f32 %v14843_v3, %v6996_v59 }
 0x59c   :  { %v14832_v51 = vpop.f32.mrf.mxu0  ;;  %v7059_v60 = vpop.f32.mrf.mxu1  ;;  %v22879_v17 = vld [vmem:[#allocation12_spill] sm:$0xff] }
 0x59d   :  { %v7087_v1 = vadd.f32 %v7056_v6, %v6994_v15  ;;  %v6997_v25 = vadd.f32 %v14832_v51, %v6904_v28  ;;  %v6704_v10 = vadd.f32 %v20746_v49, %v6603_v14  ;;  %v6905_v6 = vadd.f32 %v20751_v42, %v6804_v2 }
 0x59e   :  { %v6966_v22 = vpop.f32.mrf.mxu0  ;;  %v14847_v39 = vpop.f32.mrf.mxu1  ;;  %v6807_v51 = vadd.f32 %v20753_v32, %v6706_v62 }
 0x59f   :  { %v6995_v43 = vadd.f32 %v6966_v22, %v6902_v56  ;;  %v7090_v31 = vadd.f32 %v14844_v9, %v6997_v25  ;;  %v6805_v3 = vadd.f32 %v20757_v27, %v6704_v10  ;;  %v22878_v9 = vld [vmem:[#allocation84_spill] sm:$0xff] }
 0x5a0   :  { %v14835_v40 = vpop.f32.mrf.mxu0  ;;  %v7072_v19 = vpop.f32.mrf.mxu1 }
 0x5a1   :  { %v7088_v58 = vadd.f32 %v7059_v60, %v6995_v43  ;;  %v7000_v22 = vadd.f32 %v14835_v40, %v6907_v35  ;;  %v6908_v60 = vadd.f32 %v22878_v9, %v6807_v51  ;;  %v6906_v7 = vadd.f32 %v22879_v17, %v6805_v3 }
 0x5a2   :  { %v6979_v61 = vpop.f32.mrf.mxu0  ;;  %v14848_v36 = vpop.f32.mrf.mxu1 }
 0x5a3   :  { %v6998_v44 = vadd.f32 %v6979_v61, %v6905_v6  ;;  %v7093_v42 = vadd.f32 %v14847_v39, %v7000_v22 }
 0x5a4   :  { %v14836_v63 = vpop.f32.mrf.mxu0  ;;  %v7075_v61 = vpop.f32.mrf.mxu1 }
 0x5a5   :  { %v7091_v52 = vadd.f32 %v7072_v19, %v6998_v44  ;;  %v7001_v38 = vadd.f32 %v14836_v63, %v6908_v60 }
 0x5a6   :  { %v6982_v11 = vpop.f32.mrf.mxu0 }
 0x5a7   :  { %v6999_v23 = vadd.f32 %v6982_v11, %v6906_v7  ;;  %v7094_v33 = vadd.f32 %v14848_v36, %v7001_v38 }
 0x5a8   :  { %v14855_v4 = vpop.f32.mrf.mxu0 }
 0x5a9   :  { %v20793_v57 = vadd.f32 %v14855_v4, %v7089_v12  ;;  %v7092_v45 = vadd.f32 %v7075_v61, %v6999_v23 }
 0x5aa   :  { %v7149_v48 = vpop.f32.mrf.mxu0 }
 0x5ab   :  { %v20787_v20 = vadd.f32 %v7149_v48, %v7087_v1  ;;  %v7215_v40 = vmul.f32 %v20793_v57, %v20793_v57  ;;  %v7194_v37 = vsel %vm7190_vm0, %v20793_v57, 0.0 }
 0x5ac   :  { %v14856_v47 = vpop.f32.mrf.mxu0 }
 0x5ad   :  { %v7213_v54 = vmul.f32 %v20787_v20, %v20787_v20  ;;  %v20799_v49 = vadd.f32 %v14856_v47, %v7090_v31  ;;  %v7191_v27 = vsel %vm7190_vm0, %v20787_v20, 0.0  ;;  %v7224_v63 = vsel %vm7190_vm0, %v7215_v40, 0.0 }
 0x5ae   :  { %v7152_v21 = vpop.f32.mrf.mxu0 }
 0x5af   :  { %v20801_v50 = vadd.f32 %v7152_v21, %v7088_v58  ;;  %v7221_v24 = vsel %vm7190_vm0, %v7213_v54, 0.0  ;;  %v7216_v8 = vmul.f32 %v20799_v49, %v20799_v49  ;;  %v7196_v11 = vsel %vm7190_vm0, %v20799_v49, 0.0 }
 0x5b0   :  { %v14859_v32 = vpop.f32.mrf.mxu0 }
 0x5b1   :  { %v7192_v5 = vsel %vm7190_vm0, %v20801_v50, 0.0  ;;  %v7214_v26 = vmul.f32 %v20801_v50, %v20801_v50  ;;  %v7186_v29 = vadd.f32 %v14859_v32, %v7093_v42  ;;  %v7226_v28 = vsel %vm7190_vm0, %v7216_v8, 0.0 }
 0x5b2   :  { %v7193_v46 = vadd.f32 %v7192_v5, %v7191_v27  ;;  %v7165_v13 = vpop.f32.mrf.mxu0 }
 0x5b3   :  { %v7222_v39 = vsel %vm7190_vm0, %v7214_v26, 0.0  ;;  %v7184_v53 = vadd.f32 %v7165_v13, %v7091_v52  ;;  %v7219_v14 = vmul.f32 %v7186_v29, %v7186_v29  ;;  %v7202_v12 = vsel %vm7190_vm0, %v7186_v29, 0.0 }
 0x5b4   :  { %v7195_v55 = vadd.f32 %v7194_v37, %v7193_v46  ;;  %v7223_v30 = vadd.f32 %v7222_v39, %v7221_v24  ;;  %v14860_v15 = vpop.f32.mrf.mxu0  ;;  %v7188_v37 = vld [vmem:[#allocation5 + $0x4] sm:$0x1]  ;;  %v7189_v24 = vld [vmem:[#allocation5 + $0x5] sm:$0x1] }
 0x5b5   :  { %v7217_v0 = vmul.f32 %v7184_v53, %v7184_v53  ;;  %v7198_v56 = vsel %vm7190_vm0, %v7184_v53, 0.0  ;;  %v7187_v59 = vadd.f32 %v14860_v15, %v7094_v33  ;;  %v7232_v47 = vsel %vm7190_vm0, %v7219_v14, 0.0  ;;  %v22880_v39 = vld [vmem:[#allocation28_spill] sm:$0xff] }
 0x5b6   :  { %v7225_v18 = vadd.f32 %v7224_v63, %v7223_v30  ;;  %v7197_v16 = vadd.f32 %v7196_v11, %v7195_v55  ;;  %v7168_v4 = vpop.f32.mrf.mxu0 }
 0x5b7   :  { %v7185_v1 = vadd.f32 %v7168_v4, %v7092_v45  ;;  %v7228_v34 = vsel %vm7190_vm0, %v7217_v0, 0.0  ;;  %v7220_v62 = vmul.f32 %v7187_v59, %v7187_v59  ;;  %v7204_v31 = vsel %vm7190_vm0, %v7187_v59, 0.0 }
 0x5b8   :  { %v7199_v19 = vadd.f32 %v7198_v56, %v7197_v16  ;;  %v7227_v41 = vadd.f32 %v7226_v28, %v7225_v18 }
 0x5b9   :  { %v7200_v2 = vsel %vm7190_vm0, %v7185_v1, 0.0  ;;  %v7218_v48 = vmul.f32 %v7185_v1, %v7185_v1  ;;  %v7234_v51 = vsel %vm7190_vm0, %v7220_v62, 0.0 }
 0x5ba   :  { %v7229_v25 = vadd.f32 %v7228_v34, %v7227_v41  ;;  %v7201_v43 = vadd.f32 %v7200_v2, %v7199_v19 }
 0x5bb   :  { %v7230_v10 = vsel %vm7190_vm0, %v7218_v48, 0.0 }
 0x5bc   :  { %v7203_v35 = vadd.f32 %v7202_v12, %v7201_v43  ;;  %v7231_v6 = vadd.f32 %v7230_v10, %v7229_v25 }
 0x5be   :  { %v7205_v58 = vadd.f32 %v7204_v31, %v7203_v35  ;;  %v7233_v36 = vadd.f32 %v7232_v47, %v7231_v6 }
 0x5c0   :  { %v7206_v3 = vrot.slane %v7205_v58, 4  ;;  %v7235_v22 = vadd.f32 %v7234_v51, %v7233_v36 }
 0x5c2   :  { %v7207_v44 = vadd.f32 %v7206_v3, %v7205_v58  ;;  %v7236_v21 = vrot.slane %v7235_v22, 4 }
 0x5c4   :  { %v7208_v54 = vrot.slane %v7207_v44, 2  ;;  %v7237_v9 = vadd.f32 %v7236_v21, %v7235_v22 }
 0x5c6   :  { %v7209_v60 = vadd.f32 %v7208_v54, %v7207_v44  ;;  %v7238_v17 = vrot.slane %v7237_v9, 2  ;;  %v22883_v44 = vld [vmem:[#allocation88_spill] sm:$0xff]  ;;  %v15731_v54 = vld [vmem:[#allocation2 + $0x180] sm:$0xff]  }
 0x5c8   :  { %v7210_v7 = vrot.slane %v7209_v60, 1  ;;  %v7239_v42 = vadd.f32 %v7238_v17, %v7237_v9 }
 0x5ca   :  { %v7211_v52 = vadd.f32 %v7210_v7, %v7209_v60  ;;  %v7240_v32 = vrot.slane %v7239_v42, 1 }
 0x5cc   :  { %v7212_v40 = vmul.f32 0.015625, %v7211_v52  ;;  %v7241_v27 = vadd.f32 %v7240_v32, %v7239_v42 }
 0x5ce   :  { %v7242_v61 = vmul.f32 0.015625, %v7241_v27  ;;  %v7243_v5 = vmul.f32 %v7212_v40, %v7212_v40 }
 0x5d0   :  { %v7244_v26 = vsub.f32 %v7242_v61, %v7243_v5 }
 0x5d2   :  { %v7245_v38 = vmax.f32 %v7244_v26, 0.0 }
 0x5d4   :  { %v7246_v23 = vadd.f32 1e-05, %v7245_v38 }
 0x5d6   :  { %16015 = vrsqrt.f32 %v7246_v23  ;;  %v22886_v23 = vld [vmem:[#allocation83_spill] sm:$0xff] }
 0x5e3   :  { %v16016_v46 = vpop.eup %16015 }
 0x5e4   :  { %v7248_v13 = vmul.f32 %v16016_v46, %v7188_v37 }
 0x5e6   :  { %v7249_v8 = vmul.f32 %v7248_v13, %v7212_v40  ;;  %v7254_v33 = vrot.slane %v7248_v13, %v22880_v39 }
 0x5e8   :  { %v7250_v45 = vsub.f32 %v7189_v24, %v7249_v8  ;;  %v7259_v55 = vmul.f32 %v7254_v33, %v7184_v53  ;;  %v7260_v30 = vmul.f32 %v7254_v33, %v7185_v1  ;;  %v7255_v63 = vmul.f32 %v7254_v33, %v20787_v20 }
 0x5e9   :  { %v7256_v11 = vmul.f32 %v7254_v33, %v20801_v50  ;;  %v7257_v0 = vmul.f32 %v7254_v33, %v20793_v57  ;;  %v7258_v18 = vmul.f32 %v7254_v33, %v20799_v49  ;;  %v7261_v16 = vmul.f32 %v7254_v33, %v7186_v29 }
 0x5ea   :  { %v7266_v15 = vrot.slane %v7250_v45, %v22880_v39  ;;  %v7262_v4 = vmul.f32 %v7254_v33, %v7187_v59  ;;  %v15733_v45 = vld [vmem:[#allocation2 + $0x178] sm:$0xff]  }
 0x5ec   :  { %v7271_v28 = vadd.f32 %v7266_v15, %v7259_v55  ;;  %v7272_v56 = vadd.f32 %v7266_v15, %v7260_v30  ;;  %v7267_v19 = vadd.f32 %v7266_v15, %v7255_v63  ;;  %v7268_v41 = vadd.f32 %v7266_v15, %v7256_v11  ;;  %v22889_v11 = vld [vmem:[#allocation29_spill] sm:$0xff] }
 0x5ed   :  { %v7269_v14 = vadd.f32 %v7266_v15, %v7257_v0  ;;  %v7270_v34 = vadd.f32 %v7266_v15, %v7258_v18  ;;  %v7273_v53 = vadd.f32 %v7266_v15, %v7261_v16  ;;  %v7274_v1 = vadd.f32 %v7266_v15, %v7262_v4  ;;  %v15743_v4 = vld [vmem:[#allocation2 + $0x1b0] sm:$0xff]  }
 0x5ee   :  { %v7279_v2 = vmax.f32 %v7271_v28, 0.0  ;;  %v7280_v48 = vmax.f32 %v7272_v56, 0.0  ;;  %v7275_v25 = vmax.f32 %v7267_v19, 0.0  ;;  %v7276_v20 = vmax.f32 %v7268_v41, 0.0 }
 0x5ef   :  { %v7277_v43 = vmax.f32 %v7269_v14, 0.0  ;;  %v7278_v50 = vmax.f32 %v7270_v34, 0.0  ;;  %v7281_v12 = vmax.f32 %v7273_v53, 0.0  ;;  %v7282_v57 = vmax.f32 %v7274_v1, 0.0 }
 0x5f0   :  { %v20837_v62 = vpack.c.bf16 %v7280_v48, %v7279_v2  ;;  %v20839_v49 = vpack.c.bf16 %v7276_v20, %v7275_v25  ;;  %v15755_v2 = vld [vmem:[#allocation2 + $0x240] sm:$0xff]  }
 0x5f1   :  { %v20841_v29 = vpack.c.bf16 %v7278_v50, %v7277_v43  ;;  %v20843_v59 = vpack.c.bf16 %v7282_v57, %v7281_v12  ;;  %v15735_v12 = vld [vmem:[#allocation2 + $0x170] sm:$0xff]  }
 0x5f2   :  { %v20848_v35 = vsel %vm6131_vm15, %v20837_v62, 0  ;;  %v7379_v6 = vrot.slane %v20839_v49, 4  ;;  %v7383_v47 = vrot.slane %v20837_v62, 4  ;;  %v7291_v58 = vsel %vm6220_vm11, %v20839_v49, 0 }
 0x5f3   :  { %v7343_v36 = vshll.u32 %v20848_v35, 16  ;;  %v7381_v51 = vrot.slane %v20841_v29, 4  ;;  %v7296_v3 = vshrl.u32 %v7291_v58, 16  ;;  %v7299_v22 = vshll.u32 %v7291_v58, 16  ;;  %v15736_v58 = vld [vmem:[#allocation2 + $0x1a0] sm:$0xff]  }
 0x5f4   :  { %v7380_v21 = vsel %vm6301_vm7, %v22883_v44, %v7379_v6  ;;  %v7385_v9 = vrot.slane %v20843_v59, 4  ;;  %v7292_v17 = vsel %vm6221_vm3, %v20841_v29, 0  ;;  %v7293_v42 = vsel %vm6222_vm6, %v20837_v62, 0 }
 0x5f5   :  { %v7345_v52 = vrot.slane %v7343_v36, 1  ;;  %14869 = vmatprep.mubr.msk.bf16.mxu1 %vm7190_vm0, %v7380_v21  ;;  %v20868_v32 = vsel %vm6301_vm7, %v7379_v6, %v7381_v51  ;;  %v20871_v40 = vsel %vm6301_vm7, %v7381_v51, %v7383_v47  ;;  %v7298_v27 = vrot.slane %v7296_v3, 7 }
 0x5f6   :  { %14870 = vmatmul.mubr.msk.bf16.vlgmr.msra.gmra.mxu1 %vm7190_vm0, %v20868_v32  ;;  %v20878_v61 = vsel %vm6301_vm7, %v7383_v47, %v7385_v9  ;;  %v7304_v5 = vshrl.u32 %v7292_v17, 16  ;;  %v7307_v26 = vshll.u32 %v7292_v17, 16  ;;  %v7312_v38 = vshrl.u32 %v7293_v42, 16  ;;  %v15737_v17 = vld [vmem:[#allocation2 + $0x1c8] sm:$0xff]  }
 0x5f7   :  { %14894 = vmatpush3.bf16.msra.mxu1 %v22886_v23  ;;  %14873 = vmatprep.mubr.msk.bf16.mxu1 %vm7190_vm0, %v20871_v40  ;;  %v7301_v37 = vor.u32 %v7299_v22, %v7298_v27  ;;  %v7315_v46 = vshll.u32 %v7293_v42, 16  ;;  %v7287_v24 = vsel %vm6129_vm10, %v20839_v49, 0  ;;  %v7288_v33 = vsel %vm6130_vm13, %v20841_v29, 0  ;;  %v15738_v23 = vld [vmem:[#allocation2 + $0x198] sm:$0xff]  }
 0x5f8   :  { %14895 = vmatprep.subr.bf16.mxu1 %v15731_v54  ;;  %v7306_v55 = vrot.slane %v7304_v5, 7  ;;  %v7314_v30 = vrot.slane %v7312_v38, 7  ;;  %v7328_v15 = vshrl.u32 %v7287_v24, 16  ;;  %v7330_v63 = vshll.u32 %v7287_v24, 16  ;;  %v22892_v5 = vld [vmem:[#allocation35_spill] sm:$0xff]  ;;  %v15739_v24 = vld [vmem:[#allocation2 + $0x1c0] sm:$0xff]  }
 0x5f9   :  { %v20891_v0 = vsel %vm1311_vm9, %v22889_v11, %v7301_v37  ;;  %v7335_v18 = vshll.u32 %v7288_v33, 16  ;;  %v7339_v16 = vshrl.u32 %v7288_v33, 16  ;;  %v7294_v28 = vsel %vm6223_vm12, %v20843_v59, 0 }
 0x5fa   :  { %v7488_v56 = vrot.slane %v20891_v0, 4  ;;  %v7309_v19 = vor.u32 %v7307_v26, %v7306_v55  ;;  %v7317_v41 = vor.u32 %v7315_v46, %v7314_v30  ;;  %v7332_v14 = vrot.slane %v7330_v63, 1  ;;  %v15741_v63 = vld [vmem:[#allocation2 + $0x1b8] sm:$0xff]  }
 0x5fb   :  { %14896 = vmatpush3.bf16.msra.mxu1 %v15731_v54  ;;  %v7337_v34 = vrot.slane %v7335_v18, 1  ;;  %v7320_v53 = vshrl.u32 %v7294_v28, 16  ;;  %v7323_v1 = vshll.u32 %v7294_v28, 16  ;;  %v7290_v48 = vsel %vm6132_vm2, %v20843_v59, 0 }
 0x5fc   :  { %v7489_v25 = vsel %vm6301_vm7, %v22883_v44, %v7488_v56  ;;  %14897 = vmatprep.subr.bf16.mxu1 %v15733_v45  ;;  %v20903_v20 = vsel %vm1311_vm9, %v7298_v27, %v7309_v19  ;;  %v20906_v43 = vsel %vm1311_vm9, %v7306_v55, %v7317_v41  ;;  %v7333_v50 = vor.u32 %v7332_v14, %v7328_v15  ;;  %v22893_v55 = vld [vmem:[#allocation25_spill] sm:$0xff] }
 0x5fd   :  { %14885 = vmatprep.mubr.msk.bf16.mxu0 %vm7190_vm0, %v7489_v25  ;;  %v7490_v57 = vrot.slane %v20903_v20, 4  ;;  %v7492_v10 = vrot.slane %v20906_v43, 4  ;;  %v7341_v6 = vor.u32 %v7339_v16, %v7337_v34  ;;  %v7322_v47 = vrot.slane %v7320_v53, 7  ;;  %v15742_v16 = vld [vmem:[#allocation2 + $0x1e8] sm:$0xff]   ;;  %v15746_v19 = vld [vmem:[#allocation2 + $0x1d8] sm:$0xff]   ;;  %v15747_v41 = vld [vmem:[#allocation2 + $0x200] sm:$0xff]  }
 0x5fe   :  { %14874 = vmatmul.mubr.msk.bf16.gmra.mxu1 %vm7190_vm0, %v20878_v61  ;;  %v20914_v31 = vsel %vm1679_vm1, %v7333_v50, %v7337_v34  ;;  %v7347_v36 = vshrl.u32 %v20848_v35, 16  ;;  %v7351_v51 = vshll.u32 %v7290_v48, 16  ;;  %v7355_v54 = vshrl.u32 %v7290_v48, 16  ;;  %v15749_v14 = vld [vmem:[#allocation2 + $0x1f8] sm:$0xff]   ;;  %v15750_v34 = vld [vmem:[#allocation2 + $0x228] sm:$0xff]   ;;  %v15756_v48 = vld [vmem:[#allocation2 + $0x210] sm:$0xff]  }
 0x5ff   :  { %v20918_v3 = vsel %vm6301_vm7, %v7488_v56, %v7490_v57  ;;  %14898 = vmatpush3.bf16.msra.mxu1 %v15733_v45  ;;  %v7605_v22 = vrot.slane %v20914_v31, 4  ;;  %v7325_v21 = vor.u32 %v7323_v1, %v7322_v47  ;;  %v20924_v60 = vsel %vm6301_vm7, %v7490_v57, %v7492_v10  ;;  %v15740_v45 = vld [vmem:[#allocation2 + $0x190] sm:$0xff]   ;;  %v15744_v56 = vld [vmem:[#allocation2 + $0x1e0] sm:$0xff]   ;;  %v15753_v53 = vld [vmem:[#allocation2 + $0x248] sm:$0xff]  }
 0x600   :  { %14886 = vmatmul.mubr.msk.bf16.vlgmr.msra.gmra.mxu0 %vm7190_vm0, %v20918_v3  ;;  %14899 = vmatprep.subr.bf16.mxu1 %v15735_v12  ;;  %v20927_v7 = vsel %vm1679_vm1, %v7341_v6, %v7345_v52  ;;  %v7349_v35 = vor.u32 %v7347_v36, %v7345_v52  ;;  %v7353_v42 = vrot.slane %v7351_v51, 1  ;;  %v15754_v1 = vld [vmem:[#allocation2 + $0x218] sm:$0xff]   ;;  %vm16106_vm15 = vmmov 0  }
 0x601   :  { %14889 = vmatprep.mubr.msk.bf16.mxu0 %vm7190_vm0, %v20924_v60  ;;  %v7606_v27 = vsel %vm6301_vm7, %v22883_v44, %v7605_v22  ;;  %14910 = vmatpush3.bf16.msra.mxu0 %v22892_v5  ;;  %v20935_v26 = vsel %vm1311_vm9, %v7314_v30, %v7325_v21  ;;  %v7607_v38 = vrot.slane %v20927_v7, 4  ;;  %v15757_v25 = vld [vmem:[#allocation2 + $0x238] sm:$0xff]   ;;  %vm22903_vm2 = vcmask 1043459  }
 0x602   :  { %14901 = vmatprep.mubr.msk.bf16.mxu1 %vm7190_vm0, %v7606_v27  ;;  %14911 = vmatprep.subr.bf16.mxu0 %v15736_v58  ;;  %v20940_v52 = vsel %vm1679_vm1, %v7349_v35, %v7353_v42  ;;  %v7357_v37 = vor.u32 %v7355_v54, %v7353_v42  ;;  %v7494_v46 = vrot.slane %v20935_v26, 4 }
 0x603   :  { %14900 = vmatpush3.bf16.msra.mxu1 %v15735_v12  ;;  %v7609_v13 = vrot.slane %v20940_v52, 4  ;;  %v20945_v8 = vsel %vm6301_vm7, %v7605_v22, %v7607_v38 }
 0x604   :  { %14925 = vmatprep.subr.bf16.mxu1 %v15737_v17  ;;  %v20954_v30 = vsel %vm1679_vm1, %v7357_v37, %v22893_v55  ;;  %v20959_v15 = vsel %vm6301_vm7, %v7492_v10, %v7494_v46  ;;  %v15762_v37 = vld [vmem:[#allocation2 + $0x268] sm:$0xff]  }
 0x605   :  { %14912 = vmatpush3.bf16.msra.mxu0 %v15736_v58  ;;  %v20950_v33 = vsel %vm6301_vm7, %v7607_v38, %v7609_v13  ;;  %v7611_v18 = vrot.slane %v20954_v30, 4 }
 0x606   :  { %14902 = vmatmul.mubr.msk.bf16.vlgmr.msra.gmra.mxu1 %vm7190_vm0, %v20945_v8  ;;  %14913 = vmatprep.subr.bf16.mxu0 %v15738_v23 }
 0x607   :  { %14926 = vmatpush3.bf16.msra.mxu1 %v15737_v17  ;;  %14905 = vmatprep.mubr.msk.bf16.mxu1 %vm7190_vm0, %v20950_v33  ;;  %v20971_v28 = vsel %vm6301_vm7, %v7609_v13, %v7611_v18 }
 0x608   :  { %14890 = vmatmul.mubr.msk.bf16.gmra.mxu0 %vm7190_vm0, %v20959_v15  ;;  %14927 = vmatprep.subr.bf16.mxu1 %v15739_v24 }
 0x609   :  { %14914 = vmatpush3.bf16.msra.mxu0 %v15738_v23  ;;  %14917 = vmatprep.mubr.msk.bf16.mxu0 %vm7190_vm0, %v20891_v0  ;;  %v15745_v0 = vld [vmem:[#allocation2 + $0x208] sm:$0xff]  }
 0x60a   :  { %14915 = vmatprep.subr.bf16.mxu0 %v15740_v45  ;;  %v15759_v23 = vld [vmem:[#allocation2 + $0x288] sm:$0xff]  }
 0x60b   :  { %14928 = vmatpush3.bf16.msra.mxu1 %v15739_v24  ;;  %v15760_v24 = vld [vmem:[#allocation2 + $0x280] sm:$0xff]  }
 0x60c   :  { %14929 = vmatprep.subr.bf16.mxu1 %v15741_v63 }
 0x60d   :  { %14916 = vmatpush3.bf16.msra.mxu0 %v15740_v45 }
 0x60e   :  { %14906 = vmatmul.mubr.msk.bf16.gmra.mxu1 %vm7190_vm0, %v20971_v28  ;;  %14941 = vmatprep.subr.bf16.mxu0 %v15742_v16 }
 0x60f   :  { %14930 = vmatpush3.bf16.msra.mxu1 %v15741_v63  ;;  %14933 = vmatprep.mubr.msk.bf16.mxu1 %vm7190_vm0, %v20839_v49  ;;  %v15748_v49 = vld [vmem:[#allocation2 + $0x1d0] sm:$0xff]   ;;  %v15761_v63 = vld [vmem:[#allocation2 + $0x278] sm:$0xff]  }
 0x610   :  { %14918 = vmatmul.mubr.msk.bf16.vlgmr.msra.gmra.mxu0 %vm7190_vm0, %v20903_v20  ;;  %14931 = vmatprep.subr.bf16.mxu1 %v15743_v4  ;;  %v15758_v20 = vld [vmem:[#allocation2 + $0x230] sm:$0xff]  }
 0x611   :  { %14921 = vmatprep.mubr.msk.bf16.mxu0 %vm7190_vm0, %v20906_v43  ;;  %14942 = vmatpush3.bf16.msra.mxu0 %v15742_v16  ;;  %v8081_v43 = vsel %vm6301_vm7, %v7494_v46, %v22883_v44 }
 0x612   :  { %14943 = vmatprep.subr.bf16.mxu0 %v15744_v56 }
 0x613   :  { %14932 = vmatpush3.bf16.msra.mxu1 %v15743_v4 }
 0x614   :  { %14957 = vmatprep.subr.bf16.mxu1 %v15745_v0 }
 0x615   :  { %14944 = vmatpush3.bf16.msra.mxu0 %v15744_v56  ;;  %v15763_v56 = vld [vmem:[#allocation2 + $0x270] sm:$0xff]  }
 0x616   :  { %14934 = vmatmul.mubr.msk.bf16.vlgmr.msra.gmra.mxu1 %vm7190_vm0, %v20841_v29  ;;  %14945 = vmatprep.subr.bf16.mxu0 %v15746_v19  ;;  %v15751_v29 = vld [vmem:[#allocation2 + $0x1f0] sm:$0xff]  }
 0x617   :  { %14958 = vmatpush3.bf16.msra.mxu1 %v15745_v0  ;;  %14937 = vmatprep.mubr.msk.bf16.mxu1 %vm7190_vm0, %v20837_v62  ;;  %v15752_v62 = vld [vmem:[#allocation2 + $0x220] sm:$0xff]  }
 0x618   :  { %14922 = vmatmul.mubr.msk.bf16.gmra.mxu0 %vm7190_vm0, %v20935_v26  ;;  %14959 = vmatprep.subr.bf16.mxu1 %v15747_v41 }
 0x619   :  { %14946 = vmatpush3.bf16.msra.mxu0 %v15746_v19  ;;  %14949 = vmatprep.mubr.msk.bf16.mxu0 %vm7190_vm0, %v20914_v31 }
 0x61a   :  { %14947 = vmatprep.subr.bf16.mxu0 %v15748_v49 }
 0x61b   :  { %14960 = vmatpush3.bf16.msra.mxu1 %v15747_v41 }
 0x61c   :  { %14961 = vmatprep.subr.bf16.mxu1 %v15749_v14 }
 0x61d   :  { %14948 = vmatpush3.bf16.msra.mxu0 %v15748_v49 }
 0x61e   :  { %14938 = vmatmul.mubr.msk.bf16.gmra.mxu1 %vm7190_vm0, %v20843_v59  ;;  %14973 = vmatprep.subr.bf16.mxu0 %v15750_v34 }
 0x61f   :  { %14962 = vmatpush3.bf16.msra.mxu1 %v15749_v14  ;;  %14965 = vmatprep.mubr.msk.bf16.mxu1 %vm7190_vm0, %v20918_v3 }
 0x620   :  { %14950 = vmatmul.mubr.msk.bf16.vlgmr.msra.gmra.mxu0 %vm7190_vm0, %v20927_v7  ;;  %14963 = vmatprep.subr.bf16.mxu1 %v15751_v29 }
 0x621   :  { %14953 = vmatprep.mubr.msk.bf16.mxu0 %vm7190_vm0, %v20940_v52  ;;  %14974 = vmatpush3.bf16.msra.mxu0 %v15750_v34  ;;  %v22089_v52 = vmov 0.0  }
 0x622   :  { %14975 = vmatprep.subr.bf16.mxu0 %v15752_v62 }
 0x623   :  { %14964 = vmatpush3.bf16.msra.mxu1 %v15751_v29 }
 0x624   :  { %14989 = vmatprep.subr.bf16.mxu1 %v15753_v53 }
 0x625   :  { %14976 = vmatpush3.bf16.msra.mxu0 %v15752_v62 }
 0x626   :  { %14966 = vmatmul.mubr.msk.bf16.vlgmr.msra.gmra.mxu1 %vm7190_vm0, %v20924_v60  ;;  %14977 = vmatprep.subr.bf16.mxu0 %v15754_v1 }
 0x627   :  { %14990 = vmatpush3.bf16.msra.mxu1 %v15753_v53  ;;  %14969 = vmatprep.mubr.msk.bf16.mxu1 %vm7190_vm0, %v20959_v15 }
 0x628   :  { %14954 = vmatmul.mubr.msk.bf16.gmra.mxu0 %vm7190_vm0, %v20954_v30  ;;  %14991 = vmatprep.subr.bf16.mxu1 %v15755_v2 }
 0x629   :  { %14978 = vmatpush3.bf16.msra.mxu0 %v15754_v1  ;;  %14981 = vmatprep.mubr.msk.bf16.mxu0 %vm7190_vm0, %v20868_v32  ;;  %v8190_v32 = vsel %vm6301_vm7, %v7385_v9, %v22883_v44 }
 0x62a   :  { %14979 = vmatprep.subr.bf16.mxu0 %v15756_v48 }
 0x62b   :  { %14992 = vmatpush3.bf16.msra.mxu1 %v15755_v2 }
 0x62c   :  { %14993 = vmatprep.subr.bf16.mxu1 %v15757_v25 }
 0x62d   :  { %14980 = vmatpush3.bf16.msra.mxu0 %v15756_v48 }
 0x62e   :  { %14970 = vmatmul.mubr.msk.bf16.gmra.mxu1 %vm7190_vm0, %v8081_v43  ;;  %15005 = vmatprep.subr.bf16.mxu0 %v22089_v52 }
 0x62f   :  { %14994 = vmatpush3.bf16.msra.mxu1 %v15757_v25  ;;  %14997 = vmatprep.mubr.msk.bf16.mxu1 %vm7190_vm0, %v20945_v8  ;;  %v15764_v8 = vld [vmem:[#allocation2 + $0x260] sm:$0xff]  }
 0x630   :  { %14982 = vmatmul.mubr.msk.bf16.vlgmr.msra.gmra.mxu0 %vm7190_vm0, %v20871_v40  ;;  %14995 = vmatprep.subr.bf16.mxu1 %v15758_v20  ;;  %v8299_v40 = vsel %vm6301_vm7, %v7611_v18, %v22883_v44 }
 0x631   :  { %14985 = vmatprep.mubr.msk.bf16.mxu0 %vm7190_vm0, %v20878_v61  ;;  %15006 = vmatpush3.bf16.msra.mxu0 %v15759_v23 }
 0x632   :  { %15007 = vmatprep.subr.bf16.mxu0 %v22089_v52 }
 0x633   :  { %14996 = vmatpush3.bf16.msra.mxu1 %v15758_v20 }
 0x634   :  { %15017 = vmatprep.subr.bf16.mxu1 %v22089_v52 }
 0x635   :  { %15008 = vmatpush3.bf16.msra.mxu0 %v15760_v24 }
 0x636   :  { %14998 = vmatmul.mubr.msk.bf16.vlgmr.msra.gmra.mxu1 %vm7190_vm0, %v20950_v33  ;;  %15009 = vmatprep.subr.bf16.mxu0 %v22089_v52 }
 0x637   :  { %15001 = vmatprep.mubr.msk.bf16.mxu1 %vm7190_vm0, %v20971_v28  ;;  %15018 = vmatpush3.bf16.msra.mxu1 %v15762_v37 }
 0x638   :  { %14986 = vmatmul.mubr.msk.bf16.gmra.mxu0 %vm7190_vm0, %v8190_v32  ;;  %15019 = vmatprep.subr.bf16.mxu1 %v22089_v52 }
 0x639   :  { %15013 = vmatprep.mubr.msk.bf16.mxu0 %vm16106_vm15, %v22089_v52  ;;  %15010 = vmatpush3.bf16.msra.mxu0 %v15761_v63 }
 0x63a   :  { %15011 = vmatprep.subr.bf16.mxu0 %v22089_v52 }
 0x63b   :  { %15020 = vmatpush3.bf16.msra.mxu1 %v15764_v8 }
 0x63c   :  { %15021 = vmatprep.subr.bf16.mxu1 %v22089_v52 }
 0x63d   :  { %15012 = vmatpush3.bf16.msra.mxu0 %v15763_v56 }
 0x63e   :  { %15002 = vmatmul.mubr.msk.bf16.gmra.mxu1 %vm7190_vm0, %v8299_v40  ;;  %15029 = vmatprep.subr.bf16.mxu0 %v22089_v52 }
 0x63f   :  { %15025 = vmatprep.mubr.msk.bf16.mxu1 %vm16106_vm15, %v22089_v52 }
 0x6b6   :  { %v21030_v61 = vpop.f32.mrf.mxu1 }
 0x6b8   :  { %v21032_v50 = vpop.f32.mrf.mxu1 }
 0x6ba   :  { %v21034_v12 = vpop.f32.mrf.mxu1 }
 0x6bc   :  { %v21036_v59 = vpop.f32.mrf.mxu1 }
 0x6be   :  { %v21038_v9 = vpop.f32.mrf.mxu1 }
 0x6c0   :  { %v21040_v57 = vpop.f32.mrf.mxu0  ;;  %v21042_v10 = vpop.f32.mrf.mxu1 }
 0x6c1   :  { %v7575_v20 = vadd.f32 %v21040_v57, %v21030_v61 }
 0x6c2   :  { %v21044_v6 = vpop.f32.mrf.mxu0  ;;  %v21046_v47 = vpop.f32.mrf.mxu1 }
 0x6c3   :  { %v7567_v25 = vadd.f32 %v21044_v6, %v21032_v50 }
 0x6c4   :  { %v21048_v44 = vpop.f32.mrf.mxu0  ;;  %v21050_v31 = vpop.f32.mrf.mxu1 }
 0x6c5   :  { %v7578_v8 = vadd.f32 %v21048_v44, %v21034_v12 }
 0x6c6   :  { %v21052_v58 = vpop.f32.mrf.mxu0  ;;  %v21054_v36 = vpop.f32.mrf.mxu1 }
 0x6c7   :  { %v7716_v23 = vadd.f32 %v21054_v36, %v7575_v20  ;;  %v7570_v50 = vadd.f32 %v21052_v58, %v21036_v59 }
 0x6c8   :  { %v21056_v51 = vpop.f32.mrf.mxu0  ;;  %v21058_v3 = vpop.f32.mrf.mxu1 }
 0x6c9   :  { %v7714_v40 = vadd.f32 %v21058_v3, %v7567_v25  ;;  %v7591_v58 = vadd.f32 %v21056_v51, %v21038_v9 }
 0x6ca   :  { %v21060_v22 = vpop.f32.mrf.mxu0  ;;  %v21062_v21 = vpop.f32.mrf.mxu1 }
 0x6cb   :  { %v7717_v56 = vadd.f32 %v21062_v21, %v7578_v8  ;;  %v7583_v55 = vadd.f32 %v21060_v22, %v21042_v10 }
 0x6cc   :  { %v21064_v54 = vpop.f32.mrf.mxu0  ;;  %v21066_v60 = vpop.f32.mrf.mxu1 }
 0x6cd   :  { %v7715_v3 = vadd.f32 %v21066_v60, %v7570_v50  ;;  %v7594_v21 = vadd.f32 %v21064_v54, %v21046_v47  ;;  %v15767_v47 = vld [vmem:[#allocation2 + $0x250] sm:$0xff]  }
 0x6ce   :  { %v21068_v17 = vpop.f32.mrf.mxu0  ;;  %v21070_v7 = vpop.f32.mrf.mxu1 }
 0x6cf   :  { %v7586_v22 = vadd.f32 %v21068_v17, %v21050_v31 }
 0x6d0   :  { %v21072_v35 = vpop.f32.mrf.mxu0  ;;  %v21074_v42 = vpop.f32.mrf.mxu1 }
 0x6d1   :  { %v7833_v61 = vadd.f32 %v21072_v35, %v7716_v23 }
 0x6d2   :  { %v7800_v27 = vpop.f32.mrf.mxu0  ;;  %v21076_v5 = vpop.f32.mrf.mxu1 }
 0x6d3   :  { %v7831_v6 = vadd.f32 %v7800_v27, %v7714_v40 }
 0x6d4   :  { %v21078_v26 = vpop.f32.mrf.mxu0  ;;  %v21080_v38 = vpop.f32.mrf.mxu1 }
 0x6d5   :  { %v7834_v12 = vadd.f32 %v21078_v26, %v7717_v56  ;;  %v7720_v26 = vadd.f32 %v21070_v7, %v7591_v58 }
 0x6d6   :  { %v21084_v46 = vpop.f32.mrf.mxu0  ;;  %v14935_v13 = vpop.f32.mrf.mxu1 }
 0x6d7   :  { %v7950_v25 = vadd.f32 %v14935_v13, %v7833_v61  ;;  %v7832_v59 = vadd.f32 %v21084_v46, %v7715_v3  ;;  %v15765_v13 = vld [vmem:[#allocation2 + $0x258] sm:$0xff]   ;;  %v7721_v46 = vadd.f32 %v21076_v5, %v7594_v21 }
 0x6d8   :  { %v21089_v33 = vpop.f32.mrf.mxu0  ;;  %v7917_v45 = vpop.f32.mrf.mxu1  ;;  %15022 = vmatpush3.bf16.msra.mxu1 %v15765_v13 }
 0x6d9   :  { %v7948_v36 = vadd.f32 %v7917_v45, %v7831_v6  ;;  %v7718_v45 = vadd.f32 %v21074_v42, %v7583_v55  ;;  %v22894_v42 = vmov 0.0   ;;  %v7837_v31 = vadd.f32 %v21089_v33, %v7720_v26 }
 0x6da   :  { %v21094_v30 = vpop.f32.mrf.mxu0  ;;  %v14936_v15 = vpop.f32.mrf.mxu1  ;;  %15023 = vmatprep.subr.bf16.mxu1 %v22894_v42 }
 0x6db   :  { %v7951_v40 = vadd.f32 %v14936_v15, %v7834_v12  ;;  %v7835_v54 = vadd.f32 %v21094_v30, %v7718_v45  ;;  %v7719_v15 = vadd.f32 %v21080_v38, %v7586_v22 }
 0x6dc   :  { %v21097_v18 = vpop.f32.mrf.mxu0  ;;  %v7920_v16 = vpop.f32.mrf.mxu1  ;;  %15024 = vmatpush3.bf16.msra.mxu1 %v15767_v47 }
 0x6dd   :  { %v7949_v23 = vadd.f32 %v7920_v16, %v7832_v59  ;;  %v7838_v17 = vadd.f32 %v21097_v18, %v7721_v46  ;;  %15041 = vmatprep.subr.bf16.mxu1 %v22894_v42 }
 0x6de   :  { %v21100_v4 = vpop.f32.mrf.mxu0  ;;  %v21102_v28 = vpop.f32.mrf.mxu1 }
 0x6df   :  { %v7836_v30 = vadd.f32 %v21100_v4, %v7719_v15 }
 0x6e0   :  { %v14951_v0 = vpop.f32.mrf.mxu0  ;;  %v21105_v19 = vpop.f32.mrf.mxu1 }
 0x6e1   :  { %v8067_v35 = vadd.f32 %v14951_v0, %v7950_v25 }
 0x6e2   :  { %v8034_v41 = vpop.f32.mrf.mxu0  ;;  %v21107_v49 = vpop.f32.mrf.mxu1 }
 0x6e3   :  { %v8065_v44 = vadd.f32 %v8034_v41, %v7948_v36 }
 0x6e4   :  { %v14952_v14 = vpop.f32.mrf.mxu0  ;;  %v21110_v34 = vpop.f32.mrf.mxu1 }
 0x6e5   :  { %v8068_v0 = vadd.f32 %v14952_v14, %v7951_v40  ;;  %v7954_v14 = vadd.f32 %v21102_v28, %v7837_v31 }
 0x6e6   :  { %v8037_v29 = vpop.f32.mrf.mxu0  ;;  %v14967_v62 = vpop.f32.mrf.mxu1 }
 0x6e7   :  { %v8176_v9 = vadd.f32 %v14967_v62, %v8067_v35  ;;  %v8066_v8 = vadd.f32 %v8037_v29, %v7949_v23  ;;  %v7952_v62 = vadd.f32 %v21105_v19, %v7835_v54  ;;  %v7955_v29 = vadd.f32 %v21107_v49, %v7838_v17 }
 0x6e8   :  { %v21112_v53 = vpop.f32.mrf.mxu0  ;;  %v8143_v1 = vpop.f32.mrf.mxu1  ;;  %v7953_v19 = vadd.f32 %v21110_v34, %v7836_v30 }
 0x6e9   :  { %v8174_v10 = vadd.f32 %v8143_v1, %v8065_v44 }
 0x6ea   :  { %v21114_v2 = vpop.f32.mrf.mxu0  ;;  %v14968_v48 = vpop.f32.mrf.mxu1 }
 0x6eb   :  { %v8177_v1 = vadd.f32 %v14968_v48, %v8068_v0  ;;  %v8069_v18 = vadd.f32 %v21114_v2, %v7952_v62  ;;  %v8071_v48 = vadd.f32 %v21112_v53, %v7954_v14 }
 0x6ec   :  { %v21120_v43 = vpop.f32.mrf.mxu0  ;;  %v8146_v32 = vpop.f32.mrf.mxu1 }
 0x6ed   :  { %v8175_v50 = vadd.f32 %v8146_v32, %v8066_v8  ;;  %v8072_v4 = vadd.f32 %v21120_v43, %v7955_v29 }
 0x6ee   :  { %v21124_v37 = vpop.f32.mrf.mxu0  ;;  %v21126_v24 = vpop.f32.mrf.mxu1 }
 0x6ef   :  { %v8070_v2 = vadd.f32 %v21124_v37, %v7953_v19 }
 0x6f0   :  { %v14983_v57 = vpop.f32.mrf.mxu0  ;;  %v8159_v63 = vpop.f32.mrf.mxu1 }
 0x6f1   :  { %v8285_v7 = vadd.f32 %v14983_v57, %v8176_v9  ;;  %v8178_v49 = vadd.f32 %v8159_v63, %v8069_v18 }
 0x6f2   :  { %v8252_v20 = vpop.f32.mrf.mxu0  ;;  %v14972_v52 = vpop.f32.mrf.mxu1 }
 0x6f3   :  { %v8283_v55 = vadd.f32 %v8252_v20, %v8174_v10  ;;  %v8180_v20 = vadd.f32 %v21126_v24, %v8071_v48  ;;  %v8181_v12 = vadd.f32 %v14972_v52, %v8072_v4 }
 0x6f4   :  { %v14984_v60 = vpop.f32.mrf.mxu0  ;;  %v8162_v27 = vpop.f32.mrf.mxu1 }
 0x6f5   :  { %v8286_v57 = vadd.f32 %v14984_v60, %v8177_v1  ;;  %v8179_v58 = vadd.f32 %v8162_v27, %v8070_v2 }
 0x6f6   :  { %v8255_v51 = vpop.f32.mrf.mxu0  ;;  %v14999_v41 = vpop.f32.mrf.mxu1 }
 0x6f7   :  { %v21159_v38 = vadd.f32 %v14999_v41, %v8285_v7  ;;  %v8284_v56 = vadd.f32 %v8255_v51, %v8175_v50 }
 0x6f8   :  { %v14987_v5 = vpop.f32.mrf.mxu0  ;;  %v8361_v16 = vpop.f32.mrf.mxu1 }
 0x6f9   :  { %v21154_v6 = vadd.f32 %v8361_v16, %v8283_v55  ;;  %v8426_v34 = vmul.f32 %v21159_v38, %v21159_v38  ;;  %v8289_v21 = vadd.f32 %v14987_v5, %v8180_v20  ;;  %v8405_v37 = vsel %vm7190_vm0, %v21159_v38, 0.0 }
 0x6fa   :  { %v8268_v33 = vpop.f32.mrf.mxu0  ;;  %v15000_v61 = vpop.f32.mrf.mxu1 }
 0x6fb   :  { %v8424_v3 = vmul.f32 %v21154_v6, %v21154_v6  ;;  %v21168_v36 = vadd.f32 %v15000_v61, %v8286_v57  ;;  %v8287_v43 = vadd.f32 %v8268_v33, %v8178_v49  ;;  %v8402_v63 = vsel %vm7190_vm0, %v21154_v6, 0.0 }
 0x6fc   :  { %v14988_v28 = vpop.f32.mrf.mxu0  ;;  %v8364_v32 = vpop.f32.mrf.mxu1  ;;  %v8435_v23 = vsel %vm7190_vm0, %v8426_v34, 0.0 }
 0x6fd   :  { %v21170_v25 = vadd.f32 %v8364_v32, %v8284_v56  ;;  %v8432_v60 = vsel %vm7190_vm0, %v8424_v3, 0.0  ;;  %v8427_v13 = vmul.f32 %v21168_v36, %v21168_v36  ;;  %v8290_v10 = vadd.f32 %v14988_v28, %v8181_v12 }
 0x6fe   :  { %v15003_v53 = vpop.f32.mrf.mxu1  ;;  %v8271_v52 = vpop.f32.mrf.mxu0  ;;  %v8407_v46 = vsel %vm7190_vm0, %v21168_v36, 0.0 }
 0x6ff   :  { %v8403_v59 = vsel %vm7190_vm0, %v21170_v25, 0.0  ;;  %v8425_v44 = vmul.f32 %v21170_v25, %v21170_v25  ;;  %v8288_v9 = vadd.f32 %v8271_v52, %v8179_v58  ;;  %v21193_v51 = vadd.f32 %v15003_v53, %v8289_v21 }
 0x700   :  { %v8404_v24 = vadd.f32 %v8403_v59, %v8402_v63  ;;  %v8377_v35 = vpop.f32.mrf.mxu1  ;;  %v8437_v8 = vsel %vm7190_vm0, %v8427_v13, 0.0  ;;  %v22896_v13 = vld [vmem:[#allocation31_spill] sm:$0xff] }
 0x701   :  { %v8433_v45 = vsel %vm7190_vm0, %v8425_v44, 0.0  ;;  %v21188_v40 = vadd.f32 %v8377_v35, %v8287_v43  ;;  %v8430_v5 = vmul.f32 %v21193_v51, %v21193_v51  ;;  %v8413_v14 = vsel %vm7190_vm0, %v21193_v51, 0.0  ;;  %v22895_v35 = vld [vmem:[#allocation15_spill] sm:$0xff] }
 0x702   :  { %v8406_v27 = vadd.f32 %v8405_v37, %v8404_v24  ;;  %v8434_v22 = vadd.f32 %v8433_v45, %v8432_v60  ;;  %v15004_v26 = vpop.f32.mrf.mxu1  ;;  %v8834_v60 = vand.u32 3, %v22895_v35  ;;  %v8841_v45 = vand.u32 3, %v22896_v13 }
 0x703   :  { %v8428_v41 = vmul.f32 %v21188_v40, %v21188_v40  ;;  %v8409_v55 = vsel %vm7190_vm0, %v21188_v40, 0.0  ;;  %v21200_v15 = vadd.f32 %v15004_v26, %v8290_v10  ;;  %v8443_v57 = vsel %vm7190_vm0, %v8430_v5, 0.0  ;;  %v8400_v26 = vld [vmem:[#allocation5 + $0x6] sm:$0x1] }
 0x704   :  { %v8436_v47 = vadd.f32 %v8435_v23, %v8434_v22  ;;  %v8408_v54 = vadd.f32 %v8407_v46, %v8406_v27  ;;  %v8380_v0 = vpop.f32.mrf.mxu1  ;;  %vm8938_vm4 = vcmp.ge.s32.totalorder %v8834_v60, 1  ;;  %vm8939_vm5 = vcmp.ge.s32.totalorder %v8841_v45, 1 }
 0x705   :  { %v21202_v31 = vadd.f32 %v8380_v0, %v8288_v9  ;;  %v8439_v16 = vsel %vm7190_vm0, %v8428_v41, 0.0  ;;  %v8431_v29 = vmul.f32 %v21200_v15, %v21200_v15  ;;  %v8415_v56 = vsel %vm7190_vm0, %v21200_v15, 0.0  ;;  %vm8944_vm11 = vmpackc.low %vm8938_vm4, %vm8938_vm4  ;;  %v8401_v0 = vld [vmem:[#allocation5 + $0x7] sm:$0x1] }
 0x706   :  { %v8410_v17 = vadd.f32 %v8409_v55, %v8408_v54  ;;  %v8438_v7 = vadd.f32 %v8437_v8, %v8436_v47  ;;  %vm8945_vm3 = vmpackc.low %vm8939_vm5, %vm8939_vm5  ;;  %vm8916_vm6 = vcmp.lt.s32.totalorder %v8834_v60, 3  ;;  %vm8917_vm10 = vcmp.lt.s32.totalorder %v8841_v45, 3 }
 0x707   :  { %v8411_v62 = vsel %vm7190_vm0, %v21202_v31, 0.0  ;;  %v8429_v1 = vmul.f32 %v21202_v31, %v21202_v31  ;;  %v8445_v4 = vsel %vm7190_vm0, %v8431_v29, 0.0  ;;  %v22897_v10 = vmov 0   ;;  %vm8922_vm12 = vmpackc.low %vm8916_vm6, %vm8916_vm6 }
 0x708   :  { %v8440_v50 = vadd.f32 %v8439_v16, %v8438_v7  ;;  %v8412_v30 = vadd.f32 %v8411_v62, %v8410_v17  ;;  %v8946_v27 = vsel %vm8944_vm11, 65537, %v22897_v10  ;;  %v8947_v22 = vsel %vm8945_vm3, 65537, %v22897_v10  ;;  %vm8923_vm13 = vmpackc.low %vm8917_vm10, %vm8917_vm10 }
 0x709   :  { %v8441_v33 = vsel %vm7190_vm0, %v8429_v1, 0.0  ;;  %v21224_v46 = vcombine.low %v8946_v27, %v8947_v22  ;;  %v8924_v9 = vsel %vm8922_vm12, 65537, %v22897_v10  ;;  %v8925_v41 = vsel %vm8923_vm13, 65537, %v22897_v10  ;;  %vm22907_vm11 = vmmov %vm22902_vm8 }
 0x70a   :  { %v8414_v61 = vadd.f32 %v8413_v14, %v8412_v30  ;;  %v8442_v18 = vadd.f32 %v8441_v33, %v8440_v50  ;;  %v21229_v55 = vcombine.low %v8924_v9, %v8925_v41  ;;  %vm22905_vm4 = vcmask 1044484   ;;  %vm22913_vm3 = vmmov %vm22903_vm2 }
 0x70b   :  { %v8954_v8 = vshll.u32 %v21224_v46, 16  ;;  %vm22906_vm5 = vcmask 1045509   ;;  %vm22914_vm6 = vcmask 1046534   ;;  %vm22915_vm10 = vmmov %vm22905_vm4  ;;  %vm22917_vm13 = vcmask 1047559  }
 0x70c   :  { %v8416_v19 = vadd.f32 %v8415_v56, %v8414_v61  ;;  %v8444_v48 = vadd.f32 %v8443_v57, %v8442_v18  ;;  %22898 = vst [vmem:[#allocation77_spill] sm:$0xff] %v21229_v55  ;;  %v8930_v1 = vshrl.u32 %v21229_v55, 16  ;;  %vm22916_vm12 = vmmov %vm22906_vm5 }
 0x70d   :  { %v21233_v62 = vrot.slane %v8954_v8, 1 }
 0x70e   :  { %v8417_v28 = vrot.slane %v8416_v19, 4  ;;  %v8446_v32 = vadd.f32 %v8445_v4, %v8444_v48 }
 0x70f   :  { %22899 = vst [vmem:[#allocation86_spill] sm:$0xff] %v21233_v62 }
 0x710   :  { %v8418_v49 = vadd.f32 %v8417_v28, %v8416_v19  ;;  %v8447_v3 = vrot.slane %v8446_v32, 4 }
 0x712   :  { %v8419_v2 = vrot.slane %v8418_v49, 2  ;;  %v8448_v20 = vadd.f32 %v8447_v3, %v8446_v32  ;;  %v21245_v3 = vrot.slane %v8930_v1, 7 }
 0x714   :  { %v8420_v12 = vadd.f32 %v8419_v2, %v8418_v49  ;;  %v8449_v34 = vrot.slane %v8448_v20, 2  ;;  %22900 = vst [vmem:[#allocation80_spill] sm:$0xff] %v21245_v3 }
 0x716   :  { %v8421_v53 = vrot.slane %v8420_v12, 1  ;;  %v8450_v43 = vadd.f32 %v8449_v34, %v8448_v20 }
 0x718   :  { %v8422_v63 = vadd.f32 %v8421_v53, %v8420_v12  ;;  %v8451_v59 = vrot.slane %v8450_v43, 1  ;;  %v22901_v12 = vld [vmem:[#allocation22_spill] sm:$0xff] }
 0x71a   :  { %v8423_v44 = vmul.f32 0.015625, %v8422_v63  ;;  %v8452_v58 = vadd.f32 %v8451_v59, %v8450_v43 }
 0x71c   :  { %v8453_v21 = vmul.f32 0.015625, %v8452_v58  ;;  %v8454_v37 = vmul.f32 %v8423_v44, %v8423_v44 }
 0x71e   :  { %v8455_v52 = vsub.f32 %v8453_v21, %v8454_v37 }
 0x720   :  { %v8456_v24 = vmax.f32 %v8455_v52, 0.0 }
 0x722   :  { %v8457_v23 = vadd.f32 1e-05, %v8456_v24 }
 0x724   :  { %16017 = vrsqrt.f32 %v8457_v23 }
 0x731   :  { %v16018_v47 = vpop.eup %16017 }
 0x732   :  { %v8459_v54 = vmul.f32 %v16018_v47, %v8400_v26 }
 0x734   :  { %v8460_v17 = vmul.f32 %v8459_v54, %v8423_v44  ;;  %v8465_v7 = vrot.slane %v8459_v54, %v22880_v39 }
 0x736   :  { %v8461_v5 = vsub.f32 %v8401_v0, %v8460_v17  ;;  %v8466_v50 = vmul.f32 %v8465_v7, %v21154_v6  ;;  %v8470_v30 = vmul.f32 %v8465_v7, %v21188_v40  ;;  %v8471_v14 = vmul.f32 %v8465_v7, %v21202_v31 }
 0x737   :  { %v8467_v33 = vmul.f32 %v8465_v7, %v21170_v25  ;;  %v8472_v61 = vmul.f32 %v8465_v7, %v21193_v51  ;;  %v8473_v18 = vmul.f32 %v8465_v7, %v21200_v15  ;;  %v8468_v57 = vmul.f32 %v8465_v7, %v21159_v38 }
 0x738   :  { %v8477_v29 = vrot.slane %v8461_v5, %v22880_v39  ;;  %v8469_v4 = vmul.f32 %v8465_v7, %v21168_v36 }
 0x73a   :  { %v8478_v56 = vadd.f32 %v8477_v29, %v8466_v50  ;;  %v8482_v19 = vadd.f32 %v8477_v29, %v8470_v30  ;;  %v8483_v48 = vadd.f32 %v8477_v29, %v8471_v14  ;;  %v8479_v6 = vadd.f32 %v8477_v29, %v8467_v33 }
 0x73b   :  { %v8484_v28 = vadd.f32 %v8477_v29, %v8472_v61  ;;  %v8485_v40 = vadd.f32 %v8477_v29, %v8473_v18  ;;  %v8480_v32 = vadd.f32 %v8477_v29, %v8468_v57  ;;  %v8481_v2 = vadd.f32 %v8477_v29, %v8469_v4 }
 0x73c   :  { %v8490_v31 = vmax.f32 %v8482_v19, 0.0  ;;  %v8491_v49 = vmax.f32 %v8483_v48, 0.0  ;;  %v21248_v51 = vmax.f32 %v8478_v56, 0.0  ;;  %v21256_v43 = vmax.f32 %v8479_v6, 0.0 }
 0x73d   :  { %v21250_v15 = vmax.f32 %v8484_v28, 0.0  ;;  %v21252_v38 = vmax.f32 %v8485_v40, 0.0  ;;  %v21262_v44 = vmax.f32 %v8480_v32, 0.0 }
 0x73e   :  { %v8570_v20 = vcombine.high %v8490_v31, %v8490_v31  ;;  %v8577_v36 = vrot.slane %v8490_v31, %v22901_v12  ;;  %v8587_v34 = vcombine.high %v8491_v49, %v8491_v49  ;;  %v8594_v53 = vrot.slane %v8491_v49, %v22901_v12 }
 0x73f   :  { %v8611_v63 = vrot.slane %v21250_v15, %v22901_v12  ;;  %v8628_v59 = vrot.slane %v21252_v38, %v22901_v12  ;;  %v8502_v31 = vcombine.high %v21248_v51, %v21248_v51  ;;  %v21270_v49 = vrot.slane %v21248_v51, %v22901_v12 }
 0x740   :  { %v8584_v58 = vrot.slane %v8570_v20, %v22901_v12  ;;  %v8585_v21 = vcombine.high %v8577_v36, %v8577_v36  ;;  %v8601_v37 = vrot.slane %v8587_v34, %v22901_v12  ;;  %v8602_v52 = vcombine.high %v8594_v53, %v8594_v53 }
 0x741   :  { %v8619_v24 = vcombine.high %v8611_v63, %v8611_v63  ;;  %v8636_v60 = vcombine.high %v8628_v59, %v8628_v59  ;;  %v13504_v13 = vrot.slane %v8577_v36, 9  ;;  %v13508_v45 = vrot.slane %v8594_v53, 9 }
 0x742   :  { %v8586_v23 = vcombine.high %v8584_v58, %v8584_v58  ;;  %v8603_v27 = vcombine.high %v8601_v37, %v8601_v37  ;;  %v13505_v22 = vrot.slane %v8585_v21, 9  ;;  %v13506_v26 = vrot.slane %v8584_v58, 9 }
 0x743   :  { %v13509_v9 = vrot.slane %v8602_v52, 9  ;;  %v13510_v41 = vrot.slane %v8601_v37, 9  ;;  %v13512_v47 = vrot.slane %v8611_v63, 9  ;;  %v13513_v54 = vrot.slane %v8619_v24, 9 }
 0x744   :  { %v13507_v0 = vrot.slane %v8586_v23, 9  ;;  %v13511_v8 = vrot.slane %v8603_v27, 9  ;;  %v13516_v17 = vrot.slane %v8628_v59, 9  ;;  %v13517_v7 = vrot.slane %v8636_v60, 9 }
 0x745   :  { %v8782_v5 = vmax.f32 %v8577_v36, %v13504_v13  ;;  %v8783_v1 = vmax.f32 %v8585_v21, %v13505_v22  ;;  %v8784_v50 = vmax.f32 %v8584_v58, %v13506_v26  ;;  %v8786_v30 = vmax.f32 %v8594_v53, %v13508_v45 }
 0x746   :  { %v8785_v14 = vmax.f32 %v8586_v23, %v13507_v0  ;;  %v8787_v29 = vmax.f32 %v8602_v52, %v13509_v9  ;;  %v8788_v33 = vmax.f32 %v8601_v37, %v13510_v41  ;;  %v8789_v61 = vmax.f32 %v8603_v27, %v13511_v8 }
 0x747   :  { %v8790_v18 = vmax.f32 %v8611_v63, %v13512_v47  ;;  %v8791_v57 = vmax.f32 %v8619_v24, %v13513_v54  ;;  %v8794_v56 = vmax.f32 %v8628_v59, %v13516_v17  ;;  %v8795_v19 = vmax.f32 %v8636_v60, %v13517_v7 }
 0x748   :  { %v8806_v48 = vmax.f32 %v8782_v5, %v8786_v30  ;;  %v8807_v4 = vmax.f32 %v8783_v1, %v8787_v29  ;;  %v8808_v6 = vmax.f32 %v8784_v50, %v8788_v33  ;;  %v8809_v28 = vmax.f32 %v8785_v14, %v8789_v61 }
 0x749   :  { %v8810_v40 = vmax.f32 %v8790_v18, %v8794_v56  ;;  %v8811_v32 = vmax.f32 %v8791_v57, %v8795_v19  ;;  %v8604_v63 = vcombine.high %v21250_v15, %v21250_v15  ;;  %v8489_v21 = vmax.f32 %v8481_v2, 0.0 }
 0x74a   :  { %v8822_v20 = vpack.c.bf16 %v8806_v48, %v8806_v48  ;;  %v8823_v36 = vpack.c.bf16 %v8807_v4, %v8807_v4  ;;  %v8824_v34 = vpack.c.bf16 %v8808_v6, %v8808_v6  ;;  %v8825_v53 = vpack.c.bf16 %v8809_v28, %v8809_v28 }
 0x74b   :  { %v8826_v59 = vpack.c.bf16 %v8810_v40, %v8810_v40  ;;  %v8827_v58 = vpack.c.bf16 %v8811_v32, %v8811_v32  ;;  %v8516_v60 = vrot.slane %v8502_v31, %v22901_v12  ;;  %v8621_v13 = vcombine.high %v21252_v38, %v21252_v38 }
 0x74c   :  { %v8879_v37 = vunpack.c.l.b16 %v8823_v36  ;;  %v8880_v52 = vunpack.c.l.b16 %v8824_v34  ;;  %v8881_v24 = vunpack.c.l.b16 %v8825_v53  ;;  %v8517_v45 = vcombine.high %v21270_v49, %v21270_v49 }
 0x74d   :  { %v21277_v51 = vunpack.c.l.b16 %v8826_v59  ;;  %v8519_v23 = vcombine.high %v21256_v43, %v21256_v43  ;;  %v8878_v15 = vunpack.c.l.b16 %v8822_v20  ;;  %v8526_v2 = vrot.slane %v21256_v43, %v22901_v12 }
 0x74e   :  { %v8900_v27 = vrot.slane %v8879_v37, 7  ;;  %v8902_v22 = vrot.slane %v8880_v52, 6  ;;  %v21285_v26 = vunpack.c.l.b16 %v8827_v58  ;;  %v8904_v9 = vrot.slane %v8881_v24, 5 }
 0x74f   :  { %v8533_v41 = vrot.slane %v8519_v23, %v22901_v12  ;;  %v8536_v38 = vcombine.high %v21262_v44, %v21262_v44  ;;  %v8518_v54 = vcombine.high %v8516_v60, %v8516_v60  ;;  %v8543_v0 = vrot.slane %v21262_v44, %v22901_v12 }
 0x750   :  { %v8901_v47 = vsel %vm5920_vm14, %v8900_v27, %v8878_v15  ;;  %v8553_v8 = vcombine.high %v8489_v21, %v8489_v21  ;;  %v8560_v5 = vrot.slane %v8489_v21, %v22901_v12  ;;  %v8534_v1 = vcombine.high %v8526_v2, %v8526_v2 }
 0x751   :  { %v8903_v17 = vsel %vm22902_vm8, %v8902_v22, %v8901_v47  ;;  %v8550_v43 = vrot.slane %v8536_v38, %v22901_v12  ;;  %v8535_v50 = vcombine.high %v8533_v41, %v8533_v41  ;;  %v8618_v14 = vrot.slane %v8604_v63, %v22901_v12  ;;  %vm22918_vm8 = vmmov %vm22914_vm6 }
 0x752   :  { %v8567_v30 = vrot.slane %v8553_v8, %v22901_v12  ;;  %v21300_v29 = vsel %vm22903_vm2, %v8904_v9, %v8903_v17  ;;  %v8551_v33 = vcombine.high %v8543_v0, %v8543_v0  ;;  %v8635_v61 = vrot.slane %v8621_v13, %v22901_v12  ;;  %vm22919_vm2 = vmmov %vm22917_vm13 }
 0x753   :  { %v8552_v44 = vcombine.high %v8550_v43, %v8550_v43  ;;  %v8568_v18 = vcombine.high %v8560_v5, %v8560_v5  ;;  %v8620_v56 = vcombine.high %v8618_v14, %v8618_v14  ;;  %v13488_v19 = vrot.slane %v21270_v49, 9 }
 0x754   :  { %v8569_v57 = vcombine.high %v8567_v30, %v8567_v30  ;;  %v8637_v48 = vcombine.high %v8635_v61, %v8635_v61  ;;  %v13489_v4 = vrot.slane %v8517_v45, 9  ;;  %v13490_v6 = vrot.slane %v8516_v60, 9 }
 0x755   :  { %v13491_v28 = vrot.slane %v8518_v54, 9  ;;  %v13492_v40 = vrot.slane %v8526_v2, 9  ;;  %v13493_v32 = vrot.slane %v8534_v1, 9  ;;  %v13494_v31 = vrot.slane %v8533_v41, 9 }
 0x756   :  { %v13495_v20 = vrot.slane %v8535_v50, 9  ;;  %v13496_v36 = vrot.slane %v8543_v0, 9  ;;  %v13497_v34 = vrot.slane %v8551_v33, 9  ;;  %v13498_v53 = vrot.slane %v8550_v43, 9 }
 0x757   :  { %v13499_v63 = vrot.slane %v8552_v44, 9  ;;  %v13500_v59 = vrot.slane %v8560_v5, 9  ;;  %v13501_v58 = vrot.slane %v8568_v18, 9  ;;  %v13502_v21 = vrot.slane %v8567_v30, 9 }
 0x758   :  { %v13503_v37 = vrot.slane %v8569_v57, 9  ;;  %v13514_v52 = vrot.slane %v8618_v14, 9  ;;  %v13515_v24 = vrot.slane %v8620_v56, 9  ;;  %v13518_v13 = vrot.slane %v8635_v61, 9 }
 0x759   :  { %v13519_v23 = vrot.slane %v8637_v48, 9  ;;  %v8766_v15 = vmax.f32 %v21270_v49, %v13488_v19  ;;  %v8767_v27 = vmax.f32 %v8517_v45, %v13489_v4  ;;  %v8768_v22 = vmax.f32 %v8516_v60, %v13490_v6 }
 0x75a   :  { %v8769_v9 = vmax.f32 %v8518_v54, %v13491_v28  ;;  %v8770_v38 = vmax.f32 %v8526_v2, %v13492_v40  ;;  %v8771_v47 = vmax.f32 %v8534_v1, %v13493_v32  ;;  %v8772_v8 = vmax.f32 %v8533_v41, %v13494_v31 }
 0x75b   :  { %v8773_v17 = vmax.f32 %v8535_v50, %v13495_v20  ;;  %v8774_v25 = vmax.f32 %v8543_v0, %v13496_v36  ;;  %v8775_v16 = vmax.f32 %v8551_v33, %v13497_v34  ;;  %v8776_v7 = vmax.f32 %v8550_v43, %v13498_v53  ;;  %v22909_v20 = vld [vmem:[#allocation86_spill] sm:$0xff]  ;;  %v22910_v34 = vld [vmem:[#allocation80_spill] sm:$0xff]  ;;  %v22911_v53 = vld [vmem:[#allocation77_spill] sm:$0xff] }
 0x75c   :  { %v8777_v12 = vmax.f32 %v8552_v44, %v13499_v63  ;;  %v8778_v35 = vmax.f32 %v8560_v5, %v13500_v59  ;;  %v8779_v39 = vmax.f32 %v8568_v18, %v13501_v58  ;;  %v8780_v11 = vmax.f32 %v8567_v30, %v13502_v21 }
 0x75d   :  { %v8781_v42 = vmax.f32 %v8569_v57, %v13503_v37  ;;  %v8792_v10 = vmax.f32 %v8618_v14, %v13514_v52  ;;  %v8793_v55 = vmax.f32 %v8620_v56, %v13515_v24  ;;  %v8796_v3 = vmax.f32 %v8635_v61, %v13518_v13 }
 0x75e   :  { %v8797_v62 = vmax.f32 %v8637_v48, %v13519_v23  ;;  %v8798_v49 = vmax.f32 %v8766_v15, %v8770_v38  ;;  %v8799_v45 = vmax.f32 %v8767_v27, %v8771_v47  ;;  %v8800_v60 = vmax.f32 %v8768_v22, %v8772_v8 }
 0x75f   :  { %v8801_v54 = vmax.f32 %v8769_v9, %v8773_v17  ;;  %v8802_v2 = vmax.f32 %v8774_v25, %v8778_v35  ;;  %v8803_v1 = vmax.f32 %v8775_v16, %v8779_v39  ;;  %v8804_v41 = vmax.f32 %v8776_v7, %v8780_v11  ;;  %v15766_v17 = vld [vmem:[#allocation2 + $0x2a8] sm:$0xff]  }
 0x760   :  { %v8805_v50 = vmax.f32 %v8777_v12, %v8781_v42  ;;  %v8812_v0 = vmax.f32 %v8792_v10, %v8796_v3  ;;  %v8813_v33 = vmax.f32 %v8793_v55, %v8797_v62  ;;  %v8814_v43 = vpack.c.bf16 %v8798_v49, %v8798_v49 }
 0x761   :  { %v8815_v44 = vpack.c.bf16 %v8799_v45, %v8799_v45  ;;  %v8816_v5 = vpack.c.bf16 %v8800_v60, %v8800_v60  ;;  %v8817_v18 = vpack.c.bf16 %v8801_v54, %v8801_v54  ;;  %v8818_v30 = vpack.c.bf16 %v8802_v2, %v8802_v2 }
 0x762   :  { %v8819_v57 = vpack.c.bf16 %v8803_v1, %v8803_v1  ;;  %v22904_v14 = vrot.slane %v21277_v51, 4  ;;  %v8820_v56 = vpack.c.bf16 %v8804_v41, %v8804_v41  ;;  %v8828_v19 = vpack.c.bf16 %v8812_v0, %v8812_v0  ;;  %v15768_v0 = vld [vmem:[#allocation2 + $0x2a0] sm:$0xff]  }
 0x763   :  { %v8829_v48 = vpack.c.bf16 %v8813_v33, %v8813_v33  ;;  %v8821_v35 = vpack.c.bf16 %v8805_v50, %v8805_v50  ;;  %v8871_v39 = vunpack.c.l.b16 %v8815_v44  ;;  %v8872_v11 = vunpack.c.l.b16 %v8816_v5  ;;  %v22922_v5 = vld [vmem:[#allocation29_spill] sm:$0xff] }
 0x764   :  { %v8907_v61 = vsel %vm22905_vm4, %v22904_v14, %v21300_v29  ;;  %v8873_v42 = vunpack.c.l.b16 %v8817_v18  ;;  %v8908_v10 = vrot.slane %v21285_v26, 3  ;;  %v8870_v55 = vunpack.c.l.b16 %v8814_v43  ;;  %v15769_v14 = vld [vmem:[#allocation2 + $0x298] sm:$0xff]  }
 0x765   :  { %v8874_v16 = vunpack.c.l.b16 %v8818_v30  ;;  %v8875_v62 = vunpack.c.l.b16 %v8819_v57  ;;  %v8884_v3 = vunpack.c.l.b16 %v8828_v19  ;;  %v8885_v25 = vunpack.c.l.b16 %v8829_v48  ;;  %v22923_v19 = vld [vmem:[#allocation25_spill] sm:$0xff] }
 0x766   :  { %v8886_v12 = vrot.slane %v8871_v39, 7  ;;  %v8888_v7 = vrot.slane %v8872_v11, 6  ;;  %v8909_v51 = vsel %vm22906_vm5, %v8908_v10, %v8907_v61  ;;  %v8876_v4 = vunpack.c.l.b16 %v8820_v56  ;;  %v15770_v61 = vld [vmem:[#allocation2 + $0x2c8] sm:$0xff]   ;;  %v15772_v39 = vld [vmem:[#allocation2 + $0x2c0] sm:$0xff]  }
 0x767   :  { %v8890_v29 = vrot.slane %v8873_v42, 5  ;;  %v8877_v6 = vunpack.c.l.b16 %v8821_v35  ;;  %v8910_v40 = vrot.slane %v8884_v3, 2  ;;  %v8892_v31 = vrot.slane %v8874_v16, 4  ;;  %v15771_v35 = vld [vmem:[#allocation2 + $0x290] sm:$0xff]   ;;  %v15773_v42 = vld [vmem:[#allocation2 + $0x2b8] sm:$0xff]   ;;  %v15774_v10 = vld [vmem:[#allocation2 + $0x2e8] sm:$0xff]  }
 0x768   :  { %v8887_v28 = vsel %vm5920_vm14, %v8886_v12, %v8870_v55  ;;  %v22908_v26 = vshrl.u32 %v21224_v46, 16  ;;  %v22912_v63 = vshll.u32 %v22911_v53, 16  ;;  %v8894_v21 = vrot.slane %v8875_v62, 3  ;;  %v15775_v16 = vld [vmem:[#allocation2 + $0x2b0] sm:$0xff]   ;;  %v15776_v62 = vld [vmem:[#allocation2 + $0x2e0] sm:$0xff]   ;;  %v15777_v3 = vld [vmem:[#allocation2 + $0x2d8] sm:$0xff]  }
 0x769   :  { %v8889_v32 = vsel %vm22907_vm11, %v8888_v7, %v8887_v28  ;;  %v8911_v37 = vsel %vm22914_vm6, %v8910_v40, %v8909_v51  ;;  %v8912_v52 = vrot.slane %v8885_v25, 1  ;;  %v8896_v13 = vrot.slane %v8876_v4, 2  ;;  %v15778_v25 = vld [vmem:[#allocation2 + $0x308] sm:$0xff]   ;;  %v15779_v12 = vld [vmem:[#allocation2 + $0x2d0] sm:$0xff]   ;;  %v15780_v7 = vld [vmem:[#allocation2 + $0x300] sm:$0xff]  }
 0x76a   :  { %v21316_v36 = vor.u32 %v22909_v20, %v22908_v26  ;;  %v21321_v59 = vor.u32 %v22912_v63, %v22910_v34  ;;  %v8891_v58 = vsel %vm22913_vm3, %v8890_v29, %v8889_v32  ;;  %v8898_v46 = vrot.slane %v8877_v6, 1  ;;  %v15781_v51 = vld [vmem:[#allocation2 + $0x2f8] sm:$0xff]   ;;  %v15782_v4 = vld [vmem:[#allocation2 + $0x328] sm:$0xff]   ;;  %v15783_v29 = vld [vmem:[#allocation2 + $0x2f0] sm:$0xff]  }
 0x76b   :  { %v8893_v24 = vsel %vm22915_vm10, %v8892_v31, %v8891_v58  ;;  %v8913_v15 = vsel %vm22917_vm13, %v8912_v52, %v8911_v37  ;;  %v22920_v38 = vmov 0   ;;  %vm8992_vm11 = vcmask 1041408   ;;  %v15784_v6 = vld [vmem:[#allocation2 + $0x320] sm:$0xff]   ;;  %v15785_v28 = vld [vmem:[#allocation2 + $0x318] sm:$0xff]   ;;  %v15786_v40 = vld [vmem:[#allocation2 + $0x348] sm:$0xff]  }
 0x76c   :  { %v8895_v23 = vsel %vm22916_vm12, %v8894_v21, %v8893_v24  ;;  %vm8958_vm4 = vcmp.ne.s16.totalorder %v21316_v36, 0  ;;  %vm8936_vm5 = vcmp.ne.s16.totalorder %v21321_v59, 0  ;;  %v21335_v47 = vrot.slane %v22920_v38, 6  ;;  %v15787_v32 = vld [vmem:[#allocation2 + $0x310] sm:$0xff]   ;;  %v15788_v31 = vld [vmem:[#allocation2 + $0x340] sm:$0xff]   ;;  %v15789_v34 = vld [vmem:[#allocation2 + $0x338] sm:$0xff]  }
 0x76d   :  { %v8897_v27 = vsel %vm22918_vm8, %v8896_v13, %v8895_v23  ;;  %v22921_v33 = vmov 0.0   ;;  %v21403_v20 = vrot.slane %v22920_v38, 2  ;;  %v15790_v53 = vld [vmem:[#allocation2 + $0x368] sm:$0xff]   ;;  %vm9456_vm3 = vcmask 1045504   ;;  %v15791_v58 = vld [vmem:[#allocation2 + $0x330] sm:$0xff]   ;;  %v15792_v21 = vld [vmem:[#allocation2 + $0x360] sm:$0xff]  }
 0x76e   :  { %v8899_v22 = vsel %vm22919_vm2, %v8898_v46, %v8897_v27  ;;  %v15793_v52 = vld [vmem:[#allocation2 + $0x358] sm:$0xff]   ;;  %v15794_v13 = vld [vmem:[#allocation2 + $0x350] sm:$0xff]   ;;  %v15796_v27 = vld [vmem:[#allocation2 + $0x3e0] sm:$0xff]   ;;  %vm22929_vm12 = vcmask 1042434   ;;  %vm22930_vm13 = vcmask 1043459   ;;  %vm10974_vm2 = vcmask 1040384  }
 0x76f   :  { %v21332_v9 = vpack.c.b16 %v8913_v15, %v8899_v22  ;;  %v15795_v15 = vld [vmem:[#allocation2 + $0x3e8] sm:$0xff]   ;;  %v15797_v22 = vld [vmem:[#allocation2 + $0x3d8] sm:$0xff]   ;;  %v15819_v59 = vld [vmem:[#allocation2 + $0x400] sm:$0xff]  }
 0x771   :  { %v8994_v8 = vrot.slane %v21332_v9, 6  ;;  %v8959_v49 = vsel %vm8958_vm4, %v21332_v9, 0  ;;  %v8937_v45 = vsel %vm8936_vm5, %v21332_v9, 0  ;;  %v9538_v37 = vrot.slane %v21332_v9, 2 }
 0x772   :  { %v8961_v60 = vshrl.u32 %v8959_v49, 16  ;;  %v8971_v54 = vshll.u32 %v8937_v45, 16  ;;  %v8964_v41 = vshll.u32 %v8959_v49, 16  ;;  %v8969_v44 = vshrl.u32 %v8937_v45, 16  ;;  %v15801_v49 = vld [vmem:[#allocation2 + $0x3c8] sm:$0xff]   ;;  %v15802_v45 = vld [vmem:[#allocation2 + $0x398] sm:$0xff]  }
 0x773   :  { %v8995_v2 = vsel %vm8992_vm11, %v21335_v47, %v8994_v8  ;;  %v9539_v24 = vsel %vm9456_vm3, %v9538_v37, %v21403_v20  ;;  %v15799_v8 = vld [vmem:[#allocation2 + $0x3d0] sm:$0xff]  }
 0x774   :  { %15014 = vmatmul.mubr.msk.bf16.vlgmr.msra.gmra.mxu0 %vm7190_vm0, %v8995_v2  ;;  %v8963_v1 = vrot.slane %v8961_v60, 7  ;;  %v8973_v50 = vrot.slane %v8971_v54, 1  ;;  %v15803_v60 = vld [vmem:[#allocation2 + $0x3c0] sm:$0xff]   ;;  %v15804_v54 = vld [vmem:[#allocation2 + $0x390] sm:$0xff]   ;;  %v15805_v2 = vld [vmem:[#allocation2 + $0x3b8] sm:$0xff]  }
 0x775   :  { %15030 = vmatpush3.bf16.msra.mxu0 %v15766_v17  ;;  %15037 = vmatprep.mubr.msk.bf16.mxu0 %vm16106_vm15, %v22921_v33  ;;  %v15800_v17 = vld [vmem:[#allocation2 + $0x3a0] sm:$0xff]  }
 0x776   :  { %15031 = vmatprep.subr.bf16.mxu0 %v22921_v33  ;;  %v8966_v43 = vor.u32 %v8964_v41, %v8963_v1  ;;  %v8974_v30 = vor.u32 %v8973_v50, %v8969_v44  ;;  %v15806_v1 = vld [vmem:[#allocation2 + $0x388] sm:$0xff]   ;;  %v15807_v41 = vld [vmem:[#allocation2 + $0x3b0] sm:$0xff]   ;;  %v15808_v50 = vld [vmem:[#allocation2 + $0x380] sm:$0xff]  }
 0x777   :  { %v15811_v44 = vld [vmem:[#allocation2 + $0x370] sm:$0xff]  }
 0x778   :  { %v21352_v18 = vsel %vm1311_vm9, %v22922_v5, %v8966_v43  ;;  %v21361_v48 = vsel %vm1679_vm1, %v8974_v30, %v22923_v19 }
 0x779   :  { %15032 = vmatpush3.bf16.msra.mxu0 %v15768_v0  ;;  %v9064_v57 = vrot.slane %v21352_v18, 6  ;;  %v9142_v11 = vrot.slane %v21361_v48, 6  ;;  %v9457_v26 = vrot.slane %v21352_v18, 2  ;;  %v9618_v23 = vrot.slane %v21361_v48, 2  ;;  %v15809_v0 = vld [vmem:[#allocation2 + $0x378] sm:$0xff]  }
 0x77a   :  { %15033 = vmatprep.subr.bf16.mxu0 %v22921_v33 }
 0x77b   :  { %v9065_v56 = vsel %vm8992_vm11, %v21335_v47, %v9064_v57  ;;  %v9143_v55 = vsel %vm8992_vm11, %v21335_v47, %v9142_v11  ;;  %v9459_v63 = vsel %vm9456_vm3, %v9457_v26, %v21403_v20  ;;  %v9619_v46 = vsel %vm9456_vm3, %v9618_v23, %v21403_v20 }
 0x77c   :  { %15026 = vmatmul.mubr.msk.bf16.vlgmr.msra.gmra.mxu1 %vm7190_vm0, %v9065_v56 }
 0x77d   :  { %15034 = vmatpush3.bf16.msra.mxu0 %v15769_v14  ;;  %15042 = vmatpush3.bf16.msra.mxu1 %v15770_v61 }
 0x77e   :  { %15035 = vmatprep.subr.bf16.mxu0 %v22921_v33  ;;  %15043 = vmatprep.subr.bf16.mxu1 %v22921_v33 }
 0x77f   :  { %15049 = vmatprep.mubr.msk.bf16.mxu1 %vm16106_vm15, %v22921_v33 }
 0x781   :  { %15036 = vmatpush3.bf16.msra.mxu0 %v15771_v35  ;;  %15044 = vmatpush3.bf16.msra.mxu1 %v15772_v39 }
 0x782   :  { %15045 = vmatprep.subr.bf16.mxu1 %v22921_v33  ;;  %15053 = vmatprep.subr.bf16.mxu0 %v22921_v33 }
 0x784   :  { %15038 = vmatmul.mubr.msk.bf16.vlgmr.msra.gmra.mxu0 %vm7190_vm0, %v9143_v55 }
 0x785   :  { %15046 = vmatpush3.bf16.msra.mxu1 %v15773_v42  ;;  %15054 = vmatpush3.bf16.msra.mxu0 %v15774_v10 }
 0x786   :  { %15047 = vmatprep.subr.bf16.mxu1 %v22921_v33  ;;  %15055 = vmatprep.subr.bf16.mxu0 %v22921_v33 }
 0x787   :  { %15061 = vmatprep.mubr.msk.bf16.mxu0 %vm16106_vm15, %v22921_v33 }
 0x789   :  { %15048 = vmatpush3.bf16.msra.mxu1 %v15775_v16  ;;  %15056 = vmatpush3.bf16.msra.mxu0 %v15776_v62 }
 0x78a   :  { %15057 = vmatprep.subr.bf16.mxu0 %v22921_v33  ;;  %15065 = vmatprep.subr.bf16.mxu1 %v22921_v33 }
 0x78c   :  { %15050 = vmatmul.mubr.msk.bf16.vlgmr.msra.gmra.mxu1 %vm7190_vm0, %v21352_v18 }
 0x78d   :  { %15058 = vmatpush3.bf16.msra.mxu0 %v15777_v3  ;;  %15066 = vmatpush3.bf16.msra.mxu1 %v15778_v25 }
 0x78e   :  { %15059 = vmatprep.subr.bf16.mxu0 %v22921_v33  ;;  %15067 = vmatprep.subr.bf16.mxu1 %v22921_v33 }
 0x78f   :  { %15073 = vmatprep.mubr.msk.bf16.mxu1 %vm16106_vm15, %v22921_v33 }
 0x791   :  { %15060 = vmatpush3.bf16.msra.mxu0 %v15779_v12  ;;  %15068 = vmatpush3.bf16.msra.mxu1 %v15780_v7 }
 0x792   :  { %15069 = vmatprep.subr.bf16.mxu1 %v22921_v33  ;;  %15077 = vmatprep.subr.bf16.mxu0 %v22921_v33 }
 0x794   :  { %15062 = vmatmul.mubr.msk.bf16.vlgmr.msra.gmra.mxu0 %vm7190_vm0, %v21332_v9  ;;  %v15798_v9 = vld [vmem:[#allocation2 + $0x3a8] sm:$0xff]  }
 0x795   :  { %15070 = vmatpush3.bf16.msra.mxu1 %v15781_v51  ;;  %15078 = vmatpush3.bf16.msra.mxu0 %v15782_v4 }
 0x796   :  { %15071 = vmatprep.subr.bf16.mxu1 %v22921_v33  ;;  %15079 = vmatprep.subr.bf16.mxu0 %v22921_v33 }
 0x797   :  { %15085 = vmatprep.mubr.msk.bf16.mxu0 %vm16106_vm15, %v22921_v33 }
 0x799   :  { %15072 = vmatpush3.bf16.msra.mxu1 %v15783_v29  ;;  %15080 = vmatpush3.bf16.msra.mxu0 %v15784_v6 }
 0x79a   :  { %15081 = vmatprep.subr.bf16.mxu0 %v22921_v33  ;;  %15089 = vmatprep.subr.bf16.mxu1 %v22921_v33 }
 0x79c   :  { %15074 = vmatmul.mubr.msk.bf16.vlgmr.msra.gmra.mxu1 %vm7190_vm0, %v21361_v48 }
 0x79d   :  { %15082 = vmatpush3.bf16.msra.mxu0 %v15785_v28  ;;  %15090 = vmatpush3.bf16.msra.mxu1 %v15786_v40 }
 0x79e   :  { %15083 = vmatprep.subr.bf16.mxu0 %v22921_v33  ;;  %15091 = vmatprep.subr.bf16.mxu1 %v22921_v33 }
 0x79f   :  { %15097 = vmatprep.mubr.msk.bf16.mxu1 %vm16106_vm15, %v22921_v33 }
 0x7a1   :  { %15084 = vmatpush3.bf16.msra.mxu0 %v15787_v32  ;;  %15092 = vmatpush3.bf16.msra.mxu1 %v15788_v31 }
 0x7a2   :  { %15093 = vmatprep.subr.bf16.mxu1 %v22921_v33  ;;  %15101 = vmatprep.subr.bf16.mxu0 %v22921_v33 }
 0x7a4   :  { %15086 = vmatmul.mubr.msk.bf16.vlgmr.msra.gmra.mxu0 %vm7190_vm0, %v9459_v63 }
 0x7a5   :  { %15094 = vmatpush3.bf16.msra.mxu1 %v15789_v34  ;;  %15102 = vmatpush3.bf16.msra.mxu0 %v15790_v53 }
 0x7a6   :  { %15095 = vmatprep.subr.bf16.mxu1 %v22921_v33  ;;  %15103 = vmatprep.subr.bf16.mxu0 %v22921_v33 }
 0x7a7   :  { %15109 = vmatprep.mubr.msk.bf16.mxu0 %vm16106_vm15, %v22921_v33 }
 0x7a9   :  { %15096 = vmatpush3.bf16.msra.mxu1 %v15791_v58  ;;  %15104 = vmatpush3.bf16.msra.mxu0 %v15792_v21 }
 0x7aa   :  { %15105 = vmatprep.subr.bf16.mxu0 %v22921_v33  ;;  %15113 = vmatprep.subr.bf16.mxu1 %v22921_v33 }
 0x7ac   :  { %15098 = vmatmul.mubr.msk.bf16.vlgmr.msra.gmra.mxu1 %vm7190_vm0, %v9539_v24 }
 0x7ad   :  { %15106 = vmatpush3.bf16.msra.mxu0 %v15793_v52  ;;  %15129 = vmatprep.mubr.msk.bf16.mxu1 %vm16106_vm15, %v22921_v33 }
 0x7ae   :  { %15107 = vmatprep.subr.bf16.mxu0 %v22921_v33  ;;  %15114 = vmatpush3.bf16.msra.mxu1 %v15795_v15 }
 0x7af   :  { %15115 = vmatprep.subr.bf16.mxu1 %v22921_v33 }
 0x7b1   :  { %15108 = vmatpush3.bf16.msra.mxu0 %v15794_v13 }
 0x7b2   :  { %15133 = vmatprep.subr.bf16.mxu0 %v22921_v33  ;;  %15116 = vmatpush3.bf16.msra.mxu1 %v15796_v27 }
 0x7b3   :  { %15117 = vmatprep.subr.bf16.mxu1 %v22921_v33 }
 0x7b4   :  { %15110 = vmatmul.mubr.msk.bf16.vlgmr.msra.gmra.mxu0 %vm7190_vm0, %v9619_v46 }
 0x7b5   :  { %15149 = vmatprep.mubr.msk.bf16.mxu0 %vm16106_vm15, %v22921_v33  ;;  %15134 = vmatpush3.bf16.msra.mxu0 %v15798_v9 }
 0x7b6   :  { %15118 = vmatpush3.bf16.msra.mxu1 %v15797_v22  ;;  %15135 = vmatprep.subr.bf16.mxu0 %v22921_v33 }
 0x7b7   :  { %15119 = vmatprep.subr.bf16.mxu1 %v22921_v33 }
 0x7b9   :  { %15136 = vmatpush3.bf16.msra.mxu0 %v15800_v17 }
 0x7ba   :  { %15120 = vmatpush3.bf16.msra.mxu1 %v15799_v8  ;;  %15137 = vmatprep.subr.bf16.mxu0 %v22921_v33 }
 0x7bb   :  { %15121 = vmatprep.subr.bf16.mxu1 %v22921_v33 }
 0x7bd   :  { %15138 = vmatpush3.bf16.msra.mxu0 %v15802_v45 }
 0x7be   :  { %15122 = vmatpush3.bf16.msra.mxu1 %v15801_v49  ;;  %15139 = vmatprep.subr.bf16.mxu0 %v22921_v33 }
 0x7bf   :  { %15123 = vmatprep.subr.bf16.mxu1 %v22921_v33 }
 0x7c1   :  { %15140 = vmatpush3.bf16.msra.mxu0 %v15804_v54 }
 0x7c2   :  { %15124 = vmatpush3.bf16.msra.mxu1 %v15803_v60  ;;  %15141 = vmatprep.subr.bf16.mxu0 %v22921_v33 }
 0x7c3   :  { %15125 = vmatprep.subr.bf16.mxu1 %v22921_v33 }
 0x7c5   :  { %15142 = vmatpush3.bf16.msra.mxu0 %v15806_v1 }
 0x7c6   :  { %15126 = vmatpush3.bf16.msra.mxu1 %v15805_v2  ;;  %15143 = vmatprep.subr.bf16.mxu0 %v22921_v33 }
 0x7c7   :  { %15127 = vmatprep.subr.bf16.mxu1 %v22921_v33 }
 0x7c9   :  { %15144 = vmatpush3.bf16.msra.mxu0 %v15808_v50 }
 0x7ca   :  { %15128 = vmatpush3.bf16.msra.mxu1 %v15807_v41  ;;  %15145 = vmatprep.subr.bf16.mxu0 %v22921_v33 }
 0x7cb   :  { %15153 = vmatprep.subr.bf16.mxu1 %v22921_v33 }
 0x7cd   :  { %15146 = vmatpush3.bf16.msra.mxu0 %v15809_v0 }
 0x7ce   :  { %15147 = vmatprep.subr.bf16.mxu0 %v22921_v33 }
 0x7d1   :  { %15148 = vmatpush3.bf16.msra.mxu0 %v15811_v44 }
 0x7d2   :  { %15173 = vmatprep.subr.bf16.mxu0 %v22921_v33 }
 0x834   :  { %v9057_v43 = vpop.f32.mrf.mxu0 }
 0x836   :  { %v15015_v18 = vpop.f32.mrf.mxu0 }
 0x838   :  { %v9060_v30 = vpop.f32.mrf.mxu0 }
 0x83a   :  { %v15016_v57 = vpop.f32.mrf.mxu0 }
 0x83c   :  { %v9127_v14 = vpop.f32.mrf.mxu1 }
 0x83d   :  { %v9128_v31 = vadd.f32 %v9127_v14, %v9057_v43 }
 0x83e   :  { %v15027_v61 = vpop.f32.mrf.mxu1 }
 0x840   :  { %v9130_v56 = vpop.f32.mrf.mxu1 }
 0x841   :  { %v9131_v34 = vadd.f32 %v9130_v56, %v9060_v30 }
 0x842   :  { %v15028_v48 = vpop.f32.mrf.mxu1 }
 0x844   :  { %v9205_v35 = vpop.f32.mrf.mxu0 }
 0x845   :  { %v9212_v53 = vadd.f32 %v9205_v35, %v9128_v31 }
 0x846   :  { %v15039_v39 = vpop.f32.mrf.mxu0 }
 0x848   :  { %v9208_v11 = vpop.f32.mrf.mxu0 }
 0x849   :  { %v9213_v58 = vadd.f32 %v9208_v11, %v9131_v34 }
 0x84a   :  { %v15040_v42 = vpop.f32.mrf.mxu0 }
 0x84c   :  { %v9283_v10 = vpop.f32.mrf.mxu1 }
 0x84d   :  { %v9290_v21 = vadd.f32 %v9283_v10, %v9212_v53 }
 0x84e   :  { %v15051_v55 = vpop.f32.mrf.mxu1 }
 0x850   :  { %v9286_v16 = vpop.f32.mrf.mxu1 }
 0x851   :  { %v9291_v52 = vadd.f32 %v9286_v16, %v9213_v58 }
 0x852   :  { %v15052_v62 = vpop.f32.mrf.mxu1 }
 0x854   :  { %v9361_v3 = vpop.f32.mrf.mxu0 }
 0x855   :  { %v9368_v24 = vadd.f32 %v9361_v3, %v9290_v21 }
 0x856   :  { %v15063_v25 = vpop.f32.mrf.mxu0 }
 0x858   :  { %v9364_v12 = vpop.f32.mrf.mxu0 }
 0x859   :  { %v9369_v23 = vadd.f32 %v9364_v12, %v9291_v52  ;;  %v9690_v12 = vld [vmem:[#allocation5 + $0x8] sm:$0x1]  ;;  %v15810_v52 = vld [vmem:[#allocation2 + $0x428] sm:$0xff]  }
 0x85a   :  { %v15064_v7 = vpop.f32.mrf.mxu0 }
 0x85c   :  { %v9439_v51 = vpop.f32.mrf.mxu1 }
 0x85d   :  { %v9446_v46 = vadd.f32 %v9439_v51, %v9368_v24 }
 0x85e   :  { %v15075_v4 = vpop.f32.mrf.mxu1 }
 0x85f   :  { %v9691_v4 = vld [vmem:[#allocation5 + $0x9] sm:$0x1] }
 0x860   :  { %v9442_v29 = vpop.f32.mrf.mxu1 }
 0x861   :  { %v9447_v27 = vadd.f32 %v9442_v29, %v9369_v23 }
 0x862   :  { %v15076_v6 = vpop.f32.mrf.mxu1 }
 0x863   :  { %v22924_v6 = vld [vmem:[#allocation28_spill] sm:$0xff] }
 0x864   :  { %v9521_v28 = vpop.f32.mrf.mxu0 }
 0x865   :  { %v9528_v22 = vadd.f32 %v9521_v28, %v9446_v46 }
 0x866   :  { %v15087_v40 = vpop.f32.mrf.mxu0 }
 0x868   :  { %v9524_v32 = vpop.f32.mrf.mxu0 }
 0x869   :  { %v9529_v8 = vadd.f32 %v9524_v32, %v9447_v27  ;;  %v15812_v27 = vld [vmem:[#allocation2 + $0x420] sm:$0xff]  }
 0x86a   :  { %v15088_v26 = vpop.f32.mrf.mxu0 }
 0x86c   :  { %v9601_v63 = vpop.f32.mrf.mxu1 }
 0x86d   :  { %v9608_v17 = vadd.f32 %v9601_v63, %v9528_v22 }
 0x86e   :  { %v15099_v37 = vpop.f32.mrf.mxu1 }
 0x870   :  { %v9604_v13 = vpop.f32.mrf.mxu1 }
 0x871   :  { %v9609_v45 = vadd.f32 %v9604_v13, %v9529_v8  ;;  %v15813_v8 = vld [vmem:[#allocation2 + $0x418] sm:$0xff]  }
 0x872   :  { %v15100_v15 = vpop.f32.mrf.mxu1 }
 0x874   :  { %v9681_v9 = vpop.f32.mrf.mxu0 }
 0x875   :  { %v9688_v60 = vadd.f32 %v9681_v9, %v9608_v17  ;;  %v15814_v17 = vld [vmem:[#allocation2 + $0x468] sm:$0xff]  }
 0x876   :  { %v15111_v49 = vpop.f32.mrf.mxu0 }
 0x877   :  { %v9700_v41 = vmul.f32 %v9688_v60, %v9688_v60 }
 0x878   :  { %v9684_v54 = vpop.f32.mrf.mxu0 }
 0x879   :  { %v9689_v2 = vadd.f32 %v9684_v54, %v9609_v45  ;;  %v15815_v45 = vld [vmem:[#allocation2 + $0x410] sm:$0xff]  }
 0x87a   :  { %v15112_v1 = vpop.f32.mrf.mxu0 }
 0x87b   :  { %v9692_v50 = vadd.f32 %v9689_v2, %v9688_v60  ;;  %v9701_v0 = vmul.f32 %v9689_v2, %v9689_v2  ;;  %v15817_v1 = vld [vmem:[#allocation2 + $0x408] sm:$0xff]  }
 0x87d   :  { %v9693_v43 = vrot.slane %v9692_v50, 4  ;;  %v9702_v44 = vadd.f32 %v9701_v0, %v9700_v41  ;;  %v15818_v41 = vld [vmem:[#allocation2 + $0x458] sm:$0xff]   ;;  %v15820_v0 = vld [vmem:[#allocation2 + $0x450] sm:$0xff]  }
 0x87f   :  { %v9694_v18 = vadd.f32 %v9693_v43, %v9692_v50  ;;  %v9703_v30 = vrot.slane %v9702_v44, 4 }
 0x881   :  { %v9695_v57 = vrot.slane %v9694_v18, 2  ;;  %v9704_v14 = vadd.f32 %v9703_v30, %v9702_v44  ;;  %v15822_v30 = vld [vmem:[#allocation2 + $0x448] sm:$0xff]  }
 0x883   :  { %v9696_v61 = vadd.f32 %v9695_v57, %v9694_v18  ;;  %v9705_v56 = vrot.slane %v9704_v14, 2  ;;  %v15821_v18 = vld [vmem:[#allocation2 + $0x3f8] sm:$0xff]  }
 0x885   :  { %v9697_v48 = vrot.slane %v9696_v61, 1  ;;  %v9706_v35 = vadd.f32 %v9705_v56, %v9704_v14  ;;  %v15823_v14 = vld [vmem:[#allocation2 + $0x3f0] sm:$0xff]  }
 0x887   :  { %v9698_v39 = vadd.f32 %v9697_v48, %v9696_v61  ;;  %v9707_v11 = vrot.slane %v9706_v35, 1  ;;  %v15824_v61 = vld [vmem:[#allocation2 + $0x440] sm:$0xff]   ;;  %v15825_v48 = vld [vmem:[#allocation2 + $0x438] sm:$0xff]  }
 0x889   :  { %v9699_v42 = vmul.f32 0.0625, %v9698_v39  ;;  %v9708_v10 = vadd.f32 %v9707_v11, %v9706_v35  ;;  %v15826_v35 = vld [vmem:[#allocation2 + $0x4a8] sm:$0xff]   ;;  %v15827_v39 = vld [vmem:[#allocation2 + $0x430] sm:$0xff]   ;;  %v15828_v11 = vld [vmem:[#allocation2 + $0x4a0] sm:$0xff]  }
 0x88b   :  { %v9709_v55 = vmul.f32 0.0625, %v9708_v10  ;;  %v9710_v16 = vmul.f32 %v9699_v42, %v9699_v42  ;;  %v15830_v10 = vld [vmem:[#allocation2 + $0x4e8] sm:$0xff]  }
 0x88d   :  { %v9711_v62 = vsub.f32 %v9709_v55, %v9710_v16  ;;  %v15832_v55 = vld [vmem:[#allocation2 + $0x4e0] sm:$0xff]   ;;  %v15833_v16 = vld [vmem:[#allocation2 + $0x488] sm:$0xff]  }
 0x88f   :  { %v9712_v3 = vmax.f32 %v9711_v62, 0.0  ;;  %v15834_v62 = vld [vmem:[#allocation2 + $0x4d8] sm:$0xff]  }
 0x891   :  { %v9713_v25 = vadd.f32 1e-05, %v9712_v3  ;;  %v15835_v3 = vld [vmem:[#allocation2 + $0x480] sm:$0xff]  }
 0x893   :  { %16019 = vrsqrt.f32 %v9713_v25  ;;  %v15836_v25 = vld [vmem:[#allocation2 + $0x4d0] sm:$0xff]  }
 0x8a0   :  { %v16020_v7 = vpop.eup %16019 }
 0x8a1   :  { %v9715_v51 = vmul.f32 %v16020_v7, %v9690_v12  ;;  %v15837_v12 = vld [vmem:[#allocation2 + $0x478] sm:$0xff]   ;;  %v15838_v7 = vld [vmem:[#allocation2 + $0x4c8] sm:$0xff]  }
 0x8a3   :  { %v9716_v29 = vmul.f32 %v9715_v51, %v9699_v42  ;;  %v9721_v28 = vrot.slane %v9715_v51, %v22924_v6  ;;  %v15829_v42 = vld [vmem:[#allocation2 + $0x498] sm:$0xff]   ;;  %v15839_v51 = vld [vmem:[#allocation2 + $0x470] sm:$0xff]  }
 0x8a5   :  { %v9717_v40 = vsub.f32 %v9691_v4, %v9716_v29  ;;  %v9722_v32 = vmul.f32 %v9721_v28, %v9688_v60  ;;  %v9723_v31 = vmul.f32 %v9721_v28, %v9689_v2  ;;  %v15816_v60 = vld [vmem:[#allocation2 + $0x460] sm:$0xff]   ;;  %v15841_v29 = vld [vmem:[#allocation2 + $0x4b8] sm:$0xff]   ;;  %v15842_v28 = vld [vmem:[#allocation2 + $0x528] sm:$0xff]  }
 0x8a6   :  { %v15840_v4 = vld [vmem:[#allocation2 + $0x4c0] sm:$0xff]  }
 0x8a7   :  { %v9727_v26 = vrot.slane %v9717_v40, %v22924_v6  ;;  %v15843_v40 = vld [vmem:[#allocation2 + $0x4b0] sm:$0xff]  }
 0x8a9   :  { %v9728_v34 = vadd.f32 %v9727_v26, %v9722_v32  ;;  %v9729_v53 = vadd.f32 %v9727_v26, %v9723_v31  ;;  %v15844_v32 = vld [vmem:[#allocation2 + $0x520] sm:$0xff]   ;;  %v15845_v31 = vld [vmem:[#allocation2 + $0x518] sm:$0xff]   ;;  %v15846_v26 = vld [vmem:[#allocation2 + $0x568] sm:$0xff]  }
 0x8ab   :  { %v9730_v63 = vmax.f32 %v9728_v34, 0.0  ;;  %v9731_v58 = vmax.f32 %v9729_v53, 0.0  ;;  %v15847_v34 = vld [vmem:[#allocation2 + $0x510] sm:$0xff]   ;;  %v15848_v53 = vld [vmem:[#allocation2 + $0x560] sm:$0xff]  }
 0x8ad   :  { %v21448_v21 = vpack.c.bf16 %v9731_v58, %v9730_v63  ;;  %v15849_v63 = vld [vmem:[#allocation2 + $0x508] sm:$0xff]   ;;  %v15850_v58 = vld [vmem:[#allocation2 + $0x558] sm:$0xff]  }
 0x8af   :  { %v9786_v37 = vrot.slane %v21448_v21, 6  ;;  %v9734_v24 = vsel %vm8958_vm4, %v21448_v21, 0  ;;  %v9733_v54 = vsel %vm8936_vm5, %v21448_v21, 0 }
 0x8b0   :  { %v9736_v13 = vshrl.u32 %v9734_v24, 16  ;;  %v9739_v15 = vshll.u32 %v9734_v24, 16  ;;  %v9747_v2 = vshll.u32 %v9733_v54, 16  ;;  %v9745_v43 = vshrl.u32 %v9733_v54, 16  ;;  %v15853_v24 = vld [vmem:[#allocation2 + $0x4f8] sm:$0xff]   ;;  %v15864_v54 = vld [vmem:[#allocation2 + $0x580] sm:$0xff]  }
 0x8b1   :  { %v9787_v23 = vsel %vm8992_vm11, %v21335_v47, %v9786_v37  ;;  %v15851_v37 = vld [vmem:[#allocation2 + $0x500] sm:$0xff]  }
 0x8b2   :  { %15130 = vmatmul.mubr.bf16.vlgmr.msra.gmra.mxu1 %v9787_v23  ;;  %v9738_v46 = vrot.slane %v9736_v13, 7  ;;  %v9749_v50 = vrot.slane %v9747_v2, 1  ;;  %v15854_v13 = vld [vmem:[#allocation2 + $0x548] sm:$0xff]   ;;  %v15855_v23 = vld [vmem:[#allocation2 + $0x4f0] sm:$0xff]   ;;  %v15865_v2 = vld [vmem:[#allocation2 + $0x578] sm:$0xff]  }
 0x8b3   :  { %15154 = vmatpush3.bf16.msra.mxu1 %v15810_v52  ;;  %15169 = vmatprep.mubr.msk.bf16.mxu1 %vm16106_vm15, %v22921_v33  ;;  %v15852_v52 = vld [vmem:[#allocation2 + $0x550] sm:$0xff]  }
 0x8b4   :  { %15155 = vmatprep.subr.bf16.mxu1 %v22921_v33  ;;  %v9741_v22 = vor.u32 %v9739_v15, %v9738_v46  ;;  %v9750_v44 = vor.u32 %v9749_v50, %v9745_v43  ;;  %v15856_v46 = vld [vmem:[#allocation2 + $0x540] sm:$0xff]  }
 0x8b6   :  { %v21461_v9 = vsel %vm1311_vm9, %v22922_v5, %v9741_v22  ;;  %v21482_v57 = vsel %vm1679_vm1, %v9750_v44, %v22923_v19  ;;  %v15858_v22 = vld [vmem:[#allocation2 + $0x5a8] sm:$0xff]  }
 0x8b7   :  { %15156 = vmatpush3.bf16.msra.mxu1 %v15812_v27  ;;  %v9878_v36 = vrot.slane %v21461_v9, 6  ;;  %v9986_v56 = vrot.slane %v21482_v57, 6  ;;  %v10417_v15 = vrot.slane %v21461_v9, 2  ;;  %v15857_v27 = vld [vmem:[#allocation2 + $0x538] sm:$0xff]  }
 0x8b8   :  { %15157 = vmatprep.subr.bf16.mxu1 %v22921_v33 }
 0x8b9   :  { %v9879_v49 = vsel %vm8992_vm11, %v21335_v47, %v9878_v36  ;;  %v9987_v19 = vsel %vm8992_vm11, %v21335_v47, %v9986_v56  ;;  %v15831_v47 = vld [vmem:[#allocation2 + $0x490] sm:$0xff]   ;;  %v10418_v36 = vsel %vm9456_vm3, %v10417_v15, %v21403_v20  ;;  %v15882_v15 = vld [vmem:[#allocation2 + $0x5b8] sm:$0xff]  }
 0x8ba   :  { %15150 = vmatmul.mubr.bf16.vlgmr.msra.gmra.mxu0 %v9879_v49  ;;  %v15861_v49 = vld [vmem:[#allocation2 + $0x598] sm:$0xff]  }
 0x8bb   :  { %15158 = vmatpush3.bf16.msra.mxu1 %v15813_v8  ;;  %15174 = vmatpush3.bf16.msra.mxu0 %v15814_v17  ;;  %v15859_v8 = vld [vmem:[#allocation2 + $0x530] sm:$0xff]   ;;  %v15860_v17 = vld [vmem:[#allocation2 + $0x5a0] sm:$0xff]  }
 0x8bc   :  { %15159 = vmatprep.subr.bf16.mxu1 %v22921_v33  ;;  %15175 = vmatprep.subr.bf16.mxu0 %v22921_v33 }
 0x8bd   :  { %15189 = vmatprep.mubr.msk.bf16.mxu0 %vm16106_vm15, %v22921_v33 }
 0x8bf   :  { %15160 = vmatpush3.bf16.msra.mxu1 %v15815_v45  ;;  %15176 = vmatpush3.bf16.msra.mxu0 %v15816_v60  ;;  %v15862_v60 = vld [vmem:[#allocation2 + $0x590] sm:$0xff]  }
 0x8c0   :  { %15161 = vmatprep.subr.bf16.mxu1 %v22921_v33  ;;  %15177 = vmatprep.subr.bf16.mxu0 %v22921_v33 }
 0x8c3   :  { %15162 = vmatpush3.bf16.msra.mxu1 %v15817_v1  ;;  %15178 = vmatpush3.bf16.msra.mxu0 %v15818_v41  ;;  %v15866_v1 = vld [vmem:[#allocation2 + $0x570] sm:$0xff]   ;;  %v10637_v41 = vrot.slane %v21482_v57, 2 }
 0x8c4   :  { %15163 = vmatprep.subr.bf16.mxu1 %v22921_v33  ;;  %15179 = vmatprep.subr.bf16.mxu0 %v22921_v33 }
 0x8c5   :  { %v10638_v50 = vsel %vm9456_vm3, %v10637_v41, %v21403_v20 }
 0x8c7   :  { %15164 = vmatpush3.bf16.msra.mxu1 %v15819_v59  ;;  %15180 = vmatpush3.bf16.msra.mxu0 %v15820_v0 }
 0x8c8   :  { %15165 = vmatprep.subr.bf16.mxu1 %v22921_v33  ;;  %15181 = vmatprep.subr.bf16.mxu0 %v22921_v33 }
 0x8cb   :  { %15166 = vmatpush3.bf16.msra.mxu1 %v15821_v18  ;;  %15182 = vmatpush3.bf16.msra.mxu0 %v15822_v30 }
 0x8cc   :  { %15167 = vmatprep.subr.bf16.mxu1 %v22921_v33  ;;  %15183 = vmatprep.subr.bf16.mxu0 %v22921_v33 }
 0x8cf   :  { %15168 = vmatpush3.bf16.msra.mxu1 %v15823_v14  ;;  %15184 = vmatpush3.bf16.msra.mxu0 %v15824_v61 }
 0x8d0   :  { %15185 = vmatprep.subr.bf16.mxu0 %v22921_v33  ;;  %15193 = vmatprep.subr.bf16.mxu1 %v22921_v33 }
 0x8d2   :  { %15170 = vmatmul.mubr.bf16.vlgmr.msra.gmra.mxu1 %v9987_v19 }
 0x8d3   :  { %15186 = vmatpush3.bf16.msra.mxu0 %v15825_v48  ;;  %15194 = vmatpush3.bf16.msra.mxu1 %v15826_v35 }
 0x8d4   :  { %15187 = vmatprep.subr.bf16.mxu0 %v22921_v33  ;;  %15195 = vmatprep.subr.bf16.mxu1 %v22921_v33 }
 0x8d5   :  { %15209 = vmatprep.mubr.msk.bf16.mxu1 %vm16106_vm15, %v22921_v33 }
 0x8d7   :  { %15188 = vmatpush3.bf16.msra.mxu0 %v15827_v39  ;;  %15196 = vmatpush3.bf16.msra.mxu1 %v15828_v11 }
 0x8d8   :  { %15197 = vmatprep.subr.bf16.mxu1 %v22921_v33  ;;  %15213 = vmatprep.subr.bf16.mxu0 %v22921_v33 }
 0x8da   :  { %15190 = vmatmul.mubr.bf16.vlgmr.msra.gmra.mxu0 %v21461_v9  ;;  %v10527_v9 = vrot.slane %v21448_v21, 2 }
 0x8db   :  { %15198 = vmatpush3.bf16.msra.mxu1 %v15829_v42  ;;  %15214 = vmatpush3.bf16.msra.mxu0 %v15830_v10 }
 0x8dc   :  { %15199 = vmatprep.subr.bf16.mxu1 %v22921_v33  ;;  %15215 = vmatprep.subr.bf16.mxu0 %v22921_v33  ;;  %v10528_v45 = vsel %vm9456_vm3, %v10527_v9, %v21403_v20 }
 0x8dd   :  { %15229 = vmatprep.mubr.msk.bf16.mxu0 %vm16106_vm15, %v22921_v33 }
 0x8df   :  { %15200 = vmatpush3.bf16.msra.mxu1 %v15831_v47  ;;  %15216 = vmatpush3.bf16.msra.mxu0 %v15832_v55 }
 0x8e0   :  { %15201 = vmatprep.subr.bf16.mxu1 %v22921_v33  ;;  %15217 = vmatprep.subr.bf16.mxu0 %v22921_v33 }
 0x8e3   :  { %15202 = vmatpush3.bf16.msra.mxu1 %v15833_v16  ;;  %15218 = vmatpush3.bf16.msra.mxu0 %v15834_v62 }
 0x8e4   :  { %15203 = vmatprep.subr.bf16.mxu1 %v22921_v33  ;;  %15219 = vmatprep.subr.bf16.mxu0 %v22921_v33 }
 0x8e7   :  { %15204 = vmatpush3.bf16.msra.mxu1 %v15835_v3  ;;  %15220 = vmatpush3.bf16.msra.mxu0 %v15836_v25  ;;  %v15867_v3 = vld [vmem:[#allocation2 + $0x628] sm:$0xff]   ;;  %v15868_v25 = vld [vmem:[#allocation2 + $0x620] sm:$0xff]  }
 0x8e8   :  { %15205 = vmatprep.subr.bf16.mxu1 %v22921_v33  ;;  %15221 = vmatprep.subr.bf16.mxu0 %v22921_v33 }
 0x8eb   :  { %15206 = vmatpush3.bf16.msra.mxu1 %v15837_v12  ;;  %15222 = vmatpush3.bf16.msra.mxu0 %v15838_v7  ;;  %v15869_v12 = vld [vmem:[#allocation2 + $0x618] sm:$0xff]   ;;  %v15870_v7 = vld [vmem:[#allocation2 + $0x5e8] sm:$0xff]  }
 0x8ec   :  { %15207 = vmatprep.subr.bf16.mxu1 %v22921_v33  ;;  %15223 = vmatprep.subr.bf16.mxu0 %v22921_v33 }
 0x8ef   :  { %15208 = vmatpush3.bf16.msra.mxu1 %v15839_v51  ;;  %15224 = vmatpush3.bf16.msra.mxu0 %v15840_v4  ;;  %v15871_v51 = vld [vmem:[#allocation2 + $0x610] sm:$0xff]  }
 0x8f0   :  { %15225 = vmatprep.subr.bf16.mxu0 %v22921_v33  ;;  %15233 = vmatprep.subr.bf16.mxu1 %v22921_v33 }
 0x8f2   :  { %15210 = vmatmul.mubr.bf16.vlgmr.msra.gmra.mxu1 %v21448_v21  ;;  %v15863_v21 = vld [vmem:[#allocation2 + $0x588] sm:$0xff]  }
 0x8f3   :  { %15226 = vmatpush3.bf16.msra.mxu0 %v15841_v29  ;;  %15234 = vmatpush3.bf16.msra.mxu1 %v15842_v28  ;;  %v15872_v29 = vld [vmem:[#allocation2 + $0x5e0] sm:$0xff]  }
 0x8f4   :  { %15227 = vmatprep.subr.bf16.mxu0 %v22921_v33  ;;  %15235 = vmatprep.subr.bf16.mxu1 %v22921_v33 }
 0x8f5   :  { %15249 = vmatprep.mubr.msk.bf16.mxu1 %vm16106_vm15, %v22921_v33 }
 0x8f7   :  { %15228 = vmatpush3.bf16.msra.mxu0 %v15843_v40  ;;  %15236 = vmatpush3.bf16.msra.mxu1 %v15844_v32  ;;  %v15873_v40 = vld [vmem:[#allocation2 + $0x608] sm:$0xff]  }
 0x8f8   :  { %15237 = vmatprep.subr.bf16.mxu1 %v22921_v33  ;;  %15253 = vmatprep.subr.bf16.mxu0 %v22921_v33 }
 0x8fa   :  { %15230 = vmatmul.mubr.bf16.vlgmr.msra.gmra.mxu0 %v21482_v57 }
 0x8fb   :  { %15238 = vmatpush3.bf16.msra.mxu1 %v15845_v31  ;;  %15254 = vmatpush3.bf16.msra.mxu0 %v15846_v26  ;;  %v15874_v31 = vld [vmem:[#allocation2 + $0x5d8] sm:$0xff]  }
 0x8fc   :  { %15239 = vmatprep.subr.bf16.mxu1 %v22921_v33  ;;  %15255 = vmatprep.subr.bf16.mxu0 %v22921_v33 }
 0x8fd   :  { %15269 = vmatprep.mubr.msk.bf16.mxu0 %vm16106_vm15, %v22921_v33 }
 0x8ff   :  { %15240 = vmatpush3.bf16.msra.mxu1 %v15847_v34  ;;  %15256 = vmatpush3.bf16.msra.mxu0 %v15848_v53  ;;  %v15875_v34 = vld [vmem:[#allocation2 + $0x600] sm:$0xff]  }
 0x900   :  { %15241 = vmatprep.subr.bf16.mxu1 %v22921_v33  ;;  %15257 = vmatprep.subr.bf16.mxu0 %v22921_v33 }
 0x903   :  { %15242 = vmatpush3.bf16.msra.mxu1 %v15849_v63  ;;  %15258 = vmatpush3.bf16.msra.mxu0 %v15850_v58  ;;  %v15876_v63 = vld [vmem:[#allocation2 + $0x5d0] sm:$0xff]   ;;  %v15877_v58 = vld [vmem:[#allocation2 + $0x5f8] sm:$0xff]  }
 0x904   :  { %15243 = vmatprep.subr.bf16.mxu1 %v22921_v33  ;;  %15259 = vmatprep.subr.bf16.mxu0 %v22921_v33 }
 0x907   :  { %15244 = vmatpush3.bf16.msra.mxu1 %v15851_v37  ;;  %15260 = vmatpush3.bf16.msra.mxu0 %v15852_v52  ;;  %v15878_v52 = vld [vmem:[#allocation2 + $0x5c8] sm:$0xff]  }
 0x908   :  { %15245 = vmatprep.subr.bf16.mxu1 %v22921_v33  ;;  %15261 = vmatprep.subr.bf16.mxu0 %v22921_v33 }
 0x90b   :  { %15246 = vmatpush3.bf16.msra.mxu1 %v15853_v24  ;;  %15262 = vmatpush3.bf16.msra.mxu0 %v15854_v13  ;;  %v15879_v13 = vld [vmem:[#allocation2 + $0x5f0] sm:$0xff]  }
 0x90c   :  { %15247 = vmatprep.subr.bf16.mxu1 %v22921_v33  ;;  %15263 = vmatprep.subr.bf16.mxu0 %v22921_v33 }
 0x90f   :  { %15248 = vmatpush3.bf16.msra.mxu1 %v15855_v23  ;;  %15264 = vmatpush3.bf16.msra.mxu0 %v15856_v46  ;;  %v15880_v46 = vld [vmem:[#allocation2 + $0x5c0] sm:$0xff]  }
 0x910   :  { %15265 = vmatprep.subr.bf16.mxu0 %v22921_v33  ;;  %15273 = vmatprep.subr.bf16.mxu1 %v22921_v33 }
 0x912   :  { %15250 = vmatmul.mubr.bf16.vlgmr.msra.gmra.mxu1 %v10418_v36 }
 0x913   :  { %15266 = vmatpush3.bf16.msra.mxu0 %v15857_v27  ;;  %15274 = vmatpush3.bf16.msra.mxu1 %v15858_v22  ;;  %v15884_v27 = vld [vmem:[#allocation2 + $0x5b0] sm:$0xff]  }
 0x914   :  { %15267 = vmatprep.subr.bf16.mxu0 %v22921_v33  ;;  %15275 = vmatprep.subr.bf16.mxu1 %v22921_v33 }
 0x915   :  { %15289 = vmatprep.mubr.msk.bf16.mxu1 %vm16106_vm15, %v22921_v33 }
 0x917   :  { %15268 = vmatpush3.bf16.msra.mxu0 %v15859_v8  ;;  %15276 = vmatpush3.bf16.msra.mxu1 %v15860_v17 }
 0x918   :  { %15277 = vmatprep.subr.bf16.mxu1 %v22921_v33  ;;  %15293 = vmatprep.subr.bf16.mxu0 %v22921_v33 }
 0x91a   :  { %15270 = vmatmul.mubr.bf16.vlgmr.msra.gmra.mxu0 %v10528_v45 }
 0x91b   :  { %15278 = vmatpush3.bf16.msra.mxu1 %v15861_v49  ;;  %15309 = vmatprep.mubr.msk.bf16.mxu0 %vm16106_vm15, %v22921_v33 }
 0x91c   :  { %15279 = vmatprep.subr.bf16.mxu1 %v22921_v33  ;;  %15294 = vmatpush3.bf16.msra.mxu0 %v15867_v3 }
 0x91d   :  { %15295 = vmatprep.subr.bf16.mxu0 %v22921_v33 }
 0x91f   :  { %15280 = vmatpush3.bf16.msra.mxu1 %v15862_v60 }
 0x920   :  { %15281 = vmatprep.subr.bf16.mxu1 %v22921_v33  ;;  %15296 = vmatpush3.bf16.msra.mxu0 %v15868_v25 }
 0x921   :  { %15297 = vmatprep.subr.bf16.mxu0 %v22921_v33 }
 0x923   :  { %15282 = vmatpush3.bf16.msra.mxu1 %v15863_v21 }
 0x924   :  { %15283 = vmatprep.subr.bf16.mxu1 %v22921_v33  ;;  %15298 = vmatpush3.bf16.msra.mxu0 %v15869_v12 }
 0x925   :  { %15299 = vmatprep.subr.bf16.mxu0 %v22921_v33 }
 0x927   :  { %15284 = vmatpush3.bf16.msra.mxu1 %v15864_v54 }
 0x928   :  { %15285 = vmatprep.subr.bf16.mxu1 %v22921_v33  ;;  %15300 = vmatpush3.bf16.msra.mxu0 %v15871_v51 }
 0x929   :  { %15301 = vmatprep.subr.bf16.mxu0 %v22921_v33 }
 0x92b   :  { %15286 = vmatpush3.bf16.msra.mxu1 %v15865_v2 }
 0x92c   :  { %15287 = vmatprep.subr.bf16.mxu1 %v22921_v33  ;;  %15302 = vmatpush3.bf16.msra.mxu0 %v15873_v40  ;;  %v10731_v40 = vld [vmem:[#allocation5 + $0xa] sm:$0x1] }
 0x92d   :  { %15303 = vmatprep.subr.bf16.mxu0 %v22921_v33 }
 0x92f   :  { %15288 = vmatpush3.bf16.msra.mxu1 %v15866_v1 }
 0x930   :  { %15313 = vmatprep.subr.bf16.mxu1 %v22921_v33  ;;  %15304 = vmatpush3.bf16.msra.mxu0 %v15875_v34 }
 0x931   :  { %15305 = vmatprep.subr.bf16.mxu0 %v22921_v33 }
 0x932   :  { %15290 = vmatmul.mubr.bf16.vlgmr.msra.gmra.mxu1 %v10638_v50 }
 0x933   :  { %15329 = vmatprep.mubr.msk.bf16.mxu1 %vm16106_vm15, %v22921_v33  ;;  %15314 = vmatpush3.bf16.msra.mxu1 %v15870_v7 }
 0x934   :  { %15315 = vmatprep.subr.bf16.mxu1 %v22921_v33  ;;  %15306 = vmatpush3.bf16.msra.mxu0 %v15877_v58 }
 0x935   :  { %15307 = vmatprep.subr.bf16.mxu0 %v22921_v33 }
 0x937   :  { %15316 = vmatpush3.bf16.msra.mxu1 %v15872_v29 }
 0x938   :  { %15317 = vmatprep.subr.bf16.mxu1 %v22921_v33  ;;  %15308 = vmatpush3.bf16.msra.mxu0 %v15879_v13 }
 0x939   :  { %15333 = vmatprep.subr.bf16.mxu0 %v22921_v33 }
 0x93b   :  { %15318 = vmatpush3.bf16.msra.mxu1 %v15874_v31 }
 0x93c   :  { %15319 = vmatprep.subr.bf16.mxu1 %v22921_v33 }
 0x93f   :  { %15320 = vmatpush3.bf16.msra.mxu1 %v15876_v63  ;;  %v22925_v63 = vld [vmem:[#allocation15_spill] sm:$0xff] }
 0x940   :  { %15321 = vmatprep.subr.bf16.mxu1 %v22921_v33  ;;  %v10861_v58 = vand.u32 1, %v22925_v63 }
 0x942   :  { %vm10904_vm1 = vcmp.ge.s32.totalorder %v10861_v58, 1  ;;  %vm21589_vm6 = vcmp.lt.s32.totalorder %v10861_v58, 1 }
 0x943   :  { %15322 = vmatpush3.bf16.msra.mxu1 %v15878_v52  ;;  %vm10907_vm0 = vmpackc.low %vm10904_vm1, %vm10904_vm1 }
 0x944   :  { %15323 = vmatprep.subr.bf16.mxu1 %v22921_v33  ;;  %vm10891_vm10 = vmpackc.low %vm21589_vm6, %vm21589_vm6 }
 0x947   :  { %15324 = vmatpush3.bf16.msra.mxu1 %v15880_v46 }
 0x948   :  { %15325 = vmatprep.subr.bf16.mxu1 %v22921_v33 }
 0x94b   :  { %15326 = vmatpush3.bf16.msra.mxu1 %v15882_v15 }
 0x94c   :  { %15327 = vmatprep.subr.bf16.mxu1 %v22921_v33 }
 0x94f   :  { %15328 = vmatpush3.bf16.msra.mxu1 %v15884_v27 }
 0x950   :  { %15353 = vmatprep.subr.bf16.mxu1 %v22921_v33 }
 0x972   :  { %v9871_v59 = vpop.f32.mrf.mxu1 }
 0x974   :  { %v15131_v0 = vpop.f32.mrf.mxu1 }
 0x976   :  { %v9874_v43 = vpop.f32.mrf.mxu1 }
 0x978   :  { %v15132_v44 = vpop.f32.mrf.mxu1 }
 0x97a   :  { %v9963_v18 = vpop.f32.mrf.mxu0 }
 0x97b   :  { %v9964_v30 = vadd.f32 %v9963_v18, %v9871_v59 }
 0x97c   :  { %v15151_v14 = vpop.f32.mrf.mxu0 }
 0x97e   :  { %v9966_v61 = vpop.f32.mrf.mxu0 }
 0x97f   :  { %v9967_v56 = vadd.f32 %v9966_v61, %v9874_v43 }
 0x980   :  { %v15152_v57 = vpop.f32.mrf.mxu0 }
 0x992   :  { %v10071_v48 = vpop.f32.mrf.mxu1 }
 0x993   :  { %v10078_v35 = vadd.f32 %v10071_v48, %v9964_v30 }
 0x994   :  { %v15171_v19 = vpop.f32.mrf.mxu1 }
 0x996   :  { %v10074_v39 = vpop.f32.mrf.mxu1 }
 0x997   :  { %v10079_v11 = vadd.f32 %v10074_v39, %v9967_v56 }
 0x998   :  { %v15172_v20 = vpop.f32.mrf.mxu1 }
 0x99a   :  { %v10178_v42 = vpop.f32.mrf.mxu0 }
 0x99b   :  { %v21559_v10 = vadd.f32 %v10178_v42, %v10078_v35 }
 0x99c   :  { %v15191_v47 = vpop.f32.mrf.mxu0 }
 0x99e   :  { %v10181_v55 = vpop.f32.mrf.mxu0 }
 0x99f   :  { %v21561_v16 = vadd.f32 %v10181_v55, %v10079_v11 }
 0x9a0   :  { %v15192_v62 = vpop.f32.mrf.mxu0 }
 0x9b2   :  { %v10285_v4 = vpop.f32.mrf.mxu1 }
 0x9b3   :  { %v10292_v21 = vadd.f32 %v10285_v4, %v21559_v10 }
 0x9b4   :  { %v15211_v28 = vpop.f32.mrf.mxu1 }
 0x9b6   :  { %v10288_v32 = vpop.f32.mrf.mxu1 }
 0x9b7   :  { %v10293_v54 = vadd.f32 %v10288_v32, %v21561_v16 }
 0x9b8   :  { %v15212_v26 = vpop.f32.mrf.mxu1 }
 0x9b9   :  { %v10732_v26 = vld [vmem:[#allocation5 + $0xb] sm:$0x1] }
 0x9ba   :  { %v10392_v53 = vpop.f32.mrf.mxu0 }
 0x9bb   :  { %v10399_v2 = vadd.f32 %v10392_v53, %v10292_v21 }
 0x9bc   :  { %v15231_v37 = vpop.f32.mrf.mxu0 }
 0x9be   :  { %v10395_v24 = vpop.f32.mrf.mxu0 }
 0x9bf   :  { %v10400_v1 = vadd.f32 %v10395_v24, %v10293_v54 }
 0x9c0   :  { %v15232_v23 = vpop.f32.mrf.mxu0 }
 0x9d2   :  { %v10502_v22 = vpop.f32.mrf.mxu1 }
 0x9d3   :  { %v10509_v41 = vadd.f32 %v10502_v22, %v10399_v2 }
 0x9d4   :  { %v15251_v36 = vpop.f32.mrf.mxu1 }
 0x9d5   :  { %v22926_v36 = vld [vmem:[#allocation22_spill] sm:$0xff] }
 0x9d6   :  { %v10505_v8 = vpop.f32.mrf.mxu1 }
 0x9d7   :  { %v10510_v59 = vadd.f32 %v10505_v8, %v10400_v1 }
 0x9d8   :  { %v15252_v17 = vpop.f32.mrf.mxu1 }
 0x9da   :  { %v10612_v9 = vpop.f32.mrf.mxu0 }
 0x9db   :  { %v10619_v0 = vadd.f32 %v10612_v9, %v10509_v41 }
 0x9dc   :  { %v15271_v49 = vpop.f32.mrf.mxu0 }
 0x9dd   :  { %v10908_v49 = vsel %vm10907_vm0, 65537, %v22920_v38 }
 0x9de   :  { %v10615_v45 = vpop.f32.mrf.mxu0 }
 0x9df   :  { %v10620_v44 = vadd.f32 %v10615_v45, %v10510_v59 }
 0x9e0   :  { %v15272_v60 = vpop.f32.mrf.mxu0 }
 0x9f2   :  { %v10722_v50 = vpop.f32.mrf.mxu1 }
 0x9f3   :  { %v10729_v18 = vadd.f32 %v10722_v50, %v10619_v0 }
 0x9f4   :  { %v15291_v43 = vpop.f32.mrf.mxu1 }
 0x9f5   :  { %v10741_v56 = vmul.f32 %v10729_v18, %v10729_v18 }
 0x9f6   :  { %v10725_v30 = vpop.f32.mrf.mxu1 }
 0x9f7   :  { %v10730_v14 = vadd.f32 %v10725_v30, %v10620_v44 }
 0x9f8   :  { %v15292_v61 = vpop.f32.mrf.mxu1 }
 0x9f9   :  { %v10733_v57 = vadd.f32 %v10730_v14, %v10729_v18  ;;  %v10742_v48 = vmul.f32 %v10730_v14, %v10730_v14 }
 0x9fb   :  { %v10734_v35 = vrot.slane %v10733_v57, 4  ;;  %v10743_v19 = vadd.f32 %v10742_v48, %v10741_v56 }
 0x9fd   :  { %v10735_v39 = vadd.f32 %v10734_v35, %v10733_v57  ;;  %v10744_v11 = vrot.slane %v10743_v19, 4 }
 0x9ff   :  { %v10736_v20 = vrot.slane %v10735_v39, 2  ;;  %v10745_v42 = vadd.f32 %v10744_v11, %v10743_v19  ;;  %v15894_v19 = vld [vmem:[#allocation2 + $0x688] sm:$0xff]  }
 0xa01   :  { %v10737_v10 = vadd.f32 %v10736_v20, %v10735_v39  ;;  %v10746_v47 = vrot.slane %v10745_v42, 2 }
 0xa03   :  { %v10738_v55 = vrot.slane %v10737_v10, 1  ;;  %v10747_v16 = vadd.f32 %v10746_v47, %v10745_v42 }
 0xa05   :  { %v10739_v62 = vadd.f32 %v10738_v55, %v10737_v10  ;;  %v10748_v3 = vrot.slane %v10747_v16, 1 }
 0xa07   :  { %v10740_v25 = vmul.f32 0.0625, %v10739_v62  ;;  %v10749_v12 = vadd.f32 %v10748_v3, %v10747_v16 }
 0xa09   :  { %v10750_v7 = vmul.f32 0.0625, %v10749_v12  ;;  %v10751_v51 = vmul.f32 %v10740_v25, %v10740_v25 }
 0xa0b   :  { %v10752_v4 = vsub.f32 %v10750_v7, %v10751_v51 }
 0xa0d   :  { %v10753_v29 = vmax.f32 %v10752_v4, 0.0 }
 0xa0f   :  { %v10754_v28 = vadd.f32 1e-05, %v10753_v29 }
 0xa11   :  { %16021 = vrsqrt.f32 %v10754_v28 }
 0xa1e   :  { %v16022_v32 = vpop.eup %16021 }
 0xa1f   :  { %v10756_v31 = vmul.f32 %v16022_v32, %v10731_v40  ;;  %v10892_v40 = vsel %vm10891_vm10, 65537, %v22920_v38 }
 0xa21   :  { %v10757_v34 = vmul.f32 %v10756_v31, %v10740_v25  ;;  %v10762_v53 = vrot.slane %v10756_v31, %v22924_v6 }
 0xa23   :  { %v10758_v37 = vsub.f32 %v10732_v26, %v10757_v34  ;;  %v10763_v52 = vmul.f32 %v10762_v53, %v10729_v18  ;;  %v10764_v24 = vmul.f32 %v10762_v53, %v10730_v14  ;;  %v13648_v18 = vcombine.low %v10908_v49, %v10908_v49  ;;  %v15883_v49 = vld [vmem:[#allocation2 + $0x660] sm:$0xff]  }
 0xa24   :  { %v13647_v53 = vcombine.low %v10892_v40, %v10892_v40  ;;  %v15909_v40 = vld [vmem:[#allocation2 + $0x6b8] sm:$0xff]  }
 0xa25   :  { %v10768_v13 = vrot.slane %v10758_v37, %v22924_v6  ;;  %v10914_v47 = vshll.u32 %v13648_v18, 16  ;;  %v10912_v51 = vshrl.u32 %v13648_v18, 16  ;;  %v15889_v18 = vld [vmem:[#allocation2 + $0x648] sm:$0xff]  }
 0xa27   :  { %v10769_v23 = vadd.f32 %v10768_v13, %v10763_v52  ;;  %v10770_v46 = vadd.f32 %v10768_v13, %v10764_v24  ;;  %v10916_v4 = vrot.slane %v10914_v47, 1  ;;  %v10896_v13 = vshrl.u32 %v13647_v53, 16  ;;  %v15898_v47 = vld [vmem:[#allocation2 + $0x678] sm:$0xff]  }
 0xa29   :  { %v10771_v15 = vmax.f32 %v10769_v23, 0.0  ;;  %v10772_v27 = vmax.f32 %v10770_v46, 0.0  ;;  %v21597_v34 = vor.u32 %v10916_v4, %v10912_v51  ;;  %v15905_v51 = vld [vmem:[#allocation2 + $0x6c8] sm:$0xff]   ;;  %v15906_v4 = vld [vmem:[#allocation2 + $0x718] sm:$0xff]  }
 0xa2b   :  { %v10775_v22 = vcombine.high %v10771_v15, %v10771_v15  ;;  %v10782_v8 = vrot.slane %v10771_v15, %v22926_v36  ;;  %v10792_v17 = vcombine.high %v10772_v27, %v10772_v27  ;;  %v10799_v9 = vrot.slane %v10772_v27, %v22926_v36  ;;  %v15881_v15 = vld [vmem:[#allocation2 + $0x668] sm:$0xff]  }
 0xa2c   :  { %vm10918_vm8 = vcmp.ne.s16.totalorder %v21597_v34, 0 }
 0xa2d   :  { %v10789_v45 = vrot.slane %v10775_v22, %v22926_v36  ;;  %v10790_v60 = vcombine.high %v10782_v8, %v10782_v8  ;;  %v10806_v21 = vrot.slane %v10792_v17, %v22926_v36  ;;  %v10807_v54 = vcombine.high %v10799_v9, %v10799_v9 }
 0xa2e   :  { %v13639_v2 = vrot.slane %v10782_v8, 9  ;;  %v13643_v1 = vrot.slane %v10799_v9, 9  ;;  %v10898_v22 = vrot.slane %v10896_v13, 7  ;;  %v10899_v36 = vshll.u32 %v13647_v53, 16  ;;  %v15913_v53 = vld [vmem:[#allocation2 + $0x768] sm:$0xff]  }
 0xa2f   :  { %v10791_v41 = vcombine.high %v10789_v45, %v10789_v45  ;;  %v10808_v50 = vcombine.high %v10806_v21, %v10806_v21  ;;  %v13640_v59 = vrot.slane %v10790_v60, 9  ;;  %v13641_v0 = vrot.slane %v10789_v45, 9  ;;  %v15918_v13 = vld [vmem:[#allocation2 + $0x7a8] sm:$0xff]  }
 0xa30   :  { %v13644_v43 = vrot.slane %v10807_v54, 9  ;;  %v13645_v44 = vrot.slane %v10806_v21, 9  ;;  %v10841_v61 = vmax.f32 %v10782_v8, %v13639_v2  ;;  %v10845_v48 = vmax.f32 %v10799_v9, %v13643_v1 }
 0xa31   :  { %v13642_v30 = vrot.slane %v10791_v41, 9  ;;  %v13646_v14 = vrot.slane %v10808_v50, 9  ;;  %v10843_v56 = vmax.f32 %v10789_v45, %v13641_v0  ;;  %v10842_v57 = vmax.f32 %v10790_v60, %v13640_v59  ;;  %v15887_v59 = vld [vmem:[#allocation2 + $0x650] sm:$0xff]  }
 0xa32   :  { %v10847_v35 = vmax.f32 %v10806_v21, %v13645_v44  ;;  %v10846_v11 = vmax.f32 %v10807_v54, %v13644_v43  ;;  %v21618_v60 = vor.u32 %v10899_v36, %v10898_v22  ;;  %v15885_v54 = vld [vmem:[#allocation2 + $0x658] sm:$0xff]   ;;  %v15888_v43 = vld [vmem:[#allocation2 + $0x6a0] sm:$0xff]   ;;  %v15924_v22 = vld [vmem:[#allocation2 + $0x790] sm:$0xff]  }
 0xa33   :  { %v10844_v39 = vmax.f32 %v10791_v41, %v13642_v30  ;;  %v10848_v20 = vmax.f32 %v10808_v50, %v13646_v14  ;;  %v10849_v42 = vmax.f32 %v10841_v61, %v10843_v56  ;;  %v15886_v41 = vld [vmem:[#allocation2 + $0x6a8] sm:$0xff]   ;;  %v15890_v30 = vld [vmem:[#allocation2 + $0x698] sm:$0xff]   ;;  %v15891_v61 = vld [vmem:[#allocation2 + $0x640] sm:$0xff]  }
 0xa34   :  { %v10851_v10 = vmax.f32 %v10845_v48, %v10847_v35  ;;  %v15892_v56 = vld [vmem:[#allocation2 + $0x690] sm:$0xff]   ;;  %v15893_v35 = vld [vmem:[#allocation2 + $0x638] sm:$0xff]  }
 0xa35   :  { %v10850_v55 = vmax.f32 %v10842_v57, %v10844_v39  ;;  %v10852_v16 = vmax.f32 %v10846_v11, %v10848_v20  ;;  %v10853_v3 = vpack.c.bf16 %v10849_v42, %v10849_v42  ;;  %v15895_v11 = vld [vmem:[#allocation2 + $0x630] sm:$0xff]   ;;  %v15896_v20 = vld [vmem:[#allocation2 + $0x680] sm:$0xff]   ;;  %v15925_v36 = vld [vmem:[#allocation2 + $0x738] sm:$0xff]  }
 0xa36   :  { %v10855_v62 = vpack.c.bf16 %v10851_v10, %v10851_v10  ;;  %v15897_v10 = vld [vmem:[#allocation2 + $0x6e8] sm:$0xff]  }
 0xa37   :  { %v10854_v25 = vpack.c.bf16 %v10850_v55, %v10850_v55  ;;  %v10856_v12 = vpack.c.bf16 %v10852_v16, %v10852_v16  ;;  %v10873_v32 = vunpack.c.l.b16 %v10853_v3  ;;  %v15899_v16 = vld [vmem:[#allocation2 + $0x6e0] sm:$0xff]   ;;  %v15901_v3 = vld [vmem:[#allocation2 + $0x6d8] sm:$0xff]  }
 0xa38   :  { %v10875_v7 = vunpack.c.l.b16 %v10855_v62  ;;  %v15900_v62 = vld [vmem:[#allocation2 + $0x670] sm:$0xff]  }
 0xa39   :  { %v10874_v29 = vunpack.c.l.b16 %v10854_v25  ;;  %v10876_v28 = vunpack.c.l.b16 %v10856_v12  ;;  %v15902_v25 = vld [vmem:[#allocation2 + $0x728] sm:$0xff]   ;;  %v15903_v12 = vld [vmem:[#allocation2 + $0x6d0] sm:$0xff]  }
 0xa3a   :  { %v10879_v26 = vrot.slane %v10875_v7, 6  ;;  %v15904_v7 = vld [vmem:[#allocation2 + $0x720] sm:$0xff]  }
 0xa3b   :  { %v10877_v31 = vrot.slane %v10874_v29, 7  ;;  %v10881_v63 = vrot.slane %v10876_v28, 5  ;;  %v15907_v29 = vld [vmem:[#allocation2 + $0x6c0] sm:$0xff]   ;;  %v15908_v28 = vld [vmem:[#allocation2 + $0x710] sm:$0xff]  }
 0xa3d   :  { %v10878_v58 = vsel %vm5920_vm14, %v10877_v31, %v10873_v32  ;;  %vm10902_vm14 = vcmp.ne.s16.totalorder %v21618_v60, 0  ;;  %v15910_v32 = vld [vmem:[#allocation2 + $0x708] sm:$0xff]   ;;  %v15911_v31 = vld [vmem:[#allocation2 + $0x6b0] sm:$0xff]   ;;  %v15962_v60 = vld [vmem:[#allocation2 + $0x8d8] sm:$0xff]  }
 0xa3e   :  { %v10880_v37 = vsel %vm22929_vm12, %v10879_v26, %v10878_v58  ;;  %v15912_v26 = vld [vmem:[#allocation2 + $0x700] sm:$0xff]  }
 0xa3f   :  { %v10882_v52 = vsel %vm22930_vm13, %v10881_v63, %v10880_v37  ;;  %v15914_v63 = vld [vmem:[#allocation2 + $0x6f8] sm:$0xff]   ;;  %v15915_v58 = vld [vmem:[#allocation2 + $0x760] sm:$0xff]   ;;  %v15916_v37 = vld [vmem:[#allocation2 + $0x6f0] sm:$0xff]  }
 0xa40   :  { %v21602_v24 = vpack.c.b16 %v10882_v52, %v10882_v52  ;;  %v15917_v52 = vld [vmem:[#allocation2 + $0x758] sm:$0xff]  }
 0xa42   :  { %v21607_v38 = vsel %vm8992_vm11, %v21602_v24, 0 }
 0xa43   :  { %v10919_v23 = vsel %vm10918_vm8, %v21607_v38, 0  ;;  %v10976_v46 = vrot.slane %v21607_v38, 7  ;;  %v10903_v0 = vsel %vm10902_vm14, %v21607_v38, 0 }
 0xa44   :  { %v10921_v27 = vshrl.u32 %v10919_v23, 16  ;;  %v10924_v9 = vshll.u32 %v10919_v23, 16  ;;  %v10934_v44 = vshll.u32 %v10903_v0, 16  ;;  %v10932_v57 = vshrl.u32 %v10903_v0, 16  ;;  %v15920_v23 = vld [vmem:[#allocation2 + $0x7a0] sm:$0xff]  }
 0xa45   :  { %v10977_v8 = vsel %vm10974_vm2, %v22922_v5, %v10976_v46  ;;  %v15921_v46 = vld [vmem:[#allocation2 + $0x748] sm:$0xff]   ;;  %v15936_v0 = vld [vmem:[#allocation2 + $0x7c0] sm:$0xff]  }
 0xa46   :  { %15310 = vmatmul.mubr.bf16.vlgmr.msra.gmra.mxu0 %v10977_v8  ;;  %v10923_v17 = vrot.slane %v10921_v27, 7  ;;  %v10936_v14 = vrot.slane %v10934_v44, 1  ;;  %v15923_v27 = vld [vmem:[#allocation2 + $0x740] sm:$0xff]   ;;  %v15926_v8 = vld [vmem:[#allocation2 + $0x788] sm:$0xff]  }
 0xa47   :  { %15334 = vmatpush3.bf16.msra.mxu0 %v15881_v15  ;;  %15349 = vmatprep.mubr.msk.bf16.mxu0 %vm16106_vm15, %v22921_v33  ;;  %v15922_v15 = vld [vmem:[#allocation2 + $0x798] sm:$0xff]  }
 0xa48   :  { %15335 = vmatprep.subr.bf16.mxu0 %v22921_v33  ;;  %v10926_v45 = vor.u32 %v10924_v9, %v10923_v17  ;;  %v21644_v48 = vor.u32 %v10936_v14, %v10932_v57  ;;  %v15927_v17 = vld [vmem:[#allocation2 + $0x730] sm:$0xff]   ;;  %v15928_v9 = vld [vmem:[#allocation2 + $0x780] sm:$0xff]  }
 0xa4a   :  { %v21622_v21 = vsel %vm1311_vm9, %v22922_v5, %v10926_v45  ;;  %v21650_v39 = vsel %vm8992_vm11, %v21644_v48, 0 }
 0xa4b   :  { %15336 = vmatpush3.bf16.msra.mxu0 %v15883_v49  ;;  %v21626_v2 = vsel %vm8992_vm11, %v21622_v21, 0  ;;  %v11176_v42 = vrot.slane %v21650_v39, 7  ;;  %v15929_v49 = vld [vmem:[#allocation2 + $0x7e8] sm:$0xff]   ;;  %v11813_v44 = vrot.slane %v21650_v39, 1  ;;  %v15940_v39 = vld [vmem:[#allocation2 + $0x860] sm:$0xff]  }
 0xa4c   :  { %15337 = vmatprep.subr.bf16.mxu0 %v22921_v33  ;;  %v11068_v1 = vrot.slane %v21626_v2, 7  ;;  %v11599_v45 = vrot.slane %v21626_v2, 1  ;;  %v11706_v2 = vrot.slane %v21607_v38, 1  ;;  %v15937_v38 = vld [vmem:[#allocation2 + $0x7b8] sm:$0xff]  }
 0xa4d   :  { %v11177_v55 = vsel %vm10974_vm2, %v22922_v5, %v11176_v42  ;;  %v15941_v42 = vld [vmem:[#allocation2 + $0x858] sm:$0xff]  }
 0xa4e   :  { %v11069_v50 = vsel %vm10974_vm2, %v22922_v5, %v11068_v1  ;;  %v15932_v1 = vld [vmem:[#allocation2 + $0x770] sm:$0xff]  }
 0xa4f   :  { %15338 = vmatpush3.bf16.msra.mxu0 %v15885_v54  ;;  %15330 = vmatmul.mubr.bf16.vlgmr.msra.gmra.mxu1 %v11069_v50  ;;  %v15931_v54 = vld [vmem:[#allocation2 + $0x7e0] sm:$0xff]   ;;  %v15934_v50 = vld [vmem:[#allocation2 + $0x7d0] sm:$0xff]  }
 0xa50   :  { %15354 = vmatpush3.bf16.msra.mxu1 %v15886_v41  ;;  %15339 = vmatprep.subr.bf16.mxu0 %v22921_v33  ;;  %v15933_v41 = vld [vmem:[#allocation2 + $0x7d8] sm:$0xff]  }
 0xa51   :  { %15355 = vmatprep.subr.bf16.mxu1 %v22921_v33  ;;  %15369 = vmatprep.mubr.msk.bf16.mxu1 %vm16106_vm15, %v22921_v33 }
 0xa53   :  { %15340 = vmatpush3.bf16.msra.mxu0 %v15887_v59  ;;  %v15935_v59 = vld [vmem:[#allocation2 + $0x7c8] sm:$0xff]  }
 0xa54   :  { %15356 = vmatpush3.bf16.msra.mxu1 %v15888_v43  ;;  %15341 = vmatprep.subr.bf16.mxu0 %v22921_v33  ;;  %v15938_v43 = vld [vmem:[#allocation2 + $0x7b0] sm:$0xff]  }
 0xa55   :  { %15357 = vmatprep.subr.bf16.mxu1 %v22921_v33 }
 0xa57   :  { %15342 = vmatpush3.bf16.msra.mxu0 %v15889_v18 }
 0xa58   :  { %15358 = vmatpush3.bf16.msra.mxu1 %v15890_v30  ;;  %15343 = vmatprep.subr.bf16.mxu0 %v22921_v33 }
 0xa59   :  { %15359 = vmatprep.subr.bf16.mxu1 %v22921_v33 }
 0xa5b   :  { %15344 = vmatpush3.bf16.msra.mxu0 %v15891_v61 }
 0xa5c   :  { %15360 = vmatpush3.bf16.msra.mxu1 %v15892_v56  ;;  %15345 = vmatprep.subr.bf16.mxu0 %v22921_v33 }
 0xa5d   :  { %15361 = vmatprep.subr.bf16.mxu1 %v22921_v33 }
 0xa5f   :  { %15346 = vmatpush3.bf16.msra.mxu0 %v15893_v35 }
 0xa60   :  { %15362 = vmatpush3.bf16.msra.mxu1 %v15894_v19  ;;  %15347 = vmatprep.subr.bf16.mxu0 %v22921_v33 }
 0xa61   :  { %15363 = vmatprep.subr.bf16.mxu1 %v22921_v33 }
 0xa63   :  { %15348 = vmatpush3.bf16.msra.mxu0 %v15895_v11  ;;  %v15939_v11 = vld [vmem:[#allocation2 + $0x868] sm:$0xff]  }
 0xa64   :  { %15364 = vmatpush3.bf16.msra.mxu1 %v15896_v20  ;;  %15373 = vmatprep.subr.bf16.mxu0 %v22921_v33 }
 0xa65   :  { %15365 = vmatprep.subr.bf16.mxu1 %v22921_v33 }
 0xa66   :  { %15350 = vmatmul.mubr.bf16.vlgmr.msra.gmra.mxu0 %v11177_v55 }
 0xa67   :  { %15374 = vmatpush3.bf16.msra.mxu0 %v15897_v10  ;;  %15389 = vmatprep.mubr.msk.bf16.mxu0 %vm16106_vm15, %v22921_v33 }
 0xa68   :  { %15366 = vmatpush3.bf16.msra.mxu1 %v15898_v47  ;;  %15375 = vmatprep.subr.bf16.mxu0 %v22921_v33  ;;  %v15942_v47 = vld [vmem:[#allocation2 + $0x828] sm:$0xff]  }
 0xa69   :  { %15367 = vmatprep.subr.bf16.mxu1 %v22921_v33 }
 0xa6b   :  { %15376 = vmatpush3.bf16.msra.mxu0 %v15899_v16 }
 0xa6c   :  { %15368 = vmatpush3.bf16.msra.mxu1 %v15900_v62  ;;  %15377 = vmatprep.subr.bf16.mxu0 %v22921_v33  ;;  %v15943_v62 = vld [vmem:[#allocation2 + $0x850] sm:$0xff]  }
 0xa6d   :  { %15393 = vmatprep.subr.bf16.mxu1 %v22921_v33 }
 0xa6f   :  { %15370 = vmatmul.mubr.msk.bf16.vlgmr.msra.gmra.mxu1 %vm8992_vm11, %v21622_v21  ;;  %15378 = vmatpush3.bf16.msra.mxu0 %v15901_v3  ;;  %v15930_v21 = vld [vmem:[#allocation2 + $0x778] sm:$0xff]   ;;  %v15944_v3 = vld [vmem:[#allocation2 + $0x820] sm:$0xff]  }
 0xa70   :  { %15394 = vmatpush3.bf16.msra.mxu1 %v15902_v25  ;;  %15379 = vmatprep.subr.bf16.mxu0 %v22921_v33 }
 0xa71   :  { %15395 = vmatprep.subr.bf16.mxu1 %v22921_v33  ;;  %15409 = vmatprep.mubr.msk.bf16.mxu1 %vm16106_vm15, %v22921_v33 }
 0xa73   :  { %15380 = vmatpush3.bf16.msra.mxu0 %v15903_v12  ;;  %v15945_v12 = vld [vmem:[#allocation2 + $0x848] sm:$0xff]  }
 0xa74   :  { %15396 = vmatpush3.bf16.msra.mxu1 %v15904_v7  ;;  %15381 = vmatprep.subr.bf16.mxu0 %v22921_v33 }
 0xa75   :  { %15397 = vmatprep.subr.bf16.mxu1 %v22921_v33 }
 0xa77   :  { %15382 = vmatpush3.bf16.msra.mxu0 %v15905_v51  ;;  %v15946_v51 = vld [vmem:[#allocation2 + $0x818] sm:$0xff]  }
 0xa78   :  { %15398 = vmatpush3.bf16.msra.mxu1 %v15906_v4  ;;  %15383 = vmatprep.subr.bf16.mxu0 %v22921_v33 }
 0xa79   :  { %15399 = vmatprep.subr.bf16.mxu1 %v22921_v33 }
 0xa7b   :  { %15384 = vmatpush3.bf16.msra.mxu0 %v15907_v29 }
 0xa7c   :  { %15400 = vmatpush3.bf16.msra.mxu1 %v15908_v28  ;;  %15385 = vmatprep.subr.bf16.mxu0 %v22921_v33  ;;  %v15947_v28 = vld [vmem:[#allocation2 + $0x840] sm:$0xff]  }
 0xa7d   :  { %15401 = vmatprep.subr.bf16.mxu1 %v22921_v33 }
 0xa7f   :  { %15386 = vmatpush3.bf16.msra.mxu0 %v15909_v40 }
 0xa80   :  { %15402 = vmatpush3.bf16.msra.mxu1 %v15910_v32  ;;  %15387 = vmatprep.subr.bf16.mxu0 %v22921_v33  ;;  %v15948_v32 = vld [vmem:[#allocation2 + $0x810] sm:$0xff]  }
 0xa81   :  { %15403 = vmatprep.subr.bf16.mxu1 %v22921_v33 }
 0xa83   :  { %15388 = vmatpush3.bf16.msra.mxu0 %v15911_v31 }
 0xa84   :  { %15404 = vmatpush3.bf16.msra.mxu1 %v15912_v26  ;;  %15413 = vmatprep.subr.bf16.mxu0 %v22921_v33  ;;  %v15949_v26 = vld [vmem:[#allocation2 + $0x838] sm:$0xff]  }
 0xa85   :  { %15405 = vmatprep.subr.bf16.mxu1 %v22921_v33 }
 0xa86   :  { %15390 = vmatmul.mubr.msk.bf16.vlgmr.msra.gmra.mxu0 %vm8992_vm11, %v21602_v24  ;;  %v15919_v24 = vld [vmem:[#allocation2 + $0x750] sm:$0xff]  }
 0xa87   :  { %15414 = vmatpush3.bf16.msra.mxu0 %v15913_v53  ;;  %15429 = vmatprep.mubr.msk.bf16.mxu0 %vm16106_vm15, %v22921_v33  ;;  %v15950_v53 = vld [vmem:[#allocation2 + $0x808] sm:$0xff]  }
 0xa88   :  { %15406 = vmatpush3.bf16.msra.mxu1 %v15914_v63  ;;  %15415 = vmatprep.subr.bf16.mxu0 %v22921_v33  ;;  %v15951_v63 = vld [vmem:[#allocation2 + $0x830] sm:$0xff]  }
 0xa89   :  { %15407 = vmatprep.subr.bf16.mxu1 %v22921_v33 }
 0xa8b   :  { %15416 = vmatpush3.bf16.msra.mxu0 %v15915_v58  ;;  %v15952_v58 = vld [vmem:[#allocation2 + $0x800] sm:$0xff]  }
 0xa8c   :  { %15408 = vmatpush3.bf16.msra.mxu1 %v15916_v37  ;;  %15417 = vmatprep.subr.bf16.mxu0 %v22921_v33  ;;  %v15954_v37 = vld [vmem:[#allocation2 + $0x7f8] sm:$0xff]  }
 0xa8d   :  { %15433 = vmatprep.subr.bf16.mxu1 %v22921_v33 }
 0xa8f   :  { %15410 = vmatmul.mubr.msk.bf16.vlgmr.msra.gmra.mxu1 %vm8992_vm11, %v21644_v48  ;;  %15418 = vmatpush3.bf16.msra.mxu0 %v15917_v52  ;;  %v15956_v52 = vld [vmem:[#allocation2 + $0x7f0] sm:$0xff]  }
 0xa90   :  { %15434 = vmatpush3.bf16.msra.mxu1 %v15918_v13  ;;  %15419 = vmatprep.subr.bf16.mxu0 %v22921_v33 }
 0xa91   :  { %15435 = vmatprep.subr.bf16.mxu1 %v22921_v33  ;;  %15449 = vmatprep.mubr.msk.bf16.mxu1 %vm16106_vm15, %v22921_v33 }
 0xa93   :  { %15420 = vmatpush3.bf16.msra.mxu0 %v15919_v24 }
 0xa94   :  { %15436 = vmatpush3.bf16.msra.mxu1 %v15920_v23  ;;  %15421 = vmatprep.subr.bf16.mxu0 %v22921_v33 }
 0xa95   :  { %15437 = vmatprep.subr.bf16.mxu1 %v22921_v33 }
 0xa97   :  { %15422 = vmatpush3.bf16.msra.mxu0 %v15921_v46 }
 0xa98   :  { %15438 = vmatpush3.bf16.msra.mxu1 %v15922_v15  ;;  %15423 = vmatprep.subr.bf16.mxu0 %v22921_v33 }
 0xa99   :  { %15439 = vmatprep.subr.bf16.mxu1 %v22921_v33 }
 0xa9b   :  { %15424 = vmatpush3.bf16.msra.mxu0 %v15923_v27 }
 0xa9c   :  { %15440 = vmatpush3.bf16.msra.mxu1 %v15924_v22  ;;  %15425 = vmatprep.subr.bf16.mxu0 %v22921_v33 }
 0xa9d   :  { %15441 = vmatprep.subr.bf16.mxu1 %v22921_v33 }
 0xa9f   :  { %15426 = vmatpush3.bf16.msra.mxu0 %v15925_v36 }
 0xaa0   :  { %15442 = vmatpush3.bf16.msra.mxu1 %v15926_v8  ;;  %15427 = vmatprep.subr.bf16.mxu0 %v22921_v33 }
 0xaa1   :  { %15443 = vmatprep.subr.bf16.mxu1 %v22921_v33 }
 0xaa3   :  { %15428 = vmatpush3.bf16.msra.mxu0 %v15927_v17 }
 0xaa4   :  { %15444 = vmatpush3.bf16.msra.mxu1 %v15928_v9  ;;  %15453 = vmatprep.subr.bf16.mxu0 %v22921_v33 }
 0xaa5   :  { %15445 = vmatprep.subr.bf16.mxu1 %v22921_v33 }
 0xaa6   :  { %15430 = vmatmul.mubr.bf16.vlgmr.msra.gmra.mxu0 %v11599_v45 }
 0xaa7   :  { %15454 = vmatpush3.bf16.msra.mxu0 %v15929_v49  ;;  %15469 = vmatprep.mubr.msk.bf16.mxu0 %vm16106_vm15, %v22921_v33 }
 0xaa8   :  { %15446 = vmatpush3.bf16.msra.mxu1 %v15930_v21  ;;  %15455 = vmatprep.subr.bf16.mxu0 %v22921_v33 }
 0xaa9   :  { %15447 = vmatprep.subr.bf16.mxu1 %v22921_v33 }
 0xaab   :  { %15456 = vmatpush3.bf16.msra.mxu0 %v15931_v54 }
 0xaac   :  { %15448 = vmatpush3.bf16.msra.mxu1 %v15932_v1  ;;  %15457 = vmatprep.subr.bf16.mxu0 %v22921_v33 }
 0xaad   :  { %15473 = vmatprep.subr.bf16.mxu1 %v22921_v33 }
 0xaaf   :  { %15450 = vmatmul.mubr.bf16.vlgmr.msra.gmra.mxu1 %v11706_v2  ;;  %15458 = vmatpush3.bf16.msra.mxu0 %v15933_v41 }
 0xab0   :  { %15459 = vmatprep.subr.bf16.mxu0 %v22921_v33  ;;  %15489 = vmatprep.mubr.msk.bf16.mxu1 %vm16106_vm15, %v22921_v33 }
 0xab1   :  { %15474 = vmatpush3.bf16.msra.mxu1 %v15939_v11 }
 0xab2   :  { %15475 = vmatprep.subr.bf16.mxu1 %v22921_v33 }
 0xab3   :  { %15460 = vmatpush3.bf16.msra.mxu0 %v15934_v50 }
 0xab4   :  { %15461 = vmatprep.subr.bf16.mxu0 %v22921_v33 }
 0xab5   :  { %15476 = vmatpush3.bf16.msra.mxu1 %v15940_v39 }
 0xab6   :  { %15477 = vmatprep.subr.bf16.mxu1 %v22921_v33 }
 0xab7   :  { %15462 = vmatpush3.bf16.msra.mxu0 %v15935_v59 }
 0xab8   :  { %15463 = vmatprep.subr.bf16.mxu0 %v22921_v33 }
 0xab9   :  { %15478 = vmatpush3.bf16.msra.mxu1 %v15941_v42 }
 0xaba   :  { %15479 = vmatprep.subr.bf16.mxu1 %v22921_v33 }
 0xabb   :  { %15464 = vmatpush3.bf16.msra.mxu0 %v15936_v0 }
 0xabc   :  { %15465 = vmatprep.subr.bf16.mxu0 %v22921_v33 }
 0xabd   :  { %15480 = vmatpush3.bf16.msra.mxu1 %v15943_v62 }
 0xabe   :  { %15481 = vmatprep.subr.bf16.mxu1 %v22921_v33 }
 0xabf   :  { %15466 = vmatpush3.bf16.msra.mxu0 %v15937_v38 }
 0xac0   :  { %15467 = vmatprep.subr.bf16.mxu0 %v22921_v33 }
 0xac1   :  { %15482 = vmatpush3.bf16.msra.mxu1 %v15945_v12 }
 0xac2   :  { %15483 = vmatprep.subr.bf16.mxu1 %v22921_v33 }
 0xac3   :  { %15468 = vmatpush3.bf16.msra.mxu0 %v15938_v43 }
 0xac4   :  { %15493 = vmatprep.subr.bf16.mxu0 %v22921_v33 }
 0xac5   :  { %15484 = vmatpush3.bf16.msra.mxu1 %v15947_v28  ;;  %v11905_v28 = vld [vmem:[#allocation5 + $0xd] sm:$0x1] }
 0xac6   :  { %15470 = vmatmul.mubr.bf16.vlgmr.msra.gmra.mxu0 %v11813_v44  ;;  %15485 = vmatprep.subr.bf16.mxu1 %v22921_v33 }
 0xac7   :  { %15509 = vmatprep.mubr.msk.bf16.mxu0 %vm16106_vm15, %v22921_v33  ;;  %15494 = vmatpush3.bf16.msra.mxu0 %v15942_v47 }
 0xac8   :  { %15495 = vmatprep.subr.bf16.mxu0 %v22921_v33 }
 0xac9   :  { %15486 = vmatpush3.bf16.msra.mxu1 %v15949_v26 }
 0xaca   :  { %15487 = vmatprep.subr.bf16.mxu1 %v22921_v33 }
 0xacb   :  { %15496 = vmatpush3.bf16.msra.mxu0 %v15944_v3 }
 0xacc   :  { %15497 = vmatprep.subr.bf16.mxu0 %v22921_v33 }
 0xacd   :  { %15488 = vmatpush3.bf16.msra.mxu1 %v15951_v63 }
 0xace   :  { %15513 = vmatprep.subr.bf16.mxu1 %v22921_v33 }
 0xacf   :  { %15498 = vmatpush3.bf16.msra.mxu0 %v15946_v51  ;;  %v11904_v51 = vld [vmem:[#allocation5 + $0xc] sm:$0x1] }
 0xad0   :  { %15499 = vmatprep.subr.bf16.mxu0 %v22921_v33 }
 0xad3   :  { %15500 = vmatpush3.bf16.msra.mxu0 %v15948_v32 }
 0xad4   :  { %15501 = vmatprep.subr.bf16.mxu0 %v22921_v33 }
 0xad7   :  { %15502 = vmatpush3.bf16.msra.mxu0 %v15950_v53 }
 0xad8   :  { %15503 = vmatprep.subr.bf16.mxu0 %v22921_v33 }
 0xadb   :  { %15504 = vmatpush3.bf16.msra.mxu0 %v15952_v58 }
 0xadc   :  { %15505 = vmatprep.subr.bf16.mxu0 %v22921_v33 }
 0xadf   :  { %15506 = vmatpush3.bf16.msra.mxu0 %v15954_v37 }
 0xae0   :  { %15507 = vmatprep.subr.bf16.mxu0 %v22921_v33 }
 0xae3   :  { %15508 = vmatpush3.bf16.msra.mxu0 %v15956_v52 }
 0xae4   :  { %15533 = vmatprep.subr.bf16.mxu0 %v22921_v33 }
 0xb06   :  { %v11061_v18 = vpop.f32.mrf.mxu0 }
 0xb08   :  { %v15311_v30 = vpop.f32.mrf.mxu0 }
 0xb0a   :  { %v11064_v14 = vpop.f32.mrf.mxu0 }
 0xb0c   :  { %v15312_v61 = vpop.f32.mrf.mxu0 }
 0xb0f   :  { %v11153_v56 = vpop.f32.mrf.mxu1 }
 0xb10   :  { %v11154_v57 = vadd.f32 %v11153_v56, %v11061_v18 }
 0xb11   :  { %v15331_v48 = vpop.f32.mrf.mxu1 }
 0xb13   :  { %v11156_v35 = vpop.f32.mrf.mxu1 }
 0xb15   :  { %v15332_v19 = vpop.f32.mrf.mxu1 }
 0xb26   :  { %v11261_v20 = vpop.f32.mrf.mxu0 }
 0xb27   :  { %v11267_v10 = vadd.f32 %v11261_v20, %v11154_v57 }
 0xb28   :  { %v15351_v55 = vpop.f32.mrf.mxu0 }
 0xb2a   :  { %v11264_v16 = vpop.f32.mrf.mxu0 }
 0xb2c   :  { %v15352_v25 = vpop.f32.mrf.mxu0 }
 0xb2f   :  { %v11366_v7 = vpop.f32.mrf.mxu1 }
 0xb30   :  { %v11372_v4 = vadd.f32 %v11366_v7, %v11267_v10 }
 0xb31   :  { %v15371_v29 = vpop.f32.mrf.mxu1 }
 0xb33   :  { %v11369_v40 = vpop.f32.mrf.mxu1 }
 0xb35   :  { %v15372_v31 = vpop.f32.mrf.mxu1 }
 0xb46   :  { %v11471_v13 = vpop.f32.mrf.mxu0 }
 0xb47   :  { %v11477_v41 = vadd.f32 %v11471_v13, %v11372_v4 }
 0xb48   :  { %v15391_v24 = vpop.f32.mrf.mxu0 }
 0xb4a   :  { %v11474_v23 = vpop.f32.mrf.mxu0 }
 0xb4b   :  { %v15953_v23 = vld [vmem:[#allocation2 + $0x8a8] sm:$0xff]  }
 0xb4c   :  { %v15392_v46 = vpop.f32.mrf.mxu0 }
 0xb4f   :  { %v11576_v15 = vpop.f32.mrf.mxu1 }
 0xb50   :  { %v11582_v2 = vadd.f32 %v11576_v15, %v11477_v41  ;;  %v15960_v41 = vld [vmem:[#allocation2 + $0x8e0] sm:$0xff]  }
 0xb51   :  { %v15411_v27 = vpop.f32.mrf.mxu1 }
 0xb53   :  { %v11579_v22 = vpop.f32.mrf.mxu1 }
 0xb55   :  { %v15412_v36 = vpop.f32.mrf.mxu1 }
 0xb56   :  { %v15955_v36 = vld [vmem:[#allocation2 + $0x8a0] sm:$0xff]  }
 0xb66   :  { %v11683_v8 = vpop.f32.mrf.mxu0 }
 0xb67   :  { %v11689_v50 = vadd.f32 %v11683_v8, %v11582_v2 }
 0xb68   :  { %v15431_v17 = vpop.f32.mrf.mxu0 }
 0xb69   :  { %v15957_v17 = vld [vmem:[#allocation2 + $0x898] sm:$0xff]  }
 0xb6a   :  { %v11686_v9 = vpop.f32.mrf.mxu0 }
 0xb6c   :  { %v15432_v49 = vpop.f32.mrf.mxu0 }
 0xb6f   :  { %v11790_v45 = vpop.f32.mrf.mxu1 }
 0xb70   :  { %v11796_v59 = vadd.f32 %v11790_v45, %v11689_v50  ;;  %v15958_v45 = vld [vmem:[#allocation2 + $0x8e8] sm:$0xff]  }
 0xb71   :  { %v15451_v21 = vpop.f32.mrf.mxu1  ;;  %v15961_v50 = vld [vmem:[#allocation2 + $0x888] sm:$0xff]  }
 0xb73   :  { %v11793_v54 = vpop.f32.mrf.mxu1 }
 0xb75   :  { %v15452_v1 = vpop.f32.mrf.mxu1 }
 0xb76   :  { %v15959_v1 = vld [vmem:[#allocation2 + $0x890] sm:$0xff]  }
 0xb86   :  { %v11897_v0 = vpop.f32.mrf.mxu0 }
 0xb87   :  { %v11903_v38 = vadd.f32 %v11897_v0, %v11796_v59  ;;  %v15963_v0 = vld [vmem:[#allocation2 + $0x880] sm:$0xff]  }
 0xb88   :  { %v15471_v43 = vpop.f32.mrf.mxu0 }
 0xb89   :  { %v11907_v44 = vsel %vm6301_vm7, %v11903_v38, 0.0  ;;  %v11915_v18 = vmul.f32 %v11903_v38, %v11903_v38  ;;  %v15964_v43 = vld [vmem:[#allocation2 + $0x8d0] sm:$0xff]  }
 0xb8a   :  { %v11908_v30 = vrot.slane %v11907_v44, 4  ;;  %v11900_v14 = vpop.f32.mrf.mxu0 }
 0xb8b   :  { %v11916_v61 = vsel %vm6301_vm7, %v11915_v18, 0.0  ;;  %v15965_v18 = vld [vmem:[#allocation2 + $0x878] sm:$0xff]   ;;  %vm12981_vm7 = vcmask 122880  }
 0xb8c   :  { %v11909_v56 = vadd.f32 %v11908_v30, %v11907_v44  ;;  %v11917_v57 = vrot.slane %v11916_v61, 4  ;;  %v15472_v48 = vpop.f32.mrf.mxu0  ;;  %v15966_v30 = vld [vmem:[#allocation2 + $0x8c8] sm:$0xff]  }
 0xb8d   :  { %v15969_v48 = vld [vmem:[#allocation2 + $0x928] sm:$0xff]  }
 0xb8e   :  { %v11910_v35 = vrot.slane %v11909_v56, 2  ;;  %v11918_v19 = vadd.f32 %v11917_v57, %v11916_v61  ;;  %v15967_v61 = vld [vmem:[#allocation2 + $0x870] sm:$0xff]  }
 0xb90   :  { %v11911_v11 = vadd.f32 %v11910_v35, %v11909_v56  ;;  %v11919_v39 = vrot.slane %v11918_v19, 2  ;;  %v15968_v56 = vld [vmem:[#allocation2 + $0x8c0] sm:$0xff]   ;;  %v15970_v35 = vld [vmem:[#allocation2 + $0x8b8] sm:$0xff]  }
 0xb92   :  { %v11912_v20 = vrot.slane %v11911_v11, 1  ;;  %v11920_v42 = vadd.f32 %v11919_v39, %v11918_v19  ;;  %v15972_v39 = vld [vmem:[#allocation2 + $0x8b0] sm:$0xff]  }
 0xb94   :  { %v11913_v10 = vadd.f32 %v11912_v20, %v11911_v11  ;;  %v11921_v47 = vrot.slane %v11920_v42, 1  ;;  %v15971_v11 = vld [vmem:[#allocation2 + $0x920] sm:$0xff]   ;;  %v15973_v20 = vld [vmem:[#allocation2 + $0x918] sm:$0xff]  }
 0xb96   :  { %v11914_v55 = vmul.f32 0.25, %v11913_v10  ;;  %v11922_v16 = vadd.f32 %v11921_v47, %v11920_v42  ;;  %v15975_v42 = vld [vmem:[#allocation2 + $0x910] sm:$0xff]   ;;  %v15976_v10 = vld [vmem:[#allocation2 + $0x960] sm:$0xff]   ;;  %v15977_v47 = vld [vmem:[#allocation2 + $0x908] sm:$0xff]  }
 0xb98   :  { %v11923_v62 = vmul.f32 0.25, %v11922_v16  ;;  %v11924_v3 = vmul.f32 %v11914_v55, %v11914_v55  ;;  %v15979_v16 = vld [vmem:[#allocation2 + $0x900] sm:$0xff]  }
 0xb9a   :  { %v11925_v25 = vsub.f32 %v11923_v62, %v11924_v3  ;;  %v15980_v62 = vld [vmem:[#allocation2 + $0x950] sm:$0xff]   ;;  %v15981_v3 = vld [vmem:[#allocation2 + $0x8f8] sm:$0xff]  }
 0xb9c   :  { %v11926_v12 = vmax.f32 %v11925_v25, 0.0  ;;  %v15982_v25 = vld [vmem:[#allocation2 + $0x948] sm:$0xff]  }
 0xb9e   :  { %v11927_v7 = vadd.f32 1e-05, %v11926_v12  ;;  %v15983_v12 = vld [vmem:[#allocation2 + $0x8f0] sm:$0xff]  }
 0xba0   :  { %16023 = vrsqrt.f32 %v11927_v7  ;;  %v15984_v7 = vld [vmem:[#allocation2 + $0x940] sm:$0xff]  }
 0xbad   :  { %v16024_v4 = vpop.eup %16023 }
 0xbae   :  { %v11929_v29 = vmul.f32 %v16024_v4, %v11904_v51  ;;  %v15985_v51 = vld [vmem:[#allocation2 + $0x9a8] sm:$0xff]   ;;  %v15986_v4 = vld [vmem:[#allocation2 + $0x938] sm:$0xff]  }
 0xbb0   :  { %v11930_v40 = vmul.f32 %v11929_v29, %v11914_v55  ;;  %v11935_v32 = vrot.slane %v11929_v29, %v22924_v6  ;;  %v15978_v55 = vld [vmem:[#allocation2 + $0x958] sm:$0xff]   ;;  %v15987_v29 = vld [vmem:[#allocation2 + $0x9a0] sm:$0xff]  }
 0xbb2   :  { %v11931_v31 = vsub.f32 %v11905_v28, %v11930_v40  ;;  %v11936_v26 = vmul.f32 %v11935_v32, %v11903_v38  ;;  %v15988_v28 = vld [vmem:[#allocation2 + $0x930] sm:$0xff]   ;;  %v15989_v40 = vld [vmem:[#allocation2 + $0x998] sm:$0xff]   ;;  %v15990_v32 = vld [vmem:[#allocation2 + $0x9e8] sm:$0xff]  }
 0xbb4   :  { %v11940_v53 = vrot.slane %v11931_v31, %v22924_v6  ;;  %v15991_v31 = vld [vmem:[#allocation2 + $0x990] sm:$0xff]  }
 0xbb6   :  { %v11941_v63 = vadd.f32 %v11940_v53, %v11936_v26  ;;  %v15992_v26 = vld [vmem:[#allocation2 + $0x9e0] sm:$0xff]   ;;  %v15993_v53 = vld [vmem:[#allocation2 + $0x988] sm:$0xff]  }
 0xbb8   :  { %v11942_v58 = vmax.f32 %v11941_v63, 0.0  ;;  %v15994_v63 = vld [vmem:[#allocation2 + $0x9d8] sm:$0xff]  }
 0xbba   :  { %v21744_v37 = vpack.c.bf16 %v11942_v58, %v11942_v58  ;;  %v15995_v58 = vld [vmem:[#allocation2 + $0x980] sm:$0xff]  }
 0xbbc   :  { %v21748_v52 = vsel %vm8992_vm11, %v21744_v37, 0 }
 0xbbd   :  { %v11948_v13 = vsel %vm10918_vm8, %v21748_v52, 0  ;;  %v12003_v24 = vrot.slane %v21748_v52, 7  ;;  %v11947_v54 = vsel %vm10902_vm14, %v21748_v52, 0 }
 0xbbe   :  { %v11950_v46 = vshrl.u32 %v11948_v13, 16  ;;  %v11953_v22 = vshll.u32 %v11948_v13, 16  ;;  %v11963_v2 = vshll.u32 %v11947_v54, 16  ;;  %v11961_v38 = vshrl.u32 %v11947_v54, 16  ;;  %v15997_v13 = vld [vmem:[#allocation2 + $0x978] sm:$0xff]   ;;  %v16010_v54 = vld [vmem:[#allocation2 + $0x9f0] sm:$0xff]  }
 0xbbf   :  { %v12004_v15 = vsel %vm10974_vm2, %v22922_v5, %v12003_v24  ;;  %v15998_v24 = vld [vmem:[#allocation2 + $0x9c8] sm:$0xff]  }
 0xbc0   :  { %v11952_v27 = vrot.slane %v11950_v46, 7  ;;  %15490 = vmatmul.mubr.bf16.vlgmr.msra.gmra.mxu1 %v12004_v15  ;;  %v11965_v59 = vrot.slane %v11963_v2, 1  ;;  %v16000_v46 = vld [vmem:[#allocation2 + $0x9c0] sm:$0xff]   ;;  %v16001_v15 = vld [vmem:[#allocation2 + $0xa28] sm:$0xff]  }
 0xbc1   :  { %15514 = vmatpush3.bf16.msra.mxu1 %v15953_v23  ;;  %15529 = vmatprep.mubr.msk.bf16.mxu1 %vm16106_vm15, %v22921_v33  ;;  %v15999_v23 = vld [vmem:[#allocation2 + $0x970] sm:$0xff]  }
 0xbc2   :  { %15515 = vmatprep.subr.bf16.mxu1 %v22921_v33  ;;  %v11955_v8 = vor.u32 %v11953_v22, %v11952_v27  ;;  %v21782_v44 = vor.u32 %v11965_v59, %v11961_v38  ;;  %v16002_v22 = vld [vmem:[#allocation2 + $0x9b8] sm:$0xff]  }
 0xbc4   :  { %v21761_v34 = vsel %vm1311_vm9, %v22922_v5, %v11955_v8  ;;  %v21788_v14 = vsel %vm8992_vm11, %v21782_v44, 0  ;;  %v16004_v8 = vld [vmem:[#allocation2 + $0x9b0] sm:$0xff]   ;;  %vm12933_vm9 = vcmask 125952  }
 0xbc5   :  { %15516 = vmatpush3.bf16.msra.mxu1 %v15955_v36  ;;  %v21765_v9 = vsel %vm8992_vm11, %v21761_v34, 0  ;;  %v12203_v57 = vrot.slane %v21788_v14, 7  ;;  %v16003_v36 = vld [vmem:[#allocation2 + $0xa20] sm:$0xff]  }
 0xbc6   :  { %15517 = vmatprep.subr.bf16.mxu1 %v22921_v33  ;;  %v12095_v49 = vrot.slane %v21765_v9, 7  ;;  %v12626_v27 = vrot.slane %v21765_v9, 1  ;;  %v16006_v9 = vld [vmem:[#allocation2 + $0xa10] sm:$0xff]  }
 0xbc7   :  { %v12204_v19 = vsel %vm10974_vm2, %v22922_v5, %v12203_v57 }
 0xbc8   :  { %v12096_v21 = vsel %vm10974_vm2, %v22922_v5, %v12095_v49  ;;  %v15974_v5 = vld [vmem:[#allocation2 + $0x968] sm:$0xff]  }
 0xbc9   :  { %15518 = vmatpush3.bf16.msra.mxu1 %v15957_v17  ;;  %15510 = vmatmul.mubr.bf16.vlgmr.msra.gmra.mxu0 %v12096_v21  ;;  %v12733_v17 = vrot.slane %v21748_v52, 1  ;;  %v16007_v49 = vld [vmem:[#allocation2 + $0xa08] sm:$0xff]   ;;  %v16009_v21 = vld [vmem:[#allocation2 + $0x9f8] sm:$0xff]   ;;  %v12840_v52 = vrot.slane %v21788_v14, 1 }
 0xbca   :  { %15534 = vmatpush3.bf16.msra.mxu0 %v15958_v45  ;;  %15519 = vmatprep.subr.bf16.mxu1 %v22921_v33  ;;  %v16008_v45 = vld [vmem:[#allocation2 + $0xa00] sm:$0xff]  }
 0xbcb   :  { %15535 = vmatprep.subr.bf16.mxu0 %v22921_v33  ;;  %15549 = vmatprep.mubr.msk.bf16.mxu0 %vm16106_vm15, %v22921_v33 }
 0xbcd   :  { %15520 = vmatpush3.bf16.msra.mxu1 %v15959_v1 }
 0xbce   :  { %15536 = vmatpush3.bf16.msra.mxu0 %v15960_v41  ;;  %15521 = vmatprep.subr.bf16.mxu1 %v22921_v33 }
 0xbcf   :  { %15537 = vmatprep.subr.bf16.mxu0 %v22921_v33 }
 0xbd1   :  { %15522 = vmatpush3.bf16.msra.mxu1 %v15961_v50 }
 0xbd2   :  { %15538 = vmatpush3.bf16.msra.mxu0 %v15962_v60  ;;  %15523 = vmatprep.subr.bf16.mxu1 %v22921_v33 }
 0xbd3   :  { %15539 = vmatprep.subr.bf16.mxu0 %v22921_v33 }
 0xbd5   :  { %15524 = vmatpush3.bf16.msra.mxu1 %v15963_v0 }
 0xbd6   :  { %15540 = vmatpush3.bf16.msra.mxu0 %v15964_v43  ;;  %15525 = vmatprep.subr.bf16.mxu1 %v22921_v33 }
 0xbd7   :  { %15541 = vmatprep.subr.bf16.mxu0 %v22921_v33 }
 0xbd9   :  { %15526 = vmatpush3.bf16.msra.mxu1 %v15965_v18 }
 0xbda   :  { %15542 = vmatpush3.bf16.msra.mxu0 %v15966_v30  ;;  %15527 = vmatprep.subr.bf16.mxu1 %v22921_v33 }
 0xbdb   :  { %15543 = vmatprep.subr.bf16.mxu0 %v22921_v33 }
 0xbdd   :  { %15528 = vmatpush3.bf16.msra.mxu1 %v15967_v61 }
 0xbde   :  { %15544 = vmatpush3.bf16.msra.mxu0 %v15968_v56  ;;  %15553 = vmatprep.subr.bf16.mxu1 %v22921_v33 }
 0xbdf   :  { %15545 = vmatprep.subr.bf16.mxu0 %v22921_v33 }
 0xbe0   :  { %15530 = vmatmul.mubr.bf16.vlgmr.msra.gmra.mxu1 %v12204_v19 }
 0xbe1   :  { %15554 = vmatpush3.bf16.msra.mxu1 %v15969_v48  ;;  %15569 = vmatprep.mubr.msk.bf16.mxu1 %vm16106_vm15, %v22921_v33 }
 0xbe2   :  { %15546 = vmatpush3.bf16.msra.mxu0 %v15970_v35  ;;  %15555 = vmatprep.subr.bf16.mxu1 %v22921_v33 }
 0xbe3   :  { %15547 = vmatprep.subr.bf16.mxu0 %v22921_v33 }
 0xbe5   :  { %15556 = vmatpush3.bf16.msra.mxu1 %v15971_v11 }
 0xbe6   :  { %15548 = vmatpush3.bf16.msra.mxu0 %v15972_v39  ;;  %15557 = vmatprep.subr.bf16.mxu1 %v22921_v33 }
 0xbe7   :  { %15573 = vmatprep.subr.bf16.mxu0 %v22921_v33 }
 0xbe9   :  { %15550 = vmatmul.mubr.msk.bf16.vlgmr.msra.gmra.mxu0 %vm8992_vm11, %v21761_v34  ;;  %15558 = vmatpush3.bf16.msra.mxu1 %v15973_v20  ;;  %v16005_v34 = vld [vmem:[#allocation2 + $0xa18] sm:$0xff]  }
 0xbea   :  { %15574 = vmatpush3.bf16.msra.mxu0 %v15974_v5  ;;  %15559 = vmatprep.subr.bf16.mxu1 %v22921_v33 }
 0xbeb   :  { %15575 = vmatprep.subr.bf16.mxu0 %v22921_v33  ;;  %15589 = vmatprep.mubr.msk.bf16.mxu0 %vm16106_vm15, %v22921_v33 }
 0xbed   :  { %15560 = vmatpush3.bf16.msra.mxu1 %v15975_v42 }
 0xbee   :  { %15576 = vmatpush3.bf16.msra.mxu0 %v15976_v10  ;;  %15561 = vmatprep.subr.bf16.mxu1 %v22921_v33 }
 0xbef   :  { %15577 = vmatprep.subr.bf16.mxu0 %v22921_v33 }
 0xbf1   :  { %15562 = vmatpush3.bf16.msra.mxu1 %v15977_v47 }
 0xbf2   :  { %15578 = vmatpush3.bf16.msra.mxu0 %v15978_v55  ;;  %15563 = vmatprep.subr.bf16.mxu1 %v22921_v33 }
 0xbf3   :  { %15579 = vmatprep.subr.bf16.mxu0 %v22921_v33 }
 0xbf5   :  { %15564 = vmatpush3.bf16.msra.mxu1 %v15979_v16 }
 0xbf6   :  { %15580 = vmatpush3.bf16.msra.mxu0 %v15980_v62  ;;  %15565 = vmatprep.subr.bf16.mxu1 %v22921_v33 }
 0xbf7   :  { %15581 = vmatprep.subr.bf16.mxu0 %v22921_v33 }
 0xbf9   :  { %15566 = vmatpush3.bf16.msra.mxu1 %v15981_v3 }
 0xbfa   :  { %15582 = vmatpush3.bf16.msra.mxu0 %v15982_v25  ;;  %15567 = vmatprep.subr.bf16.mxu1 %v22921_v33 }
 0xbfb   :  { %15583 = vmatprep.subr.bf16.mxu0 %v22921_v33 }
 0xbfd   :  { %15568 = vmatpush3.bf16.msra.mxu1 %v15983_v12 }
 0xbfe   :  { %15584 = vmatpush3.bf16.msra.mxu0 %v15984_v7  ;;  %15593 = vmatprep.subr.bf16.mxu1 %v22921_v33 }
 0xbff   :  { %15585 = vmatprep.subr.bf16.mxu0 %v22921_v33 }
 0xc00   :  { %15570 = vmatmul.mubr.msk.bf16.vlgmr.msra.gmra.mxu1 %vm8992_vm11, %v21744_v37  ;;  %v15996_v37 = vld [vmem:[#allocation2 + $0x9d0] sm:$0xff]  }
 0xc01   :  { %15594 = vmatpush3.bf16.msra.mxu1 %v15985_v51  ;;  %15609 = vmatprep.mubr.msk.bf16.mxu1 %vm16106_vm15, %v22921_v33 }
 0xc02   :  { %15586 = vmatpush3.bf16.msra.mxu0 %v15986_v4  ;;  %15595 = vmatprep.subr.bf16.mxu1 %v22921_v33 }
 0xc03   :  { %15587 = vmatprep.subr.bf16.mxu0 %v22921_v33 }
 0xc05   :  { %15596 = vmatpush3.bf16.msra.mxu1 %v15987_v29 }
 0xc06   :  { %15588 = vmatpush3.bf16.msra.mxu0 %v15988_v28  ;;  %15597 = vmatprep.subr.bf16.mxu1 %v22921_v33 }
 0xc07   :  { %15613 = vmatprep.subr.bf16.mxu0 %v22921_v33 }
 0xc09   :  { %15590 = vmatmul.mubr.msk.bf16.vlgmr.msra.gmra.mxu0 %vm8992_vm11, %v21782_v44  ;;  %15598 = vmatpush3.bf16.msra.mxu1 %v15989_v40 }
 0xc0a   :  { %15614 = vmatpush3.bf16.msra.mxu0 %v15990_v32  ;;  %15599 = vmatprep.subr.bf16.mxu1 %v22921_v33 }
 0xc0b   :  { %15615 = vmatprep.subr.bf16.mxu0 %v22921_v33  ;;  %15629 = vmatprep.mubr.msk.bf16.mxu0 %vm16106_vm15, %v22921_v33 }
 0xc0d   :  { %15600 = vmatpush3.bf16.msra.mxu1 %v15991_v31 }
 0xc0e   :  { %15616 = vmatpush3.bf16.msra.mxu0 %v15992_v26  ;;  %15601 = vmatprep.subr.bf16.mxu1 %v22921_v33 }
 0xc0f   :  { %15617 = vmatprep.subr.bf16.mxu0 %v22921_v33 }
 0xc11   :  { %15602 = vmatpush3.bf16.msra.mxu1 %v15993_v53 }
 0xc12   :  { %15618 = vmatpush3.bf16.msra.mxu0 %v15994_v63  ;;  %15603 = vmatprep.subr.bf16.mxu1 %v22921_v33 }
 0xc13   :  { %15619 = vmatprep.subr.bf16.mxu0 %v22921_v33 }
 0xc15   :  { %15604 = vmatpush3.bf16.msra.mxu1 %v15995_v58 }
 0xc16   :  { %15620 = vmatpush3.bf16.msra.mxu0 %v15996_v37  ;;  %15605 = vmatprep.subr.bf16.mxu1 %v22921_v33 }
 0xc17   :  { %15621 = vmatprep.subr.bf16.mxu0 %v22921_v33 }
 0xc19   :  { %15606 = vmatpush3.bf16.msra.mxu1 %v15997_v13 }
 0xc1a   :  { %15622 = vmatpush3.bf16.msra.mxu0 %v15998_v24  ;;  %15607 = vmatprep.subr.bf16.mxu1 %v22921_v33 }
 0xc1b   :  { %15623 = vmatprep.subr.bf16.mxu0 %v22921_v33 }
 0xc1d   :  { %15608 = vmatpush3.bf16.msra.mxu1 %v15999_v23 }
 0xc1e   :  { %15624 = vmatpush3.bf16.msra.mxu0 %v16000_v46  ;;  %15633 = vmatprep.subr.bf16.mxu1 %v22921_v33 }
 0xc1f   :  { %15625 = vmatprep.subr.bf16.mxu0 %v22921_v33 }
 0xc20   :  { %15610 = vmatmul.mubr.bf16.vlgmr.msra.gmra.mxu1 %v12626_v27 }
 0xc21   :  { %15634 = vmatpush3.bf16.msra.mxu1 %v16001_v15  ;;  %15649 = vmatprep.mubr.msk.bf16.mxu1 %vm16106_vm15, %v22921_v33  ;;  %vm12986_vm15 = vcmask 0  }
 0xc22   :  { %15626 = vmatpush3.bf16.msra.mxu0 %v16002_v22  ;;  %15635 = vmatprep.subr.bf16.mxu1 %v22921_v33 }
 0xc23   :  { %15627 = vmatprep.subr.bf16.mxu0 %v22921_v33 }
 0xc25   :  { %15636 = vmatpush3.bf16.msra.mxu1 %v16003_v36 }
 0xc26   :  { %15628 = vmatpush3.bf16.msra.mxu0 %v16004_v8  ;;  %15637 = vmatprep.subr.bf16.mxu1 %v22921_v33 }
 0xc29   :  { %15630 = vmatmul.mubr.bf16.vlgmr.msra.gmra.mxu0 %v12733_v17  ;;  %15638 = vmatpush3.bf16.msra.mxu1 %v16005_v34 }
 0xc2a   :  { %15639 = vmatprep.subr.bf16.mxu1 %v22921_v33 }
 0xc2d   :  { %15640 = vmatpush3.bf16.msra.mxu1 %v16006_v9 }
 0xc2e   :  { %15641 = vmatprep.subr.bf16.mxu1 %v22921_v33 }
 0xc31   :  { %15642 = vmatpush3.bf16.msra.mxu1 %v16007_v49 }
 0xc32   :  { %15643 = vmatprep.subr.bf16.mxu1 %v22921_v33 }
 0xc35   :  { %15644 = vmatpush3.bf16.msra.mxu1 %v16008_v45 }
 0xc36   :  { %15645 = vmatprep.subr.bf16.mxu1 %v22921_v33 }
 0xc39   :  { %15646 = vmatpush3.bf16.msra.mxu1 %v16009_v21 }
 0xc3a   :  { %15647 = vmatprep.subr.bf16.mxu1 %v22921_v33 }
 0xc3d   :  { %15648 = vmatpush3.bf16.msra.mxu1 %v16010_v54 }
 0xc40   :  { %15650 = vmatmul.mubr.bf16.vlgmr.msra.gmra.mxu1 %v12840_v52 }
 0xc80   :  { %v12088_v1 = vpop.f32.mrf.mxu1 }
 0xc82   :  { %v15491_v41 = vpop.f32.mrf.mxu1 }
 0xc84   :  { %v12091_v2 = vpop.f32.mrf.mxu1 }
 0xc85   :  { %v12931_v2 = vld [vmem:[#allocation5 + $0xe] sm:$0x1] }
 0xc86   :  { %v15492_v50 = vpop.f32.mrf.mxu1 }
 0xc89   :  { %v12180_v60 = vpop.f32.mrf.mxu0 }
 0xc8a   :  { %v12181_v59 = vadd.f32 %v12180_v60, %v12088_v1 }
 0xc8b   :  { %v15511_v0 = vpop.f32.mrf.mxu0 }
 0xc8d   :  { %v12183_v38 = vpop.f32.mrf.mxu0 }
 0xc8f   :  { %v15512_v43 = vpop.f32.mrf.mxu0 }
 0xca0   :  { %v12288_v44 = vpop.f32.mrf.mxu1 }
 0xca1   :  { %v12294_v18 = vadd.f32 %v12288_v44, %v12181_v59  ;;  %v12932_v59 = vld [vmem:[#allocation5 + $0xf] sm:$0x1] }
 0xca2   :  { %v15531_v30 = vpop.f32.mrf.mxu1 }
 0xca4   :  { %v12291_v61 = vpop.f32.mrf.mxu1 }
 0xca6   :  { %v15532_v56 = vpop.f32.mrf.mxu1 }
 0xca9   :  { %v12393_v57 = vpop.f32.mrf.mxu0 }
 0xcaa   :  { %v12399_v33 = vadd.f32 %v12393_v57, %v12294_v18 }
 0xcab   :  { %v15551_v48 = vpop.f32.mrf.mxu0 }
 0xcad   :  { %v12396_v35 = vpop.f32.mrf.mxu0 }
 0xcaf   :  { %v15552_v14 = vpop.f32.mrf.mxu0 }
 0xcc0   :  { %v12498_v19 = vpop.f32.mrf.mxu1 }
 0xcc1   :  { %v12504_v4 = vadd.f32 %v12498_v19, %v12399_v33  ;;  %v12978_v19 = vld [vmem:[#allocation5 + $0x10] sm:$0x1] }
 0xcc2   :  { %v15571_v11 = vpop.f32.mrf.mxu1 }
 0xcc4   :  { %v12501_v39 = vpop.f32.mrf.mxu1 }
 0xcc6   :  { %v15572_v20 = vpop.f32.mrf.mxu1 }
 0xcc9   :  { %v12603_v5 = vpop.f32.mrf.mxu0 }
 0xcca   :  { %v12609_v29 = vadd.f32 %v12603_v5, %v12504_v4  ;;  %v12979_v5 = vld [vmem:[#allocation5 + $0x11] sm:$0x1] }
 0xccb   :  { %v15591_v42 = vpop.f32.mrf.mxu0 }
 0xccd   :  { %v12606_v10 = vpop.f32.mrf.mxu0 }
 0xccf   :  { %v15592_v47 = vpop.f32.mrf.mxu0 }
 0xce0   :  { %v12710_v55 = vpop.f32.mrf.mxu1 }
 0xce1   :  { %v12716_v28 = vadd.f32 %v12710_v55, %v12609_v29 }
 0xce2   :  { %v15611_v16 = vpop.f32.mrf.mxu1 }
 0xce4   :  { %v12713_v62 = vpop.f32.mrf.mxu1 }
 0xce6   :  { %v15612_v3 = vpop.f32.mrf.mxu1 }
 0xce9   :  { %v12817_v25 = vpop.f32.mrf.mxu0 }
 0xcea   :  { %v12823_v40 = vadd.f32 %v12817_v25, %v12716_v28 }
 0xceb   :  { %v15631_v12 = vpop.f32.mrf.mxu0 }
 0xced   :  { %v12820_v7 = vpop.f32.mrf.mxu0 }
 0xcef   :  { %v15632_v51 = vpop.f32.mrf.mxu0 }
 0xd00   :  { %v12924_v32 = vpop.f32.mrf.mxu1 }
 0xd01   :  { %v12930_v31 = vadd.f32 %v12924_v32, %v12823_v40 }
 0xd02   :  { %v15651_v26 = vpop.f32.mrf.mxu1 }
 0xd03   :  { %v12934_v53 = vsel %vm12933_vm9, %v12930_v31, 0.0  ;;  %v12942_v63 = vmul.f32 %v12930_v31, %v12930_v31 }
 0xd04   :  { %v12935_v58 = vrot.slane %v12934_v53, 4  ;;  %v12927_v37 = vpop.f32.mrf.mxu1 }
 0xd05   :  { %v12943_v13 = vsel %vm12933_vm9, %v12942_v63, 0.0 }
 0xd06   :  { %v12936_v24 = vadd.f32 %v12935_v58, %v12934_v53  ;;  %v12944_v23 = vrot.slane %v12943_v13, 4  ;;  %v15652_v46 = vpop.f32.mrf.mxu1 }
 0xd08   :  { %v12937_v15 = vrot.slane %v12936_v24, 2  ;;  %v12945_v27 = vadd.f32 %v12944_v23, %v12943_v13 }
 0xd0a   :  { %v12938_v22 = vadd.f32 %v12937_v15, %v12936_v24  ;;  %v12946_v36 = vrot.slane %v12945_v27, 2 }
 0xd0c   :  { %v12939_v8 = vrot.slane %v12938_v22, 1  ;;  %v12947_v34 = vadd.f32 %v12946_v36, %v12945_v27 }
 0xd0e   :  { %v12940_v17 = vadd.f32 %v12939_v8, %v12938_v22  ;;  %v12948_v9 = vrot.slane %v12947_v34, 1 }
 0xd10   :  { %v12941_v49 = vmul.f32 0.25, %v12940_v17  ;;  %v12949_v45 = vadd.f32 %v12948_v9, %v12947_v34 }
 0xd12   :  { %v12950_v21 = vmul.f32 0.25, %v12949_v45  ;;  %v12951_v54 = vmul.f32 %v12941_v49, %v12941_v49 }
 0xd14   :  { %v12952_v52 = vsub.f32 %v12950_v21, %v12951_v54 }
 0xd16   :  { %v12953_v1 = vmax.f32 %v12952_v52, 0.0 }
 0xd18   :  { %v12954_v41 = vadd.f32 1e-05, %v12953_v1 }
 0xd1a   :  { %16025 = vrsqrt.f32 %v12954_v41 }
 0xd27   :  { %v16026_v50 = vpop.eup %16025 }
 0xd28   :  { %v12956_v60 = vmul.f32 %v16026_v50, %v12931_v2 }
 0xd2a   :  { %v12957_v0 = vmul.f32 %v12956_v60, %v12941_v49  ;;  %v12962_v38 = vrot.slane %v12956_v60, %v22924_v6 }
 0xd2c   :  { %v12958_v43 = vsub.f32 %v12932_v59, %v12957_v0  ;;  %v12963_v44 = vmul.f32 %v12962_v38, %v12930_v31 }
 0xd2e   :  { %v12967_v18 = vrot.slane %v12958_v43, %v22924_v6 }
 0xd30   :  { %v12968_v30 = vadd.f32 %v12967_v18, %v12963_v44 }
 0xd32   :  { %v12969_v61 = vsel %vm12933_vm9, %v12968_v30, 0.0 }
 0xd33   :  { %v12970_v56 = vrot.slane %v12969_v61, 4 }
 0xd35   :  { %v12971_v57 = vadd.f32 %v12970_v56, %v12969_v61 }
 0xd37   :  { %v12972_v33 = vrot.slane %v12971_v57, 2 }
 0xd39   :  { %v12973_v48 = vadd.f32 %v12972_v33, %v12971_v57 }
 0xd3b   :  { %v12974_v35 = vrot.slane %v12973_v48, 1 }
 0xd3d   :  { %v12975_v14 = vadd.f32 %v12974_v35, %v12973_v48 }
 0xd3f   :  { %v12977_v11 = vmul.f32 0.25, %v12975_v14 }
 0xd41   :  { %v12980_v39 = vmul.f32 %v12978_v19, %v12977_v11 }
 0xd43   :  { %v12982_v20 = vsel %vm12981_vm7, %v12980_v39, 0.0 }
 0xd44   :  { %12983 = vadd.xlane.f32.xlu0 %v12982_v20 }
 0xdcd   :  { %v12984_v42 = vpop.xlane.xlu0 %12983 }
 0xdce   :  { %v12985_v6 = vadd.f32 %v12984_v42, %v12979_v5 }
 0xdd0   :  { %12987 = vst.msk [vmem:[#allocation7] sm:$0x1] %vm12986_vm15, %v12985_v6 }
 0xdd1   :  { %16081 = shalt.err (!%p16078_p0)
}
 0xdd2   :  { %12997 = dma.vmem_to_hbm [thread:$0]  %s12995_s28, 16, %s21867_s3, [#allocation4]  }
 0xdd3   :  { %16094 = dma.done.wait [#allocation4], 16  }
 0xdd4   :  { %16095 = vsyncadd [#allocation4], 4294967280 }
 0xdd5   :  { %13001 = vsyncpa [#allocation3], 1 }
 0xdd6   :  { %13002 = vsyncpa [#allocation6], 1 }
 0xdd7   :  { %13003 = vsyncpa [#allocation4], 1 }

</bundles_post_ra>
